<compile_context>
chip_gen: v7x
topology: tpu7x:2x2x1
jax: 0.10.0
libtpu: 0.0.40
codegen_flags: <defaults>
</compile_context>

<pallas_src>
import jax
import jax.numpy as jnp
from jax.experimental import pallas as pl
from jax.experimental.pallas import tpu as pltpu


TILE_F = 512                            # lane-dense face tile (multiple of 128)
VMEM_LIMIT_BYTES = 48 * 1024 * 1024     # explicit cap; fits v7x's 64 MiB VMEM with headroom

_TILED_PARAMS = pltpu.CompilerParams(
    dimension_semantics=("parallel", "parallel"),
    vmem_limit_bytes=VMEM_LIMIT_BYTES,
)


# -----------------------------------------------------------------------------
# Small helpers
# -----------------------------------------------------------------------------
def _f_tiles(F):
    """Pick a lane-dense face tile. Returns (tile, num_tiles, padded_F)."""
    if F <= TILE_F:
        return F, 1, F                  # single block == full dim (always legal)
    n = -(-F // TILE_F)
    return TILE_F, n, n * TILE_F


def _pad_last(x, Fpad):
    F = x.shape[-1]
    if Fpad == F:
        return x
    pad = [(0, 0)] * x.ndim
    pad[-1] = (0, Fpad - F)
    return jnp.pad(x, pad)


def _fold_bn_conv(p):
    """Fold eval-mode BatchNorm (running_mean=0, running_var=1) into 1x1-conv weights."""
    scale = p["gamma"] / jnp.sqrt(1.0 + 1e-5)
    w = (p["w"] * scale[:, None]).astype(jnp.bfloat16)               # (O, C) bf16 (MXU)
    b = (p["b"] * scale + p["beta"]).astype(jnp.float32)[:, None]    # (O, 1) f32
    return w, b


# -----------------------------------------------------------------------------
# Pallas kernels
# -----------------------------------------------------------------------------
def _conv1x1_kernel(x_ref, w_ref, b_ref, o_ref):
    # x: (1, C, TF) bf16   w: (O, C) bf16   b: (O, 1) f32  ->  o: (1, O, TF) bf16
    y = jnp.dot(w_ref[...], x_ref[0], preferred_element_type=jnp.float32)
    o_ref[0] = jnp.maximum(y + b_ref[...], 0.0).astype(o_ref.dtype)


def _conv_face_kernel(self_ref, nbr_ref, w_ref, b_ref, o_ref):
    # self: (1, C, TF)  nbr: (1, K, C, TF)  ->  o: (1, O, TF)
    # Fuses the self + sum-over-neighbors reduction (lane-dense VPU adds) with the
    # 1x1 conv + folded BN + ReLU (single MXU matmul).
    K = nbr_ref.shape[1]
    x = self_ref[0].astype(jnp.float32)
    for k in range(K):                                  # K is small and static -> unrolled
        x = x + nbr_ref[0, k].astype(jnp.float32)
    y = jnp.dot(w_ref[...], x.astype(jnp.bfloat16), preferred_element_type=jnp.float32)
    o_ref[0] = jnp.maximum(y + b_ref[...], 0.0).astype(o_ref.dtype)


def _conv_surface_kernel(rel_ref, w_ref, b_ref, o_ref):
    # rel: (1, K, 9, TF)  w: (O, 9)  b: (O, 1)  ->  o: (1, O, TF) = max_k relu(W @ rel_k + b)
    K = rel_ref.shape[1]
    b = b_ref[...]
    acc = None
    for k in range(K):
        y = jnp.dot(w_ref[...], rel_ref[0, k], preferred_element_type=jnp.float32) + b
        y = jnp.maximum(y, 0.0)
        acc = y if acc is None else jnp.maximum(acc, y)
    o_ref[0] = acc.astype(o_ref.dtype)


def _maxpool_face_kernel(self_ref, nbr_ref, o_ref):
    # Element-wise max of a face feature with its n-ring neighbor features (channel-preserving).
    K = nbr_ref.shape[1]
    m = self_ref[0].astype(jnp.float32)
    for k in range(K):
        m = jnp.maximum(m, nbr_ref[0, k].astype(jnp.float32))
    o_ref[0] = m.astype(o_ref.dtype)


def _classifier_kernel(x_ref, w1_ref, b1_ref, w2_ref, b2_ref, w3_ref, b3_ref, o_ref):
    # x: (M, C, Fp) -> global max over faces, then fc1+BN+ReLU, fc2+BN+ReLU, fc3 (all fused).
    pooled = jnp.max(x_ref[...].astype(jnp.float32), axis=-1)         # (M, C)
    h = jnp.dot(pooled.astype(jnp.bfloat16), w1_ref[...],
                preferred_element_type=jnp.float32) + b1_ref[...]
    h = jnp.maximum(h, 0.0)
    h = jnp.dot(h.astype(jnp.bfloat16), w2_ref[...],
                preferred_element_type=jnp.float32) + b2_ref[...]
    h = jnp.maximum(h, 0.0)
    o_ref[...] = jnp.dot(h.astype(jnp.bfloat16), w3_ref[...],
                         preferred_element_type=jnp.float32) + b3_ref[...]


# -----------------------------------------------------------------------------
# Pallas wrappers (face-axis tiling, bf16 activations)
# -----------------------------------------------------------------------------
def conv1x1_bn_relu(x, p):
    """1x1 Conv1d + folded BN + ReLU.  x: [M, C, F] -> [M, O, F] (bf16)."""
    w_eff, b_eff = _fold_bn_conv(p)
    M, C, F = x.shape
    O = w_eff.shape[0]
    tf, nf, Fpad = _f_tiles(F)
    xp = _pad_last(x, Fpad).astype(jnp.bfloat16)
    out = pl.pallas_call(
        _conv1x1_kernel,
        out_shape=jax.ShapeDtypeStruct((M, O, Fpad), jnp.bfloat16),
        grid=(M, nf),
        in_specs=[
            pl.BlockSpec((1, C, tf), lambda m, f: (m, 0, f)),
            pl.BlockSpec((O, C), lambda m, f: (0, 0)),
            pl.BlockSpec((O, 1), lambda m, f: (0, 0)),
        ],
        out_specs=pl.BlockSpec((1, O, tf), lambda m, f: (m, 0, f)),
        compiler_params=_TILED_PARAMS,
    )(xp, w_eff, b_eff)
    return out[:, :, :F] if Fpad != F else out


def conv_face_fused(self_fea, nbr, p):
    """ConvFace core: relu(BN(W @ (self + sum_k nbr_k) + b)).

    self_fea: [M, C, Fd]   nbr: [M, K, C, Fd]  ->  [M, O, Fd] (bf16)
    """
    w_eff, b_eff = _fold_bn_conv(p)
    M, C, Fd = self_fea.shape
    K = nbr.shape[1]
    O = w_eff.shape[0]
    tf, nf, Fpad = _f_tiles(Fd)
    sp = _pad_last(self_fea, Fpad).astype(jnp.bfloat16)
    nb = _pad_last(nbr, Fpad).astype(jnp.bfloat16)
    out = pl.pallas_call(
        _conv_face_kernel,
        out_shape=jax.ShapeDtypeStruct((M, O, Fpad), jnp.bfloat16),
        grid=(M, nf),
        in_specs=[
            pl.BlockSpec((1, C, tf), lambda m, f: (m, 0, f)),
            pl.BlockSpec((1, K, C, tf), lambda m, f: (m, 0, 0, f)),
            pl.BlockSpec((O, C), lambda m, f: (0, 0)),
            pl.BlockSpec((O, 1), lambda m, f: (0, 0)),
        ],
        out_specs=pl.BlockSpec((1, O, tf), lambda m, f: (m, 0, f)),
        compiler_params=_TILED_PARAMS,
    )(sp, nb, w_eff, b_eff)
    return out[:, :, :Fd] if Fpad != Fd else out


def max_pool_face_feature(fea, ring_n):
    # TODO(synk): MaxPoolFaceFeature source not in the reference; implemented as an
    # element-wise max over each face feature and its n-ring neighbor features.
    M, C, F = fea.shape
    K = ring_n.shape[-1]
    nbr = gather_kcf(fea, ring_n)                                   # [M, K, C, F]
    tf, nf, Fpad = _f_tiles(F)
    sp = _pad_last(fea, Fpad).astype(jnp.bfloat16)
    nb = _pad_last(nbr, Fpad).astype(jnp.bfloat16)
    out = pl.pallas_call(
        _maxpool_face_kernel,
        out_shape=jax.ShapeDtypeStruct((M, C, Fpad), jnp.bfloat16),
        grid=(M, nf),
        in_specs=[
            pl.BlockSpec((1, C, tf), lambda m, f: (m, 0, f)),
            pl.BlockSpec((1, K, C, tf), lambda m, f: (m, 0, 0, f)),
        ],
        out_specs=pl.BlockSpec((1, C, tf), lambda m, f: (m, 0, f)),
        compiler_params=_TILED_PARAMS,
    )(sp, nb)
    return out[:, :, :F] if Fpad != F else out


def conv_surface(verts, faces, ring_n, centers, p):
    # TODO(synk): exact ConvSurface source not in the reference; MeshNet2-style stand-in:
    # neighbor-face vertex coords relative to the face center -> shared 1x1 conv+BN+ReLU ->
    # max over neighbors (conv and max-over-K fused in one Pallas kernel, faces on lanes).
    M, F, K = ring_n.shape
    vidx = jax.vmap(lambda fc, r: fc[r])(faces, ring_n)             # [M, F, K, 3]
    nbr_v = jax.vmap(lambda v, i: v[i])(verts, vidx)                # [M, F, K, 3, 3]
    rel = nbr_v - centers[:, :, None, None, :]                      # [M, F, K, 3, 3]
    rel = jnp.transpose(rel.reshape(M, F, K, 9), (0, 2, 3, 1))      # [M, K, 9, F] chan-major
    w_eff, b_eff = _fold_bn_conv(p)
    O = w_eff.shape[0]
    tf, nf, Fpad = _f_tiles(F)
    relp = _pad_last(rel, Fpad).astype(jnp.bfloat16)
    out = pl.pallas_call(
        _conv_surface_kernel,
        out_shape=jax.ShapeDtypeStruct((M, O, Fpad), jnp.bfloat16),
        grid=(M, nf),
        in_specs=[
            pl.BlockSpec((1, K, 9, tf), lambda m, f: (m, 0, 0, f)),
            pl.BlockSpec((O, 9), lambda m, f: (0, 0)),
            pl.BlockSpec((O, 1), lambda m, f: (0, 0)),
        ],
        out_specs=pl.BlockSpec((1, O, tf), lambda m, f: (m, 0, f)),
        compiler_params=_TILED_PARAMS,
    )(relp, w_eff, b_eff)
    return out[:, :, :F] if Fpad != F else out


def descriptors_fused(centers, normals, p_point, p_normal):
    # TODO(synk): Point/NormalDescriptor sources not in the reference; standard MeshNet2
    # Conv1d(3, num_kernel, 1)+BN+ReLU, fused here into one block-diagonal 1x1 conv.
    nk = p_point["w"].shape[0]
    x = jnp.transpose(jnp.concatenate([centers, normals], axis=-1), (0, 2, 1))   # [M, 6, F]
    w = jnp.zeros((2 * nk, 6), jnp.float32)
    w = w.at[:nk, :3].set(p_point["w"]).at[nk:, 3:].set(p_normal["w"])
    fused = dict(
        w=w,
        b=jnp.concatenate([p_point["b"], p_normal["b"]]),
        gamma=jnp.concatenate([p_point["gamma"], p_normal["gamma"]]),
        beta=jnp.concatenate([p_point["beta"], p_normal["beta"]]),
    )
    out = conv1x1_bn_relu(x, fused)                                  # [M, 2*nk, F]
    return out[:, :nk], out[:, nk:]


def classifier_head(pooled, p1, p2, p3):
    """Fused global face-max + Linear/BN/ReLU x2 + final Linear.  pooled: [M, C, Fp]."""
    def fold_linear(p):
        scale = p["gamma"] / jnp.sqrt(1.0 + 1e-5)
        w = (p["w"] * scale[:, None]).astype(jnp.bfloat16)
        b = (p["b"] * scale + p["beta"]).astype(jnp.float32)
        return w.T, b[None, :]
    w1t, b1 = fold_linear(p1)
    w2t, b2 = fold_linear(p2)
    w3t = p3["w"].astype(jnp.bfloat16).T
    b3 = p3["b"].astype(jnp.float32)[None, :]
    M = pooled.shape[0]
    ncls = p3["w"].shape[0]
    return pl.pallas_call(
        _classifier_kernel,
        out_shape=jax.ShapeDtypeStruct((M, ncls), jnp.float32),
        compiler_params=pltpu.CompilerParams(vmem_limit_bytes=VMEM_LIMIT_BYTES),
    )(pooled.astype(jnp.bfloat16), w1t, b1, w2t, b2, w3t, b3)


# -----------------------------------------------------------------------------
# Gather helpers (plain JAX glue; faces kept on the lane axis)
# -----------------------------------------------------------------------------
def gather_kcf(fea, idx):
    """fea: [M, C, Fsrc], idx: [M, Fd, K] -> neighbor features [M, K, C, Fd]."""
    def one(f, r):
        g = jnp.take(f, r.T, axis=1)         # [C, K, Fd]
        return jnp.moveaxis(g, 1, 0)         # [K, C, Fd]
    return jax.vmap(one)(fea, idx)


def pooled_neighbor_positions(pool_idx, ring_pooled):
    """Map full-face neighbor indices to positions in the pooled index space.

    Returns [M, Fp, K] positions in [0, Fp]; position Fp means "neighbor not in pool_idx"
    (zero feature), reproducing the reference's zero-placeholder + re-gather semantics
    without the full-F scatter of the 128-channel intermediate.
    """
    Fp = pool_idx.shape[0]
    pos = jnp.searchsorted(pool_idx, ring_pooled)
    pos_c = jnp.clip(pos, 0, Fp - 1)
    valid = pool_idx[pos_c] == ring_pooled
    return jnp.where(valid, pos_c, Fp)


# -----------------------------------------------------------------------------
# Network sub-modules
# -----------------------------------------------------------------------------
def conv_face_block(fea, ring_pooled, pool_idx, pos_safe, p1, p2):
    """ConvFaceBlock: ConvFace(C->128) -> ConvFace(128->growth) -> concat with input."""
    M, C, F = fea.shape
    # --- ConvFace 1 ---
    self1 = fea if pool_idx is None else jnp.take(fea, pool_idx, axis=2)
    nbr1 = gather_kcf(fea, ring_pooled)                             # [M, K, C, Fp]
    out1 = conv_face_fused(self1, nbr1, p1)                         # [M, 128, Fp]
    # --- ConvFace 2 (neighbors come from the zero placeholder of out1) ---
    if pool_idx is None:
        nbr2 = gather_kcf(out1, ring_pooled)
    else:
        out1_pad = jnp.concatenate(
            [out1, jnp.zeros((M, out1.shape[1], 1), out1.dtype)], axis=2)
        nbr2 = gather_kcf(out1_pad, pos_safe)                       # zeros where not pooled
    out2 = conv_face_fused(out1, nbr2, p2)                          # [M, growth, Fp]
    # --- scatter back to full F (needed for the channel concat with the full-F input) ---
    if pool_idx is None:
        ph2 = out2
    else:
        ph2 = jnp.zeros((M, out2.shape[1], F), out2.dtype).at[:, :, pool_idx].set(out2)
    return jnp.concatenate([fea, ph2], axis=1)


def mesh_block(fea, ring_n, pool_idx, block_params):
    if pool_idx is not None:
        ring_n = jnp.take(ring_n, pool_idx, axis=1)                 # [M, Fp, K]
        pos_safe = pooled_neighbor_positions(pool_idx, ring_n)
    else:
        pos_safe = None
    for (p1, p2) in block_params:
        fea = conv_face_block(fea, ring_n, pool_idx, pos_safe, p1, p2)
    return fea


# -----------------------------------------------------------------------------
# Parameter init (deterministic, synthetic)
# -----------------------------------------------------------------------------
def init_conv(key, out_c, in_c):
    k1, k2, k3, k4 = jax.random.split(key, 4)
    return dict(
        w=0.1 * jax.random.normal(k1, (out_c, in_c), jnp.float32),
        b=0.01 * jax.random.normal(k2, (out_c,), jnp.float32),
        gamma=1.0 + 0.05 * jax.random.normal(k3, (out_c,), jnp.float32),
        beta=0.05 * jax.random.normal(k4, (out_c,), jnp.float32),
    )


def init_mesh_block(key, in_channel, growth, num_block):
    params = []
    c = in_channel
    for _ in range(num_block):
        key, k1, k2 = jax.random.split(key, 3)
        params.append((init_conv(k1, 128, c), init_conv(k2, growth, 128)))
        c += growth
    return params, c


def init_network_params(key, cfg, num_cls):
    nk = cfg["num_kernel"]
    snk = cfg["ConvSurface"]["num_kernel"]
    blocks = cfg["MeshBlock"]["blocks"]
    keys = jax.random.split(key, 12)
    params = {}
    params["point"] = init_conv(keys[0], nk, 3)
    params["normal"] = init_conv(keys[1], nk, 3)
    params["surf1"] = init_conv(keys[2], snk, 9)
    params["surf2"] = init_conv(keys[3], snk, 9)
    params["surf3"] = init_conv(keys[4], snk, 9)

    in_channel = nk * 2 + snk * 3
    params["mb1"], in_channel = init_mesh_block(keys[5], in_channel, nk, blocks[0])
    params["mb2"], in_channel = init_mesh_block(keys[6], in_channel, nk, blocks[1])
    params["mb3"], in_channel = init_mesh_block(keys[7], in_channel, nk, blocks[2])

    params["fc1"] = init_conv(keys[8], 512, in_channel)
    params["fc2"] = init_conv(keys[9], 256, 512)
    params["fc3"] = dict(
        w=0.1 * jax.random.normal(keys[10], (num_cls, 256), jnp.float32),
        b=0.01 * jax.random.normal(keys[11], (num_cls,), jnp.float32),
    )
    return params


# -----------------------------------------------------------------------------
# Full Network forward
# -----------------------------------------------------------------------------
def network_forward(params, verts, faces, centers, normals,
                    ring_1, ring_2, ring_3, pool_rate, rng_key):
    points_fea, normals_fea = descriptors_fused(centers, normals,
                                                params["point"], params["normal"])
    s1 = conv_surface(verts, faces, ring_1, centers, params["surf1"])
    s2 = conv_surface(verts, faces, ring_2, centers, params["surf2"])
    s3 = conv_surface(verts, faces, ring_3, centers, params["surf3"])
    fea = jnp.concatenate([points_fea, s1, s2, s3, normals_fea], axis=1)

    fea = mesh_block(fea, ring_1, None, params["mb1"])
    fea = max_pool_face_feature(fea, ring_1)

    F = ring_2.shape[1]
    k1, k2 = jax.random.split(rng_key)
    pool_idx = jnp.sort(jax.random.permutation(k1, F)[: F // pool_rate])
    fea = mesh_block(fea, ring_2, pool_idx, params["mb2"])
    fea = max_pool_face_feature(fea, ring_2)

    n_pool = pool_idx.shape[0]
    pool_idx_idx = jax.random.permutation(k2, n_pool)[: n_pool // pool_rate]
    pool_idx = jnp.sort(pool_idx[pool_idx_idx])
    fea = mesh_block(fea, ring_3, pool_idx, params["mb3"])

    pooled = jnp.take(fea, pool_idx, axis=2)                        # [M, C, Fp]
    # global max over faces + classifier (Dropout is eval-mode identity) fused in one kernel
    return classifier_head(pooled, params["fc1"], params["fc2"], params["fc3"])


# -----------------------------------------------------------------------------
# Main
# -----------------------------------------------------------------------------
if __name__ == "__main__":
    num_meshes, num_verts, num_faces = 2, 12, 16
    num_cls, pool_rate = 4, 2
    cfg = {"num_kernel": 8,
           "ConvSurface": {"num_kernel": 8},
           "MeshBlock": {"blocks": [1, 1, 1]}}

    key = jax.random.PRNGKey(0)
    (k_verts, k_faces, k_cent, k_norm,
     k_r1, k_r2, k_r3, k_par, k_pool) = jax.random.split(key, 9)

    verts = jax.random.normal(k_verts, (num_meshes, num_verts, 3), jnp.float32)
    faces = jax.random.randint(k_faces, (num_meshes, num_faces, 3), 0, num_verts, jnp.int32)
    centers = jax.random.normal(k_cent, (num_meshes, num_faces, 3), jnp.float32)
    normals = jax.random.normal(k_norm, (num_meshes, num_faces, 3), jnp.float32)
    ring_1 = jax.random.randint(k_r1, (num_meshes, num_faces, 3), 0, num_faces, jnp.int32)
    ring_2 = jax.random.randint(k_r2, (num_meshes, num_faces, 6), 0, num_faces, jnp.int32)
    ring_3 = jax.random.randint(k_r3, (num_meshes, num_faces, 12), 0, num_faces, jnp.int32)

    params = init_network_params(k_par, cfg, num_cls)

    fwd = jax.jit(network_forward, static_argnums=(8,))   # pool_rate is static
    logits = fwd(params, verts, faces, centers, normals,
                 ring_1, ring_2, ring_3, pool_rate, k_pool)
    logits = jax.block_until_ready(logits)
    assert logits.shape == (num_meshes, num_cls), logits.shape
    assert bool(jnp.all(jnp.isfinite(logits)))
    print("KERNEL_OK")
</pallas_src>

<mosaic_0001>
module attributes {stable_mosaic.version = 11 : i64} {
  func.func @_conv1x1_kernel(%arg0: i32, %arg1: i32, %arg2: memref<1x6x16xbf16, #tpu.memory_space<vmem>>, %arg3: memref<16x6xbf16, #tpu.memory_space<vmem>>, %arg4: memref<16x1xf32, #tpu.memory_space<vmem>>, %arg5: memref<1x16x16xbf16, #tpu.memory_space<vmem>>) attributes {dimension_semantics = [#tpu.dimension_semantics<parallel>, #tpu.dimension_semantics<parallel>], iteration_bounds = array<i64: 2, 1>, scalar_prefetch = 0 : i64, scratch_operands = 0 : i64, tpu.core_type = #tpu.core_type<tc>, window_params = [{transform_indices = @transform_0, window_bounds = array<i64: 1, 6, 16>}, {pipeline_mode = #tpu.pipeline_mode<synchronous>, transform_indices = @transform_1, window_bounds = array<i64: 16, 6>}, {pipeline_mode = #tpu.pipeline_mode<synchronous>, transform_indices = @transform_2, window_bounds = array<i64: 16, 1>}, {transform_indices = @transform_3, window_bounds = array<i64: 1, 16, 16>}]} {
    %c0 = arith.constant 0 : index
    %c0_0 = arith.constant 0 : index
    %0 = vector.load %arg3[%c0, %c0_0] : memref<16x6xbf16, #tpu.memory_space<vmem>>, vector<16x6xbf16>
    %c0_1 = arith.constant 0 : index
    %c0_2 = arith.constant 0 : index
    %c0_3 = arith.constant 0 : index
    %1 = vector.load %arg2[%c0_1, %c0_2, %c0_3] : memref<1x6x16xbf16, #tpu.memory_space<vmem>>, vector<1x6x16xbf16>
    %2 = vector.shape_cast %1 : vector<1x6x16xbf16> to vector<6x16xbf16>
    %cst = arith.constant dense<0.000000e+00> : vector<16x16xf32>
    %3 = tpu.matmul %0, %2, %cst {dimension_numbers = #tpu.dot_dimension_numbers<[1], [0], [0], [1], [0, 0, 1, 1], [], []>} : vector<16x6xbf16>, vector<6x16xbf16>, vector<16x16xf32> -> vector<16x16xf32>
    %c0_4 = arith.constant 0 : index
    %c0_5 = arith.constant 0 : index
    %4 = vector.load %arg4[%c0_4, %c0_5] : memref<16x1xf32, #tpu.memory_space<vmem>>, vector<16x1xf32>
    %5 = vector.broadcast %4 : vector<16x1xf32> to vector<16x16xf32>
    %6 = arith.addf %3, %5 : vector<16x16xf32>
    %cst_6 = arith.constant 0.000000e+00 : f32
    %7 = vector.broadcast %cst_6 : f32 to vector<16x16xf32>
    %8 = arith.maximumf %6, %7 : vector<16x16xf32>
    %9 = arith.truncf %8 : vector<16x16xf32> to vector<16x16xbf16>
    %c0_7 = arith.constant 0 : index
    %c0_8 = arith.constant 0 : index
    %c0_9 = arith.constant 0 : index
    %10 = vector.load %arg5[%c0_7, %c0_8, %c0_9] : memref<1x16x16xbf16, #tpu.memory_space<vmem>>, vector<1x16x16xbf16>
    %11 = vector.shape_cast %10 : vector<1x16x16xbf16> to vector<16x16xbf16>
    %12 = vector.shape_cast %9 : vector<16x16xbf16> to vector<1x16x16xbf16>
    tpu.vector_store %arg5[%c0_7, %c0_8, %c0_9], %12 {strides = array<i32>} : memref<1x16x16xbf16, #tpu.memory_space<vmem>>, vector<1x16x16xbf16>,
    return
  }
  func.func @transform_0(%arg0: i32, %arg1: i32) -> (i32, i32, i32) {
    %c0_i32 = arith.constant 0 : i32
    %c0_i32_0 = arith.constant 0 : i32
    return %arg0, %c0_i32, %arg1 : i32, i32, i32
  }
  func.func @transform_1(%arg0: i32, %arg1: i32) -> (i32, i32) {
    %c0_i32 = arith.constant 0 : i32
    %c0_i32_0 = arith.constant 0 : i32
    %c0_i32_1 = arith.constant 0 : i32
    return %c0_i32, %c0_i32_0 : i32, i32
  }
  func.func @transform_2(%arg0: i32, %arg1: i32) -> (i32, i32) {
    %c0_i32 = arith.constant 0 : i32
    %c0_i32_0 = arith.constant 0 : i32
    %c0_i32_1 = arith.constant 0 : i32
    return %c0_i32, %c0_i32_0 : i32, i32
  }
  func.func @transform_3(%arg0: i32, %arg1: i32) -> (i32, i32, i32) {
    %c0_i32 = arith.constant 0 : i32
    %c0_i32_0 = arith.constant 0 : i32
    return %arg0, %c0_i32, %arg1 : i32, i32, i32
  }
}

module attributes {stable_mosaic.version = 11 : i64} {
  func.func @_conv_surface_kernel(%arg0: i32, %arg1: i32, %arg2: memref<1x3x9x16xbf16, #tpu.memory_space<vmem>>, %arg3: memref<8x9xbf16, #tpu.memory_space<vmem>>, %arg4: memref<8x1xf32, #tpu.memory_space<vmem>>, %arg5: memref<1x8x16xbf16, #tpu.memory_space<vmem>>) attributes {dimension_semantics = [#tpu.dimension_semantics<parallel>, #tpu.dimension_semantics<parallel>], iteration_bounds = array<i64: 2, 1>, scalar_prefetch = 0 : i64, scratch_operands = 0 : i64, tpu.core_type = #tpu.core_type<tc>, window_params = [{transform_indices = @transform_0, window_bounds = array<i64: 1, 3, 9, 16>}, {pipeline_mode = #tpu.pipeline_mode<synchronous>, transform_indices = @transform_1, window_bounds = array<i64: 8, 9>}, {pipeline_mode = #tpu.pipeline_mode<synchronous>, transform_indices = @transform_2, window_bounds = array<i64: 8, 1>}, {transform_indices = @transform_3, window_bounds = array<i64: 1, 8, 16>}]} {
    %c0 = arith.constant 0 : index
    %c0_0 = arith.constant 0 : index
    %0 = vector.load %arg4[%c0, %c0_0] : memref<8x1xf32, #tpu.memory_space<vmem>>, vector<8x1xf32>
    %c0_1 = arith.constant 0 : index
    %c0_2 = arith.constant 0 : index
    %1 = vector.load %arg3[%c0_1, %c0_2] : memref<8x9xbf16, #tpu.memory_space<vmem>>, vector<8x9xbf16>
    %c0_3 = arith.constant 0 : index
    %c0_4 = arith.constant 0 : index
    %c0_5 = arith.constant 0 : index
    %c0_6 = arith.constant 0 : index
    %2 = vector.load %arg2[%c0_3, %c0_4, %c0_5, %c0_6] : memref<1x3x9x16xbf16, #tpu.memory_space<vmem>>, vector<1x1x9x16xbf16>
    %3 = vector.shape_cast %2 : vector<1x1x9x16xbf16> to vector<9x16xbf16>
    %cst = arith.constant dense<0.000000e+00> : vector<8x16xf32>
    %4 = tpu.matmul %1, %3, %cst {dimension_numbers = #tpu.dot_dimension_numbers<[1], [0], [0], [1], [0, 0, 1, 1], [], []>} : vector<8x9xbf16>, vector<9x16xbf16>, vector<8x16xf32> -> vector<8x16xf32>
    %5 = vector.broadcast %0 : vector<8x1xf32> to vector<8x16xf32>
    %6 = arith.addf %4, %5 : vector<8x16xf32>
    %cst_7 = arith.constant 0.000000e+00 : f32
    %7 = vector.broadcast %cst_7 : f32 to vector<8x16xf32>
    %8 = arith.maximumf %6, %7 : vector<8x16xf32>
    %c0_8 = arith.constant 0 : index
    %c0_9 = arith.constant 0 : index
    %9 = vector.load %arg3[%c0_8, %c0_9] : memref<8x9xbf16, #tpu.memory_space<vmem>>, vector<8x9xbf16>
    %c0_10 = arith.constant 0 : index
    %c1 = arith.constant 1 : index
    %c0_11 = arith.constant 0 : index
    %c0_12 = arith.constant 0 : index
    %10 = vector.load %arg2[%c0_10, %c1, %c0_11, %c0_12] : memref<1x3x9x16xbf16, #tpu.memory_space<vmem>>, vector<1x1x9x16xbf16>
    %11 = vector.shape_cast %10 : vector<1x1x9x16xbf16> to vector<9x16xbf16>
    %cst_13 = arith.constant dense<0.000000e+00> : vector<8x16xf32>
    %12 = tpu.matmul %9, %11, %cst_13 {dimension_numbers = #tpu.dot_dimension_numbers<[1], [0], [0], [1], [0, 0, 1, 1], [], []>} : vector<8x9xbf16>, vector<9x16xbf16>, vector<8x16xf32> -> vector<8x16xf32>
    %13 = vector.broadcast %0 : vector<8x1xf32> to vector<8x16xf32>
    %14 = arith.addf %12, %13 : vector<8x16xf32>
    %cst_14 = arith.constant 0.000000e+00 : f32
    %15 = vector.broadcast %cst_14 : f32 to vector<8x16xf32>
    %16 = arith.maximumf %14, %15 : vector<8x16xf32>
    %17 = arith.maximumf %8, %16 : vector<8x16xf32>
    %c0_15 = arith.constant 0 : index
    %c0_16 = arith.constant 0 : index
    %18 = vector.load %arg3[%c0_15, %c0_16] : memref<8x9xbf16, #tpu.memory_space<vmem>>, vector<8x9xbf16>
    %c0_17 = arith.constant 0 : index
    %c2 = arith.constant 2 : index
    %c0_18 = arith.constant 0 : index
    %c0_19 = arith.constant 0 : index
    %19 = vector.load %arg2[%c0_17, %c2, %c0_18, %c0_19] : memref<1x3x9x16xbf16, #tpu.memory_space<vmem>>, vector<1x1x9x16xbf16>
    %20 = vector.shape_cast %19 : vector<1x1x9x16xbf16> to vector<9x16xbf16>
    %cst_20 = arith.constant dense<0.000000e+00> : vector<8x16xf32>
    %21 = tpu.matmul %18, %20, %cst_20 {dimension_numbers = #tpu.dot_dimension_numbers<[1], [0], [0], [1], [0, 0, 1, 1], [], []>} : vector<8x9xbf16>, vector<9x16xbf16>, vector<8x16xf32> -> vector<8x16xf32>
    %22 = vector.broadcast %0 : vector<8x1xf32> to vector<8x16xf32>
    %23 = arith.addf %21, %22 : vector<8x16xf32>
    %cst_21 = arith.constant 0.000000e+00 : f32
    %24 = vector.broadcast %cst_21 : f32 to vector<8x16xf32>
    %25 = arith.maximumf %23, %24 : vector<8x16xf32>
    %26 = arith.maximumf %17, %25 : vector<8x16xf32>
    %27 = arith.truncf %26 : vector<8x16xf32> to vector<8x16xbf16>
    %c0_22 = arith.constant 0 : index
    %c0_23 = arith.constant 0 : index
    %c0_24 = arith.constant 0 : index
    %28 = vector.load %arg5[%c0_22, %c0_23, %c0_24] : memref<1x8x16xbf16, #tpu.memory_space<vmem>>, vector<1x8x16xbf16>
    %29 = vector.shape_cast %28 : vector<1x8x16xbf16> to vector<8x16xbf16>
    %30 = vector.shape_cast %27 : vector<8x16xbf16> to vector<1x8x16xbf16>
    tpu.vector_store %arg5[%c0_22, %c0_23, %c0_24], %30 {strides = array<i32>} : memref<1x8x16xbf16, #tpu.memory_space<vmem>>, vector<1x8x16xbf16>,
    return
  }
  func.func @transform_0(%arg0: i32, %arg1: i32) -> (i32, i32, i32, i32) {
    %c0_i32 = arith.constant 0 : i32
    %c0_i32_0 = arith.constant 0 : i32
    %c0_i32_1 = arith.constant 0 : i32
    return %arg0, %c0_i32, %c0_i32_0, %arg1 : i32, i32, i32, i32
  }
  func.func @transform_1(%arg0: i32, %arg1: i32) -> (i32, i32) {
    %c0_i32 = arith.constant 0 : i32
    %c0_i32_0 = arith.constant 0 : i32
    %c0_i32_1 = arith.constant 0 : i32
    return %c0_i32, %c0_i32_0 : i32, i32
  }
  func.func @transform_2(%arg0: i32, %arg1: i32) -> (i32, i32) {
    %c0_i32 = arith.constant 0 : i32
    %c0_i32_0 = arith.constant 0 : i32
    %c0_i32_1 = arith.constant 0 : i32
    return %c0_i32, %c0_i32_0 : i32, i32
  }
  func.func @transform_3(%arg0: i32, %arg1: i32) -> (i32, i32, i32) {
    %c0_i32 = arith.constant 0 : i32
    %c0_i32_0 = arith.constant 0 : i32
    return %arg0, %c0_i32, %arg1 : i32, i32, i32
  }
}

module attributes {stable_mosaic.version = 11 : i64} {
  func.func @_conv_surface_kernel(%arg0: i32, %arg1: i32, %arg2: memref<1x6x9x16xbf16, #tpu.memory_space<vmem>>, %arg3: memref<8x9xbf16, #tpu.memory_space<vmem>>, %arg4: memref<8x1xf32, #tpu.memory_space<vmem>>, %arg5: memref<1x8x16xbf16, #tpu.memory_space<vmem>>) attributes {dimension_semantics = [#tpu.dimension_semantics<parallel>, #tpu.dimension_semantics<parallel>], iteration_bounds = array<i64: 2, 1>, scalar_prefetch = 0 : i64, scratch_operands = 0 : i64, tpu.core_type = #tpu.core_type<tc>, window_params = [{transform_indices = @transform_0, window_bounds = array<i64: 1, 6, 9, 16>}, {pipeline_mode = #tpu.pipeline_mode<synchronous>, transform_indices = @transform_1, window_bounds = array<i64: 8, 9>}, {pipeline_mode = #tpu.pipeline_mode<synchronous>, transform_indices = @transform_2, window_bounds = array<i64: 8, 1>}, {transform_indices = @transform_3, window_bounds = array<i64: 1, 8, 16>}]} {
    %c0 = arith.constant 0 : index
    %c0_0 = arith.constant 0 : index
    %0 = vector.load %arg4[%c0, %c0_0] : memref<8x1xf32, #tpu.memory_space<vmem>>, vector<8x1xf32>
    %c0_1 = arith.constant 0 : index
    %c0_2 = arith.constant 0 : index
    %1 = vector.load %arg3[%c0_1, %c0_2] : memref<8x9xbf16, #tpu.memory_space<vmem>>, vector<8x9xbf16>
    %c0_3 = arith.constant 0 : index
    %c0_4 = arith.constant 0 : index
    %c0_5 = arith.constant 0 : index
    %c0_6 = arith.constant 0 : index
    %2 = vector.load %arg2[%c0_3, %c0_4, %c0_5, %c0_6] : memref<1x6x9x16xbf16, #tpu.memory_space<vmem>>, vector<1x1x9x16xbf16>
    %3 = vector.shape_cast %2 : vector<1x1x9x16xbf16> to vector<9x16xbf16>
    %cst = arith.constant dense<0.000000e+00> : vector<8x16xf32>
    %4 = tpu.matmul %1, %3, %cst {dimension_numbers = #tpu.dot_dimension_numbers<[1], [0], [0], [1], [0, 0, 1, 1], [], []>} : vector<8x9xbf16>, vector<9x16xbf16>, vector<8x16xf32> -> vector<8x16xf32>
    %5 = vector.broadcast %0 : vector<8x1xf32> to vector<8x16xf32>
    %6 = arith.addf %4, %5 : vector<8x16xf32>
    %cst_7 = arith.constant 0.000000e+00 : f32
    %7 = vector.broadcast %cst_7 : f32 to vector<8x16xf32>
    %8 = arith.maximumf %6, %7 : vector<8x16xf32>
    %c0_8 = arith.constant 0 : index
    %c0_9 = arith.constant 0 : index
    %9 = vector.load %arg3[%c0_8, %c0_9] : memref<8x9xbf16, #tpu.memory_space<vmem>>, vector<8x9xbf16>
    %c0_10 = arith.constant 0 : index
    %c1 = arith.constant 1 : index
    %c0_11 = arith.constant 0 : index
    %c0_12 = arith.constant 0 : index
    %10 = vector.load %arg2[%c0_10, %c1, %c0_11, %c0_12] : memref<1x6x9x16xbf16, #tpu.memory_space<vmem>>, vector<1x1x9x16xbf16>
    %11 = vector.shape_cast %10 : vector<1x1x9x16xbf16> to vector<9x16xbf16>
    %cst_13 = arith.constant dense<0.000000e+00> : vector<8x16xf32>
    %12 = tpu.matmul %9, %11, %cst_13 {dimension_numbers = #tpu.dot_dimension_numbers<[1], [0], [0], [1], [0, 0, 1, 1], [], []>} : vector<8x9xbf16>, vector<9x16xbf16>, vector<8x16xf32> -> vector<8x16xf32>
    %13 = vector.broadcast %0 : vector<8x1xf32> to vector<8x16xf32>
    %14 = arith.addf %12, %13 : vector<8x16xf32>
    %cst_14 = arith.constant 0.000000e+00 : f32
    %15 = vector.broadcast %cst_14 : f32 to vector<8x16xf32>
    %16 = arith.maximumf %14, %15 : vector<8x16xf32>
    %17 = arith.maximumf %8, %16 : vector<8x16xf32>
    %c0_15 = arith.constant 0 : index
    %c0_16 = arith.constant 0 : index
    %18 = vector.load %arg3[%c0_15, %c0_16] : memref<8x9xbf16, #tpu.memory_space<vmem>>, vector<8x9xbf16>
    %c0_17 = arith.constant 0 : index
    %c2 = arith.constant 2 : index
    %c0_18 = arith.constant 0 : index
    %c0_19 = arith.constant 0 : index
    %19 = vector.load %arg2[%c0_17, %c2, %c0_18, %c0_19] : memref<1x6x9x16xbf16, #tpu.memory_space<vmem>>, vector<1x1x9x16xbf16>
    %20 = vector.shape_cast %19 : vector<1x1x9x16xbf16> to vector<9x16xbf16>
    %cst_20 = arith.constant dense<0.000000e+00> : vector<8x16xf32>
    %21 = tpu.matmul %18, %20, %cst_20 {dimension_numbers = #tpu.dot_dimension_numbers<[1], [0], [0], [1], [0, 0, 1, 1], [], []>} : vector<8x9xbf16>, vector<9x16xbf16>, vector<8x16xf32> -> vector<8x16xf32>
    %22 = vector.broadcast %0 : vector<8x1xf32> to vector<8x16xf32>
    %23 = arith.addf %21, %22 : vector<8x16xf32>
    %cst_21 = arith.constant 0.000000e+00 : f32
    %24 = vector.broadcast %cst_21 : f32 to vector<8x16xf32>
    %25 = arith.maximumf %23, %24 : vector<8x16xf32>
    %26 = arith.maximumf %17, %25 : vector<8x16xf32>
    %c0_22 = arith.constant 0 : index
    %c0_23 = arith.constant 0 : index
    %27 = vector.load %arg3[%c0_22, %c0_23] : memref<8x9xbf16, #tpu.memory_space<vmem>>, vector<8x9xbf16>
    %c0_24 = arith.constant 0 : index
    %c3 = arith.constant 3 : index
    %c0_25 = arith.constant 0 : index
    %c0_26 = arith.constant 0 : index
    %28 = vector.load %arg2[%c0_24, %c3, %c0_25, %c0_26] : memref<1x6x9x16xbf16, #tpu.memory_space<vmem>>, vector<1x1x9x16xbf16>
    %29 = vector.shape_cast %28 : vector<1x1x9x16xbf16> to vector<9x16xbf16>
    %cst_27 = arith.constant dense<0.000000e+00> : vector<8x16xf32>
    %30 = tpu.matmul %27, %29, %cst_27 {dimension_numbers = #tpu.dot_dimension_numbers<[1], [0], [0], [1], [0, 0, 1, 1], [], []>} : vector<8x9xbf16>, vector<9x16xbf16>, vector<8x16xf32> -> vector<8x16xf32>
    %31 = vector.broadcast %0 : vector<8x1xf32> to vector<8x16xf32>
    %32 = arith.addf %30, %31 : vector<8x16xf32>
    %cst_28 = arith.constant 0.000000e+00 : f32
    %33 = vector.broadcast %cst_28 : f32 to vector<8x16xf32>
    %34 = arith.maximumf %32, %33 : vector<8x16xf32>
    %35 = arith.maximumf %26, %34 : vector<8x16xf32>
    %c0_29 = arith.constant 0 : index
    %c0_30 = arith.constant 0 : index
    %36 = vector.load %arg3[%c0_29, %c0_30] : memref<8x9xbf16, #tpu.memory_space<vmem>>, vector<8x9xbf16>
    %c0_31 = arith.constant 0 : index
    %c4 = arith.constant 4 : index
    %c0_32 = arith.constant 0 : index
    %c0_33 = arith.constant 0 : index
    %37 = vector.load %arg2[%c0_31, %c4, %c0_32, %c0_33] : memref<1x6x9x16xbf16, #tpu.memory_space<vmem>>, vector<1x1x9x16xbf16>
    %38 = vector.shape_cast %37 : vector<1x1x9x16xbf16> to vector<9x16xbf16>
    %cst_34 = arith.constant dense<0.000000e+00> : vector<8x16xf32>
    %39 = tpu.matmul %36, %38, %cst_34 {dimension_numbers = #tpu.dot_dimension_numbers<[1], [0], [0], [1], [0, 0, 1, 1], [], []>} : vector<8x9xbf16>, vector<9x16xbf16>, vector<8x16xf32> -> vector<8x16xf32>
    %40 = vector.broadcast %0 : vector<8x1xf32> to vector<8x16xf32>
    %41 = arith.addf %39, %40 : vector<8x16xf32>
    %cst_35 = arith.constant 0.000000e+00 : f32
    %42 = vector.broadcast %cst_35 : f32 to vector<8x16xf32>
    %43 = arith.maximumf %41, %42 : vector<8x16xf32>
    %44 = arith.maximumf %35, %43 : vector<8x16xf32>
    %c0_36 = arith.constant 0 : index
    %c0_37 = arith.constant 0 : index
    %45 = vector.load %arg3[%c0_36, %c0_37] : memref<8x9xbf16, #tpu.memory_space<vmem>>, vector<8x9xbf16>
    %c0_38 = arith.constant 0 : index
    %c5 = arith.constant 5 : index
    %c0_39 = arith.constant 0 : index
    %c0_40 = arith.constant 0 : index
    %46 = vector.load %arg2[%c0_38, %c5, %c0_39, %c0_40] : memref<1x6x9x16xbf16, #tpu.memory_space<vmem>>, vector<1x1x9x16xbf16>
    %47 = vector.shape_cast %46 : vector<1x1x9x16xbf16> to vector<9x16xbf16>
    %cst_41 = arith.constant dense<0.000000e+00> : vector<8x16xf32>
    %48 = tpu.matmul %45, %47, %cst_41 {dimension_numbers = #tpu.dot_dimension_numbers<[1], [0], [0], [1], [0, 0, 1, 1], [], []>} : vector<8x9xbf16>, vector<9x16xbf16>, vector<8x16xf32> -> vector<8x16xf32>
    %49 = vector.broadcast %0 : vector<8x1xf32> to vector<8x16xf32>
    %50 = arith.addf %48, %49 : vector<8x16xf32>
    %cst_42 = arith.constant 0.000000e+00 : f32
    %51 = vector.broadcast %cst_42 : f32 to vector<8x16xf32>
    %52 = arith.maximumf %50, %51 : vector<8x16xf32>
    %53 = arith.maximumf %44, %52 : vector<8x16xf32>
    %54 = arith.truncf %53 : vector<8x16xf32> to vector<8x16xbf16>
    %c0_43 = arith.constant 0 : index
    %c0_44 = arith.constant 0 : index
    %c0_45 = arith.constant 0 : index
    %55 = vector.load %arg5[%c0_43, %c0_44, %c0_45] : memref<1x8x16xbf16, #tpu.memory_space<vmem>>, vector<1x8x16xbf16>
    %56 = vector.shape_cast %55 : vector<1x8x16xbf16> to vector<8x16xbf16>
    %57 = vector.shape_cast %54 : vector<8x16xbf16> to vector<1x8x16xbf16>
    tpu.vector_store %arg5[%c0_43, %c0_44, %c0_45], %57 {strides = array<i32>} : memref<1x8x16xbf16, #tpu.memory_space<vmem>>, vector<1x8x16xbf16>,
    return
  }
  func.func @transform_0(%arg0: i32, %arg1: i32) -> (i32, i32, i32, i32) {
    %c0_i32 = arith.constant 0 : i32
    %c0_i32_0 = arith.constant 0 : i32
    %c0_i32_1 = arith.constant 0 : i32
    return %arg0, %c0_i32, %c0_i32_0, %arg1 : i32, i32, i32, i32
  }
  func.func @transform_1(%arg0: i32, %arg1: i32) -> (i32, i32) {
    %c0_i32 = arith.constant 0 : i32
    %c0_i32_0 = arith.constant 0 : i32
    %c0_i32_1 = arith.constant 0 : i32
    return %c0_i32, %c0_i32_0 : i32, i32
  }
  func.func @transform_2(%arg0: i32, %arg1: i32) -> (i32, i32) {
    %c0_i32 = arith.constant 0 : i32
    %c0_i32_0 = arith.constant 0 : i32
    %c0_i32_1 = arith.constant 0 : i32
    return %c0_i32, %c0_i32_0 : i32, i32
  }
  func.func @transform_3(%arg0: i32, %arg1: i32) -> (i32, i32, i32) {
    %c0_i32 = arith.constant 0 : i32
    %c0_i32_0 = arith.constant 0 : i32
    return %arg0, %c0_i32, %arg1 : i32, i32, i32
  }
}

module attributes {stable_mosaic.version = 11 : i64} {
  func.func @_conv_surface_kernel(%arg0: i32, %arg1: i32, %arg2: memref<1x12x9x16xbf16, #tpu.memory_space<vmem>>, %arg3: memref<8x9xbf16, #tpu.memory_space<vmem>>, %arg4: memref<8x1xf32, #tpu.memory_space<vmem>>, %arg5: memref<1x8x16xbf16, #tpu.memory_space<vmem>>) attributes {dimension_semantics = [#tpu.dimension_semantics<parallel>, #tpu.dimension_semantics<parallel>], iteration_bounds = array<i64: 2, 1>, scalar_prefetch = 0 : i64, scratch_operands = 0 : i64, tpu.core_type = #tpu.core_type<tc>, window_params = [{transform_indices = @transform_0, window_bounds = array<i64: 1, 12, 9, 16>}, {pipeline_mode = #tpu.pipeline_mode<synchronous>, transform_indices = @transform_1, window_bounds = array<i64: 8, 9>}, {pipeline_mode = #tpu.pipeline_mode<synchronous>, transform_indices = @transform_2, window_bounds = array<i64: 8, 1>}, {transform_indices = @transform_3, window_bounds = array<i64: 1, 8, 16>}]} {
    %c0 = arith.constant 0 : index
    %c0_0 = arith.constant 0 : index
    %0 = vector.load %arg4[%c0, %c0_0] : memref<8x1xf32, #tpu.memory_space<vmem>>, vector<8x1xf32>
    %c0_1 = arith.constant 0 : index
    %c0_2 = arith.constant 0 : index
    %1 = vector.load %arg3[%c0_1, %c0_2] : memref<8x9xbf16, #tpu.memory_space<vmem>>, vector<8x9xbf16>
    %c0_3 = arith.constant 0 : index
    %c0_4 = arith.constant 0 : index
    %c0_5 = arith.constant 0 : index
    %c0_6 = arith.constant 0 : index
    %2 = vector.load %arg2[%c0_3, %c0_4, %c0_5, %c0_6] : memref<1x12x9x16xbf16, #tpu.memory_space<vmem>>, vector<1x1x9x16xbf16>
    %3 = vector.shape_cast %2 : vector<1x1x9x16xbf16> to vector<9x16xbf16>
    %cst = arith.constant dense<0.000000e+00> : vector<8x16xf32>
    %4 = tpu.matmul %1, %3, %cst {dimension_numbers = #tpu.dot_dimension_numbers<[1], [0], [0], [1], [0, 0, 1, 1], [], []>} : vector<8x9xbf16>, vector<9x16xbf16>, vector<8x16xf32> -> vector<8x16xf32>
    %5 = vector.broadcast %0 : vector<8x1xf32> to vector<8x16xf32>
    %6 = arith.addf %4, %5 : vector<8x16xf32>
    %cst_7 = arith.constant 0.000000e+00 : f32
    %7 = vector.broadcast %cst_7 : f32 to vector<8x16xf32>
    %8 = arith.maximumf %6, %7 : vector<8x16xf32>
    %c0_8 = arith.constant 0 : index
    %c0_9 = arith.constant 0 : index
    %9 = vector.load %arg3[%c0_8, %c0_9] : memref<8x9xbf16, #tpu.memory_space<vmem>>, vector<8x9xbf16>
    %c0_10 = arith.constant 0 : index
    %c1 = arith.constant 1 : index
    %c0_11 = arith.constant 0 : index
    %c0_12 = arith.constant 0 : index
    %10 = vector.load %arg2[%c0_10, %c1, %c0_11, %c0_12] : memref<1x12x9x16xbf16, #tpu.memory_space<vmem>>, vector<1x1x9x16xbf16>
    %11 = vector.shape_cast %10 : vector<1x1x9x16xbf16> to vector<9x16xbf16>
    %cst_13 = arith.constant dense<0.000000e+00> : vector<8x16xf32>
    %12 = tpu.matmul %9, %11, %cst_13 {dimension_numbers = #tpu.dot_dimension_numbers<[1], [0], [0], [1], [0, 0, 1, 1], [], []>} : vector<8x9xbf16>, vector<9x16xbf16>, vector<8x16xf32> -> vector<8x16xf32>
    %13 = vector.broadcast %0 : vector<8x1xf32> to vector<8x16xf32>
    %14 = arith.addf %12, %13 : vector<8x16xf32>
    %cst_14 = arith.constant 0.000000e+00 : f32
    %15 = vector.broadcast %cst_14 : f32 to vector<8x16xf32>
    %16 = arith.maximumf %14, %15 : vector<8x16xf32>
    %17 = arith.maximumf %8, %16 : vector<8x16xf32>
    %c0_15 = arith.constant 0 : index
    %c0_16 = arith.constant 0 : index
    %18 = vector.load %arg3[%c0_15, %c0_16] : memref<8x9xbf16, #tpu.memory_space<vmem>>, vector<8x9xbf16>
    %c0_17 = arith.constant 0 : index
    %c2 = arith.constant 2 : index
    %c0_18 = arith.constant 0 : index
    %c0_19 = arith.constant 0 : index
    %19 = vector.load %arg2[%c0_17, %c2, %c0_18, %c0_19] : memref<1x12x9x16xbf16, #tpu.memory_space<vmem>>, vector<1x1x9x16xbf16>
    %20 = vector.shape_cast %19 : vector<1x1x9x16xbf16> to vector<9x16xbf16>
    %cst_20 = arith.constant dense<0.000000e+00> : vector<8x16xf32>
    %21 = tpu.matmul %18, %20, %cst_20 {dimension_numbers = #tpu.dot_dimension_numbers<[1], [0], [0], [1], [0, 0, 1, 1], [], []>} : vector<8x9xbf16>, vector<9x16xbf16>, vector<8x16xf32> -> vector<8x16xf32>
    %22 = vector.broadcast %0 : vector<8x1xf32> to vector<8x16xf32>
    %23 = arith.addf %21, %22 : vector<8x16xf32>
    %cst_21 = arith.constant 0.000000e+00 : f32
    %24 = vector.broadcast %cst_21 : f32 to vector<8x16xf32>
    %25 = arith.maximumf %23, %24 : vector<8x16xf32>
    %26 = arith.maximumf %17, %25 : vector<8x16xf32>
    %c0_22 = arith.constant 0 : index
    %c0_23 = arith.constant 0 : index
    %27 = vector.load %arg3[%c0_22, %c0_23] : memref<8x9xbf16, #tpu.memory_space<vmem>>, vector<8x9xbf16>
    %c0_24 = arith.constant 0 : index
    %c3 = arith.constant 3 : index
    %c0_25 = arith.constant 0 : index
    %c0_26 = arith.constant 0 : index
    %28 = vector.load %arg2[%c0_24, %c3, %c0_25, %c0_26] : memref<1x12x9x16xbf16, #tpu.memory_space<vmem>>, vector<1x1x9x16xbf16>
    %29 = vector.shape_cast %28 : vector<1x1x9x16xbf16> to vector<9x16xbf16>
    %cst_27 = arith.constant dense<0.000000e+00> : vector<8x16xf32>
    %30 = tpu.matmul %27, %29, %cst_27 {dimension_numbers = #tpu.dot_dimension_numbers<[1], [0], [0], [1], [0, 0, 1, 1], [], []>} : vector<8x9xbf16>, vector<9x16xbf16>, vector<8x16xf32> -> vector<8x16xf32>
    %31 = vector.broadcast %0 : vector<8x1xf32> to vector<8x16xf32>
    %32 = arith.addf %30, %31 : vector<8x16xf32>
    %cst_28 = arith.constant 0.000000e+00 : f32
    %33 = vector.broadcast %cst_28 : f32 to vector<8x16xf32>
    %34 = arith.maximumf %32, %33 : vector<8x16xf32>
    %35 = arith.maximumf %26, %34 : vector<8x16xf32>
    %c0_29 = arith.constant 0 : index
    %c0_30 = arith.constant 0 : index
    %36 = vector.load %arg3[%c0_29, %c0_30] : memref<8x9xbf16, #tpu.memory_space<vmem>>, vector<8x9xbf16>
    %c0_31 = arith.constant 0 : index
    %c4 = arith.constant 4 : index
    %c0_32 = arith.constant 0 : index
    %c0_33 = arith.constant 0 : index
    %37 = vector.load %arg2[%c0_31, %c4, %c0_32, %c0_33] : memref<1x12x9x16xbf16, #tpu.memory_space<vmem>>, vector<1x1x9x16xbf16>
    %38 = vector.shape_cast %37 : vector<1x1x9x16xbf16> to vector<9x16xbf16>
    %cst_34 = arith.constant dense<0.000000e+00> : vector<8x16xf32>
    %39 = tpu.matmul %36, %38, %cst_34 {dimension_numbers = #tpu.dot_dimension_numbers<[1], [0], [0], [1], [0, 0, 1, 1], [], []>} : vector<8x9xbf16>, vector<9x16xbf16>, vector<8x16xf32> -> vector<8x16xf32>
    %40 = vector.broadcast %0 : vector<8x1xf32> to vector<8x16xf32>
    %41 = arith.addf %39, %40 : vector<8x16xf32>
    %cst_35 = arith.constant 0.000000e+00 : f32
    %42 = vector.broadcast %cst_35 : f32 to vector<8x16xf32>
    %43 = arith.maximumf %41, %42 : vector<8x16xf32>
    %44 = arith.maximumf %35, %43 : vector<8x16xf32>
    %c0_36 = arith.constant 0 : index
    %c0_37 = arith.constant 0 : index
    %45 = vector.load %arg3[%c0_36, %c0_37] : memref<8x9xbf16, #tpu.memory_space<vmem>>, vector<8x9xbf16>
    %c0_38 = arith.constant 0 : index
    %c5 = arith.constant 5 : index
    %c0_39 = arith.constant 0 : index
    %c0_40 = arith.constant 0 : index
    %46 = vector.load %arg2[%c0_38, %c5, %c0_39, %c0_40] : memref<1x12x9x16xbf16, #tpu.memory_space<vmem>>, vector<1x1x9x16xbf16>
    %47 = vector.shape_cast %46 : vector<1x1x9x16xbf16> to vector<9x16xbf16>
    %cst_41 = arith.constant dense<0.000000e+00> : vector<8x16xf32>
    %48 = tpu.matmul %45, %47, %cst_41 {dimension_numbers = #tpu.dot_dimension_numbers<[1], [0], [0], [1], [0, 0, 1, 1], [], []>} : vector<8x9xbf16>, vector<9x16xbf16>, vector<8x16xf32> -> vector<8x16xf32>
    %49 = vector.broadcast %0 : vector<8x1xf32> to vector<8x16xf32>
    %50 = arith.addf %48, %49 : vector<8x16xf32>
    %cst_42 = arith.constant 0.000000e+00 : f32
    %51 = vector.broadcast %cst_42 : f32 to vector<8x16xf32>
    %52 = arith.maximumf %50, %51 : vector<8x16xf32>
    %53 = arith.maximumf %44, %52 : vector<8x16xf32>
    %c0_43 = arith.constant 0 : index
    %c0_44 = arith.constant 0 : index
    %54 = vector.load %arg3[%c0_43, %c0_44] : memref<8x9xbf16, #tpu.memory_space<vmem>>, vector<8x9xbf16>
    %c0_45 = arith.constant 0 : index
    %c6 = arith.constant 6 : index
    %c0_46 = arith.constant 0 : index
    %c0_47 = arith.constant 0 : index
    %55 = vector.load %arg2[%c0_45, %c6, %c0_46, %c0_47] : memref<1x12x9x16xbf16, #tpu.memory_space<vmem>>, vector<1x1x9x16xbf16>
    %56 = vector.shape_cast %55 : vector<1x1x9x16xbf16> to vector<9x16xbf16>
    %cst_48 = arith.constant dense<0.000000e+00> : vector<8x16xf32>
    %57 = tpu.matmul %54, %56, %cst_48 {dimension_numbers = #tpu.dot_dimension_numbers<[1], [0], [0], [1], [0, 0, 1, 1], [], []>} : vector<8x9xbf16>, vector<9x16xbf16>, vector<8x16xf32> -> vector<8x16xf32>
    %58 = vector.broadcast %0 : vector<8x1xf32> to vector<8x16xf32>
    %59 = arith.addf %57, %58 : vector<8x16xf32>
    %cst_49 = arith.constant 0.000000e+00 : f32
    %60 = vector.broadcast %cst_49 : f32 to vector<8x16xf32>
    %61 = arith.maximumf %59, %60 : vector<8x16xf32>
    %62 = arith.maximumf %53, %61 : vector<8x16xf32>
    %c0_50 = arith.constant 0 : index
    %c0_51 = arith.constant 0 : index
    %63 = vector.load %arg3[%c0_50, %c0_51] : memref<8x9xbf16, #tpu.memory_space<vmem>>, vector<8x9xbf16>
    %c0_52 = arith.constant 0 : index
    %c7 = arith.constant 7 : index
    %c0_53 = arith.constant 0 : index
    %c0_54 = arith.constant 0 : index
    %64 = vector.load %arg2[%c0_52, %c7, %c0_53, %c0_54] : memref<1x12x9x16xbf16, #tpu.memory_space<vmem>>, vector<1x1x9x16xbf16>
    %65 = vector.shape_cast %64 : vector<1x1x9x16xbf16> to vector<9x16xbf16>
    %cst_55 = arith.constant dense<0.000000e+00> : vector<8x16xf32>
    %66 = tpu.matmul %63, %65, %cst_55 {dimension_numbers = #tpu.dot_dimension_numbers<[1], [0], [0], [1], [0, 0, 1, 1], [], []>} : vector<8x9xbf16>, vector<9x16xbf16>, vector<8x16xf32> -> vector<8x16xf32>
    %67 = vector.broadcast %0 : vector<8x1xf32> to vector<8x16xf32>
    %68 = arith.addf %66, %67 : vector<8x16xf32>
    %cst_56 = arith.constant 0.000000e+00 : f32
    %69 = vector.broadcast %cst_56 : f32 to vector<8x16xf32>
    %70 = arith.maximumf %68, %69 : vector<8x16xf32>
    %71 = arith.maximumf %62, %70 : vector<8x16xf32>
    %c0_57 = arith.constant 0 : index
    %c0_58 = arith.constant 0 : index
    %72 = vector.load %arg3[%c0_57, %c0_58] : memref<8x9xbf16, #tpu.memory_space<vmem>>, vector<8x9xbf16>
    %c0_59 = arith.constant 0 : index
    %c8 = arith.constant 8 : index
    %c0_60 = arith.constant 0 : index
    %c0_61 = arith.constant 0 : index
    %73 = vector.load %arg2[%c0_59, %c8, %c0_60, %c0_61] : memref<1x12x9x16xbf16, #tpu.memory_space<vmem>>, vector<1x1x9x16xbf16>
    %74 = vector.shape_cast %73 : vector<1x1x9x16xbf16> to vector<9x16xbf16>
    %cst_62 = arith.constant dense<0.000000e+00> : vector<8x16xf32>
    %75 = tpu.matmul %72, %74, %cst_62 {dimension_numbers = #tpu.dot_dimension_numbers<[1], [0], [0], [1], [0, 0, 1, 1], [], []>} : vector<8x9xbf16>, vector<9x16xbf16>, vector<8x16xf32> -> vector<8x16xf32>
    %76 = vector.broadcast %0 : vector<8x1xf32> to vector<8x16xf32>
    %77 = arith.addf %75, %76 : vector<8x16xf32>
    %cst_63 = arith.constant 0.000000e+00 : f32
    %78 = vector.broadcast %cst_63 : f32 to vector<8x16xf32>
    %79 = arith.maximumf %77, %78 : vector<8x16xf32>
    %80 = arith.maximumf %71, %79 : vector<8x16xf32>
    %c0_64 = arith.constant 0 : index
    %c0_65 = arith.constant 0 : index
    %81 = vector.load %arg3[%c0_64, %c0_65] : memref<8x9xbf16, #tpu.memory_space<vmem>>, vector<8x9xbf16>
    %c0_66 = arith.constant 0 : index
    %c9 = arith.constant 9 : index
    %c0_67 = arith.constant 0 : index
    %c0_68 = arith.constant 0 : index
    %82 = vector.load %arg2[%c0_66, %c9, %c0_67, %c0_68] : memref<1x12x9x16xbf16, #tpu.memory_space<vmem>>, vector<1x1x9x16xbf16>
    %83 = vector.shape_cast %82 : vector<1x1x9x16xbf16> to vector<9x16xbf16>
    %cst_69 = arith.constant dense<0.000000e+00> : vector<8x16xf32>
    %84 = tpu.matmul %81, %83, %cst_69 {dimension_numbers = #tpu.dot_dimension_numbers<[1], [0], [0], [1], [0, 0, 1, 1], [], []>} : vector<8x9xbf16>, vector<9x16xbf16>, vector<8x16xf32> -> vector<8x16xf32>
    %85 = vector.broadcast %0 : vector<8x1xf32> to vector<8x16xf32>
    %86 = arith.addf %84, %85 : vector<8x16xf32>
    %cst_70 = arith.constant 0.000000e+00 : f32
    %87 = vector.broadcast %cst_70 : f32 to vector<8x16xf32>
    %88 = arith.maximumf %86, %87 : vector<8x16xf32>
    %89 = arith.maximumf %80, %88 : vector<8x16xf32>
    %c0_71 = arith.constant 0 : index
    %c0_72 = arith.constant 0 : index
    %90 = vector.load %arg3[%c0_71, %c0_72] : memref<8x9xbf16, #tpu.memory_space<vmem>>, vector<8x9xbf16>
    %c0_73 = arith.constant 0 : index
    %c10 = arith.constant 10 : index
    %c0_74 = arith.constant 0 : index
    %c0_75 = arith.constant 0 : index
    %91 = vector.load %arg2[%c0_73, %c10, %c0_74, %c0_75] : memref<1x12x9x16xbf16, #tpu.memory_space<vmem>>, vector<1x1x9x16xbf16>
    %92 = vector.shape_cast %91 : vector<1x1x9x16xbf16> to vector<9x16xbf16>
    %cst_76 = arith.constant dense<0.000000e+00> : vector<8x16xf32>
    %93 = tpu.matmul %90, %92, %cst_76 {dimension_numbers = #tpu.dot_dimension_numbers<[1], [0], [0], [1], [0, 0, 1, 1], [], []>} : vector<8x9xbf16>, vector<9x16xbf16>, vector<8x16xf32> -> vector<8x16xf32>
    %94 = vector.broadcast %0 : vector<8x1xf32> to vector<8x16xf32>
    %95 = arith.addf %93, %94 : vector<8x16xf32>
    %cst_77 = arith.constant 0.000000e+00 : f32
    %96 = vector.broadcast %cst_77 : f32 to vector<8x16xf32>
    %97 = arith.maximumf %95, %96 : vector<8x16xf32>
    %98 = arith.maximumf %89, %97 : vector<8x16xf32>
    %c0_78 = arith.constant 0 : index
    %c0_79 = arith.constant 0 : index
    %99 = vector.load %arg3[%c0_78, %c0_79] : memref<8x9xbf16, #tpu.memory_space<vmem>>, vector<8x9xbf16>
    %c0_80 = arith.constant 0 : index
    %c11 = arith.constant 11 : index
    %c0_81 = arith.constant 0 : index
    %c0_82 = arith.constant 0 : index
    %100 = vector.load %arg2[%c0_80, %c11, %c0_81, %c0_82] : memref<1x12x9x16xbf16, #tpu.memory_space<vmem>>, vector<1x1x9x16xbf16>
    %101 = vector.shape_cast %100 : vector<1x1x9x16xbf16> to vector<9x16xbf16>
    %cst_83 = arith.constant dense<0.000000e+00> : vector<8x16xf32>
    %102 = tpu.matmul %99, %101, %cst_83 {dimension_numbers = #tpu.dot_dimension_numbers<[1], [0], [0], [1], [0, 0, 1, 1], [], []>} : vector<8x9xbf16>, vector<9x16xbf16>, vector<8x16xf32> -> vector<8x16xf32>
    %103 = vector.broadcast %0 : vector<8x1xf32> to vector<8x16xf32>
    %104 = arith.addf %102, %103 : vector<8x16xf32>
    %cst_84 = arith.constant 0.000000e+00 : f32
    %105 = vector.broadcast %cst_84 : f32 to vector<8x16xf32>
    %106 = arith.maximumf %104, %105 : vector<8x16xf32>
    %107 = arith.maximumf %98, %106 : vector<8x16xf32>
    %108 = arith.truncf %107 : vector<8x16xf32> to vector<8x16xbf16>
    %c0_85 = arith.constant 0 : index
    %c0_86 = arith.constant 0 : index
    %c0_87 = arith.constant 0 : index
    %109 = vector.load %arg5[%c0_85, %c0_86, %c0_87] : memref<1x8x16xbf16, #tpu.memory_space<vmem>>, vector<1x8x16xbf16>
    %110 = vector.shape_cast %109 : vector<1x8x16xbf16> to vector<8x16xbf16>
    %111 = vector.shape_cast %108 : vector<8x16xbf16> to vector<1x8x16xbf16>
    tpu.vector_store %arg5[%c0_85, %c0_86, %c0_87], %111 {strides = array<i32>} : memref<1x8x16xbf16, #tpu.memory_space<vmem>>, vector<1x8x16xbf16>,
    return
  }
  func.func @transform_0(%arg0: i32, %arg1: i32) -> (i32, i32, i32, i32) {
    %c0_i32 = arith.constant 0 : i32
    %c0_i32_0 = arith.constant 0 : i32
    %c0_i32_1 = arith.constant 0 : i32
    return %arg0, %c0_i32, %c0_i32_0, %arg1 : i32, i32, i32, i32
  }
  func.func @transform_1(%arg0: i32, %arg1: i32) -> (i32, i32) {
    %c0_i32 = arith.constant 0 : i32
    %c0_i32_0 = arith.constant 0 : i32
    %c0_i32_1 = arith.constant 0 : i32
    return %c0_i32, %c0_i32_0 : i32, i32
  }
  func.func @transform_2(%arg0: i32, %arg1: i32) -> (i32, i32) {
    %c0_i32 = arith.constant 0 : i32
    %c0_i32_0 = arith.constant 0 : i32
    %c0_i32_1 = arith.constant 0 : i32
    return %c0_i32, %c0_i32_0 : i32, i32
  }
  func.func @transform_3(%arg0: i32, %arg1: i32) -> (i32, i32, i32) {
    %c0_i32 = arith.constant 0 : i32
    %c0_i32_0 = arith.constant 0 : i32
    return %arg0, %c0_i32, %arg1 : i32, i32, i32
  }
}

module attributes {stable_mosaic.version = 11 : i64} {
  func.func @_conv_face_kernel(%arg0: i32, %arg1: i32, %arg2: memref<1x40x16xbf16, #tpu.memory_space<vmem>>, %arg3: memref<1x3x40x16xbf16, #tpu.memory_space<vmem>>, %arg4: memref<128x40xbf16, #tpu.memory_space<vmem>>, %arg5: memref<128x1xf32, #tpu.memory_space<vmem>>, %arg6: memref<1x128x16xbf16, #tpu.memory_space<vmem>>) attributes {dimension_semantics = [#tpu.dimension_semantics<parallel>, #tpu.dimension_semantics<parallel>], iteration_bounds = array<i64: 2, 1>, scalar_prefetch = 0 : i64, scratch_operands = 0 : i64, tpu.core_type = #tpu.core_type<tc>, window_params = [{transform_indices = @transform_0, window_bounds = array<i64: 1, 40, 16>}, {transform_indices = @transform_1, window_bounds = array<i64: 1, 3, 40, 16>}, {pipeline_mode = #tpu.pipeline_mode<synchronous>, transform_indices = @transform_2, window_bounds = array<i64: 128, 40>}, {pipeline_mode = #tpu.pipeline_mode<synchronous>, transform_indices = @transform_3, window_bounds = array<i64: 128, 1>}, {transform_indices = @transform_4, window_bounds = array<i64: 1, 128, 16>}]} {
    %c0 = arith.constant 0 : index
    %c0_0 = arith.constant 0 : index
    %c0_1 = arith.constant 0 : index
    %0 = vector.load %arg2[%c0, %c0_0, %c0_1] : memref<1x40x16xbf16, #tpu.memory_space<vmem>>, vector<1x40x16xbf16>
    %1 = vector.shape_cast %0 : vector<1x40x16xbf16> to vector<40x16xbf16>
    %2 = arith.extf %1 : vector<40x16xbf16> to vector<40x16xf32>
    %c0_2 = arith.constant 0 : index
    %c0_3 = arith.constant 0 : index
    %c0_4 = arith.constant 0 : index
    %c0_5 = arith.constant 0 : index
    %3 = vector.load %arg3[%c0_2, %c0_3, %c0_4, %c0_5] : memref<1x3x40x16xbf16, #tpu.memory_space<vmem>>, vector<1x1x40x16xbf16>
    %4 = vector.shape_cast %3 : vector<1x1x40x16xbf16> to vector<40x16xbf16>
    %5 = arith.extf %4 : vector<40x16xbf16> to vector<40x16xf32>
    %6 = arith.addf %2, %5 : vector<40x16xf32>
    %c0_6 = arith.constant 0 : index
    %c1 = arith.constant 1 : index
    %c0_7 = arith.constant 0 : index
    %c0_8 = arith.constant 0 : index
    %7 = vector.load %arg3[%c0_6, %c1, %c0_7, %c0_8] : memref<1x3x40x16xbf16, #tpu.memory_space<vmem>>, vector<1x1x40x16xbf16>
    %8 = vector.shape_cast %7 : vector<1x1x40x16xbf16> to vector<40x16xbf16>
    %9 = arith.extf %8 : vector<40x16xbf16> to vector<40x16xf32>
    %10 = arith.addf %6, %9 : vector<40x16xf32>
    %c0_9 = arith.constant 0 : index
    %c2 = arith.constant 2 : index
    %c0_10 = arith.constant 0 : index
    %c0_11 = arith.constant 0 : index
    %11 = vector.load %arg3[%c0_9, %c2, %c0_10, %c0_11] : memref<1x3x40x16xbf16, #tpu.memory_space<vmem>>, vector<1x1x40x16xbf16>
    %12 = vector.shape_cast %11 : vector<1x1x40x16xbf16> to vector<40x16xbf16>
    %13 = arith.extf %12 : vector<40x16xbf16> to vector<40x16xf32>
    %14 = arith.addf %10, %13 : vector<40x16xf32>
    %c0_12 = arith.constant 0 : index
    %c0_13 = arith.constant 0 : index
    %15 = vector.load %arg4[%c0_12, %c0_13] : memref<128x40xbf16, #tpu.memory_space<vmem>>, vector<128x40xbf16>
    %16 = arith.truncf %14 : vector<40x16xf32> to vector<40x16xbf16>
    %cst = arith.constant dense<0.000000e+00> : vector<128x16xf32>
    %17 = tpu.matmul %15, %16, %cst {dimension_numbers = #tpu.dot_dimension_numbers<[1], [0], [0], [1], [0, 0, 1, 1], [], []>} : vector<128x40xbf16>, vector<40x16xbf16>, vector<128x16xf32> -> vector<128x16xf32>
    %c0_14 = arith.constant 0 : index
    %c0_15 = arith.constant 0 : index
    %18 = vector.load %arg5[%c0_14, %c0_15] : memref<128x1xf32, #tpu.memory_space<vmem>>, vector<128x1xf32>
    %19 = vector.broadcast %18 : vector<128x1xf32> to vector<128x16xf32>
    %20 = arith.addf %17, %19 : vector<128x16xf32>
    %cst_16 = arith.constant 0.000000e+00 : f32
    %21 = vector.broadcast %cst_16 : f32 to vector<128x16xf32>
    %22 = arith.maximumf %20, %21 : vector<128x16xf32>
    %23 = arith.truncf %22 : vector<128x16xf32> to vector<128x16xbf16>
    %c0_17 = arith.constant 0 : index
    %c0_18 = arith.constant 0 : index
    %c0_19 = arith.constant 0 : index
    %24 = vector.load %arg6[%c0_17, %c0_18, %c0_19] : memref<1x128x16xbf16, #tpu.memory_space<vmem>>, vector<1x128x16xbf16>
    %25 = vector.shape_cast %24 : vector<1x128x16xbf16> to vector<128x16xbf16>
    %26 = vector.shape_cast %23 : vector<128x16xbf16> to vector<1x128x16xbf16>
    tpu.vector_store %arg6[%c0_17, %c0_18, %c0_19], %26 {strides = array<i32>} : memref<1x128x16xbf16, #tpu.memory_space<vmem>>, vector<1x128x16xbf16>,
    return
  }
  func.func @transform_0(%arg0: i32, %arg1: i32) -> (i32, i32, i32) {
    %c0_i32 = arith.constant 0 : i32
    %c0_i32_0 = arith.constant 0 : i32
    return %arg0, %c0_i32, %arg1 : i32, i32, i32
  }
  func.func @transform_1(%arg0: i32, %arg1: i32) -> (i32, i32, i32, i32) {
    %c0_i32 = arith.constant 0 : i32
    %c0_i32_0 = arith.constant 0 : i32
    %c0_i32_1 = arith.constant 0 : i32
    return %arg0, %c0_i32, %c0_i32_0, %arg1 : i32, i32, i32, i32
  }
  func.func @transform_2(%arg0: i32, %arg1: i32) -> (i32, i32) {
    %c0_i32 = arith.constant 0 : i32
    %c0_i32_0 = arith.constant 0 : i32
    %c0_i32_1 = arith.constant 0 : i32
    return %c0_i32, %c0_i32_0 : i32, i32
  }
  func.func @transform_3(%arg0: i32, %arg1: i32) -> (i32, i32) {
    %c0_i32 = arith.constant 0 : i32
    %c0_i32_0 = arith.constant 0 : i32
    %c0_i32_1 = arith.constant 0 : i32
    return %c0_i32, %c0_i32_0 : i32, i32
  }
  func.func @transform_4(%arg0: i32, %arg1: i32) -> (i32, i32, i32) {
    %c0_i32 = arith.constant 0 : i32
    %c0_i32_0 = arith.constant 0 : i32
    return %arg0, %c0_i32, %arg1 : i32, i32, i32
  }
}

module attributes {stable_mosaic.version = 11 : i64} {
  func.func @_conv_face_kernel(%arg0: i32, %arg1: i32, %arg2: memref<1x128x16xbf16, #tpu.memory_space<vmem>>, %arg3: memref<1x3x128x16xbf16, #tpu.memory_space<vmem>>, %arg4: memref<8x128xbf16, #tpu.memory_space<vmem>>, %arg5: memref<8x1xf32, #tpu.memory_space<vmem>>, %arg6: memref<1x8x16xbf16, #tpu.memory_space<vmem>>) attributes {dimension_semantics = [#tpu.dimension_semantics<parallel>, #tpu.dimension_semantics<parallel>], iteration_bounds = array<i64: 2, 1>, scalar_prefetch = 0 : i64, scratch_operands = 0 : i64, tpu.core_type = #tpu.core_type<tc>, window_params = [{transform_indices = @transform_0, window_bounds = array<i64: 1, 128, 16>}, {transform_indices = @transform_1, window_bounds = array<i64: 1, 3, 128, 16>}, {pipeline_mode = #tpu.pipeline_mode<synchronous>, transform_indices = @transform_2, window_bounds = array<i64: 8, 128>}, {pipeline_mode = #tpu.pipeline_mode<synchronous>, transform_indices = @transform_3, window_bounds = array<i64: 8, 1>}, {transform_indices = @transform_4, window_bounds = array<i64: 1, 8, 16>}]} {
    %c0 = arith.constant 0 : index
    %c0_0 = arith.constant 0 : index
    %c0_1 = arith.constant 0 : index
    %0 = vector.load %arg2[%c0, %c0_0, %c0_1] : memref<1x128x16xbf16, #tpu.memory_space<vmem>>, vector<1x128x16xbf16>
    %1 = vector.shape_cast %0 : vector<1x128x16xbf16> to vector<128x16xbf16>
    %2 = arith.extf %1 : vector<128x16xbf16> to vector<128x16xf32>
    %c0_2 = arith.constant 0 : index
    %c0_3 = arith.constant 0 : index
    %c0_4 = arith.constant 0 : index
    %c0_5 = arith.constant 0 : index
    %3 = vector.load %arg3[%c0_2, %c0_3, %c0_4, %c0_5] : memref<1x3x128x16xbf16, #tpu.memory_space<vmem>>, vector<1x1x128x16xbf16>
    %4 = vector.shape_cast %3 : vector<1x1x128x16xbf16> to vector<128x16xbf16>
    %5 = arith.extf %4 : vector<128x16xbf16> to vector<128x16xf32>
    %6 = arith.addf %2, %5 : vector<128x16xf32>
    %c0_6 = arith.constant 0 : index
    %c1 = arith.constant 1 : index
    %c0_7 = arith.constant 0 : index
    %c0_8 = arith.constant 0 : index
    %7 = vector.load %arg3[%c0_6, %c1, %c0_7, %c0_8] : memref<1x3x128x16xbf16, #tpu.memory_space<vmem>>, vector<1x1x128x16xbf16>
    %8 = vector.shape_cast %7 : vector<1x1x128x16xbf16> to vector<128x16xbf16>
    %9 = arith.extf %8 : vector<128x16xbf16> to vector<128x16xf32>
    %10 = arith.addf %6, %9 : vector<128x16xf32>
    %c0_9 = arith.constant 0 : index
    %c2 = arith.constant 2 : index
    %c0_10 = arith.constant 0 : index
    %c0_11 = arith.constant 0 : index
    %11 = vector.load %arg3[%c0_9, %c2, %c0_10, %c0_11] : memref<1x3x128x16xbf16, #tpu.memory_space<vmem>>, vector<1x1x128x16xbf16>
    %12 = vector.shape_cast %11 : vector<1x1x128x16xbf16> to vector<128x16xbf16>
    %13 = arith.extf %12 : vector<128x16xbf16> to vector<128x16xf32>
    %14 = arith.addf %10, %13 : vector<128x16xf32>
    %c0_12 = arith.constant 0 : index
    %c0_13 = arith.constant 0 : index
    %15 = vector.load %arg4[%c0_12, %c0_13] : memref<8x128xbf16, #tpu.memory_space<vmem>>, vector<8x128xbf16>
    %16 = arith.truncf %14 : vector<128x16xf32> to vector<128x16xbf16>
    %cst = arith.constant dense<0.000000e+00> : vector<8x16xf32>
    %17 = tpu.matmul %15, %16, %cst {dimension_numbers = #tpu.dot_dimension_numbers<[1], [0], [0], [1], [0, 0, 1, 1], [], []>} : vector<8x128xbf16>, vector<128x16xbf16>, vector<8x16xf32> -> vector<8x16xf32>
    %c0_14 = arith.constant 0 : index
    %c0_15 = arith.constant 0 : index
    %18 = vector.load %arg5[%c0_14, %c0_15] : memref<8x1xf32, #tpu.memory_space<vmem>>, vector<8x1xf32>
    %19 = vector.broadcast %18 : vector<8x1xf32> to vector<8x16xf32>
    %20 = arith.addf %17, %19 : vector<8x16xf32>
    %cst_16 = arith.constant 0.000000e+00 : f32
    %21 = vector.broadcast %cst_16 : f32 to vector<8x16xf32>
    %22 = arith.maximumf %20, %21 : vector<8x16xf32>
    %23 = arith.truncf %22 : vector<8x16xf32> to vector<8x16xbf16>
    %c0_17 = arith.constant 0 : index
    %c0_18 = arith.constant 0 : index
    %c0_19 = arith.constant 0 : index
    %24 = vector.load %arg6[%c0_17, %c0_18, %c0_19] : memref<1x8x16xbf16, #tpu.memory_space<vmem>>, vector<1x8x16xbf16>
    %25 = vector.shape_cast %24 : vector<1x8x16xbf16> to vector<8x16xbf16>
    %26 = vector.shape_cast %23 : vector<8x16xbf16> to vector<1x8x16xbf16>
    tpu.vector_store %arg6[%c0_17, %c0_18, %c0_19], %26 {strides = array<i32>} : memref<1x8x16xbf16, #tpu.memory_space<vmem>>, vector<1x8x16xbf16>,
    return
  }
  func.func @transform_0(%arg0: i32, %arg1: i32) -> (i32, i32, i32) {
    %c0_i32 = arith.constant 0 : i32
    %c0_i32_0 = arith.constant 0 : i32
    return %arg0, %c0_i32, %arg1 : i32, i32, i32
  }
  func.func @transform_1(%arg0: i32, %arg1: i32) -> (i32, i32, i32, i32) {
    %c0_i32 = arith.constant 0 : i32
    %c0_i32_0 = arith.constant 0 : i32
    %c0_i32_1 = arith.constant 0 : i32
    return %arg0, %c0_i32, %c0_i32_0, %arg1 : i32, i32, i32, i32
  }
  func.func @transform_2(%arg0: i32, %arg1: i32) -> (i32, i32) {
    %c0_i32 = arith.constant 0 : i32
    %c0_i32_0 = arith.constant 0 : i32
    %c0_i32_1 = arith.constant 0 : i32
    return %c0_i32, %c0_i32_0 : i32, i32
  }
  func.func @transform_3(%arg0: i32, %arg1: i32) -> (i32, i32) {
    %c0_i32 = arith.constant 0 : i32
    %c0_i32_0 = arith.constant 0 : i32
    %c0_i32_1 = arith.constant 0 : i32
    return %c0_i32, %c0_i32_0 : i32, i32
  }
  func.func @transform_4(%arg0: i32, %arg1: i32) -> (i32, i32, i32) {
    %c0_i32 = arith.constant 0 : i32
    %c0_i32_0 = arith.constant 0 : i32
    return %arg0, %c0_i32, %arg1 : i32, i32, i32
  }
}

module attributes {stable_mosaic.version = 11 : i64} {
  func.func @_maxpool_face_kernel(%arg0: i32, %arg1: i32, %arg2: memref<1x48x16xbf16, #tpu.memory_space<vmem>>, %arg3: memref<1x3x48x16xbf16, #tpu.memory_space<vmem>>, %arg4: memref<1x48x16xbf16, #tpu.memory_space<vmem>>) attributes {dimension_semantics = [#tpu.dimension_semantics<parallel>, #tpu.dimension_semantics<parallel>], iteration_bounds = array<i64: 2, 1>, scalar_prefetch = 0 : i64, scratch_operands = 0 : i64, tpu.core_type = #tpu.core_type<tc>, window_params = [{transform_indices = @transform_0, window_bounds = array<i64: 1, 48, 16>}, {transform_indices = @transform_1, window_bounds = array<i64: 1, 3, 48, 16>}, {transform_indices = @transform_2, window_bounds = array<i64: 1, 48, 16>}]} {
    %c0 = arith.constant 0 : index
    %c0_0 = arith.constant 0 : index
    %c0_1 = arith.constant 0 : index
    %0 = vector.load %arg2[%c0, %c0_0, %c0_1] : memref<1x48x16xbf16, #tpu.memory_space<vmem>>, vector<1x48x16xbf16>
    %1 = vector.shape_cast %0 : vector<1x48x16xbf16> to vector<48x16xbf16>
    %2 = arith.extf %1 : vector<48x16xbf16> to vector<48x16xf32>
    %c0_2 = arith.constant 0 : index
    %c0_3 = arith.constant 0 : index
    %c0_4 = arith.constant 0 : index
    %c0_5 = arith.constant 0 : index
    %3 = vector.load %arg3[%c0_2, %c0_3, %c0_4, %c0_5] : memref<1x3x48x16xbf16, #tpu.memory_space<vmem>>, vector<1x1x48x16xbf16>
    %4 = vector.shape_cast %3 : vector<1x1x48x16xbf16> to vector<48x16xbf16>
    %5 = arith.extf %4 : vector<48x16xbf16> to vector<48x16xf32>
    %6 = arith.maximumf %2, %5 : vector<48x16xf32>
    %c0_6 = arith.constant 0 : index
    %c1 = arith.constant 1 : index
    %c0_7 = arith.constant 0 : index
    %c0_8 = arith.constant 0 : index
    %7 = vector.load %arg3[%c0_6, %c1, %c0_7, %c0_8] : memref<1x3x48x16xbf16, #tpu.memory_space<vmem>>, vector<1x1x48x16xbf16>
    %8 = vector.shape_cast %7 : vector<1x1x48x16xbf16> to vector<48x16xbf16>
    %9 = arith.extf %8 : vector<48x16xbf16> to vector<48x16xf32>
    %10 = arith.maximumf %6, %9 : vector<48x16xf32>
    %c0_9 = arith.constant 0 : index
    %c2 = arith.constant 2 : index
    %c0_10 = arith.constant 0 : index
    %c0_11 = arith.constant 0 : index
    %11 = vector.load %arg3[%c0_9, %c2, %c0_10, %c0_11] : memref<1x3x48x16xbf16, #tpu.memory_space<vmem>>, vector<1x1x48x16xbf16>
    %12 = vector.shape_cast %11 : vector<1x1x48x16xbf16> to vector<48x16xbf16>
    %13 = arith.extf %12 : vector<48x16xbf16> to vector<48x16xf32>
    %14 = arith.maximumf %10, %13 : vector<48x16xf32>
    %15 = arith.truncf %14 : vector<48x16xf32> to vector<48x16xbf16>
    %c0_12 = arith.constant 0 : index
    %c0_13 = arith.constant 0 : index
    %c0_14 = arith.constant 0 : index
    %16 = vector.load %arg4[%c0_12, %c0_13, %c0_14] : memref<1x48x16xbf16, #tpu.memory_space<vmem>>, vector<1x48x16xbf16>
    %17 = vector.shape_cast %16 : vector<1x48x16xbf16> to vector<48x16xbf16>
    %18 = vector.shape_cast %15 : vector<48x16xbf16> to vector<1x48x16xbf16>
    tpu.vector_store %arg4[%c0_12, %c0_13, %c0_14], %18 {strides = array<i32>} : memref<1x48x16xbf16, #tpu.memory_space<vmem>>, vector<1x48x16xbf16>,
    return
  }
  func.func @transform_0(%arg0: i32, %arg1: i32) -> (i32, i32, i32) {
    %c0_i32 = arith.constant 0 : i32
    %c0_i32_0 = arith.constant 0 : i32
    return %arg0, %c0_i32, %arg1 : i32, i32, i32
  }
  func.func @transform_1(%arg0: i32, %arg1: i32) -> (i32, i32, i32, i32) {
    %c0_i32 = arith.constant 0 : i32
    %c0_i32_0 = arith.constant 0 : i32
    %c0_i32_1 = arith.constant 0 : i32
    return %arg0, %c0_i32, %c0_i32_0, %arg1 : i32, i32, i32, i32
  }
  func.func @transform_2(%arg0: i32, %arg1: i32) -> (i32, i32, i32) {
    %c0_i32 = arith.constant 0 : i32
    %c0_i32_0 = arith.constant 0 : i32
    return %arg0, %c0_i32, %arg1 : i32, i32, i32
  }
}

module attributes {stable_mosaic.version = 11 : i64} {
  func.func @_conv_face_kernel(%arg0: i32, %arg1: i32, %arg2: memref<1x48x8xbf16, #tpu.memory_space<vmem>>, %arg3: memref<1x6x48x8xbf16, #tpu.memory_space<vmem>>, %arg4: memref<128x48xbf16, #tpu.memory_space<vmem>>, %arg5: memref<128x1xf32, #tpu.memory_space<vmem>>, %arg6: memref<1x128x8xbf16, #tpu.memory_space<vmem>>) attributes {dimension_semantics = [#tpu.dimension_semantics<parallel>, #tpu.dimension_semantics<parallel>], iteration_bounds = array<i64: 2, 1>, scalar_prefetch = 0 : i64, scratch_operands = 0 : i64, tpu.core_type = #tpu.core_type<tc>, window_params = [{transform_indices = @transform_0, window_bounds = array<i64: 1, 48, 8>}, {transform_indices = @transform_1, window_bounds = array<i64: 1, 6, 48, 8>}, {pipeline_mode = #tpu.pipeline_mode<synchronous>, transform_indices = @transform_2, window_bounds = array<i64: 128, 48>}, {pipeline_mode = #tpu.pipeline_mode<synchronous>, transform_indices = @transform_3, window_bounds = array<i64: 128, 1>}, {transform_indices = @transform_4, window_bounds = array<i64: 1, 128, 8>}]} {
    %c0 = arith.constant 0 : index
    %c0_0 = arith.constant 0 : index
    %c0_1 = arith.constant 0 : index
    %0 = vector.load %arg2[%c0, %c0_0, %c0_1] : memref<1x48x8xbf16, #tpu.memory_space<vmem>>, vector<1x48x8xbf16>
    %1 = vector.shape_cast %0 : vector<1x48x8xbf16> to vector<48x8xbf16>
    %2 = arith.extf %1 : vector<48x8xbf16> to vector<48x8xf32>
    %c0_2 = arith.constant 0 : index
    %c0_3 = arith.constant 0 : index
    %c0_4 = arith.constant 0 : index
    %c0_5 = arith.constant 0 : index
    %3 = vector.load %arg3[%c0_2, %c0_3, %c0_4, %c0_5] : memref<1x6x48x8xbf16, #tpu.memory_space<vmem>>, vector<1x1x48x8xbf16>
    %4 = vector.shape_cast %3 : vector<1x1x48x8xbf16> to vector<48x8xbf16>
    %5 = arith.extf %4 : vector<48x8xbf16> to vector<48x8xf32>
    %6 = arith.addf %2, %5 : vector<48x8xf32>
    %c0_6 = arith.constant 0 : index
    %c1 = arith.constant 1 : index
    %c0_7 = arith.constant 0 : index
    %c0_8 = arith.constant 0 : index
    %7 = vector.load %arg3[%c0_6, %c1, %c0_7, %c0_8] : memref<1x6x48x8xbf16, #tpu.memory_space<vmem>>, vector<1x1x48x8xbf16>
    %8 = vector.shape_cast %7 : vector<1x1x48x8xbf16> to vector<48x8xbf16>
    %9 = arith.extf %8 : vector<48x8xbf16> to vector<48x8xf32>
    %10 = arith.addf %6, %9 : vector<48x8xf32>
    %c0_9 = arith.constant 0 : index
    %c2 = arith.constant 2 : index
    %c0_10 = arith.constant 0 : index
    %c0_11 = arith.constant 0 : index
    %11 = vector.load %arg3[%c0_9, %c2, %c0_10, %c0_11] : memref<1x6x48x8xbf16, #tpu.memory_space<vmem>>, vector<1x1x48x8xbf16>
    %12 = vector.shape_cast %11 : vector<1x1x48x8xbf16> to vector<48x8xbf16>
    %13 = arith.extf %12 : vector<48x8xbf16> to vector<48x8xf32>
    %14 = arith.addf %10, %13 : vector<48x8xf32>
    %c0_12 = arith.constant 0 : index
    %c3 = arith.constant 3 : index
    %c0_13 = arith.constant 0 : index
    %c0_14 = arith.constant 0 : index
    %15 = vector.load %arg3[%c0_12, %c3, %c0_13, %c0_14] : memref<1x6x48x8xbf16, #tpu.memory_space<vmem>>, vector<1x1x48x8xbf16>
    %16 = vector.shape_cast %15 : vector<1x1x48x8xbf16> to vector<48x8xbf16>
    %17 = arith.extf %16 : vector<48x8xbf16> to vector<48x8xf32>
    %18 = arith.addf %14, %17 : vector<48x8xf32>
    %c0_15 = arith.constant 0 : index
    %c4 = arith.constant 4 : index
    %c0_16 = arith.constant 0 : index
    %c0_17 = arith.constant 0 : index
    %19 = vector.load %arg3[%c0_15, %c4, %c0_16, %c0_17] : memref<1x6x48x8xbf16, #tpu.memory_space<vmem>>, vector<1x1x48x8xbf16>
    %20 = vector.shape_cast %19 : vector<1x1x48x8xbf16> to vector<48x8xbf16>
    %21 = arith.extf %20 : vector<48x8xbf16> to vector<48x8xf32>
    %22 = arith.addf %18, %21 : vector<48x8xf32>
    %c0_18 = arith.constant 0 : index
    %c5 = arith.constant 5 : index
    %c0_19 = arith.constant 0 : index
    %c0_20 = arith.constant 0 : index
    %23 = vector.load %arg3[%c0_18, %c5, %c0_19, %c0_20] : memref<1x6x48x8xbf16, #tpu.memory_space<vmem>>, vector<1x1x48x8xbf16>
    %24 = vector.shape_cast %23 : vector<1x1x48x8xbf16> to vector<48x8xbf16>
    %25 = arith.extf %24 : vector<48x8xbf16> to vector<48x8xf32>
    %26 = arith.addf %22, %25 : vector<48x8xf32>
    %c0_21 = arith.constant 0 : index
    %c0_22 = arith.constant 0 : index
    %27 = vector.load %arg4[%c0_21, %c0_22] : memref<128x48xbf16, #tpu.memory_space<vmem>>, vector<128x48xbf16>
    %28 = arith.truncf %26 : vector<48x8xf32> to vector<48x8xbf16>
    %cst = arith.constant dense<0.000000e+00> : vector<128x8xf32>
    %29 = tpu.matmul %27, %28, %cst {dimension_numbers = #tpu.dot_dimension_numbers<[1], [0], [0], [1], [0, 0, 1, 1], [], []>} : vector<128x48xbf16>, vector<48x8xbf16>, vector<128x8xf32> -> vector<128x8xf32>
    %c0_23 = arith.constant 0 : index
    %c0_24 = arith.constant 0 : index
    %30 = vector.load %arg5[%c0_23, %c0_24] : memref<128x1xf32, #tpu.memory_space<vmem>>, vector<128x1xf32>
    %31 = vector.broadcast %30 : vector<128x1xf32> to vector<128x8xf32>
    %32 = arith.addf %29, %31 : vector<128x8xf32>
    %cst_25 = arith.constant 0.000000e+00 : f32
    %33 = vector.broadcast %cst_25 : f32 to vector<128x8xf32>
    %34 = arith.maximumf %32, %33 : vector<128x8xf32>
    %35 = arith.truncf %34 : vector<128x8xf32> to vector<128x8xbf16>
    %c0_26 = arith.constant 0 : index
    %c0_27 = arith.constant 0 : index
    %c0_28 = arith.constant 0 : index
    %36 = vector.load %arg6[%c0_26, %c0_27, %c0_28] : memref<1x128x8xbf16, #tpu.memory_space<vmem>>, vector<1x128x8xbf16>
    %37 = vector.shape_cast %36 : vector<1x128x8xbf16> to vector<128x8xbf16>
    %38 = vector.shape_cast %35 : vector<128x8xbf16> to vector<1x128x8xbf16>
    tpu.vector_store %arg6[%c0_26, %c0_27, %c0_28], %38 {strides = array<i32>} : memref<1x128x8xbf16, #tpu.memory_space<vmem>>, vector<1x128x8xbf16>,
    return
  }
  func.func @transform_0(%arg0: i32, %arg1: i32) -> (i32, i32, i32) {
    %c0_i32 = arith.constant 0 : i32
    %c0_i32_0 = arith.constant 0 : i32
    return %arg0, %c0_i32, %arg1 : i32, i32, i32
  }
  func.func @transform_1(%arg0: i32, %arg1: i32) -> (i32, i32, i32, i32) {
    %c0_i32 = arith.constant 0 : i32
    %c0_i32_0 = arith.constant 0 : i32
    %c0_i32_1 = arith.constant 0 : i32
    return %arg0, %c0_i32, %c0_i32_0, %arg1 : i32, i32, i32, i32
  }
  func.func @transform_2(%arg0: i32, %arg1: i32) -> (i32, i32) {
    %c0_i32 = arith.constant 0 : i32
    %c0_i32_0 = arith.constant 0 : i32
    %c0_i32_1 = arith.constant 0 : i32
    return %c0_i32, %c0_i32_0 : i32, i32
  }
  func.func @transform_3(%arg0: i32, %arg1: i32) -> (i32, i32) {
    %c0_i32 = arith.constant 0 : i32
    %c0_i32_0 = arith.constant 0 : i32
    %c0_i32_1 = arith.constant 0 : i32
    return %c0_i32, %c0_i32_0 : i32, i32
  }
  func.func @transform_4(%arg0: i32, %arg1: i32) -> (i32, i32, i32) {
    %c0_i32 = arith.constant 0 : i32
    %c0_i32_0 = arith.constant 0 : i32
    return %arg0, %c0_i32, %arg1 : i32, i32, i32
  }
}

module attributes {stable_mosaic.version = 11 : i64} {
  func.func @_conv_face_kernel(%arg0: i32, %arg1: i32, %arg2: memref<1x128x8xbf16, #tpu.memory_space<vmem>>, %arg3: memref<1x6x128x8xbf16, #tpu.memory_space<vmem>>, %arg4: memref<8x128xbf16, #tpu.memory_space<vmem>>, %arg5: memref<8x1xf32, #tpu.memory_space<vmem>>, %arg6: memref<1x8x8xbf16, #tpu.memory_space<vmem>>) attributes {dimension_semantics = [#tpu.dimension_semantics<parallel>, #tpu.dimension_semantics<parallel>], iteration_bounds = array<i64: 2, 1>, scalar_prefetch = 0 : i64, scratch_operands = 0 : i64, tpu.core_type = #tpu.core_type<tc>, window_params = [{transform_indices = @transform_0, window_bounds = array<i64: 1, 128, 8>}, {transform_indices = @transform_1, window_bounds = array<i64: 1, 6, 128, 8>}, {pipeline_mode = #tpu.pipeline_mode<synchronous>, transform_indices = @transform_2, window_bounds = array<i64: 8, 128>}, {pipeline_mode = #tpu.pipeline_mode<synchronous>, transform_indices = @transform_3, window_bounds = array<i64: 8, 1>}, {transform_indices = @transform_4, window_bounds = array<i64: 1, 8, 8>}]} {
    %c0 = arith.constant 0 : index
    %c0_0 = arith.constant 0 : index
    %c0_1 = arith.constant 0 : index
    %0 = vector.load %arg2[%c0, %c0_0, %c0_1] : memref<1x128x8xbf16, #tpu.memory_space<vmem>>, vector<1x128x8xbf16>
    %1 = vector.shape_cast %0 : vector<1x128x8xbf16> to vector<128x8xbf16>
    %2 = arith.extf %1 : vector<128x8xbf16> to vector<128x8xf32>
    %c0_2 = arith.constant 0 : index
    %c0_3 = arith.constant 0 : index
    %c0_4 = arith.constant 0 : index
    %c0_5 = arith.constant 0 : index
    %3 = vector.load %arg3[%c0_2, %c0_3, %c0_4, %c0_5] : memref<1x6x128x8xbf16, #tpu.memory_space<vmem>>, vector<1x1x128x8xbf16>
    %4 = vector.shape_cast %3 : vector<1x1x128x8xbf16> to vector<128x8xbf16>
    %5 = arith.extf %4 : vector<128x8xbf16> to vector<128x8xf32>
    %6 = arith.addf %2, %5 : vector<128x8xf32>
    %c0_6 = arith.constant 0 : index
    %c1 = arith.constant 1 : index
    %c0_7 = arith.constant 0 : index
    %c0_8 = arith.constant 0 : index
    %7 = vector.load %arg3[%c0_6, %c1, %c0_7, %c0_8] : memref<1x6x128x8xbf16, #tpu.memory_space<vmem>>, vector<1x1x128x8xbf16>
    %8 = vector.shape_cast %7 : vector<1x1x128x8xbf16> to vector<128x8xbf16>
    %9 = arith.extf %8 : vector<128x8xbf16> to vector<128x8xf32>
    %10 = arith.addf %6, %9 : vector<128x8xf32>
    %c0_9 = arith.constant 0 : index
    %c2 = arith.constant 2 : index
    %c0_10 = arith.constant 0 : index
    %c0_11 = arith.constant 0 : index
    %11 = vector.load %arg3[%c0_9, %c2, %c0_10, %c0_11] : memref<1x6x128x8xbf16, #tpu.memory_space<vmem>>, vector<1x1x128x8xbf16>
    %12 = vector.shape_cast %11 : vector<1x1x128x8xbf16> to vector<128x8xbf16>
    %13 = arith.extf %12 : vector<128x8xbf16> to vector<128x8xf32>
    %14 = arith.addf %10, %13 : vector<128x8xf32>
    %c0_12 = arith.constant 0 : index
    %c3 = arith.constant 3 : index
    %c0_13 = arith.constant 0 : index
    %c0_14 = arith.constant 0 : index
    %15 = vector.load %arg3[%c0_12, %c3, %c0_13, %c0_14] : memref<1x6x128x8xbf16, #tpu.memory_space<vmem>>, vector<1x1x128x8xbf16>
    %16 = vector.shape_cast %15 : vector<1x1x128x8xbf16> to vector<128x8xbf16>
    %17 = arith.extf %16 : vector<128x8xbf16> to vector<128x8xf32>
    %18 = arith.addf %14, %17 : vector<128x8xf32>
    %c0_15 = arith.constant 0 : index
    %c4 = arith.constant 4 : index
    %c0_16 = arith.constant 0 : index
    %c0_17 = arith.constant 0 : index
    %19 = vector.load %arg3[%c0_15, %c4, %c0_16, %c0_17] : memref<1x6x128x8xbf16, #tpu.memory_space<vmem>>, vector<1x1x128x8xbf16>
    %20 = vector.shape_cast %19 : vector<1x1x128x8xbf16> to vector<128x8xbf16>
    %21 = arith.extf %20 : vector<128x8xbf16> to vector<128x8xf32>
    %22 = arith.addf %18, %21 : vector<128x8xf32>
    %c0_18 = arith.constant 0 : index
    %c5 = arith.constant 5 : index
    %c0_19 = arith.constant 0 : index
    %c0_20 = arith.constant 0 : index
    %23 = vector.load %arg3[%c0_18, %c5, %c0_19, %c0_20] : memref<1x6x128x8xbf16, #tpu.memory_space<vmem>>, vector<1x1x128x8xbf16>
    %24 = vector.shape_cast %23 : vector<1x1x128x8xbf16> to vector<128x8xbf16>
    %25 = arith.extf %24 : vector<128x8xbf16> to vector<128x8xf32>
    %26 = arith.addf %22, %25 : vector<128x8xf32>
    %c0_21 = arith.constant 0 : index
    %c0_22 = arith.constant 0 : index
    %27 = vector.load %arg4[%c0_21, %c0_22] : memref<8x128xbf16, #tpu.memory_space<vmem>>, vector<8x128xbf16>
    %28 = arith.truncf %26 : vector<128x8xf32> to vector<128x8xbf16>
    %cst = arith.constant dense<0.000000e+00> : vector<8x8xf32>
    %29 = tpu.matmul %27, %28, %cst {dimension_numbers = #tpu.dot_dimension_numbers<[1], [0], [0], [1], [0, 0, 1, 1], [], []>} : vector<8x128xbf16>, vector<128x8xbf16>, vector<8x8xf32> -> vector<8x8xf32>
    %c0_23 = arith.constant 0 : index
    %c0_24 = arith.constant 0 : index
    %30 = vector.load %arg5[%c0_23, %c0_24] : memref<8x1xf32, #tpu.memory_space<vmem>>, vector<8x1xf32>
    %31 = vector.broadcast %30 : vector<8x1xf32> to vector<8x8xf32>
    %32 = arith.addf %29, %31 : vector<8x8xf32>
    %cst_25 = arith.constant 0.000000e+00 : f32
    %33 = vector.broadcast %cst_25 : f32 to vector<8x8xf32>
    %34 = arith.maximumf %32, %33 : vector<8x8xf32>
    %35 = arith.truncf %34 : vector<8x8xf32> to vector<8x8xbf16>
    %c0_26 = arith.constant 0 : index
    %c0_27 = arith.constant 0 : index
    %c0_28 = arith.constant 0 : index
    %36 = vector.load %arg6[%c0_26, %c0_27, %c0_28] : memref<1x8x8xbf16, #tpu.memory_space<vmem>>, vector<1x8x8xbf16>
    %37 = vector.shape_cast %36 : vector<1x8x8xbf16> to vector<8x8xbf16>
    %38 = vector.shape_cast %35 : vector<8x8xbf16> to vector<1x8x8xbf16>
    tpu.vector_store %arg6[%c0_26, %c0_27, %c0_28], %38 {strides = array<i32>} : memref<1x8x8xbf16, #tpu.memory_space<vmem>>, vector<1x8x8xbf16>,
    return
  }
  func.func @transform_0(%arg0: i32, %arg1: i32) -> (i32, i32, i32) {
    %c0_i32 = arith.constant 0 : i32
    %c0_i32_0 = arith.constant 0 : i32
    return %arg0, %c0_i32, %arg1 : i32, i32, i32
  }
  func.func @transform_1(%arg0: i32, %arg1: i32) -> (i32, i32, i32, i32) {
    %c0_i32 = arith.constant 0 : i32
    %c0_i32_0 = arith.constant 0 : i32
    %c0_i32_1 = arith.constant 0 : i32
    return %arg0, %c0_i32, %c0_i32_0, %arg1 : i32, i32, i32, i32
  }
  func.func @transform_2(%arg0: i32, %arg1: i32) -> (i32, i32) {
    %c0_i32 = arith.constant 0 : i32
    %c0_i32_0 = arith.constant 0 : i32
    %c0_i32_1 = arith.constant 0 : i32
    return %c0_i32, %c0_i32_0 : i32, i32
  }
  func.func @transform_3(%arg0: i32, %arg1: i32) -> (i32, i32) {
    %c0_i32 = arith.constant 0 : i32
    %c0_i32_0 = arith.constant 0 : i32
    %c0_i32_1 = arith.constant 0 : i32
    return %c0_i32, %c0_i32_0 : i32, i32
  }
  func.func @transform_4(%arg0: i32, %arg1: i32) -> (i32, i32, i32) {
    %c0_i32 = arith.constant 0 : i32
    %c0_i32_0 = arith.constant 0 : i32
    return %arg0, %c0_i32, %arg1 : i32, i32, i32
  }
}

module attributes {stable_mosaic.version = 11 : i64} {
  func.func @_maxpool_face_kernel(%arg0: i32, %arg1: i32, %arg2: memref<1x56x16xbf16, #tpu.memory_space<vmem>>, %arg3: memref<1x6x56x16xbf16, #tpu.memory_space<vmem>>, %arg4: memref<1x56x16xbf16, #tpu.memory_space<vmem>>) attributes {dimension_semantics = [#tpu.dimension_semantics<parallel>, #tpu.dimension_semantics<parallel>], iteration_bounds = array<i64: 2, 1>, scalar_prefetch = 0 : i64, scratch_operands = 0 : i64, tpu.core_type = #tpu.core_type<tc>, window_params = [{transform_indices = @transform_0, window_bounds = array<i64: 1, 56, 16>}, {transform_indices = @transform_1, window_bounds = array<i64: 1, 6, 56, 16>}, {transform_indices = @transform_2, window_bounds = array<i64: 1, 56, 16>}]} {
    %c0 = arith.constant 0 : index
    %c0_0 = arith.constant 0 : index
    %c0_1 = arith.constant 0 : index
    %0 = vector.load %arg2[%c0, %c0_0, %c0_1] : memref<1x56x16xbf16, #tpu.memory_space<vmem>>, vector<1x56x16xbf16>
    %1 = vector.shape_cast %0 : vector<1x56x16xbf16> to vector<56x16xbf16>
    %2 = arith.extf %1 : vector<56x16xbf16> to vector<56x16xf32>
    %c0_2 = arith.constant 0 : index
    %c0_3 = arith.constant 0 : index
    %c0_4 = arith.constant 0 : index
    %c0_5 = arith.constant 0 : index
    %3 = vector.load %arg3[%c0_2, %c0_3, %c0_4, %c0_5] : memref<1x6x56x16xbf16, #tpu.memory_space<vmem>>, vector<1x1x56x16xbf16>
    %4 = vector.shape_cast %3 : vector<1x1x56x16xbf16> to vector<56x16xbf16>
    %5 = arith.extf %4 : vector<56x16xbf16> to vector<56x16xf32>
    %6 = arith.maximumf %2, %5 : vector<56x16xf32>
    %c0_6 = arith.constant 0 : index
    %c1 = arith.constant 1 : index
    %c0_7 = arith.constant 0 : index
    %c0_8 = arith.constant 0 : index
    %7 = vector.load %arg3[%c0_6, %c1, %c0_7, %c0_8] : memref<1x6x56x16xbf16, #tpu.memory_space<vmem>>, vector<1x1x56x16xbf16>
    %8 = vector.shape_cast %7 : vector<1x1x56x16xbf16> to vector<56x16xbf16>
    %9 = arith.extf %8 : vector<56x16xbf16> to vector<56x16xf32>
    %10 = arith.maximumf %6, %9 : vector<56x16xf32>
    %c0_9 = arith.constant 0 : index
    %c2 = arith.constant 2 : index
    %c0_10 = arith.constant 0 : index
    %c0_11 = arith.constant 0 : index
    %11 = vector.load %arg3[%c0_9, %c2, %c0_10, %c0_11] : memref<1x6x56x16xbf16, #tpu.memory_space<vmem>>, vector<1x1x56x16xbf16>
    %12 = vector.shape_cast %11 : vector<1x1x56x16xbf16> to vector<56x16xbf16>
    %13 = arith.extf %12 : vector<56x16xbf16> to vector<56x16xf32>
    %14 = arith.maximumf %10, %13 : vector<56x16xf32>
    %c0_12 = arith.constant 0 : index
    %c3 = arith.constant 3 : index
    %c0_13 = arith.constant 0 : index
    %c0_14 = arith.constant 0 : index
    %15 = vector.load %arg3[%c0_12, %c3, %c0_13, %c0_14] : memref<1x6x56x16xbf16, #tpu.memory_space<vmem>>, vector<1x1x56x16xbf16>
    %16 = vector.shape_cast %15 : vector<1x1x56x16xbf16> to vector<56x16xbf16>
    %17 = arith.extf %16 : vector<56x16xbf16> to vector<56x16xf32>
    %18 = arith.maximumf %14, %17 : vector<56x16xf32>
    %c0_15 = arith.constant 0 : index
    %c4 = arith.constant 4 : index
    %c0_16 = arith.constant 0 : index
    %c0_17 = arith.constant 0 : index
    %19 = vector.load %arg3[%c0_15, %c4, %c0_16, %c0_17] : memref<1x6x56x16xbf16, #tpu.memory_space<vmem>>, vector<1x1x56x16xbf16>
    %20 = vector.shape_cast %19 : vector<1x1x56x16xbf16> to vector<56x16xbf16>
    %21 = arith.extf %20 : vector<56x16xbf16> to vector<56x16xf32>
    %22 = arith.maximumf %18, %21 : vector<56x16xf32>
    %c0_18 = arith.constant 0 : index
    %c5 = arith.constant 5 : index
    %c0_19 = arith.constant 0 : index
    %c0_20 = arith.constant 0 : index
    %23 = vector.load %arg3[%c0_18, %c5, %c0_19, %c0_20] : memref<1x6x56x16xbf16, #tpu.memory_space<vmem>>, vector<1x1x56x16xbf16>
    %24 = vector.shape_cast %23 : vector<1x1x56x16xbf16> to vector<56x16xbf16>
    %25 = arith.extf %24 : vector<56x16xbf16> to vector<56x16xf32>
    %26 = arith.maximumf %22, %25 : vector<56x16xf32>
    %27 = arith.truncf %26 : vector<56x16xf32> to vector<56x16xbf16>
    %c0_21 = arith.constant 0 : index
    %c0_22 = arith.constant 0 : index
    %c0_23 = arith.constant 0 : index
    %28 = vector.load %arg4[%c0_21, %c0_22, %c0_23] : memref<1x56x16xbf16, #tpu.memory_space<vmem>>, vector<1x56x16xbf16>
    %29 = vector.shape_cast %28 : vector<1x56x16xbf16> to vector<56x16xbf16>
    %30 = vector.shape_cast %27 : vector<56x16xbf16> to vector<1x56x16xbf16>
    tpu.vector_store %arg4[%c0_21, %c0_22, %c0_23], %30 {strides = array<i32>} : memref<1x56x16xbf16, #tpu.memory_space<vmem>>, vector<1x56x16xbf16>,
    return
  }
  func.func @transform_0(%arg0: i32, %arg1: i32) -> (i32, i32, i32) {
    %c0_i32 = arith.constant 0 : i32
    %c0_i32_0 = arith.constant 0 : i32
    return %arg0, %c0_i32, %arg1 : i32, i32, i32
  }
  func.func @transform_1(%arg0: i32, %arg1: i32) -> (i32, i32, i32, i32) {
    %c0_i32 = arith.constant 0 : i32
    %c0_i32_0 = arith.constant 0 : i32
    %c0_i32_1 = arith.constant 0 : i32
    return %arg0, %c0_i32, %c0_i32_0, %arg1 : i32, i32, i32, i32
  }
  func.func @transform_2(%arg0: i32, %arg1: i32) -> (i32, i32, i32) {
    %c0_i32 = arith.constant 0 : i32
    %c0_i32_0 = arith.constant 0 : i32
    return %arg0, %c0_i32, %arg1 : i32, i32, i32
  }
}

module attributes {stable_mosaic.version = 11 : i64} {
  func.func @_conv_face_kernel(%arg0: i32, %arg1: i32, %arg2: memref<1x56x4xbf16, #tpu.memory_space<vmem>>, %arg3: memref<1x12x56x4xbf16, #tpu.memory_space<vmem>>, %arg4: memref<128x56xbf16, #tpu.memory_space<vmem>>, %arg5: memref<128x1xf32, #tpu.memory_space<vmem>>, %arg6: memref<1x128x4xbf16, #tpu.memory_space<vmem>>) attributes {dimension_semantics = [#tpu.dimension_semantics<parallel>, #tpu.dimension_semantics<parallel>], iteration_bounds = array<i64: 2, 1>, scalar_prefetch = 0 : i64, scratch_operands = 0 : i64, tpu.core_type = #tpu.core_type<tc>, window_params = [{transform_indices = @transform_0, window_bounds = array<i64: 1, 56, 4>}, {transform_indices = @transform_1, window_bounds = array<i64: 1, 12, 56, 4>}, {pipeline_mode = #tpu.pipeline_mode<synchronous>, transform_indices = @transform_2, window_bounds = array<i64: 128, 56>}, {pipeline_mode = #tpu.pipeline_mode<synchronous>, transform_indices = @transform_3, window_bounds = array<i64: 128, 1>}, {transform_indices = @transform_4, window_bounds = array<i64: 1, 128, 4>}]} {
    %c0 = arith.constant 0 : index
    %c0_0 = arith.constant 0 : index
    %c0_1 = arith.constant 0 : index
    %0 = vector.load %arg2[%c0, %c0_0, %c0_1] : memref<1x56x4xbf16, #tpu.memory_space<vmem>>, vector<1x56x4xbf16>
    %1 = vector.shape_cast %0 : vector<1x56x4xbf16> to vector<56x4xbf16>
    %2 = arith.extf %1 : vector<56x4xbf16> to vector<56x4xf32>
    %c0_2 = arith.constant 0 : index
    %c0_3 = arith.constant 0 : index
    %c0_4 = arith.constant 0 : index
    %c0_5 = arith.constant 0 : index
    %3 = vector.load %arg3[%c0_2, %c0_3, %c0_4, %c0_5] : memref<1x12x56x4xbf16, #tpu.memory_space<vmem>>, vector<1x1x56x4xbf16>
    %4 = vector.shape_cast %3 : vector<1x1x56x4xbf16> to vector<56x4xbf16>
    %5 = arith.extf %4 : vector<56x4xbf16> to vector<56x4xf32>
    %6 = arith.addf %2, %5 : vector<56x4xf32>
    %c0_6 = arith.constant 0 : index
    %c1 = arith.constant 1 : index
    %c0_7 = arith.constant 0 : index
    %c0_8 = arith.constant 0 : index
    %7 = vector.load %arg3[%c0_6, %c1, %c0_7, %c0_8] : memref<1x12x56x4xbf16, #tpu.memory_space<vmem>>, vector<1x1x56x4xbf16>
    %8 = vector.shape_cast %7 : vector<1x1x56x4xbf16> to vector<56x4xbf16>
    %9 = arith.extf %8 : vector<56x4xbf16> to vector<56x4xf32>
    %10 = arith.addf %6, %9 : vector<56x4xf32>
    %c0_9 = arith.constant 0 : index
    %c2 = arith.constant 2 : index
    %c0_10 = arith.constant 0 : index
    %c0_11 = arith.constant 0 : index
    %11 = vector.load %arg3[%c0_9, %c2, %c0_10, %c0_11] : memref<1x12x56x4xbf16, #tpu.memory_space<vmem>>, vector<1x1x56x4xbf16>
    %12 = vector.shape_cast %11 : vector<1x1x56x4xbf16> to vector<56x4xbf16>
    %13 = arith.extf %12 : vector<56x4xbf16> to vector<56x4xf32>
    %14 = arith.addf %10, %13 : vector<56x4xf32>
    %c0_12 = arith.constant 0 : index
    %c3 = arith.constant 3 : index
    %c0_13 = arith.constant 0 : index
    %c0_14 = arith.constant 0 : index
    %15 = vector.load %arg3[%c0_12, %c3, %c0_13, %c0_14] : memref<1x12x56x4xbf16, #tpu.memory_space<vmem>>, vector<1x1x56x4xbf16>
    %16 = vector.shape_cast %15 : vector<1x1x56x4xbf16> to vector<56x4xbf16>
    %17 = arith.extf %16 : vector<56x4xbf16> to vector<56x4xf32>
    %18 = arith.addf %14, %17 : vector<56x4xf32>
    %c0_15 = arith.constant 0 : index
    %c4 = arith.constant 4 : index
    %c0_16 = arith.constant 0 : index
    %c0_17 = arith.constant 0 : index
    %19 = vector.load %arg3[%c0_15, %c4, %c0_16, %c0_17] : memref<1x12x56x4xbf16, #tpu.memory_space<vmem>>, vector<1x1x56x4xbf16>
    %20 = vector.shape_cast %19 : vector<1x1x56x4xbf16> to vector<56x4xbf16>
    %21 = arith.extf %20 : vector<56x4xbf16> to vector<56x4xf32>
    %22 = arith.addf %18, %21 : vector<56x4xf32>
    %c0_18 = arith.constant 0 : index
    %c5 = arith.constant 5 : index
    %c0_19 = arith.constant 0 : index
    %c0_20 = arith.constant 0 : index
    %23 = vector.load %arg3[%c0_18, %c5, %c0_19, %c0_20] : memref<1x12x56x4xbf16, #tpu.memory_space<vmem>>, vector<1x1x56x4xbf16>
    %24 = vector.shape_cast %23 : vector<1x1x56x4xbf16> to vector<56x4xbf16>
    %25 = arith.extf %24 : vector<56x4xbf16> to vector<56x4xf32>
    %26 = arith.addf %22, %25 : vector<56x4xf32>
    %c0_21 = arith.constant 0 : index
    %c6 = arith.constant 6 : index
    %c0_22 = arith.constant 0 : index
    %c0_23 = arith.constant 0 : index
    %27 = vector.load %arg3[%c0_21, %c6, %c0_22, %c0_23] : memref<1x12x56x4xbf16, #tpu.memory_space<vmem>>, vector<1x1x56x4xbf16>
    %28 = vector.shape_cast %27 : vector<1x1x56x4xbf16> to vector<56x4xbf16>
    %29 = arith.extf %28 : vector<56x4xbf16> to vector<56x4xf32>
    %30 = arith.addf %26, %29 : vector<56x4xf32>
    %c0_24 = arith.constant 0 : index
    %c7 = arith.constant 7 : index
    %c0_25 = arith.constant 0 : index
    %c0_26 = arith.constant 0 : index
    %31 = vector.load %arg3[%c0_24, %c7, %c0_25, %c0_26] : memref<1x12x56x4xbf16, #tpu.memory_space<vmem>>, vector<1x1x56x4xbf16>
    %32 = vector.shape_cast %31 : vector<1x1x56x4xbf16> to vector<56x4xbf16>
    %33 = arith.extf %32 : vector<56x4xbf16> to vector<56x4xf32>
    %34 = arith.addf %30, %33 : vector<56x4xf32>
    %c0_27 = arith.constant 0 : index
    %c8 = arith.constant 8 : index
    %c0_28 = arith.constant 0 : index
    %c0_29 = arith.constant 0 : index
    %35 = vector.load %arg3[%c0_27, %c8, %c0_28, %c0_29] : memref<1x12x56x4xbf16, #tpu.memory_space<vmem>>, vector<1x1x56x4xbf16>
    %36 = vector.shape_cast %35 : vector<1x1x56x4xbf16> to vector<56x4xbf16>
    %37 = arith.extf %36 : vector<56x4xbf16> to vector<56x4xf32>
    %38 = arith.addf %34, %37 : vector<56x4xf32>
    %c0_30 = arith.constant 0 : index
    %c9 = arith.constant 9 : index
    %c0_31 = arith.constant 0 : index
    %c0_32 = arith.constant 0 : index
    %39 = vector.load %arg3[%c0_30, %c9, %c0_31, %c0_32] : memref<1x12x56x4xbf16, #tpu.memory_space<vmem>>, vector<1x1x56x4xbf16>
    %40 = vector.shape_cast %39 : vector<1x1x56x4xbf16> to vector<56x4xbf16>
    %41 = arith.extf %40 : vector<56x4xbf16> to vector<56x4xf32>
    %42 = arith.addf %38, %41 : vector<56x4xf32>
    %c0_33 = arith.constant 0 : index
    %c10 = arith.constant 10 : index
    %c0_34 = arith.constant 0 : index
    %c0_35 = arith.constant 0 : index
    %43 = vector.load %arg3[%c0_33, %c10, %c0_34, %c0_35] : memref<1x12x56x4xbf16, #tpu.memory_space<vmem>>, vector<1x1x56x4xbf16>
    %44 = vector.shape_cast %43 : vector<1x1x56x4xbf16> to vector<56x4xbf16>
    %45 = arith.extf %44 : vector<56x4xbf16> to vector<56x4xf32>
    %46 = arith.addf %42, %45 : vector<56x4xf32>
    %c0_36 = arith.constant 0 : index
    %c11 = arith.constant 11 : index
    %c0_37 = arith.constant 0 : index
    %c0_38 = arith.constant 0 : index
    %47 = vector.load %arg3[%c0_36, %c11, %c0_37, %c0_38] : memref<1x12x56x4xbf16, #tpu.memory_space<vmem>>, vector<1x1x56x4xbf16>
    %48 = vector.shape_cast %47 : vector<1x1x56x4xbf16> to vector<56x4xbf16>
    %49 = arith.extf %48 : vector<56x4xbf16> to vector<56x4xf32>
    %50 = arith.addf %46, %49 : vector<56x4xf32>
    %c0_39 = arith.constant 0 : index
    %c0_40 = arith.constant 0 : index
    %51 = vector.load %arg4[%c0_39, %c0_40] : memref<128x56xbf16, #tpu.memory_space<vmem>>, vector<128x56xbf16>
    %52 = arith.truncf %50 : vector<56x4xf32> to vector<56x4xbf16>
    %cst = arith.constant dense<0.000000e+00> : vector<128x4xf32>
    %53 = tpu.matmul %51, %52, %cst {dimension_numbers = #tpu.dot_dimension_numbers<[1], [0], [0], [1], [0, 0, 1, 1], [], []>} : vector<128x56xbf16>, vector<56x4xbf16>, vector<128x4xf32> -> vector<128x4xf32>
    %c0_41 = arith.constant 0 : index
    %c0_42 = arith.constant 0 : index
    %54 = vector.load %arg5[%c0_41, %c0_42] : memref<128x1xf32, #tpu.memory_space<vmem>>, vector<128x1xf32>
    %55 = vector.broadcast %54 : vector<128x1xf32> to vector<128x4xf32>
    %56 = arith.addf %53, %55 : vector<128x4xf32>
    %cst_43 = arith.constant 0.000000e+00 : f32
    %57 = vector.broadcast %cst_43 : f32 to vector<128x4xf32>
    %58 = arith.maximumf %56, %57 : vector<128x4xf32>
    %59 = arith.truncf %58 : vector<128x4xf32> to vector<128x4xbf16>
    %c0_44 = arith.constant 0 : index
    %c0_45 = arith.constant 0 : index
    %c0_46 = arith.constant 0 : index
    %60 = vector.load %arg6[%c0_44, %c0_45, %c0_46] : memref<1x128x4xbf16, #tpu.memory_space<vmem>>, vector<1x128x4xbf16>
    %61 = vector.shape_cast %60 : vector<1x128x4xbf16> to vector<128x4xbf16>
    %62 = vector.shape_cast %59 : vector<128x4xbf16> to vector<1x128x4xbf16>
    tpu.vector_store %arg6[%c0_44, %c0_45, %c0_46], %62 {strides = array<i32>} : memref<1x128x4xbf16, #tpu.memory_space<vmem>>, vector<1x128x4xbf16>,
    return
  }
  func.func @transform_0(%arg0: i32, %arg1: i32) -> (i32, i32, i32) {
    %c0_i32 = arith.constant 0 : i32
    %c0_i32_0 = arith.constant 0 : i32
    return %arg0, %c0_i32, %arg1 : i32, i32, i32
  }
  func.func @transform_1(%arg0: i32, %arg1: i32) -> (i32, i32, i32, i32) {
    %c0_i32 = arith.constant 0 : i32
    %c0_i32_0 = arith.constant 0 : i32
    %c0_i32_1 = arith.constant 0 : i32
    return %arg0, %c0_i32, %c0_i32_0, %arg1 : i32, i32, i32, i32
  }
  func.func @transform_2(%arg0: i32, %arg1: i32) -> (i32, i32) {
    %c0_i32 = arith.constant 0 : i32
    %c0_i32_0 = arith.constant 0 : i32
    %c0_i32_1 = arith.constant 0 : i32
    return %c0_i32, %c0_i32_0 : i32, i32
  }
  func.func @transform_3(%arg0: i32, %arg1: i32) -> (i32, i32) {
    %c0_i32 = arith.constant 0 : i32
    %c0_i32_0 = arith.constant 0 : i32
    %c0_i32_1 = arith.constant 0 : i32
    return %c0_i32, %c0_i32_0 : i32, i32
  }
  func.func @transform_4(%arg0: i32, %arg1: i32) -> (i32, i32, i32) {
    %c0_i32 = arith.constant 0 : i32
    %c0_i32_0 = arith.constant 0 : i32
    return %arg0, %c0_i32, %arg1 : i32, i32, i32
  }
}

module attributes {stable_mosaic.version = 11 : i64} {
  func.func @_conv_face_kernel(%arg0: i32, %arg1: i32, %arg2: memref<1x128x4xbf16, #tpu.memory_space<vmem>>, %arg3: memref<1x12x128x4xbf16, #tpu.memory_space<vmem>>, %arg4: memref<8x128xbf16, #tpu.memory_space<vmem>>, %arg5: memref<8x1xf32, #tpu.memory_space<vmem>>, %arg6: memref<1x8x4xbf16, #tpu.memory_space<vmem>>) attributes {dimension_semantics = [#tpu.dimension_semantics<parallel>, #tpu.dimension_semantics<parallel>], iteration_bounds = array<i64: 2, 1>, scalar_prefetch = 0 : i64, scratch_operands = 0 : i64, tpu.core_type = #tpu.core_type<tc>, window_params = [{transform_indices = @transform_0, window_bounds = array<i64: 1, 128, 4>}, {transform_indices = @transform_1, window_bounds = array<i64: 1, 12, 128, 4>}, {pipeline_mode = #tpu.pipeline_mode<synchronous>, transform_indices = @transform_2, window_bounds = array<i64: 8, 128>}, {pipeline_mode = #tpu.pipeline_mode<synchronous>, transform_indices = @transform_3, window_bounds = array<i64: 8, 1>}, {transform_indices = @transform_4, window_bounds = array<i64: 1, 8, 4>}]} {
    %c0 = arith.constant 0 : index
    %c0_0 = arith.constant 0 : index
    %c0_1 = arith.constant 0 : index
    %0 = vector.load %arg2[%c0, %c0_0, %c0_1] : memref<1x128x4xbf16, #tpu.memory_space<vmem>>, vector<1x128x4xbf16>
    %1 = vector.shape_cast %0 : vector<1x128x4xbf16> to vector<128x4xbf16>
    %2 = arith.extf %1 : vector<128x4xbf16> to vector<128x4xf32>
    %c0_2 = arith.constant 0 : index
    %c0_3 = arith.constant 0 : index
    %c0_4 = arith.constant 0 : index
    %c0_5 = arith.constant 0 : index
    %3 = vector.load %arg3[%c0_2, %c0_3, %c0_4, %c0_5] : memref<1x12x128x4xbf16, #tpu.memory_space<vmem>>, vector<1x1x128x4xbf16>
    %4 = vector.shape_cast %3 : vector<1x1x128x4xbf16> to vector<128x4xbf16>
    %5 = arith.extf %4 : vector<128x4xbf16> to vector<128x4xf32>
    %6 = arith.addf %2, %5 : vector<128x4xf32>
    %c0_6 = arith.constant 0 : index
    %c1 = arith.constant 1 : index
    %c0_7 = arith.constant 0 : index
    %c0_8 = arith.constant 0 : index
    %7 = vector.load %arg3[%c0_6, %c1, %c0_7, %c0_8] : memref<1x12x128x4xbf16, #tpu.memory_space<vmem>>, vector<1x1x128x4xbf16>
    %8 = vector.shape_cast %7 : vector<1x1x128x4xbf16> to vector<128x4xbf16>
    %9 = arith.extf %8 : vector<128x4xbf16> to vector<128x4xf32>
    %10 = arith.addf %6, %9 : vector<128x4xf32>
    %c0_9 = arith.constant 0 : index
    %c2 = arith.constant 2 : index
    %c0_10 = arith.constant 0 : index
    %c0_11 = arith.constant 0 : index
    %11 = vector.load %arg3[%c0_9, %c2, %c0_10, %c0_11] : memref<1x12x128x4xbf16, #tpu.memory_space<vmem>>, vector<1x1x128x4xbf16>
    %12 = vector.shape_cast %11 : vector<1x1x128x4xbf16> to vector<128x4xbf16>
    %13 = arith.extf %12 : vector<128x4xbf16> to vector<128x4xf32>
    %14 = arith.addf %10, %13 : vector<128x4xf32>
    %c0_12 = arith.constant 0 : index
    %c3 = arith.constant 3 : index
    %c0_13 = arith.constant 0 : index
    %c0_14 = arith.constant 0 : index
    %15 = vector.load %arg3[%c0_12, %c3, %c0_13, %c0_14] : memref<1x12x128x4xbf16, #tpu.memory_space<vmem>>, vector<1x1x128x4xbf16>
    %16 = vector.shape_cast %15 : vector<1x1x128x4xbf16> to vector<128x4xbf16>
    %17 = arith.extf %16 : vector<128x4xbf16> to vector<128x4xf32>
    %18 = arith.addf %14, %17 : vector<128x4xf32>
    %c0_15 = arith.constant 0 : index
    %c4 = arith.constant 4 : index
    %c0_16 = arith.constant 0 : index
    %c0_17 = arith.constant 0 : index
    %19 = vector.load %arg3[%c0_15, %c4, %c0_16, %c0_17] : memref<1x12x128x4xbf16, #tpu.memory_space<vmem>>, vector<1x1x128x4xbf16>
    %20 = vector.shape_cast %19 : vector<1x1x128x4xbf16> to vector<128x4xbf16>
    %21 = arith.extf %20 : vector<128x4xbf16> to vector<128x4xf32>
    %22 = arith.addf %18, %21 : vector<128x4xf32>
    %c0_18 = arith.constant 0 : index
    %c5 = arith.constant 5 : index
    %c0_19 = arith.constant 0 : index
    %c0_20 = arith.constant 0 : index
    %23 = vector.load %arg3[%c0_18, %c5, %c0_19, %c0_20] : memref<1x12x128x4xbf16, #tpu.memory_space<vmem>>, vector<1x1x128x4xbf16>
    %24 = vector.shape_cast %23 : vector<1x1x128x4xbf16> to vector<128x4xbf16>
    %25 = arith.extf %24 : vector<128x4xbf16> to vector<128x4xf32>
    %26 = arith.addf %22, %25 : vector<128x4xf32>
    %c0_21 = arith.constant 0 : index
    %c6 = arith.constant 6 : index
    %c0_22 = arith.constant 0 : index
    %c0_23 = arith.constant 0 : index
    %27 = vector.load %arg3[%c0_21, %c6, %c0_22, %c0_23] : memref<1x12x128x4xbf16, #tpu.memory_space<vmem>>, vector<1x1x128x4xbf16>
    %28 = vector.shape_cast %27 : vector<1x1x128x4xbf16> to vector<128x4xbf16>
    %29 = arith.extf %28 : vector<128x4xbf16> to vector<128x4xf32>
    %30 = arith.addf %26, %29 : vector<128x4xf32>
    %c0_24 = arith.constant 0 : index
    %c7 = arith.constant 7 : index
    %c0_25 = arith.constant 0 : index
    %c0_26 = arith.constant 0 : index
    %31 = vector.load %arg3[%c0_24, %c7, %c0_25, %c0_26] : memref<1x12x128x4xbf16, #tpu.memory_space<vmem>>, vector<1x1x128x4xbf16>
    %32 = vector.shape_cast %31 : vector<1x1x128x4xbf16> to vector<128x4xbf16>
    %33 = arith.extf %32 : vector<128x4xbf16> to vector<128x4xf32>
    %34 = arith.addf %30, %33 : vector<128x4xf32>
    %c0_27 = arith.constant 0 : index
    %c8 = arith.constant 8 : index
    %c0_28 = arith.constant 0 : index
    %c0_29 = arith.constant 0 : index
    %35 = vector.load %arg3[%c0_27, %c8, %c0_28, %c0_29] : memref<1x12x128x4xbf16, #tpu.memory_space<vmem>>, vector<1x1x128x4xbf16>
    %36 = vector.shape_cast %35 : vector<1x1x128x4xbf16> to vector<128x4xbf16>
    %37 = arith.extf %36 : vector<128x4xbf16> to vector<128x4xf32>
    %38 = arith.addf %34, %37 : vector<128x4xf32>
    %c0_30 = arith.constant 0 : index
    %c9 = arith.constant 9 : index
    %c0_31 = arith.constant 0 : index
    %c0_32 = arith.constant 0 : index
    %39 = vector.load %arg3[%c0_30, %c9, %c0_31, %c0_32] : memref<1x12x128x4xbf16, #tpu.memory_space<vmem>>, vector<1x1x128x4xbf16>
    %40 = vector.shape_cast %39 : vector<1x1x128x4xbf16> to vector<128x4xbf16>
    %41 = arith.extf %40 : vector<128x4xbf16> to vector<128x4xf32>
    %42 = arith.addf %38, %41 : vector<128x4xf32>
    %c0_33 = arith.constant 0 : index
    %c10 = arith.constant 10 : index
    %c0_34 = arith.constant 0 : index
    %c0_35 = arith.constant 0 : index
    %43 = vector.load %arg3[%c0_33, %c10, %c0_34, %c0_35] : memref<1x12x128x4xbf16, #tpu.memory_space<vmem>>, vector<1x1x128x4xbf16>
    %44 = vector.shape_cast %43 : vector<1x1x128x4xbf16> to vector<128x4xbf16>
    %45 = arith.extf %44 : vector<128x4xbf16> to vector<128x4xf32>
    %46 = arith.addf %42, %45 : vector<128x4xf32>
    %c0_36 = arith.constant 0 : index
    %c11 = arith.constant 11 : index
    %c0_37 = arith.constant 0 : index
    %c0_38 = arith.constant 0 : index
    %47 = vector.load %arg3[%c0_36, %c11, %c0_37, %c0_38] : memref<1x12x128x4xbf16, #tpu.memory_space<vmem>>, vector<1x1x128x4xbf16>
    %48 = vector.shape_cast %47 : vector<1x1x128x4xbf16> to vector<128x4xbf16>
    %49 = arith.extf %48 : vector<128x4xbf16> to vector<128x4xf32>
    %50 = arith.addf %46, %49 : vector<128x4xf32>
    %c0_39 = arith.constant 0 : index
    %c0_40 = arith.constant 0 : index
    %51 = vector.load %arg4[%c0_39, %c0_40] : memref<8x128xbf16, #tpu.memory_space<vmem>>, vector<8x128xbf16>
    %52 = arith.truncf %50 : vector<128x4xf32> to vector<128x4xbf16>
    %cst = arith.constant dense<0.000000e+00> : vector<8x4xf32>
    %53 = tpu.matmul %51, %52, %cst {dimension_numbers = #tpu.dot_dimension_numbers<[1], [0], [0], [1], [0, 0, 1, 1], [], []>} : vector<8x128xbf16>, vector<128x4xbf16>, vector<8x4xf32> -> vector<8x4xf32>
    %c0_41 = arith.constant 0 : index
    %c0_42 = arith.constant 0 : index
    %54 = vector.load %arg5[%c0_41, %c0_42] : memref<8x1xf32, #tpu.memory_space<vmem>>, vector<8x1xf32>
    %55 = vector.broadcast %54 : vector<8x1xf32> to vector<8x4xf32>
    %56 = arith.addf %53, %55 : vector<8x4xf32>
    %cst_43 = arith.constant 0.000000e+00 : f32
    %57 = vector.broadcast %cst_43 : f32 to vector<8x4xf32>
    %58 = arith.maximumf %56, %57 : vector<8x4xf32>
    %59 = arith.truncf %58 : vector<8x4xf32> to vector<8x4xbf16>
    %c0_44 = arith.constant 0 : index
    %c0_45 = arith.constant 0 : index
    %c0_46 = arith.constant 0 : index
    %60 = vector.load %arg6[%c0_44, %c0_45, %c0_46] : memref<1x8x4xbf16, #tpu.memory_space<vmem>>, vector<1x8x4xbf16>
    %61 = vector.shape_cast %60 : vector<1x8x4xbf16> to vector<8x4xbf16>
    %62 = vector.shape_cast %59 : vector<8x4xbf16> to vector<1x8x4xbf16>
    tpu.vector_store %arg6[%c0_44, %c0_45, %c0_46], %62 {strides = array<i32>} : memref<1x8x4xbf16, #tpu.memory_space<vmem>>, vector<1x8x4xbf16>,
    return
  }
  func.func @transform_0(%arg0: i32, %arg1: i32) -> (i32, i32, i32) {
    %c0_i32 = arith.constant 0 : i32
    %c0_i32_0 = arith.constant 0 : i32
    return %arg0, %c0_i32, %arg1 : i32, i32, i32
  }
  func.func @transform_1(%arg0: i32, %arg1: i32) -> (i32, i32, i32, i32) {
    %c0_i32 = arith.constant 0 : i32
    %c0_i32_0 = arith.constant 0 : i32
    %c0_i32_1 = arith.constant 0 : i32
    return %arg0, %c0_i32, %c0_i32_0, %arg1 : i32, i32, i32, i32
  }
  func.func @transform_2(%arg0: i32, %arg1: i32) -> (i32, i32) {
    %c0_i32 = arith.constant 0 : i32
    %c0_i32_0 = arith.constant 0 : i32
    %c0_i32_1 = arith.constant 0 : i32
    return %c0_i32, %c0_i32_0 : i32, i32
  }
  func.func @transform_3(%arg0: i32, %arg1: i32) -> (i32, i32) {
    %c0_i32 = arith.constant 0 : i32
    %c0_i32_0 = arith.constant 0 : i32
    %c0_i32_1 = arith.constant 0 : i32
    return %c0_i32, %c0_i32_0 : i32, i32
  }
  func.func @transform_4(%arg0: i32, %arg1: i32) -> (i32, i32, i32) {
    %c0_i32 = arith.constant 0 : i32
    %c0_i32_0 = arith.constant 0 : i32
    return %arg0, %c0_i32, %arg1 : i32, i32, i32
  }
}

module attributes {stable_mosaic.version = 11 : i64} {
  func.func @_classifier_kernel(%arg0: memref<2x64x4xbf16, #tpu.memory_space<vmem>>, %arg1: memref<64x512xbf16, #tpu.memory_space<vmem>>, %arg2: memref<1x512xf32, #tpu.memory_space<vmem>>, %arg3: memref<512x256xbf16, #tpu.memory_space<vmem>>, %arg4: memref<1x256xf32, #tpu.memory_space<vmem>>, %arg5: memref<256x4xbf16, #tpu.memory_space<vmem>>, %arg6: memref<1x4xf32, #tpu.memory_space<vmem>>, %arg7: memref<2x4xf32, #tpu.memory_space<vmem>>) attributes {dimension_semantics = [], scalar_prefetch = 0 : i64, scratch_operands = 0 : i64, tpu.core_type = #tpu.core_type<tc>} {
    %c0 = arith.constant 0 : index
    %c0_0 = arith.constant 0 : index
    %c0_1 = arith.constant 0 : index
    %0 = vector.load %arg0[%c0, %c0_0, %c0_1] : memref<2x64x4xbf16, #tpu.memory_space<vmem>>, vector<2x64x4xbf16>
    %1 = arith.extf %0 : vector<2x64x4xbf16> to vector<2x64x4xf32>
    %cst = arith.constant dense<0xFF800000> : vector<2x64xf32>
    %2 = vector.multi_reduction <maximumf>, %1, %cst [2] : vector<2x64x4xf32> to vector<2x64xf32>
    %3 = arith.truncf %2 : vector<2x64xf32> to vector<2x64xbf16>
    %c0_2 = arith.constant 0 : index
    %c0_3 = arith.constant 0 : index
    %4 = vector.load %arg1[%c0_2, %c0_3] : memref<64x512xbf16, #tpu.memory_space<vmem>>, vector<64x512xbf16>
    %cst_4 = arith.constant dense<0.000000e+00> : vector<2x512xf32>
    %5 = tpu.matmul %3, %4, %cst_4 {dimension_numbers = #tpu.dot_dimension_numbers<[1], [0], [0], [1], [0, 0, 1, 1], [], []>} : vector<2x64xbf16>, vector<64x512xbf16>, vector<2x512xf32> -> vector<2x512xf32>
    %c0_5 = arith.constant 0 : index
    %c0_6 = arith.constant 0 : index
    %6 = vector.load %arg2[%c0_5, %c0_6] : memref<1x512xf32, #tpu.memory_space<vmem>>, vector<1x512xf32>
    %7 = vector.broadcast %6 : vector<1x512xf32> to vector<2x512xf32>
    %8 = arith.addf %5, %7 : vector<2x512xf32>
    %cst_7 = arith.constant 0.000000e+00 : f32
    %9 = vector.broadcast %cst_7 : f32 to vector<2x512xf32>
    %10 = arith.maximumf %8, %9 : vector<2x512xf32>
    %11 = arith.truncf %10 : vector<2x512xf32> to vector<2x512xbf16>
    %c0_8 = arith.constant 0 : index
    %c0_9 = arith.constant 0 : index
    %12 = vector.load %arg3[%c0_8, %c0_9] : memref<512x256xbf16, #tpu.memory_space<vmem>>, vector<512x256xbf16>
    %cst_10 = arith.constant dense<0.000000e+00> : vector<2x256xf32>
    %13 = tpu.matmul %11, %12, %cst_10 {dimension_numbers = #tpu.dot_dimension_numbers<[1], [0], [0], [1], [0, 0, 1, 1], [], []>} : vector<2x512xbf16>, vector<512x256xbf16>, vector<2x256xf32> -> vector<2x256xf32>
    %c0_11 = arith.constant 0 : index
    %c0_12 = arith.constant 0 : index
    %14 = vector.load %arg4[%c0_11, %c0_12] : memref<1x256xf32, #tpu.memory_space<vmem>>, vector<1x256xf32>
    %15 = vector.broadcast %14 : vector<1x256xf32> to vector<2x256xf32>
    %16 = arith.addf %13, %15 : vector<2x256xf32>
    %cst_13 = arith.constant 0.000000e+00 : f32
    %17 = vector.broadcast %cst_13 : f32 to vector<2x256xf32>
    %18 = arith.maximumf %16, %17 : vector<2x256xf32>
    %19 = arith.truncf %18 : vector<2x256xf32> to vector<2x256xbf16>
    %c0_14 = arith.constant 0 : index
    %c0_15 = arith.constant 0 : index
    %20 = vector.load %arg5[%c0_14, %c0_15] : memref<256x4xbf16, #tpu.memory_space<vmem>>, vector<256x4xbf16>
    %cst_16 = arith.constant dense<0.000000e+00> : vector<2x4xf32>
    %21 = tpu.matmul %19, %20, %cst_16 {dimension_numbers = #tpu.dot_dimension_numbers<[1], [0], [0], [1], [0, 0, 1, 1], [], []>} : vector<2x256xbf16>, vector<256x4xbf16>, vector<2x4xf32> -> vector<2x4xf32>
    %c0_17 = arith.constant 0 : index
    %c0_18 = arith.constant 0 : index
    %22 = vector.load %arg6[%c0_17, %c0_18] : memref<1x4xf32, #tpu.memory_space<vmem>>, vector<1x4xf32>
    %23 = vector.broadcast %22 : vector<1x4xf32> to vector<2x4xf32>
    %24 = arith.addf %21, %23 : vector<2x4xf32>
    %c0_19 = arith.constant 0 : index
    %c0_20 = arith.constant 0 : index
    %25 = vector.load %arg7[%c0_19, %c0_20] : memref<2x4xf32, #tpu.memory_space<vmem>>, vector<2x4xf32>
    tpu.vector_store %arg7[%c0_19, %c0_20], %24 {strides = array<i32>} : memref<2x4xf32, #tpu.memory_space<vmem>>, vector<2x4xf32>,
    return
  }
}

</mosaic_0001>

<bundles_post_ra>
// kernel: network_forward.13
= control target key start
LH: loop header
LB: loop body
LE: loop exit
PB: predicated region body
PF: predicated region fallthrough
CT: control target
= control target key end

     0   :  { %s463_s12 = smov 0   ;;  %s465_s13 = smov 0   ;;  %s505_s0 = inlined_call_operand.vmem [shape: bf16[2,6,16], index: 0, kind: input, shape index: {}]   ;;  %s506_s1 = inlined_call_operand.vmem [shape: bf16[16,6], index: 1, kind: input, shape index: {}]   ;;  %s507_s2 = inlined_call_operand.vmem [shape: f32[16,1], index: 2, kind: input, shape index: {}]   ;;  %s508_s3 = inlined_call_operand.vmem [shape: bf16[2,16,16], index: 3, kind: output, shape index: {}]  }
   0x1   :  { %s467_s14 = smov 0  }
   0x2 LB: > { %s25_s15 = sadd.s32 1, %s434_s13  ;;  %p366_p0 = scmp.ge.s32.totalorder %s438_s14, 1  ;;  %s438_s14 = sphi %s467_s14, %s13_s14   ;;  %s434_s13 = sphi %s465_s13, %s510_s13   ;;  %s430_s12 = sphi %s463_s12, %s509_s12  }
   0x3   : > { %p27_p1 = scmp.ge.s32.totalorder %s25_s15, 2  ;;  %p155_p2 = scmp.lt.s32.totalorder %s438_s14, 3 }
   0x5   : > { %s512_s15 = smov (%p27_p1, %s25_s15), 0  ;;  %p156_p3 = pnand %p366_p0, %p155_p2 }
   0x6   : > { %p184_p4 = scmp.lt.s32.totalorder (!%p156_p3), %s430_s12, 1  ;;  %v440_v0 = vmov (!%p156_p3), 0.0   ;;  %vm441_vm0 = vmmov (!%p156_p3), 0   ;;  %v203_v1 = vld [vmem:[%s507_s2] sm:$0xff] (!%p156_p3)  ;;  %v442_v2 = vmov (!%p156_p3), 0   ;;  %vm224_vm1 = vcmask (!%p156_p3), 1042432  }
   0x7   : > { %159 = sbr.rel (%p156_p3) target bundleno = 243 (0xf3), region = 32  ;;  %381 = vmatprep.subr.bf16.mxu0 (!%p156_p3), %v440_v0  ;;  %383 = vmatprep.mubr.msk.bf16.mxu0 (!%p156_p3), %vm441_vm0, %v440_v0  ;;  %v204_v3 = vld [vmem:[%s507_s2 + $0x8] sm:$0xff] (!%p156_p3)  ;;  %v415_v6 = vld [vmem:[%s506_s1] sm:$0xff] (!%p156_p3)   ;;  %vm220_vm2 = vcmask (!%p156_p3), 48128   ;;  %vm279_vm3 = vcmask (!%p156_p3), 125952  }
   0x8   : > { %414 = vset.pattern.permute.xlu0 (!%p156_p3), %v442_v2 }
   0x9   : > { %207 = vperm.xlu0 (!%p156_p3), %414, %v203_v1  }
   0xd   : > { %212 = vperm.xlu0 (!%p156_p3), %414, %v204_v3  }
   0xe   : > { %s514_s12 = smov (!%p184_p4, %s430_s12), 1 }
   0xf   : > { %s367_s18 = sshll.u32 %s514_s12, 2  ;;  %s376_s26 = sshll.u32 %s514_s12, 3 }
  0x10   : > { %s190_s23 = scalar_lea.vmem %s505_s0, %s367_s18  ;;  %s198_s29 = scalar_lea.vmem %s508_s3, %s376_s26 }
  0x11   : > { %v202_v4 = vld [vmem:[%s190_s23] sm:$0x7] }
  0x12   : > { %v226_v5 = vsel %vm224_vm1, %v202_v4, 0 }
  0x13   : > { %382 = vmatpush3.bf16.msra.mxu0 %v226_v5 }
  0x16   : > { %384 = vmatmul.mubr.msk.bf16.vlgmr.msra.gmra.mrb[0].mxu0 %vm220_vm2, %v415_v6 }
  0x88   : > { %v208_v7 = vpop.permute.xlu0 %207 }
  0x8c   : > { %v213_v11 = vpop.permute.xlu0 %212 }
  0xe9   : > { %v262_v8 = vpop.f32.mrb[0].mxu0 }
  0xea   : > { %v263_v9 = vadd.f32 %v262_v8, %v208_v7  ;;  %v385_v10 = vpop.f32.mrb[1].mxu0 }
  0xeb   : > { %v265_v12 = vpop.f32.mrb[2].mxu0 }
  0xec   : > { %v269_v13 = vmax.f32 %v263_v9, 0.0  ;;  %v266_v14 = vadd.f32 %v265_v12, %v213_v11  ;;  %v386_v15 = vpop.f32.mrb[3].mxu0 }
  0xee   : > { %v377_v16 = vpack.c.bf16 %v269_v13, %v269_v13  ;;  %v270_v17 = vmax.f32 %v266_v14, 0.0 }
  0xf0   : > { %280 = vst.msk [vmem:[%s198_s29] sm:$0xf] %vm279_vm3, %v377_v16  ;;  %v378_v18 = vpack.c.bf16 %v270_v17, %v270_v17 }
  0xf2   : > { %281 = vst.msk [vmem:[%s198_s29 + $0x4] sm:$0xf] %vm279_vm3, %v378_v18 }
  0xf3 PF: > { %s13_s14 = sadd.s32 1, %s438_s14   ;;  %s509_s12 = smov %s434_s13 }
  0xf4   : > { %p10_p5 = scmp.ge.s32.totalorder %s13_s14, 4   ;;  %s510_s13 = smov %s512_s15 }
  0xf6   :  { %12 = sbr.rel (!%p10_p5) target bundleno = 2 (0x2), region = 62 }

// kernel: network_forward.14
= control target key start
LH: loop header
LB: loop body
LE: loop exit
PB: predicated region body
PF: predicated region fallthrough
CT: control target
= control target key end

     0   :  { %s577_s12 = smov 0   ;;  %s579_s13 = smov 0   ;;  %s623_s0 = inlined_call_operand.vmem [shape: bf16[2,3,9,16], index: 0, kind: input, shape index: {}]   ;;  %s624_s1 = inlined_call_operand.vmem [shape: bf16[8,9], index: 1, kind: input, shape index: {}]   ;;  %s625_s2 = inlined_call_operand.vmem [shape: f32[8,1], index: 2, kind: input, shape index: {}]   ;;  %s626_s3 = inlined_call_operand.vmem [shape: bf16[2,8,16], index: 3, kind: output, shape index: {}]  }
   0x1   :  { %s581_s14 = smov 0  }
   0x2 LB: > { %s25_s15 = sadd.s32 1, %s547_s13  ;;  %p457_p0 = scmp.ge.s32.totalorder %s551_s14, 1  ;;  %s551_s14 = sphi %s581_s14, %s13_s14   ;;  %s547_s13 = sphi %s579_s13, %s628_s13   ;;  %s543_s12 = sphi %s577_s12, %s627_s12  }
   0x3   : > { %p27_p1 = scmp.ge.s32.totalorder %s25_s15, 2  ;;  %p156_p2 = scmp.lt.s32.totalorder %s551_s14, 3 }
   0x5   : > { %s630_s15 = smov (%p27_p1, %s25_s15), 0  ;;  %p157_p3 = pnand %p457_p0, %p156_p2 }
   0x6   : > { %p185_p4 = scmp.lt.s32.totalorder (!%p157_p3), %s543_s12, 1  ;;  %vm219_vm0 = vcmask (!%p157_p3), 1043456   ;;  %v553_v0 = vmov (!%p157_p3), 0.0   ;;  %v201_v1 = vld [vmem:[%s625_s2] sm:$0xff] (!%p157_p3)  ;;  %vm554_vm1 = vmmov (!%p157_p3), 0   ;;  %vm220_vm2 = vcmask (!%p157_p3), 1044480  }
   0x7   : > { %160 = sbr.rel (%p157_p3) target bundleno = 253 (0xfd), region = 32  ;;  %478 = vmatprep.subr.bf16.mxu0 (!%p157_p3), %v553_v0  ;;  %484 = vmatprep.subr.bf16.mxu1 (!%p157_p3), %v553_v0  ;;  %v555_v2 = vmov (!%p157_p3), 65535   ;;  %v556_v4 = vmov (!%p157_p3), 0   ;;  %v202_v12 = vld [vmem:[%s624_s1] sm:$0xf] (!%p157_p3)  ;;  %vm215_vm3 = vcmask (!%p157_p3), 72704  }
   0x8   : > { %480 = vmatprep.mubr.msk.bf16.mxu0 (!%p157_p3), %vm554_vm1, %v553_v0  ;;  %486 = vmatprep.mubr.msk.bf16.mxu1 (!%p157_p3), %vm554_vm1, %v553_v0  ;;  %v221_v3 = vsel (!%p157_p3), %vm219_vm0, 4294967295, %v555_v2  ;;  %vm374_vm4 = vcmask (!%p157_p3), 125952  }
   0x9   : > { %525 = vset.pattern.permute.xlu0 (!%p157_p3), %v556_v4  ;;  %v222_v5 = vsel (!%p157_p3), %vm220_vm2, %v221_v3, 0 }
   0xa   : > { %207 = vperm.xlu0 (!%p157_p3), %525, %v201_v1  }
   0xe   : > { %s632_s12 = smov (!%p185_p4, %s543_s12), 1 }
   0xf   : > { %s496_s18 = smul.u32 24, %s632_s12  ;;  %s459_s24 = sshll.u32 %s632_s12, 2 }
  0x10   : > { %s199_s27 = scalar_lea.vmem %s626_s3, %s459_s24 }
  0x11   : > { %s192_s21 = scalar_lea.vmem %s623_s0, %s496_s18 }
  0x12   : > { %v526_v6 = vld [vmem:[%s192_s21] sm:$0x1f]   ;;  %v527_v7 = vld [vmem:[%s192_s21 + $0x10] sm:$0x1f]   ;;  %v528_v9 = vld [vmem:[%s192_s21 + $0x8] sm:$0x1f]  }
  0x13   : > { %v224_v8 = vand.u32 %v526_v6, %v222_v5  ;;  %v329_v10 = vand.u32 %v527_v7, %v222_v5  ;;  %v276_v11 = vand.u32 %v528_v9, %v222_v5 }
  0x15   : > { %479 = vmatpush3.bf16.msra.mxu0 %v224_v8  ;;  %485 = vmatpush3.bf16.msra.mxu1 %v276_v11 }
  0x16   : > { %490 = vmatprep.subr.bf16.mxu0 %v553_v0 }
  0x18   : > { %481 = vmatmul.mubr.msk.bf16.vlgmr.msra.gmra.mrb[0].mxu0 %vm215_vm3, %v202_v12  ;;  %487 = vmatmul.mubr.msk.bf16.vlgmr.msra.gmra.mrb[0].mxu1 %vm215_vm3, %v202_v12 }
  0x19   : > { %491 = vmatpush3.bf16.msra.mxu0 %v329_v10  ;;  %492 = vmatprep.mubr.msk.bf16.mxu0 %vm554_vm1, %v553_v0 }
  0x20   : > { %493 = vmatmul.mubr.msk.bf16.vlgmr.msra.gmra.mrb[4].mxu0 %vm215_vm3, %v202_v12 }
  0x89   : > { %v208_v13 = vpop.permute.xlu0 %207 }
  0xeb   : > { %v260_v14 = vpop.f32.mrb[0].mxu0  ;;  %v312_v17 = vpop.f32.mrb[0].mxu1 }
  0xec   : > { %v261_v15 = vadd.f32 %v260_v14, %v208_v13  ;;  %v482_v16 = vpop.f32.mrb[1].mxu0  ;;  %v313_v20 = vadd.f32 %v312_v17, %v208_v13  ;;  %v488_v22 = vpop.f32.mrb[1].mxu1 }
  0xed   : > { %v263_v18 = vpop.f32.mrb[2].mxu0  ;;  %v315_v23 = vpop.f32.mrb[2].mxu1 }
  0xee   : > { %v266_v19 = vmax.f32 %v261_v15, 0.0  ;;  %v483_v21 = vpop.f32.mrb[3].mxu0  ;;  %v318_v24 = vmax.f32 %v313_v20, 0.0  ;;  %v489_v25 = vpop.f32.mrb[3].mxu1 }
  0xf0   : > { %v319_v26 = vmax.f32 %v266_v19, %v318_v24 }
  0xf3   : > { %v365_v27 = vpop.f32.mrb[4].mxu0 }
  0xf4   : > { %v366_v28 = vadd.f32 %v365_v27, %v208_v13  ;;  %v494_v29 = vpop.f32.mrb[5].mxu0 }
  0xf5   : > { %v368_v30 = vpop.f32.mrb[6].mxu0 }
  0xf6   : > { %v371_v31 = vmax.f32 %v366_v28, 0.0  ;;  %v495_v32 = vpop.f32.mrb[7].mxu0 }
  0xf8   : > { %v372_v33 = vmax.f32 %v319_v26, %v371_v31 }
  0xfa   : > { %v373_v34 = vpack.c.bf16 %v372_v33, %v372_v33 }
  0xfc   : > { %375 = vst.msk [vmem:[%s199_s27] sm:$0xf] %vm374_vm4, %v373_v34 }
  0xfd PF: > { %s13_s14 = sadd.s32 1, %s551_s14   ;;  %s627_s12 = smov %s547_s13 }
  0xfe   : > { %p10_p5 = scmp.ge.s32.totalorder %s13_s14, 4   ;;  %s628_s13 = smov %s630_s15 }
 0x100   :  { %12 = sbr.rel (!%p10_p5) target bundleno = 2 (0x2), region = 64 }

// kernel: network_forward.15
= control target key start
LH: loop header
LB: loop body
LE: loop exit
PB: predicated region body
PF: predicated region fallthrough
CT: control target
= control target key end

     0   :  { %s775_s12 = smov 0   ;;  %s777_s13 = smov 0   ;;  %s830_s0 = inlined_call_operand.vmem [shape: bf16[2,6,9,16], index: 0, kind: input, shape index: {}]   ;;  %s831_s1 = inlined_call_operand.vmem [shape: bf16[8,9], index: 1, kind: input, shape index: {}]   ;;  %s832_s2 = inlined_call_operand.vmem [shape: f32[8,1], index: 2, kind: input, shape index: {}]   ;;  %s833_s3 = inlined_call_operand.vmem [shape: bf16[2,8,16], index: 3, kind: output, shape index: {}]  }
   0x1   :  { %s779_s14 = smov 0  }
   0x2 LB: > { %s25_s15 = sadd.s32 1, %s745_s13  ;;  %p616_p0 = scmp.ge.s32.totalorder %s749_s14, 1  ;;  %s749_s14 = sphi %s779_s14, %s13_s14   ;;  %s745_s13 = sphi %s777_s13, %s835_s13   ;;  %s741_s12 = sphi %s775_s12, %s834_s12  }
   0x3   : > { %p27_p1 = scmp.ge.s32.totalorder %s25_s15, 2  ;;  %p156_p2 = scmp.lt.s32.totalorder %s749_s14, 3 }
   0x5   : > { %s837_s15 = smov (%p27_p1, %s25_s15), 0  ;;  %p157_p3 = pnand %p616_p0, %p156_p2 }
   0x6   : > { %p185_p4 = scmp.lt.s32.totalorder (!%p157_p3), %s741_s12, 1  ;;  %vm219_vm0 = vcmask (!%p157_p3), 1043456   ;;  %v751_v0 = vmov (!%p157_p3), 0.0   ;;  %v201_v1 = vld [vmem:[%s832_s2] sm:$0xff] (!%p157_p3)  ;;  %vm752_vm1 = vmmov (!%p157_p3), 0   ;;  %vm220_vm2 = vcmask (!%p157_p3), 1044480  }
   0x7   : > { %160 = sbr.rel (%p157_p3) target bundleno = 263 (0x107), region = 32  ;;  %655 = vmatprep.subr.bf16.mxu0 (!%p157_p3), %v751_v0  ;;  %661 = vmatprep.subr.bf16.mxu1 (!%p157_p3), %v751_v0  ;;  %v753_v2 = vmov (!%p157_p3), 65535   ;;  %v754_v4 = vmov (!%p157_p3), 0   ;;  %v202_v9 = vld [vmem:[%s831_s1] sm:$0xf] (!%p157_p3)  ;;  %vm215_vm3 = vcmask (!%p157_p3), 72704  }
   0x8   : > { %657 = vmatprep.mubr.msk.bf16.mxu0 (!%p157_p3), %vm752_vm1, %v751_v0  ;;  %663 = vmatprep.mubr.msk.bf16.mxu1 (!%p157_p3), %vm752_vm1, %v751_v0  ;;  %v221_v3 = vsel (!%p157_p3), %vm219_vm0, 4294967295, %v753_v2  ;;  %vm533_vm4 = vcmask (!%p157_p3), 125952  }
   0x9   : > { %720 = vset.pattern.permute.xlu0 (!%p157_p3), %v754_v4  ;;  %v222_v5 = vsel (!%p157_p3), %vm220_vm2, %v221_v3, 0 }
   0xa   : > { %207 = vperm.xlu0 (!%p157_p3), %720, %v201_v1  }
   0xe   : > { %s839_s12 = smov (!%p185_p4, %s741_s12), 1 }
   0xf   : > { %s691_s18 = smul.u32 48, %s839_s12  ;;  %s618_s24 = sshll.u32 %s839_s12, 2 }
  0x10   : > { %s199_s27 = scalar_lea.vmem %s833_s3, %s618_s24 }
  0x11   : > { %s192_s21 = scalar_lea.vmem %s830_s0, %s691_s18 }
  0x12   : > { %v721_v6 = vld [vmem:[%s192_s21] sm:$0x1f]   ;;  %v722_v7 = vld [vmem:[%s192_s21 + $0x8] sm:$0x1f]   ;;  %v723_v10 = vld [vmem:[%s192_s21 + $0x10] sm:$0x1f]  }
  0x13   : > { %v224_v8 = vand.u32 %v721_v6, %v222_v5  ;;  %v276_v11 = vand.u32 %v722_v7, %v222_v5  ;;  %v724_v12 = vld [vmem:[%s192_s21 + $0x18] sm:$0x1f]   ;;  %v329_v13 = vand.u32 %v723_v10, %v222_v5  ;;  %v725_v15 = vld [vmem:[%s192_s21 + $0x20] sm:$0x1f]   ;;  %v726_v16 = vld [vmem:[%s192_s21 + $0x28] sm:$0x1f]  }
  0x14   : > { %v382_v14 = vand.u32 %v724_v12, %v222_v5  ;;  %v435_v17 = vand.u32 %v725_v15, %v222_v5  ;;  %v488_v18 = vand.u32 %v726_v16, %v222_v5 }
  0x15   : > { %656 = vmatpush3.bf16.msra.mxu0 %v224_v8  ;;  %662 = vmatpush3.bf16.msra.mxu1 %v276_v11 }
  0x16   : > { %667 = vmatprep.subr.bf16.mxu0 %v751_v0  ;;  %673 = vmatprep.subr.bf16.mxu1 %v751_v0 }
  0x18   : > { %658 = vmatmul.mubr.msk.bf16.vlgmr.msra.gmra.mrb[0].mxu0 %vm215_vm3, %v202_v9  ;;  %664 = vmatmul.mubr.msk.bf16.vlgmr.msra.gmra.mrb[0].mxu1 %vm215_vm3, %v202_v9 }
  0x19   : > { %668 = vmatpush3.bf16.msra.mxu0 %v329_v13  ;;  %674 = vmatpush3.bf16.msra.mxu1 %v382_v14 }
  0x1a   : > { %669 = vmatprep.mubr.msk.bf16.mxu0 %vm752_vm1, %v751_v0  ;;  %675 = vmatprep.mubr.msk.bf16.mxu1 %vm752_vm1, %v751_v0 }
  0x1b   : > { %679 = vmatprep.subr.bf16.mxu0 %v751_v0  ;;  %685 = vmatprep.subr.bf16.mxu1 %v751_v0 }
  0x20   : > { %670 = vmatmul.mubr.msk.bf16.vlgmr.msra.gmra.mrb[4].mxu0 %vm215_vm3, %v202_v9  ;;  %676 = vmatmul.mubr.msk.bf16.vlgmr.msra.gmra.mrb[4].mxu1 %vm215_vm3, %v202_v9 }
  0x21   : > { %680 = vmatpush3.bf16.msra.mxu0 %v435_v17  ;;  %686 = vmatpush3.bf16.msra.mxu1 %v488_v18 }
  0x22   : > { %681 = vmatprep.mubr.msk.bf16.mxu0 %vm752_vm1, %v751_v0  ;;  %687 = vmatprep.mubr.msk.bf16.mxu1 %vm752_vm1, %v751_v0 }
  0x28   : > { %682 = vmatmul.mubr.msk.bf16.vlgmr.msra.gmra.mrb[8].mxu0 %vm215_vm3, %v202_v9  ;;  %688 = vmatmul.mubr.msk.bf16.vlgmr.msra.gmra.mrb[8].mxu1 %vm215_vm3, %v202_v9 }
  0x89   : > { %v208_v19 = vpop.permute.xlu0 %207 }
  0xeb   : > { %v260_v20 = vpop.f32.mrb[0].mxu0  ;;  %v312_v21 = vpop.f32.mrb[0].mxu1 }
  0xec   : > { %v659_v22 = vpop.f32.mrb[1].mxu0  ;;  %v261_v23 = vadd.f32 %v260_v20, %v208_v19  ;;  %v665_v24 = vpop.f32.mrb[1].mxu1  ;;  %v313_v26 = vadd.f32 %v312_v21, %v208_v19 }
  0xed   : > { %v263_v25 = vpop.f32.mrb[2].mxu0  ;;  %v315_v27 = vpop.f32.mrb[2].mxu1 }
  0xee   : > { %v660_v28 = vpop.f32.mrb[3].mxu0  ;;  %v266_v29 = vmax.f32 %v261_v23, 0.0  ;;  %v666_v30 = vpop.f32.mrb[3].mxu1  ;;  %v318_v31 = vmax.f32 %v313_v26, 0.0 }
  0xf0   : > { %v319_v32 = vmax.f32 %v266_v29, %v318_v31 }
  0xf3   : > { %v365_v33 = vpop.f32.mrb[4].mxu0  ;;  %v418_v35 = vpop.f32.mrb[4].mxu1 }
  0xf4   : > { %v366_v34 = vadd.f32 %v365_v33, %v208_v19  ;;  %v671_v36 = vpop.f32.mrb[5].mxu0  ;;  %v419_v37 = vadd.f32 %v418_v35, %v208_v19  ;;  %v677_v38 = vpop.f32.mrb[5].mxu1 }
  0xf5   : > { %v368_v39 = vpop.f32.mrb[6].mxu0  ;;  %v421_v41 = vpop.f32.mrb[6].mxu1 }
  0xf6   : > { %v371_v40 = vmax.f32 %v366_v34, 0.0  ;;  %v672_v42 = vpop.f32.mrb[7].mxu0  ;;  %v424_v43 = vmax.f32 %v419_v37, 0.0  ;;  %v678_v44 = vpop.f32.mrb[7].mxu1 }
  0xf8   : > { %v372_v45 = vmax.f32 %v319_v32, %v371_v40 }
  0xfa   : > { %v425_v46 = vmax.f32 %v372_v45, %v424_v43 }
  0xfb   : > { %v471_v47 = vpop.f32.mrb[8].mxu0  ;;  %v524_v49 = vpop.f32.mrb[8].mxu1 }
  0xfc   : > { %v472_v48 = vadd.f32 %v471_v47, %v208_v19  ;;  %v683_v50 = vpop.f32.mrb[9].mxu0  ;;  %v525_v51 = vadd.f32 %v524_v49, %v208_v19  ;;  %v689_v52 = vpop.f32.mrb[9].mxu1 }
  0xfd   : > { %v474_v53 = vpop.f32.mrb[10].mxu0  ;;  %v527_v55 = vpop.f32.mrb[10].mxu1 }
  0xfe   : > { %v477_v54 = vmax.f32 %v472_v48, 0.0  ;;  %v684_v56 = vpop.f32.mrb[11].mxu0  ;;  %v690_v57 = vpop.f32.mrb[11].mxu1  ;;  %v530_v59 = vmax.f32 %v525_v51, 0.0 }
 0x100   : > { %v478_v58 = vmax.f32 %v425_v46, %v477_v54 }
 0x102   : > { %v531_v60 = vmax.f32 %v478_v58, %v530_v59 }
 0x104   : > { %v532_v61 = vpack.c.bf16 %v531_v60, %v531_v60 }
 0x106   : > { %534 = vst.msk [vmem:[%s199_s27] sm:$0xf] %vm533_vm4, %v532_v61 }
 0x107 PF: > { %s13_s14 = sadd.s32 1, %s749_s14   ;;  %s834_s12 = smov %s745_s13 }
 0x108   : > { %p10_p5 = scmp.ge.s32.totalorder %s13_s14, 4   ;;  %s835_s13 = smov %s837_s15 }
 0x10a   :  { %12 = sbr.rel (!%p10_p5) target bundleno = 2 (0x2), region = 67 }

// kernel: network_forward.16
= control target key start
LH: loop header
LB: loop body
LE: loop exit
PB: predicated region body
PF: predicated region fallthrough
CT: control target
= control target key end

     0   :  { %s1171_s12 = smov 0   ;;  %s1173_s13 = smov 0   ;;  %s1318_s0 = inlined_call_operand.vmem [shape: bf16[2,12,9,16], index: 0, kind: input, shape index: {}]   ;;  %s1319_s1 = inlined_call_operand.vmem [shape: bf16[8,9], index: 1, kind: input, shape index: {}]   ;;  %s1320_s2 = inlined_call_operand.vmem [shape: f32[8,1], index: 2, kind: input, shape index: {}]   ;;  %s1321_s3 = inlined_call_operand.vmem [shape: bf16[2,8,16], index: 3, kind: output, shape index: {}]  }
   0x1   :  { %s1175_s14 = smov 0  }
   0x2 LB: > { %s25_s15 = sadd.s32 1, %s1141_s13  ;;  %p934_p0 = scmp.ge.s32.totalorder %s1145_s14, 1  ;;  %s1145_s14 = sphi %s1175_s14, %s13_s14   ;;  %s1141_s13 = sphi %s1173_s13, %s1323_s13   ;;  %s1137_s12 = sphi %s1171_s12, %s1322_s12  }
   0x3   : > { %p27_p1 = scmp.ge.s32.totalorder %s25_s15, 2  ;;  %p156_p2 = scmp.lt.s32.totalorder %s1145_s14, 3 }
   0x5   : > { %s1325_s15 = smov (%p27_p1, %s25_s15), 0  ;;  %p157_p3 = pnand %p934_p0, %p156_p2 }
   0x6   : > { %p185_p4 = scmp.lt.s32.totalorder (!%p157_p3), %s1137_s12, 1  ;;  %vm219_vm0 = vcmask (!%p157_p3), 1043456   ;;  %v1147_v0 = vmov (!%p157_p3), 0.0   ;;  %v201_v1 = vld [vmem:[%s1320_s2] sm:$0xff] (!%p157_p3)  ;;  %vm1148_vm1 = vmmov (!%p157_p3), 0   ;;  %vm220_vm2 = vcmask (!%p157_p3), 1044480  }
   0x7   : > { %160 = sbr.rel (%p157_p3) target bundleno = 287 (0x11f), region = 32  ;;  %1009 = vmatprep.subr.bf16.mxu0 (!%p157_p3), %v1147_v0  ;;  %1015 = vmatprep.subr.bf16.mxu1 (!%p157_p3), %v1147_v0  ;;  %v1149_v2 = vmov (!%p157_p3), 65535   ;;  %v1150_v4 = vmov (!%p157_p3), 0   ;;  %v1214_v9 = vld [vmem:[%s1319_s1] sm:$0xf] (!%p157_p3)  ;;  %vm215_vm3 = vcmask (!%p157_p3), 72704  }
   0x8   : > { %1011 = vmatprep.mubr.msk.bf16.mxu0 (!%p157_p3), %vm1148_vm1, %v1147_v0  ;;  %1017 = vmatprep.mubr.msk.bf16.mxu1 (!%p157_p3), %vm1148_vm1, %v1147_v0  ;;  %v221_v3 = vsel (!%p157_p3), %vm219_vm0, 4294967295, %v1149_v2  ;;  %vm851_vm4 = vcmask (!%p157_p3), 125952  }
   0x9   : > { %1110 = vset.pattern.permute.xlu0 (!%p157_p3), %v1150_v4  ;;  %v1206_v5 = vsel (!%p157_p3), %vm220_vm2, %v221_v3, 0 }
   0xa   : > { %207 = vperm.xlu0 (!%p157_p3), %1110, %v201_v1  }
   0xe   : > { %s1327_s12 = smov (!%p185_p4, %s1137_s12), 1 }
   0xf   : > { %s1081_s18 = smul.u32 96, %s1327_s12  ;;  %s936_s24 = sshll.u32 %s1327_s12, 2 }
  0x10   : > { %s199_s27 = scalar_lea.vmem %s1321_s3, %s936_s24 }
  0x11   : > { %s1204_s21 = scalar_lea.vmem %s1318_s0, %s1081_s18 }
  0x12   : > { %v1111_v6 = vld [vmem:[%s1204_s21] sm:$0x1f]   ;;  %v1112_v7 = vld [vmem:[%s1204_s21 + $0x8] sm:$0x1f]   ;;  %v1113_v10 = vld [vmem:[%s1204_s21 + $0x10] sm:$0x1f]  }
  0x13   : > { %v224_v8 = vand.u32 %v1111_v6, %v1206_v5  ;;  %v276_v11 = vand.u32 %v1112_v7, %v1206_v5  ;;  %v1114_v12 = vld [vmem:[%s1204_s21 + $0x18] sm:$0x1f]   ;;  %v329_v13 = vand.u32 %v1113_v10, %v1206_v5  ;;  %v1115_v15 = vld [vmem:[%s1204_s21 + $0x20] sm:$0x1f]   ;;  %v1116_v16 = vld [vmem:[%s1204_s21 + $0x28] sm:$0x1f]  }
  0x14   : > { %v382_v14 = vand.u32 %v1114_v12, %v1206_v5  ;;  %v435_v17 = vand.u32 %v1115_v15, %v1206_v5  ;;  %v488_v18 = vand.u32 %v1116_v16, %v1206_v5  ;;  %v1117_v19 = vld [vmem:[%s1204_s21 + $0x30] sm:$0x1f]   ;;  %v1118_v20 = vld [vmem:[%s1204_s21 + $0x38] sm:$0x1f]   ;;  %v1119_v23 = vld [vmem:[%s1204_s21 + $0x40] sm:$0x1f]  }
  0x15   : > { %1010 = vmatpush3.bf16.msra.mxu0 %v224_v8  ;;  %1016 = vmatpush3.bf16.msra.mxu1 %v276_v11  ;;  %v541_v21 = vand.u32 %v1117_v19, %v1206_v5  ;;  %v594_v22 = vand.u32 %v1118_v20, %v1206_v5  ;;  %v1120_v24 = vld [vmem:[%s1204_s21 + $0x48] sm:$0x1f]   ;;  %v647_v25 = vand.u32 %v1119_v23, %v1206_v5  ;;  %v1121_v27 = vld [vmem:[%s1204_s21 + $0x50] sm:$0x1f]   ;;  %v1122_v28 = vld [vmem:[%s1204_s21 + $0x58] sm:$0x1f]  }
  0x16   : > { %1021 = vmatprep.subr.bf16.mxu0 %v1147_v0  ;;  %1027 = vmatprep.subr.bf16.mxu1 %v1147_v0  ;;  %v700_v26 = vand.u32 %v1120_v24, %v1206_v5  ;;  %v753_v29 = vand.u32 %v1121_v27, %v1206_v5  ;;  %v806_v30 = vand.u32 %v1122_v28, %v1206_v5 }
  0x18   : > { %1012 = vmatmul.mubr.msk.bf16.vlgmr.msra.gmra.mrb[0].mxu0 %vm215_vm3, %v1214_v9  ;;  %1018 = vmatmul.mubr.msk.bf16.vlgmr.msra.gmra.mrb[0].mxu1 %vm215_vm3, %v1214_v9 }
  0x19   : > { %1022 = vmatpush3.bf16.msra.mxu0 %v329_v13  ;;  %1028 = vmatpush3.bf16.msra.mxu1 %v382_v14 }
  0x1a   : > { %1023 = vmatprep.mubr.msk.bf16.mxu0 %vm1148_vm1, %v1147_v0  ;;  %1029 = vmatprep.mubr.msk.bf16.mxu1 %vm1148_vm1, %v1147_v0 }
  0x1b   : > { %1033 = vmatprep.subr.bf16.mxu0 %v1147_v0  ;;  %1039 = vmatprep.subr.bf16.mxu1 %v1147_v0 }
  0x20   : > { %1024 = vmatmul.mubr.msk.bf16.vlgmr.msra.gmra.mrb[4].mxu0 %vm215_vm3, %v1214_v9  ;;  %1030 = vmatmul.mubr.msk.bf16.vlgmr.msra.gmra.mrb[4].mxu1 %vm215_vm3, %v1214_v9 }
  0x21   : > { %1034 = vmatpush3.bf16.msra.mxu0 %v435_v17  ;;  %1040 = vmatpush3.bf16.msra.mxu1 %v488_v18 }
  0x22   : > { %1035 = vmatprep.mubr.msk.bf16.mxu0 %vm1148_vm1, %v1147_v0  ;;  %1041 = vmatprep.mubr.msk.bf16.mxu1 %vm1148_vm1, %v1147_v0 }
  0x23   : > { %1045 = vmatprep.subr.bf16.mxu0 %v1147_v0  ;;  %1051 = vmatprep.subr.bf16.mxu1 %v1147_v0 }
  0x28   : > { %1036 = vmatmul.mubr.msk.bf16.vlgmr.msra.gmra.mrb[8].mxu0 %vm215_vm3, %v1214_v9  ;;  %1042 = vmatmul.mubr.msk.bf16.vlgmr.msra.gmra.mrb[8].mxu1 %vm215_vm3, %v1214_v9 }
  0x29   : > { %1046 = vmatpush3.bf16.msra.mxu0 %v541_v21  ;;  %1052 = vmatpush3.bf16.msra.mxu1 %v594_v22 }
  0x2a   : > { %1047 = vmatprep.mubr.msk.bf16.mxu0 %vm1148_vm1, %v1147_v0  ;;  %1053 = vmatprep.mubr.msk.bf16.mxu1 %vm1148_vm1, %v1147_v0 }
  0x2b   : > { %1057 = vmatprep.subr.bf16.mxu0 %v1147_v0  ;;  %1063 = vmatprep.subr.bf16.mxu1 %v1147_v0 }
  0x30   : > { %1048 = vmatmul.mubr.msk.bf16.vlgmr.msra.gmra.mrb[12].mxu0 %vm215_vm3, %v1214_v9  ;;  %1054 = vmatmul.mubr.msk.bf16.vlgmr.msra.gmra.mrb[12].mxu1 %vm215_vm3, %v1214_v9 }
  0x31   : > { %1058 = vmatpush3.bf16.msra.mxu0 %v647_v25  ;;  %1064 = vmatpush3.bf16.msra.mxu1 %v700_v26 }
  0x32   : > { %1059 = vmatprep.mubr.msk.bf16.mxu0 %vm1148_vm1, %v1147_v0  ;;  %1065 = vmatprep.mubr.msk.bf16.mxu1 %vm1148_vm1, %v1147_v0 }
  0x33   : > { %1069 = vmatprep.subr.bf16.mxu0 %v1147_v0  ;;  %1075 = vmatprep.subr.bf16.mxu1 %v1147_v0 }
  0x38   : > { %1060 = vmatmul.mubr.msk.bf16.vlgmr.msra.gmra.mrb[16].mxu0 %vm215_vm3, %v1214_v9  ;;  %1066 = vmatmul.mubr.msk.bf16.vlgmr.msra.gmra.mrb[16].mxu1 %vm215_vm3, %v1214_v9 }
  0x39   : > { %1070 = vmatpush3.bf16.msra.mxu0 %v753_v29  ;;  %1076 = vmatpush3.bf16.msra.mxu1 %v806_v30 }
  0x3a   : > { %1071 = vmatprep.mubr.msk.bf16.mxu0 %vm1148_vm1, %v1147_v0  ;;  %1077 = vmatprep.mubr.msk.bf16.mxu1 %vm1148_vm1, %v1147_v0 }
  0x40   : > { %1072 = vmatmul.mubr.msk.bf16.vlgmr.msra.gmra.mrb[20].mxu0 %vm215_vm3, %v1214_v9  ;;  %1078 = vmatmul.mubr.msk.bf16.vlgmr.msra.gmra.mrb[20].mxu1 %vm215_vm3, %v1214_v9 }
  0x89   : > { %v1291_v31 = vpop.permute.xlu0 %207 }
  0xeb   : > { %v260_v32 = vpop.f32.mrb[0].mxu0  ;;  %v312_v33 = vpop.f32.mrb[0].mxu1 }
  0xec   : > { %v1013_v34 = vpop.f32.mrb[1].mxu0  ;;  %v261_v35 = vadd.f32 %v260_v32, %v1291_v31  ;;  %v1019_v36 = vpop.f32.mrb[1].mxu1  ;;  %v313_v38 = vadd.f32 %v312_v33, %v1291_v31 }
  0xed   : > { %v263_v37 = vpop.f32.mrb[2].mxu0  ;;  %v315_v39 = vpop.f32.mrb[2].mxu1 }
  0xee   : > { %v1014_v40 = vpop.f32.mrb[3].mxu0  ;;  %v266_v41 = vmax.f32 %v261_v35, 0.0  ;;  %v1020_v42 = vpop.f32.mrb[3].mxu1  ;;  %v318_v43 = vmax.f32 %v313_v38, 0.0 }
  0xf0   : > { %v319_v44 = vmax.f32 %v266_v41, %v318_v43 }
  0xf3   : > { %v365_v45 = vpop.f32.mrb[4].mxu0  ;;  %v418_v47 = vpop.f32.mrb[4].mxu1 }
  0xf4   : > { %v366_v46 = vadd.f32 %v365_v45, %v1291_v31  ;;  %v1025_v48 = vpop.f32.mrb[5].mxu0  ;;  %v419_v49 = vadd.f32 %v418_v47, %v1291_v31  ;;  %v1031_v50 = vpop.f32.mrb[5].mxu1 }
  0xf5   : > { %v368_v51 = vpop.f32.mrb[6].mxu0  ;;  %v421_v53 = vpop.f32.mrb[6].mxu1 }
  0xf6   : > { %v371_v52 = vmax.f32 %v366_v46, 0.0  ;;  %v1026_v54 = vpop.f32.mrb[7].mxu0  ;;  %v424_v55 = vmax.f32 %v419_v49, 0.0  ;;  %v1032_v56 = vpop.f32.mrb[7].mxu1 }
  0xf8   : > { %v372_v57 = vmax.f32 %v319_v44, %v371_v52 }
  0xfa   : > { %v425_v58 = vmax.f32 %v372_v57, %v424_v55 }
  0xfb   : > { %v471_v59 = vpop.f32.mrb[8].mxu0  ;;  %v524_v61 = vpop.f32.mrb[8].mxu1 }
  0xfc   : > { %v472_v60 = vadd.f32 %v471_v59, %v1291_v31  ;;  %v1037_v62 = vpop.f32.mrb[9].mxu0  ;;  %v525_v63 = vadd.f32 %v524_v61, %v1291_v31  ;;  %v1043_v0 = vpop.f32.mrb[9].mxu1 }
  0xfd   : > { %v474_v1 = vpop.f32.mrb[10].mxu0  ;;  %v527_v3 = vpop.f32.mrb[10].mxu1 }
  0xfe   : > { %v477_v2 = vmax.f32 %v472_v60, 0.0  ;;  %v1038_v4 = vpop.f32.mrb[11].mxu0  ;;  %v530_v5 = vmax.f32 %v525_v63, 0.0  ;;  %v1044_v6 = vpop.f32.mrb[11].mxu1 }
 0x100   : > { %v478_v7 = vmax.f32 %v425_v58, %v477_v2 }
 0x102   : > { %v531_v8 = vmax.f32 %v478_v7, %v530_v5 }
 0x103   : > { %v577_v9 = vpop.f32.mrb[12].mxu0  ;;  %v630_v11 = vpop.f32.mrb[12].mxu1 }
 0x104   : > { %v578_v10 = vadd.f32 %v577_v9, %v1291_v31  ;;  %v1049_v12 = vpop.f32.mrb[13].mxu0  ;;  %v631_v13 = vadd.f32 %v630_v11, %v1291_v31  ;;  %v1055_v14 = vpop.f32.mrb[13].mxu1 }
 0x105   : > { %v580_v15 = vpop.f32.mrb[14].mxu0  ;;  %v633_v17 = vpop.f32.mrb[14].mxu1 }
 0x106   : > { %v583_v16 = vmax.f32 %v578_v10, 0.0  ;;  %v1050_v18 = vpop.f32.mrb[15].mxu0  ;;  %v1056_v19 = vpop.f32.mrb[15].mxu1  ;;  %v636_v21 = vmax.f32 %v631_v13, 0.0 }
 0x108   : > { %v584_v20 = vmax.f32 %v531_v8, %v583_v16 }
 0x10a   : > { %v637_v22 = vmax.f32 %v584_v20, %v636_v21 }
 0x10b   : > { %v683_v23 = vpop.f32.mrb[16].mxu0  ;;  %v736_v25 = vpop.f32.mrb[16].mxu1 }
 0x10c   : > { %v684_v24 = vadd.f32 %v683_v23, %v1291_v31  ;;  %v1061_v26 = vpop.f32.mrb[17].mxu0  ;;  %v737_v27 = vadd.f32 %v736_v25, %v1291_v31  ;;  %v1067_v28 = vpop.f32.mrb[17].mxu1 }
 0x10d   : > { %v686_v29 = vpop.f32.mrb[18].mxu0  ;;  %v739_v32 = vpop.f32.mrb[18].mxu1 }
 0x10e   : > { %v689_v30 = vmax.f32 %v684_v24, 0.0  ;;  %v1062_v33 = vpop.f32.mrb[19].mxu0  ;;  %v1068_v34 = vpop.f32.mrb[19].mxu1  ;;  %v742_v36 = vmax.f32 %v737_v27, 0.0 }
 0x110   : > { %v690_v35 = vmax.f32 %v637_v22, %v689_v30 }
 0x112   : > { %v743_v37 = vmax.f32 %v690_v35, %v742_v36 }
 0x113   : > { %v789_v38 = vpop.f32.mrb[20].mxu0  ;;  %v842_v40 = vpop.f32.mrb[20].mxu1 }
 0x114   : > { %v790_v39 = vadd.f32 %v789_v38, %v1291_v31  ;;  %v1073_v41 = vpop.f32.mrb[21].mxu0  ;;  %v843_v42 = vadd.f32 %v842_v40, %v1291_v31  ;;  %v1079_v43 = vpop.f32.mrb[21].mxu1 }
 0x115   : > { %v792_v44 = vpop.f32.mrb[22].mxu0  ;;  %v845_v46 = vpop.f32.mrb[22].mxu1 }
 0x116   : > { %v795_v45 = vmax.f32 %v790_v39, 0.0  ;;  %v1074_v47 = vpop.f32.mrb[23].mxu0  ;;  %v1080_v48 = vpop.f32.mrb[23].mxu1  ;;  %v848_v50 = vmax.f32 %v843_v42, 0.0 }
 0x118   : > { %v796_v49 = vmax.f32 %v743_v37, %v795_v45 }
 0x11a   : > { %v849_v51 = vmax.f32 %v796_v49, %v848_v50 }
 0x11c   : > { %v850_v52 = vpack.c.bf16 %v849_v51, %v849_v51 }
 0x11e   : > { %852 = vst.msk [vmem:[%s199_s27] sm:$0xf] %vm851_vm4, %v850_v52 }
 0x11f PF: > { %s13_s14 = sadd.s32 1, %s1145_s14   ;;  %s1322_s12 = smov %s1141_s13 }
 0x120   : > { %p10_p5 = scmp.ge.s32.totalorder %s13_s14, 4   ;;  %s1323_s13 = smov %s1325_s15 }
 0x122   :  { %12 = sbr.rel (!%p10_p5) target bundleno = 2 (0x2), region = 73 }

// kernel: network_forward.17
= control target key start
LH: loop header
LB: loop body
LE: loop exit
PB: predicated region body
PF: predicated region fallthrough
CT: control target
= control target key end

     0   :  { %s1033_s15 = smov 0   ;;  %s1035_s16 = smov 0   ;;  %s1207_s0 = inlined_call_operand.vmem [shape: bf16[2,40,16], index: 0, kind: input, shape index: {}]   ;;  %s1208_s1 = inlined_call_operand.vmem [shape: bf16[2,3,40,16], index: 1, kind: input, shape index: {}]   ;;  %s1209_s2 = inlined_call_operand.vmem [shape: bf16[128,40], index: 2, kind: input, shape index: {}]   ;;  %s1210_s3 = inlined_call_operand.vmem [shape: f32[128,1], index: 3, kind: input, shape index: {}]   ;;  %s1211_s4 = inlined_call_operand.vmem [shape: bf16[2,128,16], index: 4, kind: output, shape index: {}]  }
   0x1   :  { %s1037_s17 = smov 0  }
   0x2 LB: > { %s26_s18 = sadd.s32 1, %s1001_s16  ;;  %p801_p0 = scmp.ge.s32.totalorder %s1005_s17, 1  ;;  %s1005_s17 = sphi %s1037_s17, %s14_s17   ;;  %s1001_s16 = sphi %s1035_s16, %s1213_s16   ;;  %s997_s15 = sphi %s1033_s15, %s1212_s15  }
   0x3   : > { %p28_p1 = scmp.ge.s32.totalorder %s26_s18, 2  ;;  %p196_p2 = scmp.lt.s32.totalorder %s1005_s17, 3 }
   0x5   : > { %s1215_s18 = smov (%p28_p1, %s26_s18), 0  ;;  %p197_p3 = pnand %p801_p0, %p196_p2 }
   0x6   : > { %p236_p4 = scmp.lt.s32.totalorder (!%p197_p3), %s997_s15, 1  ;;  %v975_v0 = vld [vmem:[%s1209_s2] sm:$0xff] (!%p197_p3)   ;;  %vm473_vm0 = vcmask (!%p197_p3), 326656   ;;  %v1007_v2 = vmov (!%p197_p3), 0   ;;  %v339_v34 = vld [vmem:[%s1210_s3 + $0x10] sm:$0xff] (!%p197_p3)  ;;  %v340_v43 = vld [vmem:[%s1210_s3 + $0x18] sm:$0xff] (!%p197_p3) }
   0x7   : > { %200 = sbr.rel (%p197_p3) target bundleno = 272 (0x110), region = 36  ;;  %v976_v1 = vld [vmem:[%s1209_s2 + $0x20] sm:$0xff] (!%p197_p3)   ;;  %922 = vmatprep.mubr.msk.bf16.mxu0 (!%p197_p3), %vm473_vm0, %v975_v0  ;;  %974 = vset.pattern.permute.xlu1 (!%p197_p3), %v1007_v2  ;;  %v338_v44 = vld [vmem:[%s1210_s3 + $0x8] sm:$0xff] (!%p197_p3)  ;;  %vm498_vm1 = vcmask (!%p197_p3), 1043456   ;;  %v344_v58 = vld [vmem:[%s1210_s3 + $0x38] sm:$0xff] (!%p197_p3)  ;;  %vm679_vm2 = vcmask (!%p197_p3), 125952  }
   0x8   : > { %930 = vmatprep.mubr.msk.bf16.mxu1 (!%p197_p3), %vm473_vm0, %v976_v1  ;;  %973 = vset.pattern.permute.xlu0 (!%p197_p3), %v1007_v2  ;;  %v337_v35 = vld [vmem:[%s1210_s3] sm:$0xff] (!%p197_p3)  ;;  %v342_v55 = vld [vmem:[%s1210_s3 + $0x28] sm:$0xff] (!%p197_p3)  ;;  %v343_v59 = vld [vmem:[%s1210_s3 + $0x30] sm:$0xff] (!%p197_p3) }
   0x9   : > { %365 = vperm.xlu1 (!%p197_p3), %974, %v339_v34   ;;  %355 = vperm.xlu0 (!%p197_p3), %973, %v337_v35   ;;  %v341_v56 = vld [vmem:[%s1210_s3 + $0x20] sm:$0xff] (!%p197_p3)  ;;  %v977_v61 = vld [vmem:[%s1209_s2 + $0x8] sm:$0xff] (!%p197_p3)   ;;  %v979_v1 = vld [vmem:[%s1209_s2 + $0x10] sm:$0xff] (!%p197_p3)  }
   0xa   : > { %v978_v62 = vld [vmem:[%s1209_s2 + $0x28] sm:$0xff] (!%p197_p3)   ;;  %v345_v0 = vld [vmem:[%s1210_s3 + $0x40] sm:$0xff] (!%p197_p3)  ;;  %v980_v2 = vld [vmem:[%s1209_s2 + $0x30] sm:$0xff] (!%p197_p3)  }
   0xb   : > { %v346_v63 = vld [vmem:[%s1210_s3 + $0x48] sm:$0xff] (!%p197_p3) }
   0xd   : > { %370 = vperm.xlu1 (!%p197_p3), %974, %v340_v43   ;;  %360 = vperm.xlu0 (!%p197_p3), %973, %v338_v44  }
   0xe   : > { %s1217_s15 = smov (!%p236_p4, %s997_s15), 1 }
   0xf   : > { %s946_s23 = smul.u32 20, %s1217_s15  ;;  %s850_s5 = sshll.u32 %s1217_s15, 6 }
  0x10   : > { %s947_s24 = smul.u32 60, %s1217_s15  ;;  %s1161_s8 = scalar_lea.vmem %s1211_s4, %s850_s5 }
  0x11   : > { %s243_s27 = scalar_lea.vmem %s1207_s0, %s946_s23  ;;  %380 = vperm.xlu1 %974, %v342_v55   ;;  %375 = vperm.xlu0 %973, %v341_v56  }
  0x12   : > { %s1069_s30 = scalar_lea.vmem %s1208_s1, %s947_s24  ;;  %v868_v3 = vld [vmem:[%s243_s27] sm:$0xff]   ;;  %v899_v4 = vld [vmem:[%s243_s27 + $0x8] sm:$0xff]   ;;  %v265_v24 = vld [vmem:[%s243_s27 + $0x10] sm:$0xf] }
  0x13   : > { %v869_v5 = vunpack.c.l.bf16 %v868_v3  ;;  %v870_v6 = vunpack.c.h.bf16 %v868_v3  ;;  %v876_v7 = vld [vmem:[%s1069_s30] sm:$0xff]   ;;  %v806_v8 = vld [vmem:[%s1069_s30 + $0x10] sm:$0xff]   ;;  %v901_v9 = vld [vmem:[%s1069_s30 + $0x18] sm:$0xff]   ;;  %v873_v10 = vunpack.c.l.bf16 %v899_v4  ;;  %v874_v11 = vunpack.c.h.bf16 %v899_v4 }
  0x14   : > { %v877_v12 = vunpack.c.l.bf16 %v876_v7  ;;  %v878_v13 = vunpack.c.h.bf16 %v876_v7  ;;  %v885_v14 = vunpack.c.l.bf16 %v901_v9  ;;  %v292_v15 = vunpack.c.h.bf16 %v806_v8  ;;  %v903_v16 = vld [vmem:[%s1069_s30 + $0x28] sm:$0xff]   ;;  %v902_v18 = vld [vmem:[%s1069_s30 + $0x20] sm:$0xff]   ;;  %v904_v23 = vld [vmem:[%s1069_s30 + $0x30] sm:$0xff]  }
  0x15   : > { %v900_v17 = vld [vmem:[%s1069_s30 + $0x8] sm:$0xff]   ;;  %v893_v19 = vunpack.c.l.bf16 %v903_v16  ;;  %v894_v20 = vunpack.c.h.bf16 %v903_v16  ;;  %v886_v27 = vunpack.c.h.bf16 %v901_v9  ;;  %v889_v28 = vunpack.c.l.bf16 %v902_v18  ;;  %v815_v33 = vld [vmem:[%s1069_s30 + $0x38] sm:$0xf]  ;;  %390 = vperm.xlu1 %974, %v344_v58   ;;  %385 = vperm.xlu0 %973, %v343_v59   ;;  %v347_v4 = vld [vmem:[%s1210_s3 + $0x50] sm:$0xff] }
  0x16   : > { %v881_v21 = vunpack.c.l.bf16 %v900_v17  ;;  %v882_v22 = vunpack.c.h.bf16 %v900_v17  ;;  %v281_v25 = vadd.f32 %v877_v12, %v869_v5  ;;  %v282_v26 = vadd.f32 %v878_v13, %v870_v6  ;;  %v348_v3 = vld [vmem:[%s1210_s3 + $0x58] sm:$0xff]  ;;  %v350_v7 = vld [vmem:[%s1210_s3 + $0x68] sm:$0xff] }
  0x17   : > { %v897_v31 = vunpack.c.l.bf16 %v904_v23  ;;  %v898_v32 = vunpack.c.h.bf16 %v904_v23  ;;  %v270_v38 = vunpack.c.l.bf16 %v265_v24  ;;  %v280_v39 = vunpack.c.l.bf16 %v806_v8  ;;  %v981_v5 = vld [vmem:[%s1209_s2 + $0x18] sm:$0xff]   ;;  %v349_v8 = vld [vmem:[%s1210_s3 + $0x60] sm:$0xff] }
  0x18   : > { %v283_v29 = vadd.f32 %v881_v21, %v873_v10  ;;  %v284_v30 = vadd.f32 %v882_v22, %v874_v11  ;;  %v297_v36 = vadd.f32 %v292_v15, %v281_v25  ;;  %v298_v37 = vadd.f32 %v885_v14, %v282_v26  ;;  %v982_v6 = vld [vmem:[%s1209_s2 + $0x38] sm:$0xff]   ;;  %v351_v10 = vld [vmem:[%s1210_s3 + $0x70] sm:$0xff] }
  0x19   : > { %v890_v42 = vunpack.c.h.bf16 %v902_v18  ;;  %v285_v47 = vadd.f32 %v280_v39, %v270_v38  ;;  %v312_v48 = vunpack.c.l.bf16 %v815_v33  ;;  %400 = vperm.xlu1 %974, %v346_v63   ;;  %395 = vperm.xlu0 %973, %v345_v0   ;;  %v352_v9 = vld [vmem:[%s1210_s3 + $0x78] sm:$0xff] }
  0x1a   : > { %v299_v40 = vadd.f32 %v886_v27, %v283_v29  ;;  %v300_v41 = vadd.f32 %v889_v28, %v284_v30  ;;  %v313_v45 = vadd.f32 %v893_v19, %v297_v36  ;;  %v314_v46 = vadd.f32 %v894_v20, %v298_v37 }
  0x1b   : > { %v301_v52 = vadd.f32 %v890_v42, %v285_v47 }
  0x1c   : > { %v315_v49 = vadd.f32 %v897_v31, %v299_v40  ;;  %v316_v50 = vadd.f32 %v898_v32, %v300_v41  ;;  %v334_v51 = vpack.c.bf16 %v314_v46, %v313_v45 }
  0x1d   : > { %v317_v54 = vadd.f32 %v312_v48, %v301_v52  ;;  %410 = vperm.xlu1 %974, %v348_v3   ;;  %405 = vperm.xlu0 %973, %v347_v4  }
  0x1e   : > { %v335_v53 = vpack.c.bf16 %v316_v50, %v315_v49  ;;  %916 = vmatprep.subr.bf16.mxu0 %v334_v51  ;;  %938 = vmatprep.subr.bf16.mxu1 %v334_v51 }
  0x1f   : > { %917 = vmatpush3.bf16.msra.mxu0 %v334_v51  ;;  %941 = vmatpush3.bf16.msra.mxu1 %v334_v51  ;;  %v336_v57 = vpack.c.bf16 %v317_v54, %v317_v54 }
  0x20   : > { %918 = vmatprep.subr.bf16.mxu0 %v335_v53  ;;  %939 = vmatprep.subr.bf16.mxu1 %v335_v53 }
  0x21   : > { %v500_v60 = vsel %vm498_vm1, %v336_v57, 0  ;;  %420 = vperm.xlu1 %974, %v350_v7   ;;  %415 = vperm.xlu0 %973, %v349_v8  }
  0x23   : > { %919 = vmatpush3.bf16.msra.mxu0 %v335_v53  ;;  %942 = vmatpush3.bf16.msra.mxu1 %v335_v53 }
  0x24   : > { %944 = vmatprep.subr.msk.bf16.mxu0 %vm498_vm1, %v336_v57  ;;  %945 = vmatprep.subr.msk.bf16.mxu1 %vm498_vm1, %v336_v57 }
  0x25   : > { %430 = vperm.xlu1 %974, %v352_v9   ;;  %425 = vperm.xlu0 %973, %v351_v10  }
  0x27   : > { %921 = vmatpush3.bf16.msra.mxu0 %v500_v60  ;;  %943 = vmatpush3.bf16.msra.mxu1 %v500_v60 }
  0x2a   : > { %923 = vmatmul.mubr.msk.bf16.vlgmr.msra.gmra.mrb[0].mxu0 %vm473_vm0, %v977_v61  ;;  %931 = vmatmul.mubr.msk.bf16.vlgmr.msra.gmra.mrb[0].mxu1 %vm473_vm0, %v978_v62 }
  0x2b   : > { %926 = vmatprep.mubr.msk.bf16.mxu0 %vm473_vm0, %v979_v1  ;;  %934 = vmatprep.mubr.msk.bf16.mxu1 %vm473_vm0, %v980_v2 }
  0x32   : > { %927 = vmatmul.mubr.msk.bf16.gmra.mrb[4].mxu0 %vm473_vm0, %v981_v5  ;;  %935 = vmatmul.mubr.msk.bf16.gmra.mrb[4].mxu1 %vm473_vm0, %v982_v6 }
  0x88   : > { %v366_v11 = vpop.permute.xlu1 %365  ;;  %v356_v12 = vpop.permute.xlu0 %355 }
  0x8c   : > { %v371_v13 = vpop.permute.xlu1 %370  ;;  %v361_v14 = vpop.permute.xlu0 %360 }
  0x90   : > { %v1151_v15 = vpop.permute.xlu1 %380  ;;  %v376_v16 = vpop.permute.xlu0 %375 }
  0x94   : > { %v1153_v17 = vpop.permute.xlu1 %390  ;;  %v386_v18 = vpop.permute.xlu0 %385 }
  0x98   : > { %v401_v19 = vpop.permute.xlu1 %400  ;;  %v396_v20 = vpop.permute.xlu0 %395 }
  0x9c   : > { %v411_v21 = vpop.permute.xlu1 %410  ;;  %v406_v22 = vpop.permute.xlu0 %405 }
  0xa0   : > { %v1155_v23 = vpop.permute.xlu1 %420  ;;  %v416_v24 = vpop.permute.xlu0 %415 }
  0xa4   : > { %v431_v53 = vpop.permute.xlu1 %430  ;;  %v426_v54 = vpop.permute.xlu0 %425 }
  0xfd   : > { %v924_v25 = vpop.f32.mrb[0].mxu0  ;;  %v932_v26 = vpop.f32.mrb[0].mxu1 }
  0xfe   : > { %v545_v27 = vadd.f32 %v924_v25, %v366_v11  ;;  %v577_v28 = vadd.f32 %v932_v26, %v406_v22  ;;  %v536_v29 = vpop.f32.mrb[1].mxu0  ;;  %v568_v30 = vpop.f32.mrb[1].mxu1 }
  0xff   : > { %v537_v31 = vadd.f32 %v536_v29, %v356_v12  ;;  %v569_v32 = vadd.f32 %v568_v30, %v396_v20  ;;  %v925_v33 = vpop.f32.mrb[2].mxu0  ;;  %v933_v34 = vpop.f32.mrb[2].mxu1 }
 0x100   : > { %v601_v35 = vmax.f32 %v545_v27, 0.0  ;;  %v609_v36 = vmax.f32 %v577_v28, 0.0  ;;  %v548_v37 = vadd.f32 %v925_v33, %v371_v13  ;;  %v580_v38 = vadd.f32 %v933_v34, %v411_v21  ;;  %v539_v39 = vpop.f32.mrb[3].mxu0  ;;  %v571_v40 = vpop.f32.mrb[3].mxu1 }
 0x101   : > { %v599_v41 = vmax.f32 %v537_v31, 0.0  ;;  %v607_v42 = vmax.f32 %v569_v32, 0.0  ;;  %v540_v43 = vadd.f32 %v539_v39, %v361_v14  ;;  %v572_v44 = vadd.f32 %v571_v40, %v401_v19 }
 0x102   : > { %v853_v45 = vpack.c.bf16 %v601_v35, %v601_v35  ;;  %v861_v46 = vpack.c.bf16 %v609_v36, %v609_v36  ;;  %v602_v47 = vmax.f32 %v548_v37, 0.0  ;;  %v610_v48 = vmax.f32 %v580_v38, 0.0 }
 0x103   : > { %v851_v49 = vpack.c.bf16 %v599_v41, %v599_v41  ;;  %v859_v50 = vpack.c.bf16 %v607_v42, %v607_v42  ;;  %v600_v51 = vmax.f32 %v540_v43, 0.0  ;;  %v608_v52 = vmax.f32 %v572_v44, 0.0 }
 0x104   : > { %682 = vst.msk [vmem:[%s1161_s8 + $0x8] sm:$0xf] %vm679_vm2, %v853_v45  ;;  %690 = vst.msk [vmem:[%s1161_s8 + $0x28] sm:$0xf] %vm679_vm2, %v861_v46  ;;  %v854_v55 = vpack.c.bf16 %v602_v47, %v602_v47  ;;  %v862_v56 = vpack.c.bf16 %v610_v48, %v610_v48 }
 0x105   : > { %680 = vst.msk [vmem:[%s1161_s8] sm:$0xf] %vm679_vm2, %v851_v49  ;;  %688 = vst.msk [vmem:[%s1161_s8 + $0x20] sm:$0xf] %vm679_vm2, %v859_v50  ;;  %v852_v57 = vpack.c.bf16 %v600_v51, %v600_v51  ;;  %v860_v58 = vpack.c.bf16 %v608_v52, %v608_v52  ;;  %v928_v59 = vpop.f32.mrb[4].mxu0  ;;  %v936_v60 = vpop.f32.mrb[4].mxu1 }
 0x106   : > { %683 = vst.msk [vmem:[%s1161_s8 + $0xc] sm:$0xf] %vm679_vm2, %v854_v55  ;;  %691 = vst.msk [vmem:[%s1161_s8 + $0x2c] sm:$0xf] %vm679_vm2, %v862_v56  ;;  %v561_v61 = vadd.f32 %v928_v59, %v386_v18  ;;  %v593_v62 = vadd.f32 %v936_v60, %v426_v54  ;;  %v552_v63 = vpop.f32.mrb[5].mxu0  ;;  %v584_v0 = vpop.f32.mrb[5].mxu1 }
 0x107   : > { %681 = vst.msk [vmem:[%s1161_s8 + $0x4] sm:$0xf] %vm679_vm2, %v852_v57  ;;  %689 = vst.msk [vmem:[%s1161_s8 + $0x24] sm:$0xf] %vm679_vm2, %v860_v58  ;;  %v553_v1 = vadd.f32 %v552_v63, %v376_v16  ;;  %v585_v2 = vadd.f32 %v584_v0, %v416_v24  ;;  %v929_v3 = vpop.f32.mrb[6].mxu0  ;;  %v937_v4 = vpop.f32.mrb[6].mxu1 }
 0x108   : > { %v605_v5 = vmax.f32 %v561_v61, 0.0  ;;  %v613_v6 = vmax.f32 %v593_v62, 0.0  ;;  %v564_v7 = vadd.f32 %v929_v3, %v1153_v17  ;;  %v596_v8 = vadd.f32 %v937_v4, %v431_v53  ;;  %v555_v9 = vpop.f32.mrb[7].mxu0  ;;  %v587_v10 = vpop.f32.mrb[7].mxu1 }
 0x109   : > { %v603_v11 = vmax.f32 %v553_v1, 0.0  ;;  %v611_v12 = vmax.f32 %v585_v2, 0.0  ;;  %v556_v13 = vadd.f32 %v555_v9, %v1151_v15  ;;  %v588_v14 = vadd.f32 %v587_v10, %v1155_v23 }
 0x10a   : > { %v857_v16 = vpack.c.bf16 %v605_v5, %v605_v5  ;;  %v865_v18 = vpack.c.bf16 %v613_v6, %v613_v6  ;;  %v606_v19 = vmax.f32 %v564_v7, 0.0  ;;  %v614_v17 = vmax.f32 %v596_v8, 0.0 }
 0x10b   : > { %v855_v20 = vpack.c.bf16 %v603_v11, %v603_v11  ;;  %v863_v21 = vpack.c.bf16 %v611_v12, %v611_v12  ;;  %v604_v22 = vmax.f32 %v556_v13, 0.0  ;;  %v612_v24 = vmax.f32 %v588_v14, 0.0 }
 0x10c   : > { %686 = vst.msk [vmem:[%s1161_s8 + $0x18] sm:$0xf] %vm679_vm2, %v857_v16  ;;  %694 = vst.msk [vmem:[%s1161_s8 + $0x38] sm:$0xf] %vm679_vm2, %v865_v18  ;;  %v858_v25 = vpack.c.bf16 %v606_v19, %v606_v19  ;;  %v866_v15 = vpack.c.bf16 %v614_v17, %v614_v17 }
 0x10d   : > { %684 = vst.msk [vmem:[%s1161_s8 + $0x10] sm:$0xf] %vm679_vm2, %v855_v20  ;;  %692 = vst.msk [vmem:[%s1161_s8 + $0x30] sm:$0xf] %vm679_vm2, %v863_v21  ;;  %v856_v23 = vpack.c.bf16 %v604_v22, %v604_v22  ;;  %v864_v26 = vpack.c.bf16 %v612_v24, %v612_v24 }
 0x10e   : > { %687 = vst.msk [vmem:[%s1161_s8 + $0x1c] sm:$0xf] %vm679_vm2, %v858_v25  ;;  %695 = vst.msk [vmem:[%s1161_s8 + $0x3c] sm:$0xf] %vm679_vm2, %v866_v15 }
 0x10f   : > { %685 = vst.msk [vmem:[%s1161_s8 + $0x14] sm:$0xf] %vm679_vm2, %v856_v23  ;;  %693 = vst.msk [vmem:[%s1161_s8 + $0x34] sm:$0xf] %vm679_vm2, %v864_v26 }
 0x110 PF: > { %s14_s17 = sadd.s32 1, %s1005_s17   ;;  %s1212_s15 = smov %s1001_s16 }
 0x111   : > { %p11_p5 = scmp.ge.s32.totalorder %s14_s17, 4   ;;  %s1213_s16 = smov %s1215_s18 }
 0x113   :  { %13 = sbr.rel (!%p11_p5) target bundleno = 2 (0x2), region = 71 }

// kernel: network_forward.18
= control target key start
LH: loop header
LB: loop body
LE: loop exit
PB: predicated region body
PF: predicated region fallthrough
CT: control target
= control target key end

     0   :  { %s903_s15 = smov 0   ;;  %s905_s16 = smov 0   ;;  %s995_s0 = inlined_call_operand.vmem [shape: bf16[2,128,16], index: 0, kind: input, shape index: {}]   ;;  %s996_s1 = inlined_call_operand.vmem [shape: bf16[2,3,128,16], index: 1, kind: input, shape index: {}]   ;;  %s997_s2 = inlined_call_operand.vmem [shape: bf16[8,128], index: 2, kind: input, shape index: {}]   ;;  %s998_s3 = inlined_call_operand.vmem [shape: f32[8,1], index: 3, kind: input, shape index: {}]   ;;  %s999_s4 = inlined_call_operand.vmem [shape: bf16[2,8,16], index: 4, kind: output, shape index: {}]  }
   0x1   :  { %s907_s17 = smov 0  }
   0x2 LB: > { %s26_s18 = sadd.s32 1, %s869_s16  ;;  %p595_p0 = scmp.ge.s32.totalorder %s873_s17, 1  ;;  %s873_s17 = sphi %s907_s17, %s14_s17   ;;  %s869_s16 = sphi %s905_s16, %s1001_s16   ;;  %s865_s15 = sphi %s903_s15, %s1000_s15  }
   0x3   : > { %p28_p1 = scmp.ge.s32.totalorder %s26_s18, 2  ;;  %p196_p2 = scmp.lt.s32.totalorder %s873_s17, 3 }
   0x5   : > { %s1003_s18 = smov (%p28_p1, %s26_s18), 0  ;;  %p197_p3 = pnand %p595_p0, %p196_p2 }
   0x6   : > { %p235_p4 = scmp.lt.s32.totalorder (!%p197_p3), %s865_s15, 1  ;;  %v875_v0 = vmov (!%p197_p3), 0.0   ;;  %vm876_vm0 = vmmov (!%p197_p3), 0   ;;  %v446_v1 = vld [vmem:[%s998_s3] sm:$0xff] (!%p197_p3)  ;;  %v877_v2 = vmov (!%p197_p3), 0   ;;  %vm494_vm1 = vcmask (!%p197_p3), 125952  }
   0x7   : > { %200 = sbr.rel (%p197_p3) target bundleno = 279 (0x117), region = 36  ;;  %802 = vmatprep.subr.bf16.mxu0 (!%p197_p3), %v875_v0  ;;  %818 = vmatprep.mubr.msk.bf16.mxu0 (!%p197_p3), %vm876_vm0, %v875_v0 }
   0x8   : > { %850 = vset.pattern.permute.xlu0 (!%p197_p3), %v877_v2 }
   0x9   : > { %449 = vperm.xlu0 (!%p197_p3), %850, %v446_v1  }
   0xe   : > { %s1005_s15 = smov (!%p235_p4, %s865_s15), 1 }
   0xf   : > { %s634_s21 = sshll.u32 %s1005_s15, 6  ;;  %s822_s22 = smul.u32 192, %s1005_s15 }
  0x10   : > { %s933_s25 = scalar_lea.vmem %s995_s0, %s634_s21  ;;  %s599_s5 = sshll.u32 %s1005_s15, 2 }
  0x11   : > { %s938_s28 = scalar_lea.vmem %s996_s1, %s822_s22  ;;  %v636_v3 = vld [vmem:[%s933_s25] sm:$0xff]   ;;  %v763_v4 = vld [vmem:[%s933_s25 + $0x8] sm:$0xff]   ;;  %v764_v23 = vld [vmem:[%s933_s25 + $0x10] sm:$0xff]   ;;  %s257_s8 = scalar_lea.vmem %s999_s4, %s599_s5 }
  0x12   : > { %v637_v5 = vunpack.c.l.bf16 %v636_v3  ;;  %v638_v6 = vunpack.c.h.bf16 %v636_v3  ;;  %v668_v7 = vld [vmem:[%s938_s28] sm:$0xff]   ;;  %v641_v10 = vunpack.c.l.bf16 %v763_v4  ;;  %v642_v11 = vunpack.c.h.bf16 %v763_v4  ;;  %v770_v16 = vld [vmem:[%s938_s28 + $0x8] sm:$0xff]   ;;  %v771_v28 = vld [vmem:[%s938_s28 + $0x10] sm:$0xff]  }
  0x13   : > { %v777_v8 = vld [vmem:[%s938_s28 + $0x40] sm:$0xff]   ;;  %v669_v12 = vunpack.c.l.bf16 %v668_v7  ;;  %v670_v13 = vunpack.c.h.bf16 %v668_v7  ;;  %v778_v17 = vld [vmem:[%s938_s28 + $0x48] sm:$0xff]   ;;  %v673_v21 = vunpack.c.l.bf16 %v770_v16  ;;  %v674_v22 = vunpack.c.h.bf16 %v770_v16  ;;  %v779_v33 = vld [vmem:[%s938_s28 + $0x50] sm:$0xff]  }
  0x14   : > { %v785_v9 = vld [vmem:[%s938_s28 + $0x80] sm:$0xff]   ;;  %v701_v14 = vunpack.c.l.bf16 %v777_v8  ;;  %v702_v15 = vunpack.c.h.bf16 %v777_v8  ;;  %v786_v18 = vld [vmem:[%s938_s28 + $0x88] sm:$0xff]   ;;  %v705_v26 = vunpack.c.l.bf16 %v778_v17  ;;  %v706_v27 = vunpack.c.h.bf16 %v778_v17  ;;  %v787_v42 = vld [vmem:[%s938_s28 + $0x90] sm:$0xff]  }
  0x15   : > { %v733_v19 = vunpack.c.l.bf16 %v785_v9  ;;  %v734_v20 = vunpack.c.h.bf16 %v785_v9  ;;  %v323_v24 = vadd.f32 %v669_v12, %v637_v5  ;;  %v324_v25 = vadd.f32 %v670_v13, %v638_v6  ;;  %v765_v43 = vld [vmem:[%s933_s25 + $0x18] sm:$0xff]   ;;  %v766_v63 = vld [vmem:[%s933_s25 + $0x20] sm:$0xff]   ;;  %v767_v16 = vld [vmem:[%s933_s25 + $0x28] sm:$0xff]  }
  0x16   : > { %v325_v29 = vadd.f32 %v673_v21, %v641_v10  ;;  %v326_v30 = vadd.f32 %v674_v22, %v642_v11  ;;  %v737_v31 = vunpack.c.l.bf16 %v786_v18  ;;  %v738_v32 = vunpack.c.h.bf16 %v786_v18  ;;  %v772_v52 = vld [vmem:[%s938_s28 + $0x18] sm:$0xff]   ;;  %v773_v5 = vld [vmem:[%s938_s28 + $0x20] sm:$0xff]   ;;  %v774_v21 = vld [vmem:[%s938_s28 + $0x28] sm:$0xff]  }
  0x17   : > { %v372_v34 = vadd.f32 %v701_v14, %v323_v24  ;;  %v373_v35 = vadd.f32 %v702_v15, %v324_v25  ;;  %v645_v36 = vunpack.c.l.bf16 %v764_v23  ;;  %v646_v37 = vunpack.c.h.bf16 %v764_v23  ;;  %v780_v53 = vld [vmem:[%s938_s28 + $0x58] sm:$0xff]   ;;  %v781_v6 = vld [vmem:[%s938_s28 + $0x60] sm:$0xff]  }
  0x18   : > { %v374_v38 = vadd.f32 %v705_v26, %v325_v29  ;;  %v375_v39 = vadd.f32 %v706_v27, %v326_v30  ;;  %v677_v40 = vunpack.c.l.bf16 %v771_v28  ;;  %v678_v41 = vunpack.c.h.bf16 %v771_v28  ;;  %v788_v58 = vld [vmem:[%s938_s28 + $0x98] sm:$0xff]   ;;  %v789_v11 = vld [vmem:[%s938_s28 + $0xa0] sm:$0xff]   ;;  %v782_v26 = vld [vmem:[%s938_s28 + $0x68] sm:$0xff]  }
  0x19   : > { %v421_v44 = vadd.f32 %v733_v19, %v372_v34  ;;  %v422_v45 = vadd.f32 %v734_v20, %v373_v35  ;;  %v709_v46 = vunpack.c.l.bf16 %v779_v33  ;;  %v710_v47 = vunpack.c.h.bf16 %v779_v33 }
  0x1a   : > { %v423_v48 = vadd.f32 %v737_v31, %v374_v38  ;;  %v424_v49 = vadd.f32 %v738_v32, %v375_v39  ;;  %v327_v50 = vadd.f32 %v677_v40, %v645_v36  ;;  %v328_v51 = vadd.f32 %v678_v41, %v646_v37  ;;  %v790_v31 = vld [vmem:[%s938_s28 + $0xa8] sm:$0xff]   ;;  %v768_v40 = vld [vmem:[%s933_s25 + $0x30] sm:$0xff]  }
  0x1b   : > { %v438_v54 = vpack.c.bf16 %v422_v45, %v421_v44  ;;  %v741_v55 = vunpack.c.l.bf16 %v787_v42  ;;  %v742_v56 = vunpack.c.h.bf16 %v787_v42  ;;  %v649_v57 = vunpack.c.l.bf16 %v765_v43  ;;  %v775_v41 = vld [vmem:[%s938_s28 + $0x30] sm:$0xff]  }
  0x1c   : > { %v439_v59 = vpack.c.bf16 %v424_v49, %v423_v48  ;;  %v376_v60 = vadd.f32 %v709_v46, %v327_v50  ;;  %v377_v61 = vadd.f32 %v710_v47, %v328_v51  ;;  %v650_v62 = vunpack.c.h.bf16 %v765_v43  ;;  %v783_v46 = vld [vmem:[%s938_s28 + $0x70] sm:$0xff]  }
  0x1d   : > { %803 = vmatpush3.bf16.msra.mxu0 %v438_v54  ;;  %v681_v1 = vunpack.c.l.bf16 %v772_v52  ;;  %v682_v2 = vunpack.c.h.bf16 %v772_v52  ;;  %v713_v3 = vunpack.c.l.bf16 %v780_v53  ;;  %v714_v4 = vunpack.c.h.bf16 %v780_v53  ;;  %v791_v51 = vld [vmem:[%s938_s28 + $0xb0] sm:$0xff]  }
  0x1e   : > { %804 = vmatprep.subr.bf16.mxu0 %v875_v0  ;;  %v425_v7 = vadd.f32 %v741_v55, %v376_v60  ;;  %v426_v8 = vadd.f32 %v742_v56, %v377_v61  ;;  %v745_v9 = vunpack.c.l.bf16 %v788_v58  ;;  %v746_v10 = vunpack.c.h.bf16 %v788_v58  ;;  %v769_v56 = vld [vmem:[%s933_s25 + $0x38] sm:$0xff]  }
  0x1f   : > { %v329_v12 = vadd.f32 %v681_v1, %v649_v57  ;;  %v330_v13 = vadd.f32 %v682_v2, %v650_v62  ;;  %v653_v14 = vunpack.c.l.bf16 %v766_v63  ;;  %v654_v15 = vunpack.c.h.bf16 %v766_v63  ;;  %v776_v61 = vld [vmem:[%s938_s28 + $0x38] sm:$0xff]  }
  0x20   : > { %v440_v17 = vpack.c.bf16 %v426_v8, %v425_v7  ;;  %v685_v18 = vunpack.c.l.bf16 %v773_v5  ;;  %v686_v19 = vunpack.c.h.bf16 %v773_v5  ;;  %v717_v20 = vunpack.c.l.bf16 %v781_v6  ;;  %v792_v8 = vld [vmem:[%s938_s28 + $0xb8] sm:$0xff]  }
  0x21   : > { %805 = vmatpush3.bf16.msra.mxu0 %v439_v59  ;;  %v378_v22 = vadd.f32 %v713_v3, %v329_v12  ;;  %v379_v23 = vadd.f32 %v714_v4, %v330_v13  ;;  %v718_v24 = vunpack.c.h.bf16 %v781_v6  ;;  %v749_v25 = vunpack.c.l.bf16 %v789_v11  ;;  %v784_v3 = vld [vmem:[%s938_s28 + $0x78] sm:$0xff]  }
  0x22   : > { %806 = vmatprep.subr.bf16.mxu0 %v875_v0  ;;  %v331_v27 = vadd.f32 %v685_v18, %v653_v14  ;;  %v332_v28 = vadd.f32 %v686_v19, %v654_v15  ;;  %v750_v29 = vunpack.c.h.bf16 %v789_v11  ;;  %v657_v30 = vunpack.c.l.bf16 %v767_v16 }
  0x23   : > { %v427_v32 = vadd.f32 %v745_v9, %v378_v22  ;;  %v428_v33 = vadd.f32 %v746_v10, %v379_v23  ;;  %v658_v34 = vunpack.c.h.bf16 %v767_v16  ;;  %v689_v35 = vunpack.c.l.bf16 %v774_v21 }
  0x24   : > { %v380_v36 = vadd.f32 %v717_v20, %v331_v27  ;;  %v381_v37 = vadd.f32 %v718_v24, %v332_v28  ;;  %v690_v38 = vunpack.c.h.bf16 %v774_v21  ;;  %v721_v39 = vunpack.c.l.bf16 %v782_v26 }
  0x25   : > { %807 = vmatpush3.bf16.msra.mxu0 %v440_v17  ;;  %v441_v42 = vpack.c.bf16 %v428_v33, %v427_v32  ;;  %v333_v43 = vadd.f32 %v689_v35, %v657_v30  ;;  %v722_v44 = vunpack.c.h.bf16 %v782_v26  ;;  %v753_v45 = vunpack.c.l.bf16 %v790_v31 }
  0x26   : > { %808 = vmatprep.subr.bf16.mxu0 %v875_v0  ;;  %v429_v47 = vadd.f32 %v749_v25, %v380_v36  ;;  %v430_v48 = vadd.f32 %v750_v29, %v381_v37  ;;  %v334_v49 = vadd.f32 %v690_v38, %v658_v34  ;;  %v754_v50 = vunpack.c.h.bf16 %v790_v31  ;;  %v437_v29 = vld [vmem:[%s997_s2] sm:$0xf] }
  0x27   : > { %v382_v52 = vadd.f32 %v721_v39, %v333_v43  ;;  %v661_v53 = vunpack.c.l.bf16 %v768_v40  ;;  %v662_v54 = vunpack.c.h.bf16 %v768_v40  ;;  %v693_v55 = vunpack.c.l.bf16 %v775_v41 }
  0x28   : > { %v442_v57 = vpack.c.bf16 %v430_v48, %v429_v47  ;;  %v383_v58 = vadd.f32 %v722_v44, %v334_v49  ;;  %v694_v59 = vunpack.c.h.bf16 %v775_v41  ;;  %v725_v60 = vunpack.c.l.bf16 %v783_v46 }
  0x29   : > { %809 = vmatpush3.bf16.msra.mxu0 %v441_v42  ;;  %v431_v62 = vadd.f32 %v753_v45, %v382_v52  ;;  %v335_v63 = vadd.f32 %v693_v55, %v661_v53  ;;  %v726_v1 = vunpack.c.h.bf16 %v783_v46  ;;  %v757_v2 = vunpack.c.l.bf16 %v791_v51 }
  0x2a   : > { %810 = vmatprep.subr.bf16.mxu0 %v875_v0  ;;  %v432_v4 = vadd.f32 %v754_v50, %v383_v58  ;;  %v336_v5 = vadd.f32 %v694_v59, %v662_v54  ;;  %v758_v6 = vunpack.c.h.bf16 %v791_v51  ;;  %v665_v7 = vunpack.c.l.bf16 %v769_v56 }
  0x2b   : > { %v384_v9 = vadd.f32 %v725_v60, %v335_v63  ;;  %v666_v10 = vunpack.c.h.bf16 %v769_v56  ;;  %v697_v11 = vunpack.c.l.bf16 %v776_v61  ;;  %v698_v12 = vunpack.c.h.bf16 %v776_v61 }
  0x2c   : > { %v443_v13 = vpack.c.bf16 %v432_v4, %v431_v62  ;;  %v385_v14 = vadd.f32 %v726_v1, %v336_v5  ;;  %v729_v15 = vunpack.c.l.bf16 %v784_v3  ;;  %v730_v16 = vunpack.c.h.bf16 %v784_v3 }
  0x2d   : > { %811 = vmatpush3.bf16.msra.mxu0 %v442_v57  ;;  %v433_v17 = vadd.f32 %v757_v2, %v384_v9  ;;  %v337_v18 = vadd.f32 %v697_v11, %v665_v7  ;;  %v338_v19 = vadd.f32 %v698_v12, %v666_v10  ;;  %v761_v20 = vunpack.c.l.bf16 %v792_v8 }
  0x2e   : > { %812 = vmatprep.subr.bf16.mxu0 %v875_v0  ;;  %v434_v21 = vadd.f32 %v758_v6, %v385_v14  ;;  %v762_v22 = vunpack.c.h.bf16 %v792_v8 }
  0x2f   : > { %v386_v23 = vadd.f32 %v729_v15, %v337_v18  ;;  %v387_v24 = vadd.f32 %v730_v16, %v338_v19 }
  0x30   : > { %v444_v25 = vpack.c.bf16 %v434_v21, %v433_v17 }
  0x31   : > { %813 = vmatpush3.bf16.msra.mxu0 %v443_v13  ;;  %v435_v26 = vadd.f32 %v761_v20, %v386_v23  ;;  %v436_v27 = vadd.f32 %v762_v22, %v387_v24 }
  0x32   : > { %814 = vmatprep.subr.bf16.mxu0 %v875_v0 }
  0x33   : > { %v445_v28 = vpack.c.bf16 %v436_v27, %v435_v26 }
  0x35   : > { %815 = vmatpush3.bf16.msra.mxu0 %v444_v25 }
  0x36   : > { %816 = vmatprep.subr.bf16.mxu0 %v875_v0 }
  0x39   : > { %817 = vmatpush3.bf16.msra.mxu0 %v445_v28 }
  0x3c   : > { %819 = vmatmul.mubr.bf16.vlgmr.msra.gmra.mrb[0].mxu0 %v437_v29 }
  0x88   : > { %v450_v30 = vpop.permute.xlu0 %449 }
 0x10f   : > { %v486_v31 = vpop.f32.mrb[0].mxu0 }
 0x110   : > { %v487_v32 = vadd.f32 %v486_v31, %v450_v30  ;;  %v820_v33 = vpop.f32.mrb[1].mxu0 }
 0x111   : > { %v489_v34 = vpop.f32.mrb[2].mxu0 }
 0x112   : > { %v492_v35 = vmax.f32 %v487_v32, 0.0  ;;  %v821_v36 = vpop.f32.mrb[3].mxu0 }
 0x114   : > { %v493_v0 = vpack.c.bf16 %v492_v35, %v492_v35 }
 0x116   : > { %495 = vst.msk [vmem:[%s257_s8] sm:$0xf] %vm494_vm1, %v493_v0 }
 0x117 PF: > { %s14_s17 = sadd.s32 1, %s873_s17   ;;  %s1000_s15 = smov %s869_s16 }
 0x118   : > { %p11_p5 = scmp.ge.s32.totalorder %s14_s17, 4   ;;  %s1001_s16 = smov %s1003_s18 }
 0x11a   :  { %13 = sbr.rel (!%p11_p5) target bundleno = 2 (0x2), region = 71 }

// kernel: network_forward.19
= control target key start
LH: loop header
LB: loop body
LE: loop exit
PB: predicated region body
PF: predicated region fallthrough
CT: control target
= control target key end

     0   :  { %s563_s9 = smov 0   ;;  %s565_s10 = smov 0   ;;  %s613_s0 = inlined_call_operand.vmem [shape: bf16[2,48,16], index: 0, kind: input, shape index: {}]   ;;  %s614_s1 = inlined_call_operand.vmem [shape: bf16[2,3,48,16], index: 1, kind: input, shape index: {}]   ;;  %s615_s2 = inlined_call_operand.vmem [shape: bf16[2,48,16], index: 2, kind: output, shape index: {}]  }
   0x1   :  { %s567_s11 = smov 0  }
   0x2 LB: > { %s24_s12 = sadd.s32 1, %s542_s10  ;;  %p410_p0 = scmp.ge.s32.totalorder %s546_s11, 1  ;;  %s546_s11 = sphi %s567_s11, %s12_s11   ;;  %s542_s10 = sphi %s565_s10, %s617_s10   ;;  %s538_s9 = sphi %s563_s9, %s616_s9  }
   0x3   : > { %p26_p1 = scmp.ge.s32.totalorder %s24_s12, 2  ;;  %p146_p2 = scmp.lt.s32.totalorder %s546_s11, 3 }
   0x5   : > { %s619_s12 = smov (%p26_p1, %s24_s12), 0  ;;  %p147_p3 = pnand %p410_p0, %p146_p2 }
   0x6   : > { %p182_p4 = scmp.lt.s32.totalorder (!%p147_p3), %s538_s9, 1  ;;  %vm298_vm0 = vcmask (!%p147_p3), 125952  }
   0x7   : > { %150 = sbr.rel (%p147_p3) target bundleno = 38 (0x26), region = 28 }
   0xe   : > { %s621_s9 = smov (!%p182_p4, %s538_s9), 1 }
   0xf   : > { %s498_s13 = smul.u32 24, %s621_s9 }
  0x10   : > { %s499_s14 = smul.u32 72, %s621_s9 }
  0x11   : > { %s189_s17 = scalar_lea.vmem %s613_s0, %s498_s13  ;;  %s205_s23 = scalar_lea.vmem %s615_s2, %s498_s13 }
  0x12   : > { %s197_s20 = scalar_lea.vmem %s614_s1, %s499_s14  ;;  %v441_v0 = vld [vmem:[%s189_s17] sm:$0xff]   ;;  %v488_v1 = vld [vmem:[%s189_s17 + $0x8] sm:$0xff]   ;;  %v489_v2 = vld [vmem:[%s189_s17 + $0x10] sm:$0xff]  }
  0x13   : > { %v442_v3 = vunpack.c.l.bf16 %v441_v0  ;;  %v453_v4 = vld [vmem:[%s197_s20] sm:$0xff]   ;;  %v492_v5 = vld [vmem:[%s197_s20 + $0x18] sm:$0xff]   ;;  %v495_v6 = vld [vmem:[%s197_s20 + $0x30] sm:$0xff]   ;;  %v443_v7 = vunpack.c.h.bf16 %v441_v0  ;;  %v446_v8 = vunpack.c.l.bf16 %v488_v1  ;;  %v447_v9 = vunpack.c.h.bf16 %v488_v1 }
  0x14   : > { %v454_v10 = vunpack.c.l.bf16 %v453_v4  ;;  %v466_v11 = vunpack.c.l.bf16 %v492_v5  ;;  %v478_v12 = vunpack.c.l.bf16 %v495_v6  ;;  %v455_v13 = vunpack.c.h.bf16 %v453_v4  ;;  %v490_v14 = vld [vmem:[%s197_s20 + $0x8] sm:$0xff]   ;;  %v493_v15 = vld [vmem:[%s197_s20 + $0x20] sm:$0xff]   ;;  %v496_v16 = vld [vmem:[%s197_s20 + $0x38] sm:$0xff]  }
  0x15   : > { %v467_v17 = vunpack.c.h.bf16 %v492_v5  ;;  %v479_v18 = vunpack.c.h.bf16 %v495_v6  ;;  %v458_v19 = vunpack.c.l.bf16 %v490_v14  ;;  %v470_v20 = vunpack.c.l.bf16 %v493_v15  ;;  %v491_v21 = vld [vmem:[%s197_s20 + $0x10] sm:$0xff]   ;;  %v494_v26 = vld [vmem:[%s197_s20 + $0x28] sm:$0xff]   ;;  %v497_v27 = vld [vmem:[%s197_s20 + $0x40] sm:$0xff]  }
  0x16   : > { %v230_v22 = vmax.f32 %v442_v3, %v454_v10  ;;  %v231_v23 = vmax.f32 %v443_v7, %v455_v13  ;;  %v482_v24 = vunpack.c.l.bf16 %v496_v16  ;;  %v459_v25 = vunpack.c.h.bf16 %v490_v14 }
  0x17   : > { %v232_v28 = vmax.f32 %v446_v8, %v458_v19  ;;  %v471_v29 = vunpack.c.h.bf16 %v493_v15  ;;  %v483_v30 = vunpack.c.h.bf16 %v496_v16  ;;  %v450_v31 = vunpack.c.l.bf16 %v489_v2 }
  0x18   : > { %v249_v32 = vmax.f32 %v230_v22, %v466_v11  ;;  %v250_v33 = vmax.f32 %v231_v23, %v467_v17  ;;  %v233_v34 = vmax.f32 %v447_v9, %v459_v25  ;;  %v462_v35 = vunpack.c.l.bf16 %v491_v21 }
  0x19   : > { %v251_v36 = vmax.f32 %v232_v28, %v470_v20  ;;  %v474_v37 = vunpack.c.l.bf16 %v494_v26  ;;  %v486_v38 = vunpack.c.l.bf16 %v497_v27  ;;  %v451_v39 = vunpack.c.h.bf16 %v489_v2 }
  0x1a   : > { %v268_v40 = vmax.f32 %v249_v32, %v478_v12  ;;  %v269_v41 = vmax.f32 %v250_v33, %v479_v18  ;;  %v252_v42 = vmax.f32 %v233_v34, %v471_v29  ;;  %v234_v43 = vmax.f32 %v450_v31, %v462_v35 }
  0x1b   : > { %v270_v44 = vmax.f32 %v251_v36, %v482_v24  ;;  %v463_v45 = vunpack.c.h.bf16 %v491_v21  ;;  %v475_v46 = vunpack.c.h.bf16 %v494_v26  ;;  %v487_v53 = vunpack.c.h.bf16 %v497_v27 }
  0x1c   : > { %v434_v47 = vpack.c.bf16 %v268_v40, %v268_v40  ;;  %v435_v48 = vpack.c.bf16 %v269_v41, %v269_v41  ;;  %v271_v49 = vmax.f32 %v252_v42, %v483_v30  ;;  %v253_v50 = vmax.f32 %v234_v43, %v474_v37 }
  0x1d   : > { %v436_v51 = vpack.c.bf16 %v270_v44, %v270_v44  ;;  %v235_v52 = vmax.f32 %v451_v39, %v463_v45 }
  0x1e   : > { %299 = vst.msk [vmem:[%s205_s23] sm:$0xf] %vm298_vm0, %v434_v47  ;;  %300 = vst.msk [vmem:[%s205_s23 + $0x4] sm:$0xf] %vm298_vm0, %v435_v48  ;;  %v437_v54 = vpack.c.bf16 %v271_v49, %v271_v49  ;;  %v272_v55 = vmax.f32 %v253_v50, %v486_v38 }
  0x1f   : > { %301 = vst.msk [vmem:[%s205_s23 + $0x8] sm:$0xf] %vm298_vm0, %v436_v51  ;;  %v254_v56 = vmax.f32 %v235_v52, %v475_v46 }
  0x20   : > { %302 = vst.msk [vmem:[%s205_s23 + $0xc] sm:$0xf] %vm298_vm0, %v437_v54  ;;  %v438_v57 = vpack.c.bf16 %v272_v55, %v272_v55 }
  0x21   : > { %v273_v58 = vmax.f32 %v254_v56, %v487_v53 }
  0x22   : > { %303 = vst.msk [vmem:[%s205_s23 + $0x10] sm:$0xf] %vm298_vm0, %v438_v57 }
  0x23   : > { %v439_v59 = vpack.c.bf16 %v273_v58, %v273_v58 }
  0x25   : > { %304 = vst.msk [vmem:[%s205_s23 + $0x14] sm:$0xf] %vm298_vm0, %v439_v59 }
  0x26 PF: > { %s12_s11 = sadd.s32 1, %s546_s11   ;;  %s616_s9 = smov %s542_s10 }
  0x27   : > { %p9_p5 = scmp.ge.s32.totalorder %s12_s11, 4   ;;  %s617_s10 = smov %s619_s12 }
  0x29   :  { %11 = sbr.rel (!%p9_p5) target bundleno = 2 (0x2), region = 63 }

// kernel: custom-call.28
= control target key start
LH: loop header
LB: loop body
LE: loop exit
PB: predicated region body
PF: predicated region fallthrough
CT: control target
= control target key end

     0   :  { %s6_s0 = inlined_call_operand.vmem [shape: u32[2,8,6], index: 0, kind: output, shape index: {}]  }

// kernel: squeeze.32
= control target key start
LH: loop header
LB: loop body
LE: loop exit
PB: predicated region body
PF: predicated region fallthrough
CT: control target
= control target key end

     0   :  { %s130_s8 = smov 110   ;;  %s131_s9 = smov 116   ;;  %vm7_vm0 = vcmask 48128   ;;  %s221_s0 = inlined_call_operand.vmem [shape: s32[96], index: 0, kind: input, shape index: {}]   ;;  %s222_s1 = inlined_call_operand.vmem [shape: s32[2,8,6], index: 1, kind: output, shape index: {}]  }
   0x1   :  { %v4_v0 = vld [vmem:[%s221_s0] sm:$0x1]  ;;  %s129_s0 = smov 122   ;;  %s132_s10 = smov 104  }
   0x2   :  { %5 = vst [vmem:[#allocation0] sm:$0x1] %v4_v0  ;;  %s133_s11 = smov 98   ;;  %s134_s12 = smov 92  }
   0x3   :  { %s135_s13 = smov 86   ;;  %s136_s14 = smov 80  }
   0x4   :  { %s137_s17 = smov 74   ;;  %s138_s18 = smov 68  }
   0x5   :  { %s139_s19 = smov 62   ;;  %s140_s20 = smov 56  }
   0x6   :  { %s141_s21 = smov 50   ;;  %s142_s22 = smov 44  }
   0x7   :  { %s143_s23 = smov 38  }
   0x9   :  { %v9_v1 = vld [vmem:[#allocation0] sm:$0x1]  }
   0xa   :  { %v21_v2 = vld [vmem:[#allocation0] sm:$0x1]   ;;  %10 = vrot.lane.b32.xlu0 %v9_v1, %s129_s0 }
   0xb   :  { %22 = vrot.lane.b32.xlu1 %v21_v2, %s130_s8  ;;  %v15_v3 = vld [vmem:[#allocation0] sm:$0x1]  }
   0xc   :  { %v27_v4 = vld [vmem:[#allocation0] sm:$0x1]  }
   0xd   :  { %v33_v5 = vld [vmem:[#allocation0] sm:$0x1]  }
   0xe   :  { %16 = vrot.lane.b32.xlu0 %v15_v3, %s131_s9  ;;  %v39_v6 = vld [vmem:[#allocation0] sm:$0x1]  }
   0xf   :  { %28 = vrot.lane.b32.xlu1 %v27_v4, %s132_s10  ;;  %v45_v7 = vld [vmem:[#allocation0] sm:$0x1]  }
  0x10   :  { %v51_v8 = vld [vmem:[#allocation0] sm:$0x1]  }
  0x11   :  { %v57_v9 = vld [vmem:[#allocation0] sm:$0x1]  }
  0x12   :  { %34 = vrot.lane.b32.xlu0 %v33_v5, %s133_s11  ;;  %v63_v10 = vld [vmem:[#allocation0] sm:$0x1]  }
  0x13   :  { %40 = vrot.lane.b32.xlu1 %v39_v6, %s134_s12  ;;  %v6_v11 = vld [vmem:[#allocation0] sm:$0x1]  }
  0x14   :  { %8 = vst.msk [vmem:[%s222_s1] sm:$0x1] %vm7_vm0, %v6_v11   ;;  %v69_v12 = vld [vmem:[#allocation0] sm:$0x1]  }
  0x15   :  { %v75_v13 = vld [vmem:[#allocation0] sm:$0x1]  }
  0x16   :  { %46 = vrot.lane.b32.xlu0 %v45_v7, %s135_s13  ;;  %v81_v14 = vld [vmem:[#allocation0] sm:$0x1]  }
  0x17   :  { %52 = vrot.lane.b32.xlu1 %v51_v8, %s136_s14  ;;  %v87_v15 = vld [vmem:[#allocation0] sm:$0x1]  }
  0x18   :  { %v93_v16 = vld [vmem:[#allocation0] sm:$0x1]  }
  0x1a   :  { %58 = vrot.lane.b32.xlu0 %v57_v9, %s137_s17 }
  0x1b   :  { %64 = vrot.lane.b32.xlu1 %v63_v10, %s138_s18 }
  0x1e   :  { %70 = vrot.lane.b32.xlu0 %v69_v12, %s139_s19 }
  0x1f   :  { %76 = vrot.lane.b32.xlu1 %v75_v13, %s140_s20 }
  0x22   :  { %82 = vrot.lane.b32.xlu0 %v81_v14, %s141_s21 }
  0x23   :  { %88 = vrot.lane.b32.xlu1 %v87_v15, %s142_s22 }
  0x26   :  { %94 = vrot.lane.b32.xlu0 %v93_v16, %s143_s23 }
  0x7c   :  { %v11_v17 = vpop.permute.xlu0 %10  }
  0x7d   :  { %v23_v18 = vpop.permute.xlu1 %22   ;;  %99 = vst.msk [vmem:[%s222_s1 + $0x1] sm:$0x1] %vm7_vm0, %v11_v17  }
  0x7e   :  { %101 = vst.msk [vmem:[%s222_s1 + $0x3] sm:$0x1] %vm7_vm0, %v23_v18  }
  0x80   :  { %v17_v19 = vpop.permute.xlu0 %16  }
  0x81   :  { %v29_v20 = vpop.permute.xlu1 %28   ;;  %100 = vst.msk [vmem:[%s222_s1 + $0x2] sm:$0x1] %vm7_vm0, %v17_v19  }
  0x82   :  { %102 = vst.msk [vmem:[%s222_s1 + $0x4] sm:$0x1] %vm7_vm0, %v29_v20  }
  0x84   :  { %v35_v21 = vpop.permute.xlu0 %34  }
  0x85   :  { %v41_v22 = vpop.permute.xlu1 %40   ;;  %103 = vst.msk [vmem:[%s222_s1 + $0x5] sm:$0x1] %vm7_vm0, %v35_v21  }
  0x86   :  { %104 = vst.msk [vmem:[%s222_s1 + $0x6] sm:$0x1] %vm7_vm0, %v41_v22  }
  0x88   :  { %v47_v23 = vpop.permute.xlu0 %46  }
  0x89   :  { %v53_v24 = vpop.permute.xlu1 %52   ;;  %105 = vst.msk [vmem:[%s222_s1 + $0x7] sm:$0x1] %vm7_vm0, %v47_v23  }
  0x8a   :  { %106 = vst.msk [vmem:[%s222_s1 + $0x8] sm:$0x1] %vm7_vm0, %v53_v24  }
  0x8c   :  { %v59_v25 = vpop.permute.xlu0 %58  }
  0x8d   :  { %v65_v26 = vpop.permute.xlu1 %64   ;;  %107 = vst.msk [vmem:[%s222_s1 + $0x9] sm:$0x1] %vm7_vm0, %v59_v25  }
  0x8e   :  { %108 = vst.msk [vmem:[%s222_s1 + $0xa] sm:$0x1] %vm7_vm0, %v65_v26  }
  0x90   :  { %v71_v27 = vpop.permute.xlu0 %70  }
  0x91   :  { %v77_v28 = vpop.permute.xlu1 %76   ;;  %109 = vst.msk [vmem:[%s222_s1 + $0xb] sm:$0x1] %vm7_vm0, %v71_v27  }
  0x92   :  { %110 = vst.msk [vmem:[%s222_s1 + $0xc] sm:$0x1] %vm7_vm0, %v77_v28  }
  0x94   :  { %v83_v29 = vpop.permute.xlu0 %82  }
  0x95   :  { %v89_v30 = vpop.permute.xlu1 %88   ;;  %111 = vst.msk [vmem:[%s222_s1 + $0xd] sm:$0x1] %vm7_vm0, %v83_v29  }
  0x96   :  { %112 = vst.msk [vmem:[%s222_s1 + $0xe] sm:$0x1] %vm7_vm0, %v89_v30  }
  0x98   :  { %v95_v31 = vpop.permute.xlu0 %94  }
  0x99   :  { %113 = vst.msk [vmem:[%s222_s1 + $0xf] sm:$0x1] %vm7_vm0, %v95_v31  }

// kernel: network_forward.20
= control target key start
LH: loop header
LB: loop body
LE: loop exit
PB: predicated region body
PF: predicated region fallthrough
CT: control target
= control target key end

     0   :  { %s1180_s15 = smov 0   ;;  %s1182_s16 = smov 0   ;;  %s1373_s0 = inlined_call_operand.vmem [shape: bf16[2,48,8], index: 0, kind: input, shape index: {}]   ;;  %s1374_s1 = inlined_call_operand.vmem [shape: bf16[2,6,48,8], index: 1, kind: input, shape index: {}]   ;;  %s1375_s2 = inlined_call_operand.vmem [shape: bf16[128,48], index: 2, kind: input, shape index: {}]   ;;  %s1376_s3 = inlined_call_operand.vmem [shape: f32[128,1], index: 3, kind: input, shape index: {}]   ;;  %s1377_s4 = inlined_call_operand.vmem [shape: bf16[2,128,8], index: 4, kind: output, shape index: {}]  }
   0x1   :  { %s1184_s17 = smov 0  }
   0x2 LB: > { %s26_s18 = sadd.s32 1, %s1148_s16  ;;  %p865_p0 = scmp.ge.s32.totalorder %s1152_s17, 1  ;;  %s1152_s17 = sphi %s1184_s17, %s14_s17   ;;  %s1148_s16 = sphi %s1182_s16, %s1379_s16   ;;  %s1144_s15 = sphi %s1180_s15, %s1378_s15  }
   0x3   : > { %p28_p1 = scmp.ge.s32.totalorder %s26_s18, 2  ;;  %p196_p2 = scmp.lt.s32.totalorder %s1152_s17, 3 }
   0x5   : > { %s1381_s18 = smov (%p28_p1, %s26_s18), 0  ;;  %p197_p3 = pnand %p865_p0, %p196_p2 }
   0x6   : > { %p236_p4 = scmp.lt.s32.totalorder (!%p197_p3), %s1144_s15, 1  ;;  %v1122_v0 = vld [vmem:[%s1375_s2] sm:$0xff] (!%p197_p3)   ;;  %vm541_vm0 = vcmask (!%p197_p3), 392192   ;;  %v1154_v2 = vmov (!%p197_p3), 0   ;;  %v407_v50 = vld [vmem:[%s1376_s3 + $0x10] sm:$0xff] (!%p197_p3)  ;;  %v408_v62 = vld [vmem:[%s1376_s3 + $0x18] sm:$0xff] (!%p197_p3) }
   0x7   : > { %200 = sbr.rel (%p197_p3) target bundleno = 280 (0x118), region = 36  ;;  %v1123_v1 = vld [vmem:[%s1375_s2 + $0x20] sm:$0xff] (!%p197_p3)   ;;  %1071 = vmatprep.mubr.msk.bf16.mxu0 (!%p197_p3), %vm541_vm0, %v1122_v0  ;;  %1121 = vset.pattern.permute.xlu1 (!%p197_p3), %v1154_v2  ;;  %v406_v63 = vld [vmem:[%s1376_s3 + $0x8] sm:$0xff] (!%p197_p3)  ;;  %vm743_vm1 = vcmask (!%p197_p3), 60416  }
   0x8   : > { %1079 = vmatprep.mubr.msk.bf16.mxu1 (!%p197_p3), %vm541_vm0, %v1123_v1  ;;  %1120 = vset.pattern.permute.xlu0 (!%p197_p3), %v1154_v2  ;;  %v405_v51 = vld [vmem:[%s1376_s3] sm:$0xff] (!%p197_p3) }
   0x9   : > { %433 = vperm.xlu1 (!%p197_p3), %1121, %v407_v50   ;;  %423 = vperm.xlu0 (!%p197_p3), %1120, %v405_v51   ;;  %v416_v51 = vld [vmem:[%s1376_s3 + $0x58] sm:$0xff] (!%p197_p3) }
   0xd   : > { %438 = vperm.xlu1 (!%p197_p3), %1121, %v408_v62   ;;  %428 = vperm.xlu0 (!%p197_p3), %1120, %v406_v63   ;;  %v1129_v62 = vld [vmem:[%s1375_s2 + $0x38] sm:$0xff] (!%p197_p3)  }
   0xe   : > { %s1383_s15 = smov (!%p236_p4, %s1144_s15), 1 }
   0xf   : > { %s1093_s23 = smul.u32 24, %s1383_s15  ;;  %s934_s5 = sshll.u32 %s1383_s15, 6 }
  0x10   : > { %s1094_s24 = smul.u32 144, %s1383_s15  ;;  %s1327_s8 = scalar_lea.vmem %s1377_s4, %s934_s5 }
  0x11   : > { %s1213_s27 = scalar_lea.vmem %s1373_s0, %s1093_s23 }
  0x12   : > { %s1218_s30 = scalar_lea.vmem %s1374_s1, %s1094_s24  ;;  %v952_v3 = vld [vmem:[%s1213_s27] sm:$0xff]   ;;  %v1035_v4 = vld [vmem:[%s1213_s27 + $0x8] sm:$0xff]   ;;  %v1036_v49 = vld [vmem:[%s1213_s27 + $0x10] sm:$0xff]  }
  0x13   : > { %v953_v5 = vunpack.c.l.bf16 %v952_v3  ;;  %v954_v6 = vunpack.c.h.bf16 %v952_v3  ;;  %v964_v7 = vld [vmem:[%s1218_s30] sm:$0xff]   ;;  %v1039_v8 = vld [vmem:[%s1218_s30 + $0x18] sm:$0xff]   ;;  %v1042_v9 = vld [vmem:[%s1218_s30 + $0x30] sm:$0xff]   ;;  %v957_v10 = vunpack.c.l.bf16 %v1035_v4  ;;  %v958_v11 = vunpack.c.h.bf16 %v1035_v4 }
  0x14   : > { %v965_v12 = vunpack.c.l.bf16 %v964_v7  ;;  %v966_v13 = vunpack.c.h.bf16 %v964_v7  ;;  %v977_v14 = vunpack.c.l.bf16 %v1039_v8  ;;  %v978_v15 = vunpack.c.h.bf16 %v1039_v8  ;;  %v1045_v16 = vld [vmem:[%s1218_s30 + $0x48] sm:$0xff]   ;;  %v1048_v17 = vld [vmem:[%s1218_s30 + $0x60] sm:$0xff]   ;;  %v1228_v18 = vld [vmem:[%s1218_s30 + $0x78] sm:$0xff]  }
  0x15   : > { %v989_v19 = vunpack.c.l.bf16 %v1042_v9  ;;  %v990_v20 = vunpack.c.h.bf16 %v1042_v9  ;;  %v1001_v21 = vunpack.c.l.bf16 %v1045_v16  ;;  %v1002_v22 = vunpack.c.h.bf16 %v1045_v16  ;;  %v1037_v23 = vld [vmem:[%s1218_s30 + $0x8] sm:$0xff]   ;;  %v1040_v24 = vld [vmem:[%s1218_s30 + $0x20] sm:$0xff]   ;;  %v1043_v29 = vld [vmem:[%s1218_s30 + $0x38] sm:$0xff]  }
  0x16   : > { %v285_v25 = vadd.f32 %v965_v12, %v953_v5  ;;  %v286_v26 = vadd.f32 %v966_v13, %v954_v6  ;;  %v1013_v27 = vunpack.c.l.bf16 %v1048_v17  ;;  %v1014_v28 = vunpack.c.h.bf16 %v1048_v17  ;;  %v1046_v34 = vld [vmem:[%s1218_s30 + $0x50] sm:$0xff]   ;;  %v1049_v39 = vld [vmem:[%s1218_s30 + $0x68] sm:$0xff]   ;;  %v1052_v44 = vld [vmem:[%s1218_s30 + $0x80] sm:$0xff]  }
  0x17   : > { %v1025_v30 = vunpack.c.l.bf16 %v1228_v18  ;;  %v1026_v31 = vunpack.c.h.bf16 %v1228_v18  ;;  %v969_v32 = vunpack.c.l.bf16 %v1037_v23  ;;  %v970_v33 = vunpack.c.h.bf16 %v1037_v23  ;;  %v1038_v56 = vld [vmem:[%s1218_s30 + $0x10] sm:$0xff]   ;;  %v1041_v61 = vld [vmem:[%s1218_s30 + $0x28] sm:$0xff]   ;;  %v1044_v8 = vld [vmem:[%s1218_s30 + $0x40] sm:$0xff]  }
  0x18   : > { %v304_v35 = vadd.f32 %v977_v14, %v285_v25  ;;  %v305_v36 = vadd.f32 %v978_v15, %v286_v26  ;;  %v981_v37 = vunpack.c.l.bf16 %v1040_v24  ;;  %v982_v38 = vunpack.c.h.bf16 %v1040_v24  ;;  %v1047_v13 = vld [vmem:[%s1218_s30 + $0x58] sm:$0xff]   ;;  %v410_v18 = vld [vmem:[%s1376_s3 + $0x28] sm:$0xff]  ;;  %v1050_v24 = vld [vmem:[%s1218_s30 + $0x70] sm:$0xff]  }
  0x19   : > { %v287_v40 = vadd.f32 %v969_v32, %v957_v10  ;;  %v288_v41 = vadd.f32 %v970_v33, %v958_v11  ;;  %v993_v42 = vunpack.c.l.bf16 %v1043_v29  ;;  %v994_v43 = vunpack.c.h.bf16 %v1043_v29  ;;  %v1053_v32 = vld [vmem:[%s1218_s30 + $0x88] sm:$0xff]   ;;  %448 = vperm.xlu1 %1121, %v410_v18  }
  0x1a   : > { %v323_v45 = vadd.f32 %v989_v19, %v304_v35  ;;  %v324_v46 = vadd.f32 %v990_v20, %v305_v36  ;;  %v1005_v47 = vunpack.c.l.bf16 %v1046_v34  ;;  %v1006_v48 = vunpack.c.h.bf16 %v1046_v34  ;;  %v409_v19 = vld [vmem:[%s1376_s3 + $0x20] sm:$0xff] }
  0x1b   : > { %v306_v52 = vadd.f32 %v981_v37, %v287_v40  ;;  %v307_v53 = vadd.f32 %v982_v38, %v288_v41  ;;  %v1017_v54 = vunpack.c.l.bf16 %v1049_v39  ;;  %v1018_v55 = vunpack.c.h.bf16 %v1049_v39  ;;  %443 = vperm.xlu0 %1120, %v409_v19   ;;  %v412_v38 = vld [vmem:[%s1376_s3 + $0x38] sm:$0xff]  ;;  %v411_v39 = vld [vmem:[%s1376_s3 + $0x30] sm:$0xff] }
  0x1c   : > { %v342_v57 = vadd.f32 %v1001_v21, %v323_v45  ;;  %v343_v58 = vadd.f32 %v1002_v22, %v324_v46  ;;  %v1029_v59 = vunpack.c.l.bf16 %v1052_v44  ;;  %v1030_v60 = vunpack.c.h.bf16 %v1052_v44  ;;  %v414_v46 = vld [vmem:[%s1376_s3 + $0x48] sm:$0xff] }
  0x1d   : > { %v325_v0 = vadd.f32 %v993_v42, %v306_v52  ;;  %v326_v1 = vadd.f32 %v994_v43, %v307_v53  ;;  %v961_v2 = vunpack.c.l.bf16 %v1036_v49  ;;  %v962_v3 = vunpack.c.h.bf16 %v1036_v49  ;;  %458 = vperm.xlu1 %1121, %v412_v38   ;;  %v415_v52 = vld [vmem:[%s1376_s3 + $0x50] sm:$0xff]  ;;  %v1124_v53 = vld [vmem:[%s1375_s2 + $0x8] sm:$0xff]  }
  0x1e   : > { %v361_v4 = vadd.f32 %v1013_v27, %v342_v57  ;;  %v362_v5 = vadd.f32 %v1014_v28, %v343_v58  ;;  %v973_v6 = vunpack.c.l.bf16 %v1038_v56  ;;  %v974_v7 = vunpack.c.h.bf16 %v1038_v56  ;;  %v1127_v56 = vld [vmem:[%s1375_s2 + $0x30] sm:$0xff]   ;;  %v418_v57 = vld [vmem:[%s1376_s3 + $0x68] sm:$0xff]  ;;  %v417_v58 = vld [vmem:[%s1376_s3 + $0x60] sm:$0xff] }
  0x1f   : > { %v344_v9 = vadd.f32 %v1005_v47, %v325_v0  ;;  %v345_v10 = vadd.f32 %v1006_v48, %v326_v1  ;;  %v985_v11 = vunpack.c.l.bf16 %v1041_v61  ;;  %v986_v12 = vunpack.c.h.bf16 %v1041_v61  ;;  %453 = vperm.xlu0 %1120, %v411_v39   ;;  %v413_v47 = vld [vmem:[%s1376_s3 + $0x40] sm:$0xff]  ;;  %v1128_v61 = vld [vmem:[%s1375_s2 + $0x18] sm:$0xff]  }
  0x20   : > { %v380_v14 = vadd.f32 %v1025_v30, %v361_v4  ;;  %v381_v15 = vadd.f32 %v1026_v31, %v362_v5  ;;  %v289_v16 = vadd.f32 %v973_v6, %v961_v2  ;;  %v290_v17 = vadd.f32 %v974_v7, %v962_v3 }
  0x21   : > { %v363_v20 = vadd.f32 %v1017_v54, %v344_v9  ;;  %v364_v21 = vadd.f32 %v1018_v55, %v345_v10  ;;  %v997_v22 = vunpack.c.l.bf16 %v1044_v8  ;;  %v998_v23 = vunpack.c.h.bf16 %v1044_v8  ;;  %468 = vperm.xlu1 %1121, %v414_v46   ;;  %v1125_v54 = vld [vmem:[%s1375_s2 + $0x28] sm:$0xff]   ;;  %v1126_v55 = vld [vmem:[%s1375_s2 + $0x10] sm:$0xff]  }
  0x22   : > { %v402_v25 = vpack.c.bf16 %v381_v15, %v380_v14  ;;  %v308_v26 = vadd.f32 %v985_v11, %v289_v16  ;;  %v309_v27 = vadd.f32 %v986_v12, %v290_v17  ;;  %v1009_v28 = vunpack.c.l.bf16 %v1047_v13 }
  0x23   : > { %v382_v29 = vadd.f32 %v1029_v59, %v363_v20  ;;  %v383_v30 = vadd.f32 %v1030_v60, %v364_v21  ;;  %v1010_v31 = vunpack.c.h.bf16 %v1047_v13  ;;  %v1021_v35 = vunpack.c.l.bf16 %v1050_v24  ;;  %463 = vperm.xlu0 %1120, %v413_v47   ;;  %v420_v59 = vld [vmem:[%s1376_s3 + $0x78] sm:$0xff]  ;;  %v419_v60 = vld [vmem:[%s1376_s3 + $0x70] sm:$0xff] }
  0x24   : > { %1065 = vmatprep.subr.bf16.mxu0 %v402_v25  ;;  %1087 = vmatprep.subr.bf16.mxu1 %v402_v25  ;;  %v327_v33 = vadd.f32 %v997_v22, %v308_v26  ;;  %v328_v34 = vadd.f32 %v998_v23, %v309_v27  ;;  %v1022_v36 = vunpack.c.h.bf16 %v1050_v24  ;;  %v1033_v42 = vunpack.c.l.bf16 %v1053_v32 }
  0x25   : > { %1066 = vmatpush3.bf16.msra.mxu0 %v402_v25  ;;  %1090 = vmatpush3.bf16.msra.mxu1 %v402_v25  ;;  %v403_v37 = vpack.c.bf16 %v383_v30, %v382_v29  ;;  %v1034_v43 = vunpack.c.h.bf16 %v1053_v32 }
  0x26   : > { %v346_v40 = vadd.f32 %v1009_v28, %v327_v33  ;;  %v347_v41 = vadd.f32 %v1010_v31, %v328_v34  ;;  %478 = vperm.xlu1 %1121, %v416_v51  }
  0x27   : > { %1067 = vmatprep.subr.bf16.mxu0 %v403_v37  ;;  %1088 = vmatprep.subr.bf16.mxu1 %v403_v37 }
  0x28   : > { %v365_v44 = vadd.f32 %v1021_v35, %v346_v40  ;;  %v366_v45 = vadd.f32 %v1022_v36, %v347_v41  ;;  %473 = vperm.xlu0 %1120, %v415_v52  }
  0x29   : > { %1068 = vmatpush3.bf16.msra.mxu0 %v403_v37  ;;  %1091 = vmatpush3.bf16.msra.mxu1 %v403_v37 }
  0x2a   : > { %v384_v48 = vadd.f32 %v1033_v42, %v365_v44  ;;  %v385_v49 = vadd.f32 %v1034_v43, %v366_v45  ;;  %488 = vperm.xlu1 %1121, %v418_v57  }
  0x2c   : > { %v404_v50 = vpack.c.bf16 %v385_v49, %v384_v48  ;;  %483 = vperm.xlu0 %1120, %v417_v58  }
  0x2e   : > { %1069 = vmatprep.subr.bf16.mxu0 %v404_v50  ;;  %1089 = vmatprep.subr.bf16.mxu1 %v404_v50 }
  0x2f   : > { %1070 = vmatpush3.bf16.msra.mxu0 %v404_v50  ;;  %1092 = vmatpush3.bf16.msra.mxu1 %v404_v50 }
  0x30   : > { %498 = vperm.xlu1 %1121, %v420_v59   ;;  %493 = vperm.xlu0 %1120, %v419_v60  }
  0x32   : > { %1072 = vmatmul.mubr.msk.bf16.vlgmr.msra.gmra.mrb[0].mxu0 %vm541_vm0, %v1124_v53  ;;  %1080 = vmatmul.mubr.msk.bf16.vlgmr.msra.gmra.mrb[0].mxu1 %vm541_vm0, %v1125_v54 }
  0x33   : > { %1075 = vmatprep.mubr.msk.bf16.mxu0 %vm541_vm0, %v1126_v55  ;;  %1083 = vmatprep.mubr.msk.bf16.mxu1 %vm541_vm0, %v1127_v56 }
  0x3a   : > { %1076 = vmatmul.mubr.msk.bf16.gmra.mrb[4].mxu0 %vm541_vm0, %v1128_v61  ;;  %1084 = vmatmul.mubr.msk.bf16.gmra.mrb[4].mxu1 %vm541_vm0, %v1129_v62 }
  0x88   : > { %v434_v63 = vpop.permute.xlu1 %433  ;;  %v424_v0 = vpop.permute.xlu0 %423 }
  0x8c   : > { %v439_v1 = vpop.permute.xlu1 %438  ;;  %v429_v2 = vpop.permute.xlu0 %428 }
  0x98   : > { %v1317_v3 = vpop.permute.xlu1 %448 }
  0x9a   : > { %v444_v4 = vpop.permute.xlu0 %443 }
  0x9c   : > { %v1319_v5 = vpop.permute.xlu1 %458 }
  0x9e   : > { %v454_v6 = vpop.permute.xlu0 %453 }
  0xa0   : > { %v469_v7 = vpop.permute.xlu1 %468 }
  0xa2   : > { %v464_v8 = vpop.permute.xlu0 %463 }
  0xa5   : > { %v479_v9 = vpop.permute.xlu1 %478 }
  0xa7   : > { %v474_v10 = vpop.permute.xlu0 %473 }
  0xa9   : > { %v1321_v11 = vpop.permute.xlu1 %488 }
  0xab   : > { %v484_v12 = vpop.permute.xlu0 %483 }
  0xaf   : > { %v499_v41 = vpop.permute.xlu1 %498  ;;  %v494_v42 = vpop.permute.xlu0 %493 }
 0x105   : > { %v1073_v13 = vpop.f32.mrb[0].mxu0  ;;  %v1081_v14 = vpop.f32.mrb[0].mxu1 }
 0x106   : > { %v609_v15 = vadd.f32 %v1073_v13, %v434_v63  ;;  %v641_v16 = vadd.f32 %v1081_v14, %v474_v10  ;;  %v600_v17 = vpop.f32.mrb[1].mxu0  ;;  %v632_v18 = vpop.f32.mrb[1].mxu1 }
 0x107   : > { %v601_v19 = vadd.f32 %v600_v17, %v424_v0  ;;  %v633_v20 = vadd.f32 %v632_v18, %v464_v8  ;;  %v1074_v21 = vpop.f32.mrb[2].mxu0  ;;  %v1082_v22 = vpop.f32.mrb[2].mxu1 }
 0x108   : > { %v665_v23 = vmax.f32 %v609_v15, 0.0  ;;  %v673_v24 = vmax.f32 %v641_v16, 0.0  ;;  %v612_v25 = vadd.f32 %v1074_v21, %v439_v1  ;;  %v644_v26 = vadd.f32 %v1082_v22, %v479_v9  ;;  %v603_v27 = vpop.f32.mrb[3].mxu0  ;;  %v635_v28 = vpop.f32.mrb[3].mxu1 }
 0x109   : > { %v663_v29 = vmax.f32 %v601_v19, 0.0  ;;  %v671_v30 = vmax.f32 %v633_v20, 0.0  ;;  %v604_v31 = vadd.f32 %v603_v27, %v429_v2  ;;  %v636_v32 = vadd.f32 %v635_v28, %v469_v7 }
 0x10a   : > { %v937_v33 = vpack.c.bf16 %v665_v23, %v665_v23  ;;  %v945_v34 = vpack.c.bf16 %v673_v24, %v673_v24  ;;  %v666_v35 = vmax.f32 %v612_v25, 0.0  ;;  %v674_v36 = vmax.f32 %v644_v26, 0.0 }
 0x10b   : > { %v935_v37 = vpack.c.bf16 %v663_v29, %v663_v29  ;;  %v943_v38 = vpack.c.bf16 %v671_v30, %v671_v30  ;;  %v664_v39 = vmax.f32 %v604_v31, 0.0  ;;  %v672_v40 = vmax.f32 %v636_v32, 0.0 }
 0x10c   : > { %746 = vst.msk [vmem:[%s1327_s8 + $0x8] sm:$0xf] %vm743_vm1, %v937_v33  ;;  %754 = vst.msk [vmem:[%s1327_s8 + $0x28] sm:$0xf] %vm743_vm1, %v945_v34  ;;  %v938_v43 = vpack.c.bf16 %v666_v35, %v666_v35  ;;  %v946_v44 = vpack.c.bf16 %v674_v36, %v674_v36 }
 0x10d   : > { %744 = vst.msk [vmem:[%s1327_s8] sm:$0xf] %vm743_vm1, %v935_v37  ;;  %752 = vst.msk [vmem:[%s1327_s8 + $0x20] sm:$0xf] %vm743_vm1, %v943_v38  ;;  %v936_v45 = vpack.c.bf16 %v664_v39, %v664_v39  ;;  %v944_v46 = vpack.c.bf16 %v672_v40, %v672_v40  ;;  %v1077_v47 = vpop.f32.mrb[4].mxu0  ;;  %v1085_v48 = vpop.f32.mrb[4].mxu1 }
 0x10e   : > { %747 = vst.msk [vmem:[%s1327_s8 + $0xc] sm:$0xf] %vm743_vm1, %v938_v43  ;;  %755 = vst.msk [vmem:[%s1327_s8 + $0x2c] sm:$0xf] %vm743_vm1, %v946_v44  ;;  %v625_v49 = vadd.f32 %v1077_v47, %v454_v6  ;;  %v657_v50 = vadd.f32 %v1085_v48, %v494_v42  ;;  %v616_v51 = vpop.f32.mrb[5].mxu0  ;;  %v648_v52 = vpop.f32.mrb[5].mxu1 }
 0x10f   : > { %745 = vst.msk [vmem:[%s1327_s8 + $0x4] sm:$0xf] %vm743_vm1, %v936_v45  ;;  %753 = vst.msk [vmem:[%s1327_s8 + $0x24] sm:$0xf] %vm743_vm1, %v944_v46  ;;  %v617_v53 = vadd.f32 %v616_v51, %v444_v4  ;;  %v649_v54 = vadd.f32 %v648_v52, %v484_v12  ;;  %v1078_v55 = vpop.f32.mrb[6].mxu0  ;;  %v1086_v56 = vpop.f32.mrb[6].mxu1 }
 0x110   : > { %v669_v57 = vmax.f32 %v625_v49, 0.0  ;;  %v677_v58 = vmax.f32 %v657_v50, 0.0  ;;  %v628_v59 = vadd.f32 %v1078_v55, %v1319_v5  ;;  %v660_v60 = vadd.f32 %v1086_v56, %v499_v41  ;;  %v619_v61 = vpop.f32.mrb[7].mxu0  ;;  %v651_v62 = vpop.f32.mrb[7].mxu1 }
 0x111   : > { %v667_v63 = vmax.f32 %v617_v53, 0.0  ;;  %v675_v0 = vmax.f32 %v649_v54, 0.0  ;;  %v620_v1 = vadd.f32 %v619_v61, %v1317_v3  ;;  %v652_v2 = vadd.f32 %v651_v62, %v1321_v11 }
 0x112   : > { %v941_v4 = vpack.c.bf16 %v669_v57, %v669_v57  ;;  %v949_v6 = vpack.c.bf16 %v677_v58, %v677_v58  ;;  %v670_v7 = vmax.f32 %v628_v59, 0.0  ;;  %v678_v5 = vmax.f32 %v660_v60, 0.0 }
 0x113   : > { %v939_v8 = vpack.c.bf16 %v667_v63, %v667_v63  ;;  %v947_v9 = vpack.c.bf16 %v675_v0, %v675_v0  ;;  %v668_v10 = vmax.f32 %v620_v1, 0.0  ;;  %v676_v12 = vmax.f32 %v652_v2, 0.0 }
 0x114   : > { %750 = vst.msk [vmem:[%s1327_s8 + $0x18] sm:$0xf] %vm743_vm1, %v941_v4  ;;  %758 = vst.msk [vmem:[%s1327_s8 + $0x38] sm:$0xf] %vm743_vm1, %v949_v6  ;;  %v942_v13 = vpack.c.bf16 %v670_v7, %v670_v7  ;;  %v950_v3 = vpack.c.bf16 %v678_v5, %v678_v5 }
 0x115   : > { %748 = vst.msk [vmem:[%s1327_s8 + $0x10] sm:$0xf] %vm743_vm1, %v939_v8  ;;  %756 = vst.msk [vmem:[%s1327_s8 + $0x30] sm:$0xf] %vm743_vm1, %v947_v9  ;;  %v940_v11 = vpack.c.bf16 %v668_v10, %v668_v10  ;;  %v948_v14 = vpack.c.bf16 %v676_v12, %v676_v12 }
 0x116   : > { %751 = vst.msk [vmem:[%s1327_s8 + $0x1c] sm:$0xf] %vm743_vm1, %v942_v13  ;;  %759 = vst.msk [vmem:[%s1327_s8 + $0x3c] sm:$0xf] %vm743_vm1, %v950_v3 }
 0x117   : > { %749 = vst.msk [vmem:[%s1327_s8 + $0x14] sm:$0xf] %vm743_vm1, %v940_v11  ;;  %757 = vst.msk [vmem:[%s1327_s8 + $0x34] sm:$0xf] %vm743_vm1, %v948_v14 }
 0x118 PF: > { %s14_s17 = sadd.s32 1, %s1152_s17   ;;  %s1378_s15 = smov %s1148_s16 }
 0x119   : > { %p11_p5 = scmp.ge.s32.totalorder %s14_s17, 4   ;;  %s1379_s16 = smov %s1381_s18 }
 0x11b   :  { %13 = sbr.rel (!%p11_p5) target bundleno = 2 (0x2), region = 74 }

// kernel: network_forward.21
= control target key start
LH: loop header
LB: loop body
LE: loop exit
PB: predicated region body
PF: predicated region fallthrough
CT: control target
= control target key end

     0   :  { %s1218_s15 = smov 0   ;;  %s1220_s16 = smov 0   ;;  %s1334_s0 = inlined_call_operand.vmem [shape: bf16[2,128,8], index: 0, kind: input, shape index: {}]   ;;  %s1335_s1 = inlined_call_operand.vmem [shape: bf16[2,6,128,8], index: 1, kind: input, shape index: {}]   ;;  %s1336_s2 = inlined_call_operand.vmem [shape: bf16[8,128], index: 2, kind: input, shape index: {}]   ;;  %s1337_s3 = inlined_call_operand.vmem [shape: f32[8,1], index: 3, kind: input, shape index: {}]   ;;  %s1338_s4 = inlined_call_operand.vmem [shape: bf16[2,8,8], index: 4, kind: output, shape index: {}]  }
   0x1   :  { %s1222_s17 = smov 0  }
   0x2 LB: > { %s26_s18 = sadd.s32 1, %s1184_s16  ;;  %p742_p0 = scmp.ge.s32.totalorder %s1188_s17, 1  ;;  %s1188_s17 = sphi %s1222_s17, %s14_s17   ;;  %s1184_s16 = sphi %s1220_s16, %s1340_s16   ;;  %s1180_s15 = sphi %s1218_s15, %s1339_s15  }
   0x3   : > { %p28_p1 = scmp.ge.s32.totalorder %s26_s18, 2  ;;  %p196_p2 = scmp.lt.s32.totalorder %s1188_s17, 3 }
   0x5   : > { %s1342_s18 = smov (%p28_p1, %s26_s18), 0  ;;  %p197_p3 = pnand %p742_p0, %p196_p2 }
   0x6   : > { %p235_p4 = scmp.lt.s32.totalorder (!%p197_p3), %s1180_s15, 1  ;;  %v1190_v0 = vmov (!%p197_p3), 0.0   ;;  %vm1191_vm0 = vmmov (!%p197_p3), 0   ;;  %v593_v1 = vld [vmem:[%s1337_s3] sm:$0xff] (!%p197_p3)  ;;  %v1192_v2 = vmov (!%p197_p3), 0   ;;  %vm641_vm1 = vcmask (!%p197_p3), 60416  }
   0x7   : > { %200 = sbr.rel (%p197_p3) target bundleno = 302 (0x12e), region = 36  ;;  %1117 = vmatprep.subr.bf16.mxu0 (!%p197_p3), %v1190_v0  ;;  %1133 = vmatprep.mubr.msk.bf16.mxu0 (!%p197_p3), %vm1191_vm0, %v1190_v0 }
   0x8   : > { %1165 = vset.pattern.permute.xlu0 (!%p197_p3), %v1192_v2 }
   0x9   : > { %596 = vperm.xlu0 (!%p197_p3), %1165, %v593_v1  }
   0xe   : > { %s1344_s15 = smov (!%p235_p4, %s1180_s15), 1 }
   0xf   : > { %s829_s21 = sshll.u32 %s1344_s15, 6  ;;  %s1137_s22 = smul.u32 384, %s1344_s15 }
  0x10   : > { %s1248_s25 = scalar_lea.vmem %s1334_s0, %s829_s21  ;;  %s746_s5 = sshll.u32 %s1344_s15, 2 }
  0x11   : > { %s1253_s28 = scalar_lea.vmem %s1335_s1, %s1137_s22  ;;  %v831_v3 = vld [vmem:[%s1248_s25] sm:$0xff]   ;;  %v1054_v4 = vld [vmem:[%s1248_s25 + $0x8] sm:$0xff]   ;;  %v1055_v49 = vld [vmem:[%s1248_s25 + $0x10] sm:$0xff]   ;;  %s257_s8 = scalar_lea.vmem %s1338_s4, %s746_s5 }
  0x12   : > { %v832_v5 = vunpack.c.l.bf16 %v831_v3  ;;  %v833_v6 = vunpack.c.h.bf16 %v831_v3  ;;  %v863_v7 = vld [vmem:[%s1253_s28] sm:$0xff]   ;;  %v836_v10 = vunpack.c.l.bf16 %v1054_v4  ;;  %v837_v11 = vunpack.c.h.bf16 %v1054_v4  ;;  %v1061_v23 = vld [vmem:[%s1253_s28 + $0x8] sm:$0xff]   ;;  %v1062_v54 = vld [vmem:[%s1253_s28 + $0x10] sm:$0xff]  }
  0x13   : > { %v1068_v8 = vld [vmem:[%s1253_s28 + $0x40] sm:$0xff]   ;;  %v864_v12 = vunpack.c.l.bf16 %v863_v7  ;;  %v865_v13 = vunpack.c.h.bf16 %v863_v7  ;;  %v1069_v24 = vld [vmem:[%s1253_s28 + $0x48] sm:$0xff]   ;;  %v868_v32 = vunpack.c.l.bf16 %v1061_v23  ;;  %v869_v33 = vunpack.c.h.bf16 %v1061_v23  ;;  %v1070_v59 = vld [vmem:[%s1253_s28 + $0x50] sm:$0xff]  }
  0x14   : > { %v1076_v9 = vld [vmem:[%s1253_s28 + $0x80] sm:$0xff]   ;;  %v896_v14 = vunpack.c.l.bf16 %v1068_v8  ;;  %v897_v15 = vunpack.c.h.bf16 %v1068_v8  ;;  %v1077_v29 = vld [vmem:[%s1253_s28 + $0x88] sm:$0xff]   ;;  %v900_v37 = vunpack.c.l.bf16 %v1069_v24  ;;  %v901_v38 = vunpack.c.h.bf16 %v1069_v24 }
  0x15   : > { %v1084_v16 = vld [vmem:[%s1253_s28 + $0xc0] sm:$0xff]   ;;  %v928_v19 = vunpack.c.l.bf16 %v1076_v9  ;;  %v929_v20 = vunpack.c.h.bf16 %v1076_v9  ;;  %v323_v25 = vadd.f32 %v864_v12, %v832_v5  ;;  %v324_v26 = vadd.f32 %v865_v13, %v833_v6  ;;  %v1085_v34 = vld [vmem:[%s1253_s28 + $0xc8] sm:$0xff]   ;;  %v1078_v5 = vld [vmem:[%s1253_s28 + $0x90] sm:$0xff]  }
  0x16   : > { %v1092_v17 = vld [vmem:[%s1253_s28 + $0x100] sm:$0xff]   ;;  %v960_v21 = vunpack.c.l.bf16 %v1084_v16  ;;  %v961_v22 = vunpack.c.h.bf16 %v1084_v16  ;;  %v1093_v39 = vld [vmem:[%s1253_s28 + $0x108] sm:$0xff]   ;;  %v325_v40 = vadd.f32 %v868_v32, %v836_v10  ;;  %v326_v41 = vadd.f32 %v869_v33, %v837_v11  ;;  %v1086_v10 = vld [vmem:[%s1253_s28 + $0xd0] sm:$0xff]  }
  0x17   : > { %v1100_v18 = vld [vmem:[%s1253_s28 + $0x140] sm:$0xff]   ;;  %v992_v27 = vunpack.c.l.bf16 %v1092_v17  ;;  %v993_v28 = vunpack.c.h.bf16 %v1092_v17  ;;  %v372_v35 = vadd.f32 %v896_v14, %v323_v25  ;;  %v373_v36 = vadd.f32 %v897_v15, %v324_v26  ;;  %v1101_v44 = vld [vmem:[%s1253_s28 + $0x148] sm:$0xff]   ;;  %v1094_v15 = vld [vmem:[%s1253_s28 + $0x110] sm:$0xff]  }
  0x18   : > { %v1024_v30 = vunpack.c.l.bf16 %v1100_v18  ;;  %v1025_v31 = vunpack.c.h.bf16 %v1100_v18  ;;  %v932_v42 = vunpack.c.l.bf16 %v1077_v29  ;;  %v933_v43 = vunpack.c.h.bf16 %v1077_v29  ;;  %v1056_v25 = vld [vmem:[%s1248_s25 + $0x18] sm:$0xff]  }
  0x19   : > { %v421_v45 = vadd.f32 %v928_v19, %v372_v35  ;;  %v422_v46 = vadd.f32 %v929_v20, %v373_v36  ;;  %v964_v47 = vunpack.c.l.bf16 %v1085_v34  ;;  %v965_v48 = vunpack.c.h.bf16 %v1085_v34  ;;  %v1102_v20 = vld [vmem:[%s1253_s28 + $0x150] sm:$0xff]   ;;  %v1071_v35 = vld [vmem:[%s1253_s28 + $0x58] sm:$0xff]  }
  0x1a   : > { %v374_v50 = vadd.f32 %v900_v37, %v325_v40  ;;  %v375_v51 = vadd.f32 %v901_v38, %v326_v41  ;;  %v996_v52 = vunpack.c.l.bf16 %v1093_v39  ;;  %v997_v53 = vunpack.c.h.bf16 %v1093_v39  ;;  %v1079_v36 = vld [vmem:[%s1253_s28 + $0x98] sm:$0xff]  }
  0x1b   : > { %v470_v55 = vadd.f32 %v960_v21, %v421_v45  ;;  %v471_v56 = vadd.f32 %v961_v22, %v422_v46  ;;  %v1028_v57 = vunpack.c.l.bf16 %v1101_v44  ;;  %v1029_v58 = vunpack.c.h.bf16 %v1101_v44  ;;  %v1087_v45 = vld [vmem:[%s1253_s28 + $0xd8] sm:$0xff]  }
  0x1c   : > { %v423_v60 = vadd.f32 %v932_v42, %v374_v50  ;;  %v424_v61 = vadd.f32 %v933_v43, %v375_v51  ;;  %v840_v62 = vunpack.c.l.bf16 %v1055_v49  ;;  %v841_v63 = vunpack.c.h.bf16 %v1055_v49  ;;  %v1095_v46 = vld [vmem:[%s1253_s28 + $0x118] sm:$0xff]  }
  0x1d   : > { %v519_v1 = vadd.f32 %v992_v27, %v470_v55  ;;  %v520_v2 = vadd.f32 %v993_v28, %v471_v56  ;;  %v872_v3 = vunpack.c.l.bf16 %v1062_v54  ;;  %v873_v4 = vunpack.c.h.bf16 %v1062_v54  ;;  %v1103_v55 = vld [vmem:[%s1253_s28 + $0x158] sm:$0xff]   ;;  %v1057_v56 = vld [vmem:[%s1248_s25 + $0x20] sm:$0xff]  }
  0x1e   : > { %v472_v6 = vadd.f32 %v964_v47, %v423_v60  ;;  %v473_v7 = vadd.f32 %v965_v48, %v424_v61  ;;  %v904_v8 = vunpack.c.l.bf16 %v1070_v59  ;;  %v905_v9 = vunpack.c.h.bf16 %v1070_v59  ;;  %v1064_v61 = vld [vmem:[%s1253_s28 + $0x20] sm:$0xff]  }
  0x1f   : > { %v568_v11 = vadd.f32 %v1024_v30, %v519_v1  ;;  %v569_v12 = vadd.f32 %v1025_v31, %v520_v2  ;;  %v327_v13 = vadd.f32 %v872_v3, %v840_v62  ;;  %v328_v14 = vadd.f32 %v873_v4, %v841_v63  ;;  %v1063_v30 = vld [vmem:[%s1253_s28 + $0x18] sm:$0xff]   ;;  %v1072_v3 = vld [vmem:[%s1253_s28 + $0x60] sm:$0xff]  }
  0x20   : > { %v521_v16 = vadd.f32 %v996_v52, %v472_v6  ;;  %v522_v17 = vadd.f32 %v997_v53, %v473_v7  ;;  %v936_v18 = vunpack.c.l.bf16 %v1078_v5  ;;  %v937_v19 = vunpack.c.h.bf16 %v1078_v5  ;;  %v1080_v4 = vld [vmem:[%s1253_s28 + $0xa0] sm:$0xff]  }
  0x21   : > { %v585_v21 = vpack.c.bf16 %v569_v12, %v568_v11  ;;  %v376_v22 = vadd.f32 %v904_v8, %v327_v13  ;;  %v377_v23 = vadd.f32 %v905_v9, %v328_v14  ;;  %v968_v24 = vunpack.c.l.bf16 %v1086_v10  ;;  %v1088_v13 = vld [vmem:[%s1253_s28 + $0xe0] sm:$0xff]  }
  0x22   : > { %v570_v26 = vadd.f32 %v1028_v57, %v521_v16  ;;  %v571_v27 = vadd.f32 %v1029_v58, %v522_v17  ;;  %v969_v28 = vunpack.c.h.bf16 %v1086_v10  ;;  %v1000_v29 = vunpack.c.l.bf16 %v1094_v15  ;;  %v1096_v14 = vld [vmem:[%s1253_s28 + $0x120] sm:$0xff]  }
  0x23   : > { %1118 = vmatpush3.bf16.msra.mxu0 %v585_v21  ;;  %v425_v31 = vadd.f32 %v936_v18, %v376_v22  ;;  %v426_v32 = vadd.f32 %v937_v19, %v377_v23  ;;  %v1001_v33 = vunpack.c.h.bf16 %v1094_v15  ;;  %v1032_v34 = vunpack.c.l.bf16 %v1102_v20  ;;  %v1104_v23 = vld [vmem:[%s1253_s28 + $0x160] sm:$0xff]  }
  0x24   : > { %1119 = vmatprep.subr.bf16.mxu0 %v1190_v0  ;;  %v586_v37 = vpack.c.bf16 %v571_v27, %v570_v26  ;;  %v1033_v38 = vunpack.c.h.bf16 %v1102_v20  ;;  %v844_v39 = vunpack.c.l.bf16 %v1056_v25  ;;  %v845_v40 = vunpack.c.h.bf16 %v1056_v25 }
  0x25   : > { %v474_v41 = vadd.f32 %v968_v24, %v425_v31  ;;  %v475_v42 = vadd.f32 %v969_v28, %v426_v32  ;;  %v876_v43 = vunpack.c.l.bf16 %v1063_v30  ;;  %v877_v44 = vunpack.c.h.bf16 %v1063_v30  ;;  %v1058_v24 = vld [vmem:[%s1248_s25 + $0x28] sm:$0xff]  }
  0x26   : > { %v908_v47 = vunpack.c.l.bf16 %v1071_v35  ;;  %v909_v48 = vunpack.c.h.bf16 %v1071_v35  ;;  %v940_v49 = vunpack.c.l.bf16 %v1079_v36  ;;  %v941_v50 = vunpack.c.h.bf16 %v1079_v36 }
  0x27   : > { %1120 = vmatpush3.bf16.msra.mxu0 %v586_v37  ;;  %v523_v51 = vadd.f32 %v1000_v29, %v474_v41  ;;  %v524_v52 = vadd.f32 %v1001_v33, %v475_v42  ;;  %v329_v53 = vadd.f32 %v876_v43, %v844_v39  ;;  %v330_v54 = vadd.f32 %v877_v44, %v845_v40  ;;  %v1065_v33 = vld [vmem:[%s1253_s28 + $0x28] sm:$0xff]  }
  0x28   : > { %1121 = vmatprep.subr.bf16.mxu0 %v1190_v0  ;;  %v972_v57 = vunpack.c.l.bf16 %v1087_v45  ;;  %v973_v58 = vunpack.c.h.bf16 %v1087_v45  ;;  %v1004_v59 = vunpack.c.l.bf16 %v1095_v46  ;;  %v1005_v60 = vunpack.c.h.bf16 %v1095_v46  ;;  %v1081_v39 = vld [vmem:[%s1253_s28 + $0xa8] sm:$0xff]  }
  0x29   : > { %v572_v62 = vadd.f32 %v1032_v34, %v523_v51  ;;  %v573_v63 = vadd.f32 %v1033_v38, %v524_v52  ;;  %v378_v1 = vadd.f32 %v908_v47, %v329_v53  ;;  %v379_v2 = vadd.f32 %v909_v48, %v330_v54  ;;  %v1073_v34 = vld [vmem:[%s1253_s28 + $0x68] sm:$0xff]  }
  0x2a   : > { %v1036_v5 = vunpack.c.l.bf16 %v1103_v55  ;;  %v1037_v6 = vunpack.c.h.bf16 %v1103_v55  ;;  %v848_v7 = vunpack.c.l.bf16 %v1057_v56  ;;  %v849_v8 = vunpack.c.h.bf16 %v1057_v56  ;;  %v1089_v48 = vld [vmem:[%s1253_s28 + $0xe8] sm:$0xff]  }
  0x2b   : > { %v587_v9 = vpack.c.bf16 %v573_v63, %v572_v62  ;;  %v427_v10 = vadd.f32 %v940_v49, %v378_v1  ;;  %v428_v11 = vadd.f32 %v941_v50, %v379_v2  ;;  %v880_v12 = vunpack.c.l.bf16 %v1064_v61  ;;  %v1097_v49 = vld [vmem:[%s1253_s28 + $0x128] sm:$0xff]  }
  0x2c   : > { %v881_v15 = vunpack.c.h.bf16 %v1064_v61  ;;  %v912_v16 = vunpack.c.l.bf16 %v1072_v3  ;;  %v913_v17 = vunpack.c.h.bf16 %v1072_v3  ;;  %v944_v18 = vunpack.c.l.bf16 %v1080_v4 }
  0x2d   : > { %1122 = vmatpush3.bf16.msra.mxu0 %v587_v9  ;;  %v476_v19 = vadd.f32 %v972_v57, %v427_v10  ;;  %v477_v20 = vadd.f32 %v973_v58, %v428_v11  ;;  %v331_v21 = vadd.f32 %v880_v12, %v848_v7  ;;  %v945_v22 = vunpack.c.h.bf16 %v1080_v4  ;;  %v1105_v58 = vld [vmem:[%s1253_s28 + $0x168] sm:$0xff]   ;;  %v1082_v11 = vld [vmem:[%s1253_s28 + $0xb0] sm:$0xff]  }
  0x2e   : > { %1123 = vmatprep.subr.bf16.mxu0 %v1190_v0  ;;  %v332_v25 = vadd.f32 %v881_v15, %v849_v8  ;;  %v976_v26 = vunpack.c.l.bf16 %v1088_v13  ;;  %v977_v27 = vunpack.c.h.bf16 %v1088_v13  ;;  %v1008_v28 = vunpack.c.l.bf16 %v1096_v14 }
  0x2f   : > { %v525_v29 = vadd.f32 %v1004_v59, %v476_v19  ;;  %v526_v30 = vadd.f32 %v1005_v60, %v477_v20  ;;  %v380_v31 = vadd.f32 %v912_v16, %v331_v21  ;;  %v1009_v32 = vunpack.c.h.bf16 %v1096_v14  ;;  %v1059_v59 = vld [vmem:[%s1248_s25 + $0x30] sm:$0xff]  }
  0x30   : > { %v381_v35 = vadd.f32 %v913_v17, %v332_v25  ;;  %v1040_v36 = vunpack.c.l.bf16 %v1104_v23  ;;  %v1041_v37 = vunpack.c.h.bf16 %v1104_v23  ;;  %v852_v38 = vunpack.c.l.bf16 %v1058_v24  ;;  %v1090_v16 = vld [vmem:[%s1253_s28 + $0xf0] sm:$0xff]  }
  0x31   : > { %v574_v40 = vadd.f32 %v1036_v5, %v525_v29  ;;  %v575_v41 = vadd.f32 %v1037_v6, %v526_v30  ;;  %v429_v42 = vadd.f32 %v944_v18, %v380_v31  ;;  %v853_v43 = vunpack.c.h.bf16 %v1058_v24  ;;  %v1066_v5 = vld [vmem:[%s1253_s28 + $0x30] sm:$0xff]   ;;  %v1060_v31 = vld [vmem:[%s1248_s25 + $0x38] sm:$0xff]  }
  0x32   : > { %v430_v44 = vadd.f32 %v945_v22, %v381_v35  ;;  %v884_v45 = vunpack.c.l.bf16 %v1065_v33  ;;  %v885_v46 = vunpack.c.h.bf16 %v1065_v33  ;;  %v916_v47 = vunpack.c.l.bf16 %v1073_v34  ;;  %v1074_v6 = vld [vmem:[%s1253_s28 + $0x70] sm:$0xff]  }
  0x33   : > { %v588_v50 = vpack.c.bf16 %v575_v41, %v574_v40  ;;  %v478_v51 = vadd.f32 %v976_v26, %v429_v42  ;;  %v917_v52 = vunpack.c.h.bf16 %v1073_v34  ;;  %v948_v53 = vunpack.c.l.bf16 %v1081_v39  ;;  %v1098_v21 = vld [vmem:[%s1253_s28 + $0x130] sm:$0xff]   ;;  %v1075_v41 = vld [vmem:[%s1253_s28 + $0x78] sm:$0xff]  }
  0x34   : > { %v479_v54 = vadd.f32 %v977_v27, %v430_v44  ;;  %v333_v55 = vadd.f32 %v884_v45, %v852_v38  ;;  %v334_v56 = vadd.f32 %v885_v46, %v853_v43  ;;  %v949_v57 = vunpack.c.h.bf16 %v1081_v39  ;;  %v1106_v26 = vld [vmem:[%s1253_s28 + $0x170] sm:$0xff]   ;;  %v1083_v46 = vld [vmem:[%s1253_s28 + $0xb8] sm:$0xff]  }
  0x35   : > { %1124 = vmatpush3.bf16.msra.mxu0 %v588_v50  ;;  %v527_v60 = vadd.f32 %v1008_v28, %v478_v51  ;;  %v980_v61 = vunpack.c.l.bf16 %v1089_v48  ;;  %v981_v62 = vunpack.c.h.bf16 %v1089_v48  ;;  %v1012_v63 = vunpack.c.l.bf16 %v1097_v49 }
  0x36   : > { %1125 = vmatprep.subr.bf16.mxu0 %v1190_v0  ;;  %v528_v1 = vadd.f32 %v1009_v32, %v479_v54  ;;  %v382_v2 = vadd.f32 %v916_v47, %v333_v55  ;;  %v383_v3 = vadd.f32 %v917_v52, %v334_v56  ;;  %v1013_v4 = vunpack.c.h.bf16 %v1097_v49  ;;  %v1091_v55 = vld [vmem:[%s1253_s28 + $0xf8] sm:$0xff]  }
  0x37   : > { %v576_v7 = vadd.f32 %v1040_v36, %v527_v60  ;;  %v1044_v8 = vunpack.c.l.bf16 %v1105_v58  ;;  %v1045_v9 = vunpack.c.h.bf16 %v1105_v58  ;;  %v856_v10 = vunpack.c.l.bf16 %v1059_v59  ;;  %v1067_v36 = vld [vmem:[%s1253_s28 + $0x38] sm:$0xff]  }
  0x38   : > { %v577_v12 = vadd.f32 %v1041_v37, %v528_v1  ;;  %v431_v13 = vadd.f32 %v948_v53, %v382_v2  ;;  %v432_v14 = vadd.f32 %v949_v57, %v383_v3  ;;  %v857_v15 = vunpack.c.h.bf16 %v1059_v59 }
  0x39   : > { %v888_v17 = vunpack.c.l.bf16 %v1066_v5  ;;  %v889_v18 = vunpack.c.h.bf16 %v1066_v5  ;;  %v920_v19 = vunpack.c.l.bf16 %v1074_v6  ;;  %v921_v20 = vunpack.c.h.bf16 %v1074_v6  ;;  %v1107_v6 = vld [vmem:[%s1253_s28 + $0x178] sm:$0xff]  }
  0x3a   : > { %v589_v22 = vpack.c.bf16 %v577_v12, %v576_v7  ;;  %v480_v23 = vadd.f32 %v980_v61, %v431_v13  ;;  %v481_v24 = vadd.f32 %v981_v62, %v432_v14  ;;  %v952_v25 = vunpack.c.l.bf16 %v1082_v11  ;;  %v1099_v62 = vld [vmem:[%s1253_s28 + $0x138] sm:$0xff]  }
  0x3b   : > { %v335_v27 = vadd.f32 %v888_v17, %v856_v10  ;;  %v336_v28 = vadd.f32 %v889_v18, %v857_v15  ;;  %v953_v29 = vunpack.c.h.bf16 %v1082_v11  ;;  %v984_v30 = vunpack.c.l.bf16 %v1090_v16 }
  0x3c   : > { %1126 = vmatpush3.bf16.msra.mxu0 %v589_v22  ;;  %v529_v32 = vadd.f32 %v1012_v63, %v480_v23  ;;  %v530_v33 = vadd.f32 %v1013_v4, %v481_v24  ;;  %v985_v34 = vunpack.c.h.bf16 %v1090_v16  ;;  %v1016_v35 = vunpack.c.l.bf16 %v1098_v21  ;;  %v584_v23 = vld [vmem:[%s1336_s2] sm:$0xf] }
  0x3d   : > { %1127 = vmatprep.subr.bf16.mxu0 %v1190_v0  ;;  %v384_v37 = vadd.f32 %v920_v19, %v335_v27  ;;  %v385_v38 = vadd.f32 %v921_v20, %v336_v28  ;;  %v1017_v39 = vunpack.c.h.bf16 %v1098_v21  ;;  %v1048_v40 = vunpack.c.l.bf16 %v1106_v26 }
  0x3e   : > { %v578_v42 = vadd.f32 %v1044_v8, %v529_v32  ;;  %v579_v43 = vadd.f32 %v1045_v9, %v530_v33  ;;  %v1049_v44 = vunpack.c.h.bf16 %v1106_v26  ;;  %v860_v45 = vunpack.c.l.bf16 %v1060_v31 }
  0x3f   : > { %v433_v47 = vadd.f32 %v952_v25, %v384_v37  ;;  %v434_v48 = vadd.f32 %v953_v29, %v385_v38  ;;  %v861_v49 = vunpack.c.h.bf16 %v1060_v31  ;;  %v892_v50 = vunpack.c.l.bf16 %v1067_v36 }
  0x40   : > { %v590_v51 = vpack.c.bf16 %v579_v43, %v578_v42  ;;  %v893_v52 = vunpack.c.h.bf16 %v1067_v36  ;;  %v924_v53 = vunpack.c.l.bf16 %v1075_v41  ;;  %v925_v54 = vunpack.c.h.bf16 %v1075_v41 }
  0x41   : > { %v482_v56 = vadd.f32 %v984_v30, %v433_v47  ;;  %v483_v57 = vadd.f32 %v985_v34, %v434_v48  ;;  %v337_v58 = vadd.f32 %v892_v50, %v860_v45  ;;  %v956_v59 = vunpack.c.l.bf16 %v1083_v46 }
  0x42   : > { %1128 = vmatpush3.bf16.msra.mxu0 %v590_v51  ;;  %v338_v60 = vadd.f32 %v893_v52, %v861_v49  ;;  %v957_v61 = vunpack.c.h.bf16 %v1083_v46  ;;  %v988_v3 = vunpack.c.l.bf16 %v1091_v55  ;;  %v989_v5 = vunpack.c.h.bf16 %v1091_v55 }
  0x43   : > { %1129 = vmatprep.subr.bf16.mxu0 %v1190_v0  ;;  %v531_v63 = vadd.f32 %v1016_v35, %v482_v56  ;;  %v532_v1 = vadd.f32 %v1017_v39, %v483_v57  ;;  %v386_v2 = vadd.f32 %v924_v53, %v337_v58  ;;  %v1020_v10 = vunpack.c.l.bf16 %v1099_v62 }
  0x44   : > { %v387_v4 = vadd.f32 %v925_v54, %v338_v60  ;;  %v1021_v12 = vunpack.c.h.bf16 %v1099_v62  ;;  %v1052_v15 = vunpack.c.l.bf16 %v1107_v6  ;;  %v1053_v17 = vunpack.c.h.bf16 %v1107_v6 }
  0x45   : > { %v580_v7 = vadd.f32 %v1048_v40, %v531_v63  ;;  %v581_v8 = vadd.f32 %v1049_v44, %v532_v1  ;;  %v435_v9 = vadd.f32 %v956_v59, %v386_v2 }
  0x46   : > { %v436_v11 = vadd.f32 %v957_v61, %v387_v4 }
  0x47   : > { %v591_v13 = vpack.c.bf16 %v581_v8, %v580_v7  ;;  %v484_v14 = vadd.f32 %v988_v3, %v435_v9 }
  0x48   : > { %v485_v16 = vadd.f32 %v989_v5, %v436_v11 }
  0x49   : > { %1130 = vmatpush3.bf16.msra.mxu0 %v591_v13  ;;  %v533_v18 = vadd.f32 %v1020_v10, %v484_v14 }
  0x4a   : > { %1131 = vmatprep.subr.bf16.mxu0 %v1190_v0  ;;  %v534_v19 = vadd.f32 %v1021_v12, %v485_v16 }
  0x4b   : > { %v582_v20 = vadd.f32 %v1052_v15, %v533_v18 }
  0x4c   : > { %v583_v21 = vadd.f32 %v1053_v17, %v534_v19 }
  0x4e   : > { %v592_v22 = vpack.c.bf16 %v583_v21, %v582_v20 }
  0x50   : > { %1132 = vmatpush3.bf16.msra.mxu0 %v592_v22 }
  0x53   : > { %1134 = vmatmul.mubr.bf16.vlgmr.msra.gmra.mrb[0].mxu0 %v584_v23 }
  0x88   : > { %v597_v24 = vpop.permute.xlu0 %596 }
 0x126   : > { %v633_v25 = vpop.f32.mrb[0].mxu0 }
 0x127   : > { %v634_v26 = vadd.f32 %v633_v25, %v597_v24  ;;  %v1135_v27 = vpop.f32.mrb[1].mxu0 }
 0x128   : > { %v636_v28 = vpop.f32.mrb[2].mxu0 }
 0x129   : > { %v639_v29 = vmax.f32 %v634_v26, 0.0  ;;  %v1136_v30 = vpop.f32.mrb[3].mxu0 }
 0x12b   : > { %v640_v0 = vpack.c.bf16 %v639_v29, %v639_v29 }
 0x12d   : > { %642 = vst.msk [vmem:[%s257_s8] sm:$0xf] %vm641_vm1, %v640_v0 }
 0x12e PF: > { %s14_s17 = sadd.s32 1, %s1188_s17   ;;  %s1339_s15 = smov %s1184_s16 }
 0x12f   : > { %p11_p5 = scmp.ge.s32.totalorder %s14_s17, 4   ;;  %s1340_s16 = smov %s1342_s18 }
 0x131   :  { %13 = sbr.rel (!%p11_p5) target bundleno = 2 (0x2), region = 74 }

// kernel: network_forward.22
= control target key start
LH: loop header
LB: loop body
LE: loop exit
PB: predicated region body
PF: predicated region fallthrough
CT: control target
= control target key end

     0   :  { %s716_s9 = smov 0   ;;  %s718_s10 = smov 0   ;;  %s829_s0 = inlined_call_operand.vmem [shape: bf16[2,56,16], index: 0, kind: input, shape index: {}]   ;;  %s830_s1 = inlined_call_operand.vmem [shape: bf16[2,6,56,16], index: 1, kind: input, shape index: {}]   ;;  %s831_s2 = inlined_call_operand.vmem [shape: bf16[2,56,16], index: 2, kind: output, shape index: {}]  }
   0x1   :  { %s720_s11 = smov 0  }
   0x2 LB: > { %s24_s12 = sadd.s32 1, %s695_s10  ;;  %p493_p0 = scmp.ge.s32.totalorder %s699_s11, 1  ;;  %s699_s11 = sphi %s720_s11, %s12_s11   ;;  %s695_s10 = sphi %s718_s10, %s833_s10   ;;  %s691_s9 = sphi %s716_s9, %s832_s9  }
   0x3   : > { %p26_p1 = scmp.ge.s32.totalorder %s24_s12, 2  ;;  %p146_p2 = scmp.lt.s32.totalorder %s699_s11, 3 }
   0x5   : > { %s835_s12 = smov (%p26_p1, %s24_s12), 0  ;;  %p147_p3 = pnand %p493_p0, %p146_p2 }
   0x6   : > { %p182_p4 = scmp.lt.s32.totalorder (!%p147_p3), %s691_s9, 1  ;;  %vm380_vm0 = vcmask (!%p147_p3), 125952  }
   0x7   : > { %150 = sbr.rel (%p147_p3) target bundleno = 53 (0x35), region = 28 }
   0xe   : > { %s837_s9 = smov (!%p182_p4, %s691_s9), 1 }
   0xf   : > { %s651_s13 = smul.u32 28, %s837_s9 }
  0x10   : > { %s652_s14 = smul.u32 168, %s837_s9 }
  0x11   : > { %s743_s17 = scalar_lea.vmem %s829_s0, %s651_s13  ;;  %s798_s23 = scalar_lea.vmem %s831_s2, %s651_s13 }
  0x12   : > { %s748_s20 = scalar_lea.vmem %s830_s1, %s652_s14  ;;  %v549_v0 = vld [vmem:[%s743_s17] sm:$0xff]   ;;  %v632_v1 = vld [vmem:[%s743_s17 + $0x8] sm:$0xff]   ;;  %v633_v43 = vld [vmem:[%s743_s17 + $0x10] sm:$0xff]  }
  0x13   : > { %v550_v2 = vunpack.c.l.bf16 %v549_v0  ;;  %v561_v3 = vld [vmem:[%s748_s20] sm:$0xff]   ;;  %v754_v4 = vld [vmem:[%s748_s20 + $0x18] sm:$0xff]   ;;  %v551_v6 = vunpack.c.h.bf16 %v549_v0  ;;  %v554_v7 = vunpack.c.l.bf16 %v632_v1  ;;  %v759_v10 = vld [vmem:[%s748_s20 + $0x50] sm:$0xff]   ;;  %v555_v14 = vunpack.c.h.bf16 %v632_v1 }
  0x14   : > { %v639_v5 = vld [vmem:[%s748_s20 + $0x38] sm:$0xff]   ;;  %v562_v8 = vunpack.c.l.bf16 %v561_v3  ;;  %v249_v9 = vunpack.c.h.bf16 %v754_v4  ;;  %v645_v11 = vld [vmem:[%s748_s20 + $0x70] sm:$0xff]   ;;  %v763_v12 = vld [vmem:[%s748_s20 + $0x88] sm:$0xff]   ;;  %v563_v13 = vunpack.c.h.bf16 %v561_v3  ;;  %v293_v16 = vunpack.c.h.bf16 %v759_v10 }
  0x15   : > { %v586_v15 = vunpack.c.l.bf16 %v639_v5  ;;  %v610_v17 = vunpack.c.l.bf16 %v645_v11  ;;  %v337_v18 = vunpack.c.h.bf16 %v763_v12  ;;  %v636_v19 = vld [vmem:[%s748_s20 + $0x20] sm:$0xff]   ;;  %v642_v20 = vld [vmem:[%s748_s20 + $0x58] sm:$0xff]   ;;  %v770_v21 = vld [vmem:[%s748_s20 + $0x90] sm:$0xff]   ;;  %v587_v25 = vunpack.c.h.bf16 %v639_v5 }
  0x16   : > { %v234_v22 = vmax.f32 %v550_v2, %v562_v8  ;;  %v235_v23 = vmax.f32 %v551_v6, %v563_v13  ;;  %v574_v24 = vunpack.c.l.bf16 %v636_v19  ;;  %v634_v26 = vld [vmem:[%s748_s20 + $0x8] sm:$0xff]   ;;  %v640_v27 = vld [vmem:[%s748_s20 + $0x40] sm:$0xff]   ;;  %v775_v28 = vld [vmem:[%s748_s20 + $0x78] sm:$0xff]   ;;  %v598_v29 = vunpack.c.l.bf16 %v642_v20 }
  0x17   : > { %v611_v30 = vunpack.c.h.bf16 %v645_v11  ;;  %v566_v31 = vunpack.c.l.bf16 %v634_v26  ;;  %v575_v32 = vunpack.c.h.bf16 %v636_v19  ;;  %v637_v33 = vld [vmem:[%s748_s20 + $0x28] sm:$0xff]   ;;  %v622_v36 = vunpack.c.l.bf16 %v770_v21  ;;  %v780_v38 = vld [vmem:[%s748_s20 + $0x60] sm:$0xff]   ;;  %v635_v48 = vld [vmem:[%s748_s20 + $0x10] sm:$0xff]  }
  0x18   : > { %v256_v34 = vmax.f32 %v234_v22, %v249_v9  ;;  %v257_v35 = vmax.f32 %v235_v23, %v574_v24  ;;  %v590_v37 = vunpack.c.l.bf16 %v640_v27  ;;  %v599_v40 = vunpack.c.h.bf16 %v642_v20  ;;  %v649_v53 = vld [vmem:[%s748_s20 + $0x98] sm:$0xff]   ;;  %v641_v54 = vld [vmem:[%s748_s20 + $0x48] sm:$0xff]   ;;  %v647_v63 = vld [vmem:[%s748_s20 + $0x80] sm:$0xff]  }
  0x19   : > { %v236_v39 = vmax.f32 %v554_v7, %v566_v31  ;;  %v614_v41 = vunpack.c.l.bf16 %v775_v28  ;;  %v567_v42 = vunpack.c.h.bf16 %v634_v26  ;;  %v623_v46 = vunpack.c.h.bf16 %v770_v21  ;;  %v638_v9 = vld [vmem:[%s748_s20 + $0x30] sm:$0xff]   ;;  %v644_v21 = vld [vmem:[%s748_s20 + $0x68] sm:$0xff]   ;;  %v212_v22 = vld [vmem:[%s743_s17 + $0x18] sm:$0xf] }
  0x1a   : > { %v278_v44 = vmax.f32 %v256_v34, %v586_v15  ;;  %v279_v45 = vmax.f32 %v257_v35, %v587_v25  ;;  %v578_v47 = vunpack.c.l.bf16 %v637_v33  ;;  %v591_v51 = vunpack.c.h.bf16 %v640_v27 }
  0x1b   : > { %v258_v49 = vmax.f32 %v236_v39, %v575_v32  ;;  %v237_v50 = vmax.f32 %v555_v14, %v567_v42  ;;  %v602_v52 = vunpack.c.l.bf16 %v780_v38  ;;  %v615_v57 = vunpack.c.h.bf16 %v775_v28 }
  0x1c   : > { %v300_v55 = vmax.f32 %v278_v44, %v293_v16  ;;  %v301_v56 = vmax.f32 %v279_v45, %v598_v29  ;;  %v558_v58 = vunpack.c.l.bf16 %v633_v43  ;;  %v570_v61 = vunpack.c.l.bf16 %v635_v48 }
  0x1d   : > { %v280_v59 = vmax.f32 %v258_v49, %v590_v37  ;;  %v259_v60 = vmax.f32 %v237_v50, %v578_v47  ;;  %v579_v62 = vunpack.c.h.bf16 %v637_v33  ;;  %v626_v2 = vunpack.c.l.bf16 %v649_v53  ;;  %v650_v37 = vld [vmem:[%s748_s20 + $0xa0] sm:$0xff]  }
  0x1e   : > { %v322_v0 = vmax.f32 %v300_v55, %v610_v17  ;;  %v323_v1 = vmax.f32 %v301_v56, %v611_v30  ;;  %v594_v3 = vunpack.c.l.bf16 %v641_v54  ;;  %v238_v7 = vmax.f32 %v558_v58, %v570_v61 }
  0x1f   : > { %v302_v5 = vmax.f32 %v280_v59, %v599_v40  ;;  %v281_v6 = vmax.f32 %v259_v60, %v591_v51  ;;  %v603_v8 = vunpack.c.h.bf16 %v780_v38  ;;  %v618_v14 = vunpack.c.l.bf16 %v647_v63 }
  0x20   : > { %v344_v11 = vmax.f32 %v322_v0, %v337_v18  ;;  %v345_v13 = vmax.f32 %v323_v1, %v622_v36  ;;  %v559_v15 = vunpack.c.h.bf16 %v633_v43  ;;  %v260_v19 = vmax.f32 %v238_v7, %v579_v62 }
  0x21   : > { %v324_v16 = vmax.f32 %v302_v5, %v614_v41  ;;  %v303_v17 = vmax.f32 %v281_v6, %v602_v52  ;;  %v571_v20 = vunpack.c.h.bf16 %v635_v48  ;;  %v582_v18 = vunpack.c.l.bf16 %v638_v9 }
  0x22   : > { %v541_v23 = vpack.c.bf16 %v344_v11, %v344_v11  ;;  %v542_v24 = vpack.c.bf16 %v345_v13, %v345_v13  ;;  %v595_v25 = vunpack.c.h.bf16 %v641_v54  ;;  %v282_v28 = vmax.f32 %v260_v19, %v594_v3 }
  0x23   : > { %v346_v26 = vmax.f32 %v324_v16, %v623_v46  ;;  %v325_v27 = vmax.f32 %v303_v17, %v615_v57  ;;  %v239_v29 = vmax.f32 %v559_v15, %v571_v20  ;;  %v627_v30 = vunpack.c.h.bf16 %v649_v53 }
  0x24   : > { %381 = vst.msk [vmem:[%s798_s23] sm:$0xf] %vm380_vm0, %v541_v23  ;;  %382 = vst.msk [vmem:[%s798_s23 + $0x4] sm:$0xf] %vm380_vm0, %v542_v24  ;;  %v606_v31 = vunpack.c.l.bf16 %v644_v21  ;;  %v219_v32 = vunpack.c.l.bf16 %v212_v22  ;;  %v304_v35 = vmax.f32 %v282_v28, %v603_v8  ;;  %v233_v38 = vunpack.c.l.bf16 %v754_v4 }
  0x25   : > { %v543_v33 = vpack.c.bf16 %v346_v26, %v346_v26  ;;  %v347_v34 = vmax.f32 %v325_v27, %v626_v2  ;;  %v261_v36 = vmax.f32 %v239_v29, %v582_v18  ;;  %v583_v39 = vunpack.c.h.bf16 %v638_v9 }
  0x26   : > { %v326_v41 = vmax.f32 %v304_v35, %v618_v14  ;;  %v619_v43 = vunpack.c.h.bf16 %v647_v63  ;;  %v240_v44 = vmax.f32 %v219_v32, %v233_v38  ;;  %v277_v45 = vunpack.c.l.bf16 %v759_v10 }
  0x27   : > { %383 = vst.msk [vmem:[%s798_s23 + $0x8] sm:$0xf] %vm380_vm0, %v543_v33  ;;  %v544_v40 = vpack.c.bf16 %v347_v34, %v347_v34  ;;  %v283_v42 = vmax.f32 %v261_v36, %v595_v25  ;;  %v630_v48 = vunpack.c.l.bf16 %v650_v37  ;;  %v607_v4 = vunpack.c.h.bf16 %v644_v21 }
  0x28   : > { %v348_v46 = vmax.f32 %v326_v41, %v627_v30  ;;  %v262_v49 = vmax.f32 %v240_v44, %v583_v39  ;;  %v321_v53 = vunpack.c.l.bf16 %v763_v12  ;;  %v631_v56 = vunpack.c.h.bf16 %v650_v37 }
  0x29   : > { %384 = vst.msk [vmem:[%s798_s23 + $0xc] sm:$0xf] %vm380_vm0, %v544_v40  ;;  %v305_v47 = vmax.f32 %v283_v42, %v606_v31 }
  0x2a   : > { %v545_v50 = vpack.c.bf16 %v348_v46, %v348_v46  ;;  %v284_v52 = vmax.f32 %v262_v49, %v277_v45 }
  0x2b   : > { %v327_v51 = vmax.f32 %v305_v47, %v619_v43 }
  0x2c   : > { %385 = vst.msk [vmem:[%s798_s23 + $0x10] sm:$0xf] %vm380_vm0, %v545_v50  ;;  %v306_v55 = vmax.f32 %v284_v52, %v607_v4 }
  0x2d   : > { %v349_v54 = vmax.f32 %v327_v51, %v630_v48 }
  0x2e   : > { %v328_v57 = vmax.f32 %v306_v55, %v321_v53 }
  0x2f   : > { %v546_v10 = vpack.c.bf16 %v349_v54, %v349_v54 }
  0x30   : > { %v350_v58 = vmax.f32 %v328_v57, %v631_v56 }
  0x31   : > { %386 = vst.msk [vmem:[%s798_s23 + $0x14] sm:$0xf] %vm380_vm0, %v546_v10 }
  0x32   : > { %v547_v59 = vpack.c.bf16 %v350_v58, %v350_v58 }
  0x34   : > { %387 = vst.msk [vmem:[%s798_s23 + $0x18] sm:$0xf] %vm380_vm0, %v547_v59 }
  0x35 PF: > { %s12_s11 = sadd.s32 1, %s699_s11   ;;  %s832_s9 = smov %s695_s10 }
  0x36   : > { %p9_p5 = scmp.ge.s32.totalorder %s12_s11, 4   ;;  %s833_s10 = smov %s835_s12 }
  0x38   :  { %11 = sbr.rel (!%p9_p5) target bundleno = 2 (0x2), region = 66 }

// kernel: custom-call.30
= control target key start
LH: loop header
LB: loop body
LE: loop exit
PB: predicated region body
PF: predicated region fallthrough
CT: control target
= control target key end

     0   :  { %s6_s0 = inlined_call_operand.vmem [shape: u32[2,4,12], index: 0, kind: output, shape index: {}]  }

// kernel: squeeze.33
= control target key start
LH: loop header
LB: loop body
LE: loop exit
PB: predicated region body
PF: predicated region fallthrough
CT: control target
= control target key end

     0   :  { %s71_s8 = smov 92   ;;  %vm7_vm0 = vcmask 97280   ;;  %s72_s9 = smov 104   ;;  %s104_s0 = inlined_call_operand.vmem [shape: s32[96], index: 0, kind: input, shape index: {}]   ;;  %s105_s1 = inlined_call_operand.vmem [shape: s32[2,4,12], index: 1, kind: output, shape index: {}]  }
   0x1   :  { %v4_v0 = vld [vmem:[%s104_s0] sm:$0x1]  ;;  %s70_s0 = smov 116   ;;  %s73_s10 = smov 80  }
   0x2   :  { %5 = vst [vmem:[#allocation1] sm:$0x1] %v4_v0  ;;  %s74_s11 = smov 68   ;;  %s75_s12 = smov 56  }
   0x3   :  { %s76_s13 = smov 44  }
   0x9   :  { %v9_v1 = vld [vmem:[#allocation1] sm:$0x1]  }
   0xa   :  { %v21_v2 = vld [vmem:[#allocation1] sm:$0x1]   ;;  %10 = vrot.lane.b32.xlu0 %v9_v1, %s70_s0 }
   0xb   :  { %22 = vrot.lane.b32.xlu1 %v21_v2, %s71_s8  ;;  %v15_v3 = vld [vmem:[#allocation1] sm:$0x1]  }
   0xc   :  { %v27_v4 = vld [vmem:[#allocation1] sm:$0x1]  }
   0xd   :  { %v6_v5 = vld [vmem:[#allocation1] sm:$0x1]  }
   0xe   :  { %8 = vst.msk [vmem:[#allocation0] sm:$0x1] %vm7_vm0, %v6_v5   ;;  %16 = vrot.lane.b32.xlu0 %v15_v3, %s72_s9  ;;  %v33_v6 = vld [vmem:[#allocation1] sm:$0x1]  }
   0xf   :  { %28 = vrot.lane.b32.xlu1 %v27_v4, %s73_s10  ;;  %v39_v7 = vld [vmem:[#allocation1] sm:$0x1]  }
  0x10   :  { %v45_v8 = vld [vmem:[#allocation1] sm:$0x1]  }
  0x12   :  { %34 = vrot.lane.b32.xlu0 %v33_v6, %s74_s11 }
  0x13   :  { %40 = vrot.lane.b32.xlu1 %v39_v7, %s75_s12 }
  0x16   :  { %46 = vrot.lane.b32.xlu0 %v45_v8, %s76_s13 }
  0x7c   :  { %v11_v9 = vpop.permute.xlu0 %10  }
  0x7d   :  { %v23_v10 = vpop.permute.xlu1 %22   ;;  %14 = vst.msk [vmem:[#allocation0 + $0x1] sm:$0x1] %vm7_vm0, %v11_v9  }
  0x7e   :  { %26 = vst.msk [vmem:[#allocation0 + $0x3] sm:$0x1] %vm7_vm0, %v23_v10  }
  0x80   :  { %v17_v11 = vpop.permute.xlu0 %16  }
  0x81   :  { %v29_v12 = vpop.permute.xlu1 %28   ;;  %20 = vst.msk [vmem:[#allocation0 + $0x2] sm:$0x1] %vm7_vm0, %v17_v11  }
  0x82   :  { %32 = vst.msk [vmem:[#allocation0 + $0x8] sm:$0x1] %vm7_vm0, %v29_v12  }
  0x84   :  { %v35_v13 = vpop.permute.xlu0 %34  }
  0x85   :  { %v41_v14 = vpop.permute.xlu1 %40   ;;  %38 = vst.msk [vmem:[#allocation0 + $0x9] sm:$0x1] %vm7_vm0, %v35_v13  }
  0x86   :  { %44 = vst.msk [vmem:[#allocation0 + $0xa] sm:$0x1] %vm7_vm0, %v41_v14  }
  0x88   :  { %v54_v15 = vld [vmem:[#allocation0] sm:$0xf]  ;;  %v47_v16 = vpop.permute.xlu0 %46  }
  0x89   :  { %56 = vst [vmem:[%s105_s1] sm:$0xf] %v54_v15  ;;  %50 = vst.msk [vmem:[#allocation0 + $0xb] sm:$0x1] %vm7_vm0, %v47_v16  }
  0x90   :  { %v58_v17 = vld [vmem:[#allocation0 + $0x8] sm:$0xf] }
  0x91   :  { %62 = vst [vmem:[%s105_s1 + $0x4] sm:$0xf] %v58_v17 }

// kernel: network_forward.23
= control target key start
LH: loop header
LB: loop body
LE: loop exit
PB: predicated region body
PF: predicated region fallthrough
CT: control target
= control target key end

     0   :  { %s1481_s15 = smov 0   ;;  %s1483_s16 = smov 0   ;;  %s1835_s0 = inlined_call_operand.vmem [shape: bf16[2,56,4], index: 0, kind: input, shape index: {}]   ;;  %s1836_s1 = inlined_call_operand.vmem [shape: bf16[2,12,56,4], index: 1, kind: input, shape index: {}]   ;;  %s1837_s2 = inlined_call_operand.vmem [shape: bf16[128,56], index: 2, kind: input, shape index: {}]   ;;  %s1838_s3 = inlined_call_operand.vmem [shape: f32[128,1], index: 3, kind: input, shape index: {}]   ;;  %s1839_s4 = inlined_call_operand.vmem [shape: bf16[2,128,4], index: 4, kind: output, shape index: {}]  }
   0x1   :  { %s1485_s17 = smov 0  }
   0x2 LB: > { %s26_s18 = sadd.s32 1, %s1449_s16  ;;  %p1022_p0 = scmp.ge.s32.totalorder %s1453_s17, 1  ;;  %s1453_s17 = sphi %s1485_s17, %s14_s17   ;;  %s1449_s16 = sphi %s1483_s16, %s1841_s16   ;;  %s1445_s15 = sphi %s1481_s15, %s1840_s15  }
   0x3   : > { %p28_p1 = scmp.ge.s32.totalorder %s26_s18, 2  ;;  %p196_p2 = scmp.lt.s32.totalorder %s1453_s17, 3 }
   0x5   : > { %s1843_s18 = smov (%p28_p1, %s26_s18), 0  ;;  %p197_p3 = pnand %p1022_p0, %p196_p2 }
   0x6   : > { %p236_p4 = scmp.lt.s32.totalorder (!%p197_p3), %s1445_s15, 1  ;;  %v1423_v0 = vld [vmem:[%s1837_s2] sm:$0xff] (!%p197_p3)   ;;  %vm694_vm0 = vcmask (!%p197_p3), 457728   ;;  %v1455_v2 = vmov (!%p197_p3), 0   ;;  %vm719_vm1 = vcmask (!%p197_p3), 1043456   ;;  %vm900_vm2 = vcmask (!%p197_p3), 27648  }
   0x7   : > { %200 = sbr.rel (%p197_p3) target bundleno = 314 (0x13a), region = 36  ;;  %v1424_v1 = vld [vmem:[%s1837_s2 + $0x20] sm:$0xff] (!%p197_p3)   ;;  %1368 = vmatprep.mubr.msk.bf16.mxu0 (!%p197_p3), %vm694_vm0, %v1423_v0  ;;  %1422 = vset.pattern.permute.xlu1 (!%p197_p3), %v1455_v2 }
   0x8   : > { %1376 = vmatprep.mubr.msk.bf16.mxu1 (!%p197_p3), %vm694_vm0, %v1424_v1  ;;  %1421 = vset.pattern.permute.xlu0 (!%p197_p3), %v1455_v2 }
   0xe   : > { %s1845_s15 = smov (!%p236_p4, %s1445_s15), 1 }
   0xf   : > { %s1394_s23 = smul.u32 28, %s1845_s15  ;;  %s1138_s6 = sshll.u32 %s1845_s15, 6 }
  0x10   : > { %s1395_s24 = smul.u32 336, %s1845_s15  ;;  %s1789_s9 = scalar_lea.vmem %s1839_s4, %s1138_s6 }
  0x11   : > { %s1514_s27 = scalar_lea.vmem %s1835_s0, %s1394_s23 }
  0x12   : > { %s1519_s30 = scalar_lea.vmem %s1836_s1, %s1395_s24  ;;  %v1156_v3 = vld [vmem:[%s1514_s27] sm:$0xff]   ;;  %v1523_v4 = vld [vmem:[%s1514_s27 + $0x8] sm:$0xff]  }
  0x13   : > { %v1157_v5 = vunpack.c.l.bf16 %v1156_v3  ;;  %v1158_v6 = vunpack.c.h.bf16 %v1156_v3  ;;  %v1168_v7 = vld [vmem:[%s1519_s30] sm:$0xff]   ;;  %v1527_v8 = vld [vmem:[%s1519_s30 + $0x18] sm:$0xff]   ;;  %v1161_v10 = vunpack.c.l.bf16 %v1523_v4  ;;  %v1537_v16 = vld [vmem:[%s1519_s30 + $0x50] sm:$0xff]   ;;  %v1162_v24 = vunpack.c.h.bf16 %v1523_v4 }
  0x14   : > { %v1530_v9 = vld [vmem:[%s1519_s30 + $0x20] sm:$0xff]   ;;  %v1169_v11 = vunpack.c.l.bf16 %v1168_v7  ;;  %v1170_v12 = vunpack.c.h.bf16 %v1168_v7  ;;  %v304_v14 = vunpack.c.h.bf16 %v1527_v8  ;;  %v1318_v15 = vld [vmem:[%s1519_s30 + $0x38] sm:$0xff]   ;;  %v1324_v21 = vld [vmem:[%s1519_s30 + $0x70] sm:$0xff]   ;;  %v348_v27 = vunpack.c.h.bf16 %v1537_v16 }
  0x15   : > { %v1181_v13 = vunpack.c.l.bf16 %v1530_v9  ;;  %v1540_v17 = vld [vmem:[%s1519_s30 + $0x58] sm:$0xff]   ;;  %v1193_v18 = vunpack.c.l.bf16 %v1318_v15  ;;  %v1194_v19 = vunpack.c.h.bf16 %v1318_v15  ;;  %v1545_v22 = vld [vmem:[%s1519_s30 + $0x88] sm:$0xff]   ;;  %v1548_v23 = vld [vmem:[%s1519_s30 + $0x90] sm:$0xff]   ;;  %v1217_v28 = vunpack.c.l.bf16 %v1324_v21 }
  0x16   : > { %v1205_v20 = vunpack.c.l.bf16 %v1540_v17  ;;  %v289_v25 = vadd.f32 %v1169_v11, %v1157_v5  ;;  %v290_v26 = vadd.f32 %v1170_v12, %v1158_v6  ;;  %v1553_v29 = vld [vmem:[%s1519_s30 + $0xa8] sm:$0xff]   ;;  %v1556_v30 = vld [vmem:[%s1519_s30 + $0xc0] sm:$0xff]   ;;  %v1218_v32 = vunpack.c.h.bf16 %v1324_v21  ;;  %v1568_v37 = vld [vmem:[%s1519_s30 + $0xf8] sm:$0xff]  }
  0x17   : > { %v1559_v31 = vld [vmem:[%s1519_s30 + $0xc8] sm:$0xff]   ;;  %v1229_v33 = vunpack.c.l.bf16 %v1548_v23  ;;  %v392_v34 = vunpack.c.h.bf16 %v1545_v22  ;;  %v1241_v35 = vunpack.c.l.bf16 %v1553_v29  ;;  %v1565_v36 = vld [vmem:[%s1519_s30 + $0xe0] sm:$0xff]   ;;  %v1242_v41 = vunpack.c.h.bf16 %v1553_v29  ;;  %v1576_v43 = vld [vmem:[%s1519_s30 + $0x118] sm:$0xff]  }
  0x18   : > { %v1571_v38 = vld [vmem:[%s1519_s30 + $0x100] sm:$0xff]   ;;  %v311_v39 = vadd.f32 %v304_v14, %v289_v25  ;;  %v312_v40 = vadd.f32 %v1181_v13, %v290_v26  ;;  %v1253_v42 = vunpack.c.l.bf16 %v1559_v31  ;;  %v1579_v44 = vld [vmem:[%s1519_s30 + $0x138] sm:$0xff]   ;;  %v436_v45 = vunpack.c.h.bf16 %v1556_v30  ;;  %v1313_v49 = vld [vmem:[%s1519_s30 + $0x8] sm:$0xff]  }
  0x19   : > { %v1265_v46 = vunpack.c.l.bf16 %v1565_v36  ;;  %v1266_v47 = vunpack.c.h.bf16 %v1565_v36  ;;  %v1277_v48 = vunpack.c.l.bf16 %v1571_v38  ;;  %v1587_v50 = vld [vmem:[%s1519_s30 + $0x28] sm:$0xff]   ;;  %v480_v53 = vunpack.c.h.bf16 %v1568_v37  ;;  %v1319_v55 = vld [vmem:[%s1519_s30 + $0x40] sm:$0xff]   ;;  %v1594_v57 = vld [vmem:[%s1519_s30 + $0x130] sm:$0xff]  }
  0x1a   : > { %v333_v51 = vadd.f32 %v1193_v18, %v311_v39  ;;  %v334_v52 = vadd.f32 %v1194_v19, %v312_v40  ;;  %v1289_v54 = vunpack.c.l.bf16 %v1576_v43  ;;  %v1290_v56 = vunpack.c.h.bf16 %v1576_v43  ;;  %v1600_v1 = vld [vmem:[%s1519_s30 + $0x60] sm:$0xff]   ;;  %v1325_v2 = vld [vmem:[%s1519_s30 + $0x78] sm:$0xff]   ;;  %v1612_v26 = vld [vmem:[%s1519_s30 + $0xd0] sm:$0xff]  }
  0x1b   : > { %v1301_v58 = vunpack.c.l.bf16 %v1579_v44  ;;  %v1173_v59 = vunpack.c.l.bf16 %v1313_v49  ;;  %v1174_v60 = vunpack.c.h.bf16 %v1313_v49  ;;  %v1182_v63 = vunpack.c.h.bf16 %v1530_v9  ;;  %v1606_v14 = vld [vmem:[%s1519_s30 + $0x98] sm:$0xff]   ;;  %v1331_v9 = vld [vmem:[%s1519_s30 + $0xb0] sm:$0xff]   ;;  %v1619_v39 = vld [vmem:[%s1519_s30 + $0x108] sm:$0xff]  }
  0x1c   : > { %v355_v61 = vadd.f32 %v348_v27, %v333_v51  ;;  %v356_v62 = vadd.f32 %v1205_v20, %v334_v52  ;;  %v1185_v0 = vunpack.c.l.bf16 %v1587_v50  ;;  %v1197_v5 = vunpack.c.l.bf16 %v1319_v55  ;;  %v1615_v27 = vld [vmem:[%s1519_s30 + $0xe8] sm:$0xff]  }
  0x1d   : > { %v291_v3 = vadd.f32 %v1173_v59, %v1161_v10  ;;  %v292_v4 = vadd.f32 %v1174_v60, %v1162_v24  ;;  %v1198_v6 = vunpack.c.h.bf16 %v1319_v55  ;;  %v524_v12 = vunpack.c.h.bf16 %v1594_v57 }
  0x1e   : > { %v377_v7 = vadd.f32 %v1217_v28, %v355_v61  ;;  %v378_v11 = vadd.f32 %v1218_v32, %v356_v62  ;;  %v1206_v13 = vunpack.c.h.bf16 %v1540_v17  ;;  %v1209_v19 = vunpack.c.l.bf16 %v1600_v1 }
  0x1f   : > { %v313_v15 = vadd.f32 %v1182_v63, %v291_v3  ;;  %v314_v18 = vadd.f32 %v1185_v0, %v292_v4  ;;  %v1221_v10 = vunpack.c.l.bf16 %v1325_v2  ;;  %v1222_v24 = vunpack.c.h.bf16 %v1325_v2  ;;  %v1312_v0 = vld [vmem:[%s1514_s27 + $0x10] sm:$0xff]   ;;  %v561_v2 = vld [vmem:[%s1838_s3 + $0x18] sm:$0xff] }
  0x20   : > { %v399_v20 = vadd.f32 %v392_v34, %v377_v7  ;;  %v400_v21 = vadd.f32 %v1229_v33, %v378_v11  ;;  %v1230_v25 = vunpack.c.h.bf16 %v1548_v23  ;;  %v1233_v29 = vunpack.c.l.bf16 %v1606_v14  ;;  %v1623_v34 = vld [vmem:[%s1519_s30 + $0x120] sm:$0xff]   ;;  %v560_v23 = vld [vmem:[%s1838_s3 + $0x10] sm:$0xff] }
  0x21   : > { %v335_v17 = vadd.f32 %v1197_v5, %v313_v15  ;;  %v336_v28 = vadd.f32 %v1198_v6, %v314_v18  ;;  %v1245_v32 = vunpack.c.l.bf16 %v1331_v9  ;;  %v1246_v51 = vunpack.c.h.bf16 %v1331_v9  ;;  %586 = vperm.xlu1 %1422, %v560_v23   ;;  %v1314_v6 = vld [vmem:[%s1519_s30 + $0x10] sm:$0xff]  }
  0x22   : > { %v421_v40 = vadd.f32 %v1241_v35, %v399_v20  ;;  %v422_v49 = vadd.f32 %v1242_v41, %v400_v21  ;;  %v1254_v33 = vunpack.c.h.bf16 %v1559_v31  ;;  %v1257_v59 = vunpack.c.l.bf16 %v1612_v26  ;;  %v558_v35 = vld [vmem:[%s1838_s3] sm:$0xff]  ;;  %v559_v31 = vld [vmem:[%s1838_s3 + $0x8] sm:$0xff]  ;;  %v1654_v9 = vld [vmem:[%s1519_s30 + $0x30] sm:$0xff]  }
  0x23   : > { %v357_v52 = vadd.f32 %v1206_v13, %v335_v17  ;;  %v358_v55 = vadd.f32 %v1209_v19, %v336_v28  ;;  %v1269_v60 = vunpack.c.l.bf16 %v1615_v27  ;;  %v1270_v62 = vunpack.c.h.bf16 %v1615_v27  ;;  %576 = vperm.xlu0 %1421, %v558_v35   ;;  %v1320_v21 = vld [vmem:[%s1519_s30 + $0x48] sm:$0xff]   ;;  %v1682_v35 = vld [vmem:[%s1519_s30 + $0x140] sm:$0xff]  }
  0x24   : > { %v443_v41 = vadd.f32 %v436_v45, %v421_v40  ;;  %v444_v61 = vadd.f32 %v1253_v42, %v422_v49  ;;  %v1278_v63 = vunpack.c.h.bf16 %v1571_v38  ;;  %v1281_v5 = vunpack.c.l.bf16 %v1619_v39  ;;  %v562_v38 = vld [vmem:[%s1838_s3 + $0x20] sm:$0xff]  ;;  %v1674_v49 = vld [vmem:[%s1519_s30 + $0x68] sm:$0xff]  }
  0x25   : > { %v379_v3 = vadd.f32 %v1221_v10, %v357_v52  ;;  %v380_v4 = vadd.f32 %v1222_v24, %v358_v55  ;;  %v1293_v45 = vunpack.c.l.bf16 %v1623_v34  ;;  %v1294_v11 = vunpack.c.h.bf16 %v1623_v34  ;;  %591 = vperm.xlu1 %1422, %v561_v2   ;;  %v563_v24 = vld [vmem:[%s1838_s3 + $0x28] sm:$0xff]  ;;  %v1326_v52 = vld [vmem:[%s1519_s30 + $0x80] sm:$0xff]  }
  0x26   : > { %v465_v42 = vadd.f32 %v1265_v46, %v443_v41  ;;  %v466_v7 = vadd.f32 %v1266_v47, %v444_v61  ;;  %v1302_v13 = vunpack.c.h.bf16 %v1579_v44  ;;  %v1165_v19 = vunpack.c.l.bf16 %v1312_v0  ;;  %v566_v34 = vld [vmem:[%s1838_s3 + $0x40] sm:$0xff] }
  0x27   : > { %v401_v15 = vadd.f32 %v1230_v25, %v379_v3  ;;  %v402_v18 = vadd.f32 %v1233_v29, %v380_v4  ;;  %v1166_v10 = vunpack.c.h.bf16 %v1312_v0  ;;  %v1177_v36 = vunpack.c.l.bf16 %v1314_v6  ;;  %581 = vperm.xlu0 %1421, %v559_v31  }
  0x28   : > { %v487_v20 = vadd.f32 %v480_v53, %v465_v42  ;;  %v488_v46 = vadd.f32 %v1277_v48, %v466_v7  ;;  %v1178_v47 = vunpack.c.h.bf16 %v1314_v6  ;;  %v1186_v17 = vunpack.c.h.bf16 %v1587_v50 }
  0x29   : > { %v423_v25 = vadd.f32 %v1245_v32, %v401_v15  ;;  %v424_v27 = vadd.f32 %v1246_v51, %v402_v18  ;;  %v1189_v53 = vunpack.c.l.bf16 %v1654_v9  ;;  %v293_v29 = vadd.f32 %v1177_v36, %v1165_v19  ;;  %601 = vperm.xlu1 %1422, %v563_v24   ;;  %v1332_v15 = vld [vmem:[%s1519_s30 + $0xb8] sm:$0xff]  }
  0x2a   : > { %v509_v48 = vadd.f32 %v1289_v54, %v487_v20  ;;  %v510_v28 = vadd.f32 %v1290_v56, %v488_v46  ;;  %v294_v40 = vadd.f32 %v1178_v47, %v1166_v10  ;;  %v1201_v50 = vunpack.c.l.bf16 %v1320_v21  ;;  %v1707_v20 = vld [vmem:[%s1519_s30 + $0xd8] sm:$0xff]  }
  0x2b   : > { %v445_v32 = vadd.f32 %v1254_v33, %v423_v25  ;;  %v446_v51 = vadd.f32 %v1257_v59, %v424_v27  ;;  %v1202_v23 = vunpack.c.h.bf16 %v1320_v21  ;;  %v315_v43 = vadd.f32 %v1186_v17, %v293_v29  ;;  %596 = vperm.xlu0 %1421, %v562_v38   ;;  %v565_v33 = vld [vmem:[%s1838_s3 + $0x38] sm:$0xff]  ;;  %v1338_v21 = vld [vmem:[%s1519_s30 + $0xf0] sm:$0xff]  }
  0x2c   : > { %v531_v55 = vadd.f32 %v524_v12, %v509_v48  ;;  %v532_v54 = vadd.f32 %v1301_v58, %v510_v28  ;;  %v316_v56 = vadd.f32 %v1189_v53, %v294_v40  ;;  %v1210_v61 = vunpack.c.h.bf16 %v1600_v1  ;;  %v1690_v12 = vld [vmem:[%s1519_s30 + $0xa0] sm:$0xff]   ;;  %v564_v1 = vld [vmem:[%s1838_s3 + $0x30] sm:$0xff]  ;;  %v267_v27 = vld [vmem:[%s1514_s27 + $0x18] sm:$0xf] }
  0x2d   : > { %v467_v59 = vadd.f32 %v1269_v60, %v445_v32  ;;  %v468_v41 = vadd.f32 %v1270_v62, %v446_v51  ;;  %v1213_v0 = vunpack.c.l.bf16 %v1674_v49  ;;  %v337_v58 = vadd.f32 %v1201_v50, %v315_v43  ;;  %611 = vperm.xlu1 %1422, %v565_v33   ;;  %v1719_v38 = vld [vmem:[%s1519_s30 + $0x110] sm:$0xff]   ;;  %v1344_v40 = vld [vmem:[%s1519_s30 + $0x128] sm:$0xff]   ;;  %v569_v50 = vld [vmem:[%s1838_s3 + $0x58] sm:$0xff] }
  0x2e   : > { %v554_v2 = vpack.c.bf16 %v532_v54, %v531_v55  ;;  %v338_v3 = vadd.f32 %v1202_v23, %v316_v56  ;;  %v1225_v4 = vunpack.c.l.bf16 %v1326_v52  ;;  %v1305_v42 = vunpack.c.l.bf16 %v1682_v35  ;;  %v568_v55 = vld [vmem:[%s1838_s3 + $0x50] sm:$0xff]  ;;  %v1347_v43 = vld [vmem:[%s1519_s30 + $0x148] sm:$0xff]  }
  0x2f   : > { %v489_v6 = vadd.f32 %v1278_v63, %v467_v59  ;;  %v490_v31 = vadd.f32 %v1281_v5, %v468_v41  ;;  %v1226_v7 = vunpack.c.h.bf16 %v1326_v52  ;;  %v359_v60 = vadd.f32 %v1210_v61, %v337_v58  ;;  %v567_v5 = vld [vmem:[%s1838_s3 + $0x48] sm:$0xff]  ;;  %606 = vperm.xlu0 %1421, %v564_v1  }
  0x30   : > { %1360 = vmatprep.subr.bf16.mxu0 %v554_v2  ;;  %1384 = vmatprep.subr.bf16.mxu1 %v554_v2  ;;  %v360_v62 = vadd.f32 %v1213_v0, %v338_v3  ;;  %v1234_v18 = vunpack.c.h.bf16 %v1606_v14  ;;  %v1237_v63 = vunpack.c.l.bf16 %v1690_v12  ;;  %v1249_v36 = vunpack.c.l.bf16 %v1332_v15 }
  0x31   : > { %1361 = vmatpush3.bf16.msra.mxu0 %v554_v2  ;;  %1388 = vmatpush3.bf16.msra.mxu1 %v554_v2  ;;  %v511_v19 = vadd.f32 %v1293_v45, %v489_v6  ;;  %v512_v10 = vadd.f32 %v1294_v11, %v490_v31  ;;  %v381_v46 = vadd.f32 %v1225_v4, %v359_v60  ;;  %v1250_v47 = vunpack.c.h.bf16 %v1332_v15  ;;  %v571_v2 = vld [vmem:[%s1838_s3 + $0x68] sm:$0xff]  ;;  %v572_v60 = vld [vmem:[%s1838_s3 + $0x70] sm:$0xff] }
  0x32   : > { %v382_v14 = vadd.f32 %v1226_v7, %v360_v62  ;;  %621 = vperm.xlu1 %1422, %v567_v5   ;;  %v1258_v17 = vunpack.c.h.bf16 %v1612_v26  ;;  %v1261_v53 = vunpack.c.l.bf16 %v1707_v20  ;;  %v1273_v28 = vunpack.c.l.bf16 %v1338_v21 }
  0x33   : > { %v533_v24 = vadd.f32 %v1302_v13, %v511_v19  ;;  %v534_v25 = vadd.f32 %v1305_v42, %v512_v10  ;;  %v403_v45 = vadd.f32 %v1234_v18, %v381_v46  ;;  %v1274_v44 = vunpack.c.h.bf16 %v1338_v21  ;;  %616 = vperm.xlu0 %1421, %v566_v34  }
  0x34   : > { %v404_v11 = vadd.f32 %v1237_v63, %v382_v14  ;;  %v274_v32 = vunpack.c.l.bf16 %v267_v27  ;;  %v288_v51 = vunpack.c.l.bf16 %v1527_v8  ;;  %v1282_v26 = vunpack.c.h.bf16 %v1619_v39 }
  0x35   : > { %v555_v48 = vpack.c.bf16 %v534_v25, %v533_v24  ;;  %v425_v29 = vadd.f32 %v1249_v36, %v403_v45  ;;  %v1285_v23 = vunpack.c.l.bf16 %v1719_v38  ;;  %v1190_v52 = vunpack.c.h.bf16 %v1654_v9  ;;  %v1426_v45 = vld [vmem:[%s1837_s2 + $0x28] sm:$0xff]  }
  0x36   : > { %v426_v13 = vadd.f32 %v1250_v47, %v404_v11  ;;  %v295_v56 = vadd.f32 %v288_v51, %v274_v32  ;;  %v332_v33 = vunpack.c.l.bf16 %v1537_v16  ;;  %v1297_v59 = vunpack.c.l.bf16 %v1344_v40  ;;  %631 = vperm.xlu1 %1422, %v569_v50   ;;  %v570_v16 = vld [vmem:[%s1838_s3 + $0x60] sm:$0xff]  ;;  %v1428_v11 = vld [vmem:[%s1837_s2 + $0x30] sm:$0xff]  }
  0x37   : > { %1362 = vmatprep.subr.bf16.mxu0 %v555_v48  ;;  %1385 = vmatprep.subr.bf16.mxu1 %v555_v48  ;;  %v447_v8 = vadd.f32 %v1258_v17, %v425_v29  ;;  %v1298_v41 = vunpack.c.h.bf16 %v1344_v40  ;;  %v1214_v9 = vunpack.c.h.bf16 %v1674_v49  ;;  %v1306_v58 = vunpack.c.h.bf16 %v1682_v35  ;;  %v573_v35 = vld [vmem:[%s1838_s3 + $0x78] sm:$0xff] }
  0x38   : > { %1363 = vmatpush3.bf16.msra.mxu0 %v555_v48  ;;  %1389 = vmatpush3.bf16.msra.mxu1 %v555_v48  ;;  %v448_v54 = vadd.f32 %v1261_v53, %v426_v13  ;;  %v317_v0 = vadd.f32 %v1190_v52, %v295_v56  ;;  %v1309_v3 = vunpack.c.l.bf16 %v1347_v43  ;;  %v376_v42 = vunpack.c.l.bf16 %v1545_v22  ;;  %v1429_v17 = vld [vmem:[%s1837_s2 + $0x18] sm:$0xff]  }
  0x39   : > { %v469_v39 = vadd.f32 %v1273_v28, %v447_v8  ;;  %626 = vperm.xlu0 %1421, %v568_v55   ;;  %v1238_v1 = vunpack.c.h.bf16 %v1690_v12  ;;  %v420_v22 = vunpack.c.l.bf16 %v1556_v30  ;;  %v1262_v10 = vunpack.c.h.bf16 %v1707_v20  ;;  %v1430_v53 = vld [vmem:[%s1837_s2 + $0x38] sm:$0xff]  }
  0x3a   : > { %v470_v61 = vadd.f32 %v1274_v44, %v448_v54  ;;  %v339_v31 = vadd.f32 %v332_v33, %v317_v0  ;;  %641 = vperm.xlu1 %1422, %v571_v2   ;;  %v464_v46 = vunpack.c.l.bf16 %v1568_v37  ;;  %v1286_v36 = vunpack.c.h.bf16 %v1719_v38  ;;  %v1425_v37 = vld [vmem:[%s1837_s2 + $0x8] sm:$0xff]  }
  0x3b   : > { %v491_v4 = vadd.f32 %v1282_v26, %v469_v39  ;;  %v508_v21 = vunpack.c.l.bf16 %v1594_v57  ;;  %v1310_v24 = vunpack.c.h.bf16 %v1347_v43  ;;  %v1427_v57 = vld [vmem:[%s1837_s2 + $0x10] sm:$0xff]  }
  0x3c   : > { %v492_v6 = vadd.f32 %v1285_v23, %v470_v61  ;;  %v361_v15 = vadd.f32 %v1214_v9, %v339_v31 }
  0x3d   : > { %v513_v7 = vadd.f32 %v1297_v59, %v491_v4  ;;  %636 = vperm.xlu0 %1421, %v570_v16  }
  0x3e   : > { %v514_v49 = vadd.f32 %v1298_v41, %v492_v6  ;;  %v383_v63 = vadd.f32 %v376_v42, %v361_v15  ;;  %651 = vperm.xlu1 %1422, %v573_v35  }
  0x3f   : > { %v535_v62 = vadd.f32 %v1306_v58, %v513_v7 }
  0x40   : > { %v536_v18 = vadd.f32 %v1309_v3, %v514_v49  ;;  %v405_v19 = vadd.f32 %v1238_v1, %v383_v63 }
  0x41   : > { %646 = vperm.xlu0 %1421, %v572_v60  }
  0x42   : > { %v556_v5 = vpack.c.bf16 %v536_v18, %v535_v62  ;;  %v427_v12 = vadd.f32 %v420_v22, %v405_v19 }
  0x44   : > { %1364 = vmatprep.subr.bf16.mxu0 %v556_v5  ;;  %1386 = vmatprep.subr.bf16.mxu1 %v556_v5  ;;  %v449_v14 = vadd.f32 %v1262_v10, %v427_v12 }
  0x45   : > { %1365 = vmatpush3.bf16.msra.mxu0 %v556_v5  ;;  %1390 = vmatpush3.bf16.msra.mxu1 %v556_v5 }
  0x46   : > { %v471_v47 = vadd.f32 %v464_v46, %v449_v14 }
  0x48   : > { %v493_v30 = vadd.f32 %v1286_v36, %v471_v47 }
  0x4a   : > { %v515_v25 = vadd.f32 %v508_v21, %v493_v30 }
  0x4c   : > { %v537_v27 = vadd.f32 %v1310_v24, %v515_v25 }
  0x4e   : > { %v557_v20 = vpack.c.bf16 %v537_v27, %v537_v27 }
  0x50   : > { %1392 = vmatprep.subr.msk.bf16.mxu0 %vm719_vm1, %v557_v20  ;;  %1393 = vmatprep.subr.msk.bf16.mxu1 %vm719_vm1, %v557_v20  ;;  %v721_v34 = vsel %vm719_vm1, %v557_v20, 0 }
  0x51   : > { %1367 = vmatpush3.bf16.msra.mxu0 %v721_v34  ;;  %1391 = vmatpush3.bf16.msra.mxu1 %v721_v34 }
  0x54   : > { %1369 = vmatmul.mubr.msk.bf16.vlgmr.msra.gmra.mrb[0].mxu0 %vm694_vm0, %v1425_v37  ;;  %1377 = vmatmul.mubr.msk.bf16.vlgmr.msra.gmra.mrb[0].mxu1 %vm694_vm0, %v1426_v45 }
  0x55   : > { %1372 = vmatprep.mubr.msk.bf16.mxu0 %vm694_vm0, %v1427_v57  ;;  %1380 = vmatprep.mubr.msk.bf16.mxu1 %vm694_vm0, %v1428_v11 }
  0x5c   : > { %1373 = vmatmul.mubr.msk.bf16.gmra.mrb[4].mxu0 %vm694_vm0, %v1429_v17  ;;  %1381 = vmatmul.mubr.msk.bf16.gmra.mrb[4].mxu1 %vm694_vm0, %v1430_v53 }
  0xa0   : > { %v587_v38 = vpop.permute.xlu1 %586 }
  0xa2   : > { %v577_v48 = vpop.permute.xlu0 %576 }
  0xa4   : > { %v592_v28 = vpop.permute.xlu1 %591 }
  0xa6   : > { %v582_v44 = vpop.permute.xlu0 %581 }
  0xa8   : > { %v1779_v29 = vpop.permute.xlu1 %601 }
  0xaa   : > { %v597_v13 = vpop.permute.xlu0 %596 }
  0xac   : > { %v1781_v40 = vpop.permute.xlu1 %611 }
  0xae   : > { %v607_v32 = vpop.permute.xlu0 %606 }
  0xb1   : > { %v622_v51 = vpop.permute.xlu1 %621 }
  0xb2   : > { %v617_v50 = vpop.permute.xlu0 %616 }
  0xb5   : > { %v632_v26 = vpop.permute.xlu1 %631 }
  0xb8   : > { %v627_v23 = vpop.permute.xlu0 %626 }
  0xb9   : > { %v1783_v52 = vpop.permute.xlu1 %641 }
  0xbc   : > { %v637_v55 = vpop.permute.xlu0 %636 }
  0xbd   : > { %v652_v22 = vpop.permute.xlu1 %651 }
  0xc0   : > { %v647_v5 = vpop.permute.xlu0 %646 }
 0x127   : > { %v1370_v8 = vpop.f32.mrb[0].mxu0  ;;  %v1378_v54 = vpop.f32.mrb[0].mxu1 }
 0x128   : > { %v766_v43 = vadd.f32 %v1370_v8, %v587_v38  ;;  %v798_v56 = vadd.f32 %v1378_v54, %v627_v23  ;;  %v757_v33 = vpop.f32.mrb[1].mxu0  ;;  %v789_v59 = vpop.f32.mrb[1].mxu1 }
 0x129   : > { %v758_v41 = vadd.f32 %v757_v33, %v577_v48  ;;  %v790_v39 = vadd.f32 %v789_v59, %v617_v50  ;;  %v1371_v61 = vpop.f32.mrb[2].mxu0  ;;  %v1379_v0 = vpop.f32.mrb[2].mxu1 }
 0x12a   : > { %v822_v9 = vmax.f32 %v766_v43, 0.0  ;;  %v830_v2 = vmax.f32 %v798_v56, 0.0  ;;  %v769_v58 = vadd.f32 %v1371_v61, %v592_v28  ;;  %v801_v3 = vadd.f32 %v1379_v0, %v632_v26  ;;  %v760_v16 = vpop.f32.mrb[3].mxu0  ;;  %v792_v4 = vpop.f32.mrb[3].mxu1 }
 0x12b   : > { %v820_v6 = vmax.f32 %v758_v41, 0.0  ;;  %v828_v31 = vmax.f32 %v790_v39, 0.0  ;;  %v761_v42 = vadd.f32 %v760_v16, %v582_v44  ;;  %v793_v7 = vadd.f32 %v792_v4, %v622_v51 }
 0x12c   : > { %v1141_v49 = vpack.c.bf16 %v822_v9, %v822_v9  ;;  %v1149_v15 = vpack.c.bf16 %v830_v2, %v830_v2  ;;  %v823_v1 = vmax.f32 %v769_v58, 0.0  ;;  %v831_v35 = vmax.f32 %v801_v3, 0.0 }
 0x12d   : > { %v1139_v60 = vpack.c.bf16 %v820_v6, %v820_v6  ;;  %v1147_v62 = vpack.c.bf16 %v828_v31, %v828_v31  ;;  %v821_v18 = vmax.f32 %v761_v42, 0.0  ;;  %v829_v63 = vmax.f32 %v793_v7, 0.0 }
 0x12e   : > { %903 = vst.msk [vmem:[%s1789_s9 + $0x8] sm:$0xf] %vm900_vm2, %v1141_v49  ;;  %911 = vst.msk [vmem:[%s1789_s9 + $0x28] sm:$0xf] %vm900_vm2, %v1149_v15  ;;  %v1142_v19 = vpack.c.bf16 %v823_v1, %v823_v1  ;;  %v1150_v10 = vpack.c.bf16 %v831_v35, %v831_v35 }
 0x12f   : > { %901 = vst.msk [vmem:[%s1789_s9] sm:$0xf] %vm900_vm2, %v1139_v60  ;;  %909 = vst.msk [vmem:[%s1789_s9 + $0x20] sm:$0xf] %vm900_vm2, %v1147_v62  ;;  %v1140_v12 = vpack.c.bf16 %v821_v18, %v821_v18  ;;  %v1148_v46 = vpack.c.bf16 %v829_v63, %v829_v63  ;;  %v1374_v14 = vpop.f32.mrb[4].mxu0  ;;  %v1382_v36 = vpop.f32.mrb[4].mxu1 }
 0x130   : > { %904 = vst.msk [vmem:[%s1789_s9 + $0xc] sm:$0xf] %vm900_vm2, %v1142_v19  ;;  %912 = vst.msk [vmem:[%s1789_s9 + $0x2c] sm:$0xf] %vm900_vm2, %v1150_v10  ;;  %v782_v47 = vadd.f32 %v1374_v14, %v607_v32  ;;  %v814_v21 = vadd.f32 %v1382_v36, %v647_v5  ;;  %v773_v30 = vpop.f32.mrb[5].mxu0  ;;  %v805_v24 = vpop.f32.mrb[5].mxu1 }
 0x131   : > { %902 = vst.msk [vmem:[%s1789_s9 + $0x4] sm:$0xf] %vm900_vm2, %v1140_v12  ;;  %910 = vst.msk [vmem:[%s1789_s9 + $0x24] sm:$0xf] %vm900_vm2, %v1148_v46  ;;  %v774_v25 = vadd.f32 %v773_v30, %v597_v13  ;;  %v806_v27 = vadd.f32 %v805_v24, %v637_v55  ;;  %v1375_v20 = vpop.f32.mrb[6].mxu0  ;;  %v1383_v34 = vpop.f32.mrb[6].mxu1 }
 0x132   : > { %v826_v37 = vmax.f32 %v782_v47, 0.0  ;;  %v834_v45 = vmax.f32 %v814_v21, 0.0  ;;  %v785_v57 = vadd.f32 %v1375_v20, %v1781_v40  ;;  %v817_v11 = vadd.f32 %v1383_v34, %v652_v22  ;;  %v776_v17 = vpop.f32.mrb[7].mxu0  ;;  %v808_v53 = vpop.f32.mrb[7].mxu1 }
 0x133   : > { %v824_v38 = vmax.f32 %v774_v25, 0.0  ;;  %v832_v48 = vmax.f32 %v806_v27, 0.0  ;;  %v777_v28 = vadd.f32 %v776_v17, %v1779_v29  ;;  %v809_v44 = vadd.f32 %v808_v53, %v1783_v52 }
 0x134   : > { %v1145_v13 = vpack.c.bf16 %v826_v37, %v826_v37  ;;  %v1153_v32 = vpack.c.bf16 %v834_v45, %v834_v45  ;;  %v827_v51 = vmax.f32 %v785_v57, 0.0  ;;  %v835_v40 = vmax.f32 %v817_v11, 0.0 }
 0x135   : > { %v1143_v50 = vpack.c.bf16 %v824_v38, %v824_v38  ;;  %v1151_v26 = vpack.c.bf16 %v832_v48, %v832_v48  ;;  %v825_v23 = vmax.f32 %v777_v28, 0.0  ;;  %v833_v55 = vmax.f32 %v809_v44, 0.0 }
 0x136   : > { %907 = vst.msk [vmem:[%s1789_s9 + $0x18] sm:$0xf] %vm900_vm2, %v1145_v13  ;;  %915 = vst.msk [vmem:[%s1789_s9 + $0x38] sm:$0xf] %vm900_vm2, %v1153_v32  ;;  %v1146_v8 = vpack.c.bf16 %v827_v51, %v827_v51  ;;  %v1154_v29 = vpack.c.bf16 %v835_v40, %v835_v40 }
 0x137   : > { %905 = vst.msk [vmem:[%s1789_s9 + $0x10] sm:$0xf] %vm900_vm2, %v1143_v50  ;;  %913 = vst.msk [vmem:[%s1789_s9 + $0x30] sm:$0xf] %vm900_vm2, %v1151_v26  ;;  %v1144_v52 = vpack.c.bf16 %v825_v23, %v825_v23  ;;  %v1152_v54 = vpack.c.bf16 %v833_v55, %v833_v55 }
 0x138   : > { %908 = vst.msk [vmem:[%s1789_s9 + $0x1c] sm:$0xf] %vm900_vm2, %v1146_v8  ;;  %916 = vst.msk [vmem:[%s1789_s9 + $0x3c] sm:$0xf] %vm900_vm2, %v1154_v29 }
 0x139   : > { %906 = vst.msk [vmem:[%s1789_s9 + $0x14] sm:$0xf] %vm900_vm2, %v1144_v52  ;;  %914 = vst.msk [vmem:[%s1789_s9 + $0x34] sm:$0xf] %vm900_vm2, %v1152_v54 }
 0x13a PF: > { %s14_s17 = sadd.s32 1, %s1453_s17   ;;  %s1840_s15 = smov %s1449_s16 }
 0x13b   : > { %p11_p5 = scmp.ge.s32.totalorder %s14_s17, 4   ;;  %s1841_s16 = smov %s1843_s18 }
 0x13d   :  { %13 = sbr.rel (!%p11_p5) target bundleno = 2 (0x2), region = 80 }

// kernel: network_forward.24
= control target key start
LH: loop header
LB: loop body
LE: loop exit
PB: predicated region body
PF: predicated region fallthrough
CT: control target
= control target key end

     0   :  { %s1848_s15 = smov 0   ;;  %s1850_s16 = smov 0   ;;  %s2068_s0 = inlined_call_operand.vmem [shape: bf16[2,128,4], index: 0, kind: input, shape index: {}]   ;;  %s2069_s1 = inlined_call_operand.vmem [shape: bf16[2,12,128,4], index: 1, kind: input, shape index: {}]   ;;  %s2070_s2 = inlined_call_operand.vmem [shape: bf16[8,128], index: 2, kind: input, shape index: {}]   ;;  %s2071_s3 = inlined_call_operand.vmem [shape: f32[8,1], index: 3, kind: input, shape index: {}]   ;;  %s2072_s4 = inlined_call_operand.vmem [shape: bf16[2,8,4], index: 4, kind: output, shape index: {}]  }
   0x1   :  { %s1852_s17 = smov 0  }
   0x2 LB: > { %s26_s18 = sadd.s32 1, %s1814_s16  ;;  %p1036_p0 = scmp.ge.s32.totalorder %s1818_s17, 1  ;;  %s1818_s17 = sphi %s1852_s17, %s14_s17   ;;  %s1814_s16 = sphi %s1850_s16, %s2074_s16   ;;  %s1810_s15 = sphi %s1848_s15, %s2073_s15  }
   0x3   : > { %p28_p1 = scmp.ge.s32.totalorder %s26_s18, 2  ;;  %p196_p2 = scmp.lt.s32.totalorder %s1818_s17, 3 }
   0x5   : > { %s2076_s18 = smov (%p28_p1, %s26_s18), 0  ;;  %p197_p3 = pnand %p1036_p0, %p196_p2 }
   0x6   : > { %p235_p4 = scmp.lt.s32.totalorder (!%p197_p3), %s1810_s15, 1  ;;  %v1820_v0 = vmov (!%p197_p3), 0.0   ;;  %vm1821_vm0 = vmmov (!%p197_p3), 0   ;;  %v887_v1 = vld [vmem:[%s2071_s3] sm:$0xff] (!%p197_p3)  ;;  %v1822_v2 = vmov (!%p197_p3), 0   ;;  %vm935_vm1 = vcmask (!%p197_p3), 27648  }
   0x7   : > { %200 = sbr.rel (%p197_p3) target bundleno = 353 (0x161), region = 36  ;;  %1747 = vmatprep.subr.bf16.mxu0 (!%p197_p3), %v1820_v0  ;;  %1763 = vmatprep.mubr.msk.bf16.mxu0 (!%p197_p3), %vm1821_vm0, %v1820_v0 }
   0x8   : > { %1795 = vset.pattern.permute.xlu0 (!%p197_p3), %v1822_v2 }
   0x9   : > { %890 = vperm.xlu0 (!%p197_p3), %1795, %v887_v1  }
   0xe   : > { %s2078_s15 = smov (!%p235_p4, %s1810_s15), 1 }
   0xf   : > { %s1219_s21 = sshll.u32 %s2078_s15, 6  ;;  %s1767_s22 = smul.u32 768, %s2078_s15 }
  0x10   : > { %s1878_s25 = scalar_lea.vmem %s2068_s0, %s1219_s21  ;;  %s1040_s5 = sshll.u32 %s2078_s15, 2 }
  0x11   : > { %s1883_s28 = scalar_lea.vmem %s2069_s1, %s1767_s22  ;;  %v1221_v3 = vld [vmem:[%s1878_s25] sm:$0xff]   ;;  %v1636_v4 = vld [vmem:[%s1878_s25 + $0x8] sm:$0xff]   ;;  %s257_s8 = scalar_lea.vmem %s2072_s4, %s1040_s5 }
  0x12   : > { %v1222_v5 = vunpack.c.l.bf16 %v1221_v3  ;;  %v1223_v6 = vunpack.c.h.bf16 %v1221_v3  ;;  %v1253_v7 = vld [vmem:[%s1883_s28] sm:$0xff]   ;;  %v1226_v10 = vunpack.c.l.bf16 %v1636_v4  ;;  %v1227_v23 = vunpack.c.h.bf16 %v1636_v4  ;;  %v1643_v40 = vld [vmem:[%s1883_s28 + $0x8] sm:$0xff]  }
  0x13   : > { %v1650_v8 = vld [vmem:[%s1883_s28 + $0x40] sm:$0xff]   ;;  %v1254_v11 = vunpack.c.l.bf16 %v1253_v7  ;;  %v1255_v12 = vunpack.c.h.bf16 %v1253_v7  ;;  %v1651_v45 = vld [vmem:[%s1883_s28 + $0x48] sm:$0xff]   ;;  %v1258_v53 = vunpack.c.l.bf16 %v1643_v40  ;;  %v1259_v54 = vunpack.c.h.bf16 %v1643_v40 }
  0x14   : > { %v1658_v9 = vld [vmem:[%s1883_s28 + $0x80] sm:$0xff]   ;;  %v1286_v13 = vunpack.c.l.bf16 %v1650_v8  ;;  %v1287_v14 = vunpack.c.h.bf16 %v1650_v8  ;;  %v1659_v50 = vld [vmem:[%s1883_s28 + $0x88] sm:$0xff]   ;;  %v1290_v58 = vunpack.c.l.bf16 %v1651_v45  ;;  %v1291_v59 = vunpack.c.h.bf16 %v1651_v45 }
  0x15   : > { %v1666_v15 = vld [vmem:[%s1883_s28 + $0xc0] sm:$0xff]   ;;  %v1318_v18 = vunpack.c.l.bf16 %v1658_v9  ;;  %v1319_v19 = vunpack.c.h.bf16 %v1658_v9  ;;  %v323_v24 = vadd.f32 %v1254_v11, %v1222_v5  ;;  %v324_v25 = vadd.f32 %v1255_v12, %v1223_v6  ;;  %v1667_v55 = vld [vmem:[%s1883_s28 + $0xc8] sm:$0xff]  }
  0x16   : > { %v1674_v16 = vld [vmem:[%s1883_s28 + $0x100] sm:$0xff]   ;;  %v1350_v20 = vunpack.c.l.bf16 %v1666_v15  ;;  %v1351_v26 = vunpack.c.h.bf16 %v1666_v15  ;;  %v1675_v60 = vld [vmem:[%s1883_s28 + $0x108] sm:$0xff]   ;;  %v325_v61 = vadd.f32 %v1258_v53, %v1226_v10  ;;  %v326_v62 = vadd.f32 %v1259_v54, %v1227_v23 }
  0x17   : > { %v1682_v17 = vld [vmem:[%s1883_s28 + $0x140] sm:$0xff]   ;;  %v1382_v27 = vunpack.c.l.bf16 %v1674_v16  ;;  %v1383_v30 = vunpack.c.h.bf16 %v1674_v16  ;;  %v372_v35 = vadd.f32 %v1286_v13, %v323_v24  ;;  %v373_v36 = vadd.f32 %v1287_v14, %v324_v25  ;;  %v1683_v2 = vld [vmem:[%s1883_s28 + $0x148] sm:$0xff]  }
  0x18   : > { %v1894_v21 = vld [vmem:[%s1883_s28 + $0x180] sm:$0xff]   ;;  %v1414_v31 = vunpack.c.l.bf16 %v1682_v17  ;;  %v1415_v32 = vunpack.c.h.bf16 %v1682_v17  ;;  %v1322_v63 = vunpack.c.l.bf16 %v1659_v50  ;;  %v1323_v1 = vunpack.c.h.bf16 %v1659_v50  ;;  %v1691_v7 = vld [vmem:[%s1883_s28 + $0x188] sm:$0xff]   ;;  %v1637_v50 = vld [vmem:[%s1878_s25 + $0x10] sm:$0xff]  }
  0x19   : > { %v1897_v22 = vld [vmem:[%s1883_s28 + $0x1c0] sm:$0xff]   ;;  %v1446_v33 = vunpack.c.l.bf16 %v1894_v21  ;;  %v1447_v37 = vunpack.c.h.bf16 %v1894_v21  ;;  %v421_v46 = vadd.f32 %v1318_v18, %v372_v35  ;;  %v422_v47 = vadd.f32 %v1319_v19, %v373_v36  ;;  %v1699_v13 = vld [vmem:[%s1883_s28 + $0x1c8] sm:$0xff]  }
  0x1a   : > { %v1900_v28 = vld [vmem:[%s1883_s28 + $0x200] sm:$0xff]   ;;  %v1478_v38 = vunpack.c.l.bf16 %v1897_v22  ;;  %v1479_v41 = vunpack.c.h.bf16 %v1897_v22  ;;  %v1354_v6 = vunpack.c.l.bf16 %v1667_v55  ;;  %v374_v8 = vadd.f32 %v1290_v58, %v325_v61  ;;  %v1707_v17 = vld [vmem:[%s1883_s28 + $0x208] sm:$0xff]   ;;  %v1652_v58 = vld [vmem:[%s1883_s28 + $0x50] sm:$0xff]  }
  0x1b   : > { %v1903_v29 = vld [vmem:[%s1883_s28 + $0x240] sm:$0xff]   ;;  %v1510_v42 = vunpack.c.l.bf16 %v1900_v28  ;;  %v1511_v43 = vunpack.c.h.bf16 %v1900_v28  ;;  %v470_v56 = vadd.f32 %v1350_v20, %v421_v46  ;;  %v471_v57 = vadd.f32 %v1351_v26, %v422_v47  ;;  %v1933_v22 = vld [vmem:[%s1883_s28 + $0x248] sm:$0xff]  }
  0x1c   : > { %v1907_v34 = vld [vmem:[%s1883_s28 + $0x280] sm:$0xff]   ;;  %v1542_v44 = vunpack.c.l.bf16 %v1903_v29  ;;  %v1543_v48 = vunpack.c.h.bf16 %v1903_v29  ;;  %v375_v9 = vadd.f32 %v1291_v59, %v326_v62  ;;  %v1355_v11 = vunpack.c.h.bf16 %v1667_v55  ;;  %v1939_v36 = vld [vmem:[%s1883_s28 + $0x2c8] sm:$0xff]   ;;  %v1644_v55 = vld [vmem:[%s1883_s28 + $0x10] sm:$0xff]  }
  0x1d   : > { %v1912_v39 = vld [vmem:[%s1883_s28 + $0x2c0] sm:$0xff]   ;;  %v1574_v49 = vunpack.c.l.bf16 %v1907_v34  ;;  %v1575_v51 = vunpack.c.h.bf16 %v1907_v34  ;;  %v519_v3 = vadd.f32 %v1382_v27, %v470_v56  ;;  %v520_v4 = vadd.f32 %v1383_v30, %v471_v57  ;;  %v1936_v27 = vld [vmem:[%s1883_s28 + $0x288] sm:$0xff]  }
  0x1e   : > { %v1606_v52 = vunpack.c.l.bf16 %v1912_v39  ;;  %v1607_v5 = vunpack.c.h.bf16 %v1912_v39  ;;  %v1386_v12 = vunpack.c.l.bf16 %v1675_v60  ;;  %v1387_v15 = vunpack.c.h.bf16 %v1675_v60 }
  0x1f   : > { %v568_v14 = vadd.f32 %v1414_v31, %v519_v3  ;;  %v569_v10 = vadd.f32 %v1415_v32, %v520_v4  ;;  %v1418_v16 = vunpack.c.l.bf16 %v1683_v2  ;;  %v423_v18 = vadd.f32 %v1322_v63, %v374_v8 }
  0x20   : > { %v424_v19 = vadd.f32 %v1323_v1, %v375_v9  ;;  %v1419_v20 = vunpack.c.h.bf16 %v1683_v2  ;;  %v1450_v21 = vunpack.c.l.bf16 %v1691_v7  ;;  %v1451_v25 = vunpack.c.h.bf16 %v1691_v7 }
  0x21   : > { %v617_v23 = vadd.f32 %v1446_v33, %v568_v14  ;;  %v618_v24 = vadd.f32 %v1447_v37, %v569_v10  ;;  %v1482_v26 = vunpack.c.l.bf16 %v1699_v13  ;;  %v472_v30 = vadd.f32 %v1354_v6, %v423_v18  ;;  %v1676_v14 = vld [vmem:[%s1883_s28 + $0x110] sm:$0xff]  }
  0x22   : > { %v473_v31 = vadd.f32 %v1355_v11, %v424_v19  ;;  %v1483_v32 = vunpack.c.h.bf16 %v1699_v13  ;;  %v1514_v35 = vunpack.c.l.bf16 %v1707_v17  ;;  %v1515_v46 = vunpack.c.h.bf16 %v1707_v17  ;;  %v1668_v11 = vld [vmem:[%s1883_s28 + $0xd0] sm:$0xff]  }
  0x23   : > { %v666_v40 = vadd.f32 %v1478_v38, %v617_v23  ;;  %v667_v45 = vadd.f32 %v1479_v41, %v618_v24  ;;  %v1546_v47 = vunpack.c.l.bf16 %v1933_v22  ;;  %v521_v33 = vadd.f32 %v1386_v12, %v472_v30  ;;  %v1684_v19 = vld [vmem:[%s1883_s28 + $0x150] sm:$0xff]  }
  0x24   : > { %v522_v37 = vadd.f32 %v1387_v15, %v473_v31  ;;  %v1547_v53 = vunpack.c.h.bf16 %v1933_v22  ;;  %v1578_v54 = vunpack.c.l.bf16 %v1936_v27  ;;  %v1579_v38 = vunpack.c.h.bf16 %v1936_v27 }
  0x25   : > { %v715_v56 = vadd.f32 %v1510_v42, %v666_v40  ;;  %v716_v57 = vadd.f32 %v1511_v43, %v667_v45  ;;  %v1610_v41 = vunpack.c.l.bf16 %v1939_v36  ;;  %v570_v59 = vadd.f32 %v1418_v16, %v521_v33  ;;  %v1660_v43 = vld [vmem:[%s1883_s28 + $0x90] sm:$0xff]  }
  0x26   : > { %v571_v60 = vadd.f32 %v1419_v20, %v522_v37  ;;  %v1230_v61 = vunpack.c.l.bf16 %v1637_v50  ;;  %v1231_v62 = vunpack.c.h.bf16 %v1637_v50  ;;  %v1262_v42 = vunpack.c.l.bf16 %v1644_v55  ;;  %v1700_v40 = vld [vmem:[%s1883_s28 + $0x1d0] sm:$0xff]  }
  0x27   : > { %v764_v63 = vadd.f32 %v1542_v44, %v715_v56  ;;  %v765_v1 = vadd.f32 %v1543_v48, %v716_v57  ;;  %v1263_v28 = vunpack.c.h.bf16 %v1644_v55  ;;  %v619_v2 = vadd.f32 %v1450_v21, %v570_v59  ;;  %v1708_v50 = vld [vmem:[%s1883_s28 + $0x210] sm:$0xff]   ;;  %v1638_v55 = vld [vmem:[%s1878_s25 + $0x18] sm:$0xff]  }
  0x28   : > { %v620_v3 = vadd.f32 %v1451_v25, %v571_v60  ;;  %v1294_v4 = vunpack.c.l.bf16 %v1652_v58  ;;  %v1295_v6 = vunpack.c.h.bf16 %v1652_v58  ;;  %v327_v9 = vadd.f32 %v1262_v42, %v1230_v61  ;;  %v1716_v33 = vld [vmem:[%s1883_s28 + $0x250] sm:$0xff]   ;;  %v1645_v59 = vld [vmem:[%s1883_s28 + $0x18] sm:$0xff]  }
  0x29   : > { %v813_v7 = vadd.f32 %v1574_v49, %v764_v63  ;;  %v814_v8 = vadd.f32 %v1575_v51, %v765_v1  ;;  %v328_v44 = vadd.f32 %v1263_v28, %v1231_v62  ;;  %v668_v29 = vadd.f32 %v1482_v26, %v619_v2  ;;  %v1724_v1 = vld [vmem:[%s1883_s28 + $0x290] sm:$0xff]   ;;  %v1661_v2 = vld [vmem:[%s1883_s28 + $0x98] sm:$0xff]  }
  0x2a   : > { %v669_v48 = vadd.f32 %v1483_v32, %v620_v3  ;;  %v1326_v12 = vunpack.c.l.bf16 %v1660_v43  ;;  %v1327_v13 = vunpack.c.h.bf16 %v1660_v43  ;;  %v376_v49 = vadd.f32 %v1294_v4, %v327_v9  ;;  %v1732_v3 = vld [vmem:[%s1883_s28 + $0x2d0] sm:$0xff]  }
  0x2b   : > { %v862_v10 = vadd.f32 %v1606_v52, %v813_v7  ;;  %v863_v15 = vadd.f32 %v1607_v5, %v814_v8  ;;  %v377_v16 = vadd.f32 %v1295_v6, %v328_v44  ;;  %v717_v34 = vadd.f32 %v1514_v35, %v668_v29  ;;  %v1692_v5 = vld [vmem:[%s1883_s28 + $0x190] sm:$0xff]  }
  0x2c   : > { %v718_v51 = vadd.f32 %v1515_v46, %v669_v48  ;;  %v1358_v17 = vunpack.c.l.bf16 %v1668_v11  ;;  %v1359_v18 = vunpack.c.h.bf16 %v1668_v11  ;;  %v425_v21 = vadd.f32 %v1326_v12, %v376_v49  ;;  %v1669_v48 = vld [vmem:[%s1883_s28 + $0xd8] sm:$0xff]  }
  0x2d   : > { %v879_v20 = vpack.c.bf16 %v863_v15, %v862_v10  ;;  %v426_v22 = vadd.f32 %v1327_v13, %v377_v16  ;;  %v1390_v23 = vunpack.c.l.bf16 %v1676_v14  ;;  %v766_v24 = vadd.f32 %v1546_v47, %v717_v34  ;;  %v1677_v15 = vld [vmem:[%s1883_s28 + $0x118] sm:$0xff]  }
  0x2e   : > { %v767_v25 = vadd.f32 %v1547_v53, %v718_v51  ;;  %v1611_v52 = vunpack.c.h.bf16 %v1939_v36  ;;  %v1391_v39 = vunpack.c.h.bf16 %v1676_v14  ;;  %v474_v26 = vadd.f32 %v1358_v17, %v425_v21  ;;  %v1685_v17 = vld [vmem:[%s1883_s28 + $0x158] sm:$0xff]  }
  0x2f   : > { %1748 = vmatpush3.bf16.msra.mxu0 %v879_v20  ;;  %v475_v27 = vadd.f32 %v1359_v18, %v426_v22  ;;  %v1422_v30 = vunpack.c.l.bf16 %v1684_v19  ;;  %v1423_v31 = vunpack.c.h.bf16 %v1684_v19  ;;  %v815_v32 = vadd.f32 %v1578_v54, %v766_v24  ;;  %v1693_v22 = vld [vmem:[%s1883_s28 + $0x198] sm:$0xff]  }
  0x30   : > { %1749 = vmatprep.subr.bf16.mxu0 %v1820_v0  ;;  %v816_v35 = vadd.f32 %v1579_v38, %v767_v25  ;;  %v523_v45 = vadd.f32 %v1390_v23, %v474_v26  ;;  %v1454_v36 = vunpack.c.l.bf16 %v1692_v5  ;;  %v1455_v47 = vunpack.c.h.bf16 %v1692_v5  ;;  %v1653_v38 = vld [vmem:[%s1883_s28 + $0x58] sm:$0xff]  }
  0x31   : > { %v524_v46 = vadd.f32 %v1391_v39, %v475_v27  ;;  %v864_v37 = vadd.f32 %v1610_v41, %v815_v32  ;;  %v1486_v58 = vunpack.c.l.bf16 %v1700_v40  ;;  %v1487_v54 = vunpack.c.h.bf16 %v1700_v40  ;;  %v1701_v39 = vld [vmem:[%s1883_s28 + $0x1d8] sm:$0xff]  }
  0x32   : > { %v865_v53 = vadd.f32 %v1611_v52, %v816_v35  ;;  %v572_v56 = vadd.f32 %v1422_v30, %v523_v45  ;;  %v1518_v61 = vunpack.c.l.bf16 %v1708_v50  ;;  %v1519_v62 = vunpack.c.h.bf16 %v1708_v50 }
  0x33   : > { %v573_v57 = vadd.f32 %v1423_v31, %v524_v46  ;;  %v1550_v63 = vunpack.c.l.bf16 %v1716_v33  ;;  %v1234_v43 = vunpack.c.l.bf16 %v1638_v55  ;;  %v1235_v41 = vunpack.c.h.bf16 %v1638_v55  ;;  %v1709_v31 = vld [vmem:[%s1883_s28 + $0x218] sm:$0xff]  }
  0x34   : > { %v880_v60 = vpack.c.bf16 %v865_v53, %v864_v37  ;;  %v621_v42 = vadd.f32 %v1454_v36, %v572_v56  ;;  %v1266_v4 = vunpack.c.l.bf16 %v1645_v59  ;;  %v1267_v6 = vunpack.c.h.bf16 %v1645_v59  ;;  %v1989_v46 = vld [vmem:[%s1883_s28 + $0x258] sm:$0xff]   ;;  %v1639_v37 = vld [vmem:[%s1878_s25 + $0x20] sm:$0xff]  }
  0x35   : > { %v622_v28 = vadd.f32 %v1455_v47, %v573_v57  ;;  %v1298_v7 = vunpack.c.l.bf16 %v1653_v38  ;;  %v1299_v8 = vunpack.c.h.bf16 %v1653_v38  ;;  %v1551_v11 = vunpack.c.h.bf16 %v1716_v33  ;;  %v1646_v53 = vld [vmem:[%s1883_s28 + $0x20] sm:$0xff]  }
  0x36   : > { %1750 = vmatpush3.bf16.msra.mxu0 %v880_v60  ;;  %v670_v9 = vadd.f32 %v1486_v58, %v621_v42  ;;  %v1582_v29 = vunpack.c.l.bf16 %v1724_v1  ;;  %v329_v12 = vadd.f32 %v1266_v4, %v1234_v43  ;;  %v330_v13 = vadd.f32 %v1267_v6, %v1235_v41  ;;  %v1670_v6 = vld [vmem:[%s1883_s28 + $0xe0] sm:$0xff]  }
  0x37   : > { %1751 = vmatprep.subr.bf16.mxu0 %v1820_v0  ;;  %v671_v44 = vadd.f32 %v1487_v54, %v622_v28  ;;  %v1330_v14 = vunpack.c.l.bf16 %v1661_v2  ;;  %v1331_v10 = vunpack.c.h.bf16 %v1661_v2  ;;  %v1583_v34 = vunpack.c.h.bf16 %v1724_v1  ;;  %v1654_v54 = vld [vmem:[%s1883_s28 + $0x60] sm:$0xff]   ;;  %v1725_v2 = vld [vmem:[%s1883_s28 + $0x298] sm:$0xff]  }
  0x38   : > { %v719_v49 = vadd.f32 %v1518_v61, %v670_v9  ;;  %v1614_v51 = vunpack.c.l.bf16 %v1732_v3  ;;  %v378_v18 = vadd.f32 %v1298_v7, %v329_v12  ;;  %v379_v19 = vadd.f32 %v1299_v8, %v330_v13 }
  0x39   : > { %v720_v16 = vadd.f32 %v1519_v62, %v671_v44  ;;  %v1362_v20 = vunpack.c.l.bf16 %v1669_v48  ;;  %v1363_v21 = vunpack.c.h.bf16 %v1669_v48  ;;  %v1615_v25 = vunpack.c.h.bf16 %v1732_v3  ;;  %v1662_v62 = vld [vmem:[%s1883_s28 + $0xa0] sm:$0xff]   ;;  %v1733_v48 = vld [vmem:[%s1883_s28 + $0x2d8] sm:$0xff]  }
  0x3a   : > { %v768_v23 = vadd.f32 %v1550_v63, %v719_v49  ;;  %v1394_v52 = vunpack.c.l.bf16 %v1677_v15  ;;  %v427_v5 = vadd.f32 %v1330_v14, %v378_v18  ;;  %v428_v26 = vadd.f32 %v1331_v10, %v379_v19  ;;  %v1678_v14 = vld [vmem:[%s1883_s28 + $0x120] sm:$0xff]  }
  0x3b   : > { %v769_v24 = vadd.f32 %v1551_v11, %v720_v16  ;;  %v1395_v27 = vunpack.c.h.bf16 %v1677_v15  ;;  %v1426_v30 = vunpack.c.l.bf16 %v1685_v17  ;;  %v1427_v40 = vunpack.c.h.bf16 %v1685_v17  ;;  %v1686_v19 = vld [vmem:[%s1883_s28 + $0x160] sm:$0xff]  }
  0x3c   : > { %v817_v32 = vadd.f32 %v1582_v29, %v768_v23  ;;  %v1458_v45 = vunpack.c.l.bf16 %v1693_v22  ;;  %v476_v36 = vadd.f32 %v1362_v20, %v427_v5  ;;  %v477_v47 = vadd.f32 %v1363_v21, %v428_v26  ;;  %v1694_v20 = vld [vmem:[%s1883_s28 + $0x1a0] sm:$0xff]  }
  0x3d   : > { %v818_v35 = vadd.f32 %v1583_v34, %v769_v24  ;;  %v1459_v50 = vunpack.c.h.bf16 %v1693_v22  ;;  %v1490_v33 = vunpack.c.l.bf16 %v1701_v39  ;;  %v1491_v57 = vunpack.c.h.bf16 %v1701_v39  ;;  %v1702_v26 = vld [vmem:[%s1883_s28 + $0x1e0] sm:$0xff]  }
  0x3e   : > { %v866_v55 = vadd.f32 %v1614_v51, %v817_v32  ;;  %v1522_v58 = vunpack.c.l.bf16 %v1709_v31  ;;  %v525_v59 = vadd.f32 %v1394_v52, %v476_v36  ;;  %v526_v38 = vadd.f32 %v1395_v27, %v477_v47  ;;  %v1710_v27 = vld [vmem:[%s1883_s28 + $0x220] sm:$0xff]  }
  0x3f   : > { %v867_v56 = vadd.f32 %v1615_v25, %v818_v35  ;;  %v1523_v60 = vunpack.c.h.bf16 %v1709_v31  ;;  %v1554_v61 = vunpack.c.l.bf16 %v1989_v46  ;;  %v1238_v1 = vunpack.c.l.bf16 %v1639_v37  ;;  %v1718_v47 = vld [vmem:[%s1883_s28 + $0x260] sm:$0xff]  }
  0x40   : > { %v1239_v42 = vunpack.c.h.bf16 %v1639_v37  ;;  %v1270_v28 = vunpack.c.l.bf16 %v1646_v53  ;;  %v574_v43 = vadd.f32 %v1426_v30, %v525_v59  ;;  %v575_v41 = vadd.f32 %v1427_v40, %v526_v38  ;;  %v1655_v38 = vld [vmem:[%s1883_s28 + $0x68] sm:$0xff]  }
  0x41   : > { %v881_v63 = vpack.c.bf16 %v867_v56, %v866_v55  ;;  %v1271_v3 = vunpack.c.h.bf16 %v1646_v53  ;;  %v1302_v4 = vunpack.c.l.bf16 %v1654_v54  ;;  %v1555_v7 = vunpack.c.h.bf16 %v1989_v46  ;;  %v1647_v56 = vld [vmem:[%s1883_s28 + $0x28] sm:$0xff]  }
  0x42   : > { %v331_v8 = vadd.f32 %v1270_v28, %v1238_v1  ;;  %v1303_v9 = vunpack.c.h.bf16 %v1654_v54  ;;  %v1334_v44 = vunpack.c.l.bf16 %v1662_v62  ;;  %v623_v11 = vadd.f32 %v1458_v45, %v574_v43  ;;  %v1663_v1 = vld [vmem:[%s1883_s28 + $0xa8] sm:$0xff]  }
  0x43   : > { %1752 = vmatpush3.bf16.msra.mxu0 %v881_v63  ;;  %v624_v29 = vadd.f32 %v1459_v50, %v575_v41  ;;  %v332_v12 = vadd.f32 %v1271_v3, %v1239_v42  ;;  %v1335_v13 = vunpack.c.h.bf16 %v1662_v62  ;;  %v1586_v10 = vunpack.c.l.bf16 %v1725_v2  ;;  %v1640_v50 = vld [vmem:[%s1878_s25 + $0x28] sm:$0xff]   ;;  %v1726_v3 = vld [vmem:[%s1883_s28 + $0x2a0] sm:$0xff]  }
  0x44   : > { %1753 = vmatprep.subr.bf16.mxu0 %v1820_v0  ;;  %v1587_v15 = vunpack.c.h.bf16 %v1725_v2  ;;  %v380_v49 = vadd.f32 %v1302_v4, %v331_v8  ;;  %v1366_v16 = vunpack.c.l.bf16 %v1670_v6  ;;  %v672_v34 = vadd.f32 %v1490_v33, %v623_v11  ;;  %v1671_v8 = vld [vmem:[%s1883_s28 + $0xe8] sm:$0xff]  }
  0x45   : > { %v673_v51 = vadd.f32 %v1491_v57, %v624_v29  ;;  %v381_v17 = vadd.f32 %v1303_v9, %v332_v12  ;;  %v1367_v18 = vunpack.c.h.bf16 %v1670_v6  ;;  %v1618_v21 = vunpack.c.l.bf16 %v1733_v48 }
  0x46   : > { %v1619_v22 = vunpack.c.h.bf16 %v1733_v48  ;;  %v429_v23 = vadd.f32 %v1334_v44, %v380_v49  ;;  %v1398_v24 = vunpack.c.l.bf16 %v1678_v14  ;;  %v721_v25 = vadd.f32 %v1522_v58, %v672_v34 }
  0x47   : > { %v722_v52 = vadd.f32 %v1523_v60, %v673_v51  ;;  %v430_v39 = vadd.f32 %v1335_v13, %v381_v17  ;;  %v1399_v5 = vunpack.c.h.bf16 %v1678_v14  ;;  %v1430_v31 = vunpack.c.l.bf16 %v1686_v19  ;;  %v1734_v13 = vld [vmem:[%s1883_s28 + $0x2e0] sm:$0xff]  }
  0x48   : > { %v478_v30 = vadd.f32 %v1366_v16, %v429_v23  ;;  %v1431_v32 = vunpack.c.h.bf16 %v1686_v19  ;;  %v1462_v35 = vunpack.c.l.bf16 %v1694_v20  ;;  %v770_v40 = vadd.f32 %v1554_v61, %v721_v25 }
  0x49   : > { %v771_v45 = vadd.f32 %v1555_v7, %v722_v52  ;;  %v479_v46 = vadd.f32 %v1367_v18, %v430_v39  ;;  %v1463_v36 = vunpack.c.h.bf16 %v1694_v20  ;;  %v1494_v37 = vunpack.c.l.bf16 %v1702_v26  ;;  %v1695_v52 = vld [vmem:[%s1883_s28 + $0x1a8] sm:$0xff]  }
  0x4a   : > { %v527_v33 = vadd.f32 %v1398_v24, %v478_v30  ;;  %v1495_v53 = vunpack.c.h.bf16 %v1702_v26  ;;  %v1526_v55 = vunpack.c.l.bf16 %v1710_v27  ;;  %v819_v57 = vadd.f32 %v1586_v10, %v770_v40  ;;  %v1703_v30 = vld [vmem:[%s1883_s28 + $0x1e8] sm:$0xff]  }
  0x4b   : > { %v820_v58 = vadd.f32 %v1587_v15, %v771_v45  ;;  %v528_v54 = vadd.f32 %v1399_v5, %v479_v46  ;;  %v1527_v59 = vunpack.c.h.bf16 %v1710_v27  ;;  %v1558_v61 = vunpack.c.l.bf16 %v1718_v47  ;;  %v1679_v15 = vld [vmem:[%s1883_s28 + $0x128] sm:$0xff]  }
  0x4c   : > { %v576_v60 = vadd.f32 %v1430_v31, %v527_v33  ;;  %v1242_v62 = vunpack.c.l.bf16 %v1640_v50  ;;  %v1243_v63 = vunpack.c.h.bf16 %v1640_v50  ;;  %v868_v42 = vadd.f32 %v1618_v21, %v819_v57  ;;  %v1687_v21 = vld [vmem:[%s1883_s28 + $0x168] sm:$0xff]  }
  0x4d   : > { %v869_v28 = vadd.f32 %v1619_v22, %v820_v58  ;;  %v577_v43 = vadd.f32 %v1431_v32, %v528_v54  ;;  %v1274_v41 = vunpack.c.l.bf16 %v1647_v56  ;;  %v1275_v4 = vunpack.c.h.bf16 %v1647_v56  ;;  %v1711_v45 = vld [vmem:[%s1883_s28 + $0x228] sm:$0xff]   ;;  %v1648_v58 = vld [vmem:[%s1883_s28 + $0x30] sm:$0xff]  }
  0x4e   : > { %v625_v2 = vadd.f32 %v1462_v35, %v576_v60  ;;  %v1306_v6 = vunpack.c.l.bf16 %v1655_v38  ;;  %v1307_v7 = vunpack.c.h.bf16 %v1655_v38  ;;  %v1338_v29 = vunpack.c.l.bf16 %v1663_v1  ;;  %v1719_v33 = vld [vmem:[%s1883_s28 + $0x268] sm:$0xff]  }
  0x4f   : > { %v882_v9 = vpack.c.bf16 %v869_v28, %v868_v42  ;;  %v626_v44 = vadd.f32 %v1463_v36, %v577_v43  ;;  %v333_v11 = vadd.f32 %v1274_v41, %v1242_v62  ;;  %v1559_v12 = vunpack.c.h.bf16 %v1718_v47  ;;  %v1664_v28 = vld [vmem:[%s1883_s28 + $0xb0] sm:$0xff]  }
  0x50   : > { %v674_v48 = vadd.f32 %v1494_v37, %v625_v2  ;;  %v334_v14 = vadd.f32 %v1275_v4, %v1243_v63  ;;  %v1339_v10 = vunpack.c.h.bf16 %v1663_v1  ;;  %v1590_v16 = vunpack.c.l.bf16 %v1726_v3  ;;  %v1641_v37 = vld [vmem:[%s1878_s25 + $0x30] sm:$0xff]  }
  0x51   : > { %1754 = vmatpush3.bf16.msra.mxu0 %v882_v9  ;;  %v675_v49 = vadd.f32 %v1495_v53, %v626_v44  ;;  %v382_v34 = vadd.f32 %v1306_v6, %v333_v11  ;;  %v1370_v51 = vunpack.c.l.bf16 %v1671_v8  ;;  %v1591_v18 = vunpack.c.h.bf16 %v1726_v3  ;;  %v1672_v4 = vld [vmem:[%s1883_s28 + $0xf0] sm:$0xff]   ;;  %v1727_v11 = vld [vmem:[%s1883_s28 + $0x2a8] sm:$0xff]  }
  0x52   : > { %1755 = vmatprep.subr.bf16.mxu0 %v1820_v0  ;;  %v723_v17 = vadd.f32 %v1526_v55, %v674_v48  ;;  %v383_v19 = vadd.f32 %v1307_v7, %v334_v14  ;;  %v1371_v20 = vunpack.c.h.bf16 %v1671_v8  ;;  %v1622_v23 = vunpack.c.l.bf16 %v1734_v13 }
  0x53   : > { %v724_v22 = vadd.f32 %v1527_v59, %v675_v49  ;;  %v431_v24 = vadd.f32 %v1338_v29, %v382_v34  ;;  %v1402_v25 = vunpack.c.l.bf16 %v1679_v15  ;;  %v1623_v5 = vunpack.c.h.bf16 %v1734_v13  ;;  %v1680_v13 = vld [vmem:[%s1883_s28 + $0x130] sm:$0xff]   ;;  %v1735_v34 = vld [vmem:[%s1883_s28 + $0x2e8] sm:$0xff]  }
  0x54   : > { %v772_v39 = vadd.f32 %v1558_v61, %v723_v17  ;;  %v432_v26 = vadd.f32 %v1339_v10, %v383_v19  ;;  %v1403_v27 = vunpack.c.h.bf16 %v1679_v15  ;;  %v1434_v35 = vunpack.c.l.bf16 %v1687_v21  ;;  %v1656_v61 = vld [vmem:[%s1883_s28 + $0x70] sm:$0xff]  }
  0x55   : > { %v773_v31 = vadd.f32 %v1559_v12, %v724_v22  ;;  %v480_v32 = vadd.f32 %v1370_v51, %v431_v24  ;;  %v1435_v40 = vunpack.c.h.bf16 %v1687_v21  ;;  %v1466_v47 = vunpack.c.l.bf16 %v1695_v52  ;;  %v1688_v19 = vld [vmem:[%s1883_s28 + $0x170] sm:$0xff]  }
  0x56   : > { %v821_v46 = vadd.f32 %v1590_v16, %v772_v39  ;;  %v481_v36 = vadd.f32 %v1371_v20, %v432_v26  ;;  %v1467_v50 = vunpack.c.h.bf16 %v1695_v52  ;;  %v1498_v56 = vunpack.c.l.bf16 %v1703_v30 }
  0x57   : > { %v822_v53 = vadd.f32 %v1591_v18, %v773_v31  ;;  %v529_v55 = vadd.f32 %v1402_v25, %v480_v32  ;;  %v1499_v57 = vunpack.c.h.bf16 %v1703_v30  ;;  %v1530_v38 = vunpack.c.l.bf16 %v1711_v45  ;;  %v1704_v32 = vld [vmem:[%s1883_s28 + $0x1f0] sm:$0xff]  }
  0x58   : > { %v870_v54 = vadd.f32 %v1622_v23, %v821_v46  ;;  %v530_v59 = vadd.f32 %v1403_v27, %v481_v36  ;;  %v1531_v60 = vunpack.c.h.bf16 %v1711_v45  ;;  %v1562_v1 = vunpack.c.l.bf16 %v1719_v33  ;;  %v1712_v36 = vld [vmem:[%s1883_s28 + $0x230] sm:$0xff]  }
  0x59   : > { %v871_v62 = vadd.f32 %v1623_v5, %v822_v53  ;;  %v578_v63 = vadd.f32 %v1434_v35, %v529_v55  ;;  %v1246_v42 = vunpack.c.l.bf16 %v1641_v37  ;;  %v1247_v41 = vunpack.c.h.bf16 %v1641_v37  ;;  %v1696_v5 = vld [vmem:[%s1883_s28 + $0x1b0] sm:$0xff]   ;;  %v1642_v37 = vld [vmem:[%s1878_s25 + $0x38] sm:$0xff]  }
  0x5a   : > { %v579_v43 = vadd.f32 %v1435_v40, %v530_v59  ;;  %v1278_v2 = vunpack.c.l.bf16 %v1648_v58  ;;  %v1279_v3 = vunpack.c.h.bf16 %v1648_v58  ;;  %v1310_v8 = vunpack.c.l.bf16 %v1656_v61  ;;  %v1649_v58 = vld [vmem:[%s1883_s28 + $0x38] sm:$0xff]  }
  0x5b   : > { %v883_v6 = vpack.c.bf16 %v871_v62, %v870_v54  ;;  %v627_v7 = vadd.f32 %v1466_v47, %v578_v63  ;;  %v1311_v9 = vunpack.c.h.bf16 %v1656_v61  ;;  %v1342_v12 = vunpack.c.l.bf16 %v1664_v28  ;;  %v1657_v54 = vld [vmem:[%s1883_s28 + $0x78] sm:$0xff]  }
  0x5c   : > { %v628_v44 = vadd.f32 %v1467_v50, %v579_v43  ;;  %v335_v29 = vadd.f32 %v1278_v2, %v1246_v42  ;;  %v336_v48 = vadd.f32 %v1279_v3, %v1247_v41  ;;  %v1563_v10 = vunpack.c.h.bf16 %v1719_v33  ;;  %v1720_v43 = vld [vmem:[%s1883_s28 + $0x270] sm:$0xff]  }
  0x5d   : > { %1756 = vmatpush3.bf16.msra.mxu0 %v883_v6  ;;  %v676_v14 = vadd.f32 %v1498_v56, %v627_v7  ;;  %v1343_v15 = vunpack.c.h.bf16 %v1664_v28  ;;  %v1374_v49 = vunpack.c.l.bf16 %v1672_v4  ;;  %v1375_v18 = vunpack.c.h.bf16 %v1672_v4  ;;  %v1665_v28 = vld [vmem:[%s1883_s28 + $0xb8] sm:$0xff]  }
  0x5e   : > { %1757 = vmatprep.subr.bf16.mxu0 %v1820_v0  ;;  %v677_v16 = vadd.f32 %v1499_v57, %v628_v44  ;;  %v384_v51 = vadd.f32 %v1310_v8, %v335_v29  ;;  %v385_v17 = vadd.f32 %v1311_v9, %v336_v48  ;;  %v1594_v21 = vunpack.c.l.bf16 %v1727_v11  ;;  %v1673_v44 = vld [vmem:[%s1883_s28 + $0xf8] sm:$0xff]  }
  0x5f   : > { %v725_v20 = vadd.f32 %v1530_v38, %v676_v14  ;;  %v1595_v22 = vunpack.c.h.bf16 %v1727_v11  ;;  %v1406_v23 = vunpack.c.l.bf16 %v1680_v13  ;;  %v1407_v39 = vunpack.c.h.bf16 %v1680_v13  ;;  %v1728_v11 = vld [vmem:[%s1883_s28 + $0x2b0] sm:$0xff]  }
  0x60   : > { %v726_v24 = vadd.f32 %v1531_v60, %v677_v16  ;;  %v433_v25 = vadd.f32 %v1342_v12, %v384_v51  ;;  %v434_v52 = vadd.f32 %v1343_v15, %v385_v17  ;;  %v1626_v27 = vunpack.c.l.bf16 %v1735_v34  ;;  %v1681_v16 = vld [vmem:[%s1883_s28 + $0x138] sm:$0xff]  }
  0x61   : > { %v774_v26 = vadd.f32 %v1562_v1, %v725_v20  ;;  %v1627_v30 = vunpack.c.h.bf16 %v1735_v34  ;;  %v1438_v31 = vunpack.c.l.bf16 %v1688_v19  ;;  %v1439_v46 = vunpack.c.h.bf16 %v1688_v19  ;;  %v1736_v34 = vld [vmem:[%s1883_s28 + $0x2f0] sm:$0xff]  }
  0x62   : > { %v775_v35 = vadd.f32 %v1563_v10, %v726_v24  ;;  %v482_v40 = vadd.f32 %v1374_v49, %v433_v25  ;;  %v483_v45 = vadd.f32 %v1375_v18, %v434_v52  ;;  %v1470_v50 = vunpack.c.l.bf16 %v1696_v5  ;;  %v1689_v24 = vld [vmem:[%s1883_s28 + $0x178] sm:$0xff]  }
  0x63   : > { %v823_v47 = vadd.f32 %v1594_v21, %v774_v26  ;;  %v1471_v33 = vunpack.c.h.bf16 %v1696_v5  ;;  %v1502_v57 = vunpack.c.l.bf16 %v1704_v32  ;;  %v1503_v38 = vunpack.c.h.bf16 %v1704_v32  ;;  %v1697_v32 = vld [vmem:[%s1883_s28 + $0x1b8] sm:$0xff]  }
  0x64   : > { %v824_v53 = vadd.f32 %v1595_v22, %v775_v35  ;;  %v531_v55 = vadd.f32 %v1406_v23, %v482_v40  ;;  %v532_v56 = vadd.f32 %v1407_v39, %v483_v45  ;;  %v1534_v60 = vunpack.c.l.bf16 %v1712_v36 }
  0x65   : > { %v872_v59 = vadd.f32 %v1626_v27, %v823_v47  ;;  %v1535_v61 = vunpack.c.h.bf16 %v1712_v36  ;;  %v1250_v42 = vunpack.c.l.bf16 %v1642_v37  ;;  %v1251_v41 = vunpack.c.h.bf16 %v1642_v37 }
  0x66   : > { %v873_v62 = vadd.f32 %v1627_v30, %v824_v53  ;;  %v580_v63 = vadd.f32 %v1438_v31, %v531_v55  ;;  %v581_v1 = vadd.f32 %v1439_v46, %v532_v56  ;;  %v1282_v2 = vunpack.c.l.bf16 %v1649_v58 }
  0x67   : > { %v1283_v3 = vunpack.c.h.bf16 %v1649_v58  ;;  %v1314_v4 = vunpack.c.l.bf16 %v1657_v54  ;;  %v1315_v9 = vunpack.c.h.bf16 %v1657_v54  ;;  %v1346_v12 = vunpack.c.l.bf16 %v1665_v28  ;;  %v1713_v58 = vld [vmem:[%s1883_s28 + $0x238] sm:$0xff]  }
  0x68   : > { %v884_v6 = vpack.c.bf16 %v873_v62, %v872_v59  ;;  %v629_v7 = vadd.f32 %v1470_v50, %v580_v63  ;;  %v630_v8 = vadd.f32 %v1471_v33, %v581_v1  ;;  %v337_v29 = vadd.f32 %v1282_v2, %v1250_v42  ;;  %v1705_v50 = vld [vmem:[%s1883_s28 + $0x1f8] sm:$0xff]  }
  0x69   : > { %v338_v48 = vadd.f32 %v1283_v3, %v1251_v41  ;;  %v1347_v13 = vunpack.c.h.bf16 %v1665_v28  ;;  %v1566_v15 = vunpack.c.l.bf16 %v1720_v43  ;;  %v1567_v49 = vunpack.c.h.bf16 %v1720_v43  ;;  %v1721_v62 = vld [vmem:[%s1883_s28 + $0x278] sm:$0xff]  }
  0x6a   : > { %1758 = vmatpush3.bf16.msra.mxu0 %v884_v6  ;;  %v678_v14 = vadd.f32 %v1502_v57, %v629_v7  ;;  %v679_v10 = vadd.f32 %v1503_v38, %v630_v8  ;;  %v386_v51 = vadd.f32 %v1314_v4, %v337_v29  ;;  %v1378_v18 = vunpack.c.l.bf16 %v1673_v44  ;;  %v1729_v43 = vld [vmem:[%s1883_s28 + $0x2b8] sm:$0xff]  }
  0x6b   : > { %1759 = vmatprep.subr.bf16.mxu0 %v1820_v0  ;;  %v387_v17 = vadd.f32 %v1315_v9, %v338_v48  ;;  %v1379_v19 = vunpack.c.h.bf16 %v1673_v44  ;;  %v1598_v22 = vunpack.c.l.bf16 %v1728_v11  ;;  %v1599_v23 = vunpack.c.h.bf16 %v1728_v11  ;;  %v1737_v6 = vld [vmem:[%s1883_s28 + $0x2f8] sm:$0xff]  }
  0x6c   : > { %v727_v20 = vadd.f32 %v1534_v60, %v678_v14  ;;  %v728_v21 = vadd.f32 %v1535_v61, %v679_v10  ;;  %v435_v25 = vadd.f32 %v1346_v12, %v386_v51  ;;  %v1410_v39 = vunpack.c.l.bf16 %v1681_v16 }
  0x6d   : > { %v436_v52 = vadd.f32 %v1347_v13, %v387_v17  ;;  %v1411_v5 = vunpack.c.h.bf16 %v1681_v16  ;;  %v1630_v30 = vunpack.c.l.bf16 %v1736_v34  ;;  %v1631_v31 = vunpack.c.h.bf16 %v1736_v34 }
  0x6e   : > { %v776_v26 = vadd.f32 %v1566_v15, %v727_v20  ;;  %v777_v27 = vadd.f32 %v1567_v49, %v728_v21  ;;  %v484_v35 = vadd.f32 %v1378_v18, %v435_v25  ;;  %v1442_v45 = vunpack.c.l.bf16 %v1689_v24 }
  0x6f   : > { %v485_v40 = vadd.f32 %v1379_v19, %v436_v52  ;;  %v1443_v46 = vunpack.c.h.bf16 %v1689_v24  ;;  %v1474_v53 = vunpack.c.l.bf16 %v1697_v32  ;;  %v1475_v55 = vunpack.c.h.bf16 %v1697_v32 }
  0x70   : > { %v825_v36 = vadd.f32 %v1598_v22, %v776_v26  ;;  %v826_v47 = vadd.f32 %v1599_v23, %v777_v27  ;;  %v533_v33 = vadd.f32 %v1410_v39, %v484_v35  ;;  %v1506_v38 = vunpack.c.l.bf16 %v1705_v50 }
  0x71   : > { %v534_v37 = vadd.f32 %v1411_v5, %v485_v40  ;;  %v1507_v60 = vunpack.c.h.bf16 %v1705_v50  ;;  %v1538_v42 = vunpack.c.l.bf16 %v1713_v58  ;;  %v1539_v28 = vunpack.c.h.bf16 %v1713_v58 }
  0x72   : > { %v874_v56 = vadd.f32 %v1630_v30, %v825_v36  ;;  %v875_v57 = vadd.f32 %v1631_v31, %v826_v47  ;;  %v582_v54 = vadd.f32 %v1442_v45, %v533_v33  ;;  %v1570_v3 = vunpack.c.l.bf16 %v1721_v62 }
  0x73   : > { %v583_v59 = vadd.f32 %v1443_v46, %v534_v37  ;;  %v1571_v4 = vunpack.c.h.bf16 %v1721_v62  ;;  %v1602_v9 = vunpack.c.l.bf16 %v1729_v43  ;;  %v1603_v44 = vunpack.c.h.bf16 %v1729_v43 }
  0x74   : > { %v885_v61 = vpack.c.bf16 %v875_v57, %v874_v56  ;;  %v631_v63 = vadd.f32 %v1474_v53, %v582_v54  ;;  %v1634_v48 = vunpack.c.l.bf16 %v1737_v6  ;;  %v1635_v12 = vunpack.c.h.bf16 %v1737_v6 }
  0x75   : > { %v632_v1 = vadd.f32 %v1475_v55, %v583_v59 }
  0x76   : > { %1760 = vmatpush3.bf16.msra.mxu0 %v885_v61  ;;  %v680_v41 = vadd.f32 %v1506_v38, %v631_v63 }
  0x77   : > { %1761 = vmatprep.subr.bf16.mxu0 %v1820_v0  ;;  %v681_v2 = vadd.f32 %v1507_v60, %v632_v1  ;;  %v878_v0 = vld [vmem:[%s2070_s2] sm:$0xf] }
  0x78   : > { %v729_v7 = vadd.f32 %v1538_v42, %v680_v41 }
  0x79   : > { %v730_v8 = vadd.f32 %v1539_v28, %v681_v2 }
  0x7a   : > { %v778_v11 = vadd.f32 %v1570_v3, %v729_v7 }
  0x7b   : > { %v779_v29 = vadd.f32 %v1571_v4, %v730_v8 }
  0x7c   : > { %v827_v13 = vadd.f32 %v1602_v9, %v778_v11 }
  0x7d   : > { %v828_v14 = vadd.f32 %v1603_v44, %v779_v29 }
  0x7e   : > { %v876_v10 = vadd.f32 %v1634_v48, %v827_v13 }
  0x7f   : > { %v877_v15 = vadd.f32 %v1635_v12, %v828_v14 }
  0x81   : > { %v886_v49 = vpack.c.bf16 %v877_v15, %v876_v10 }
  0x83   : > { %1762 = vmatpush3.bf16.msra.mxu0 %v886_v49 }
  0x86   : > { %1764 = vmatmul.mubr.bf16.vlgmr.msra.gmra.mrb[0].mxu0 %v878_v0 }
  0x88   : > { %v891_v16 = vpop.permute.xlu0 %890 }
 0x159   : > { %v927_v34 = vpop.f32.mrb[0].mxu0 }
 0x15a   : > { %v928_v51 = vadd.f32 %v927_v34, %v891_v16  ;;  %v1765_v17 = vpop.f32.mrb[1].mxu0 }
 0x15b   : > { %v930_v18 = vpop.f32.mrb[2].mxu0 }
 0x15c   : > { %v933_v19 = vmax.f32 %v928_v51, 0.0  ;;  %v1766_v20 = vpop.f32.mrb[3].mxu0 }
 0x15e   : > { %v934_v21 = vpack.c.bf16 %v933_v19, %v933_v19 }
 0x160   : > { %936 = vst.msk [vmem:[%s257_s8] sm:$0xf] %vm935_vm1, %v934_v21 }
 0x161 PF: > { %s14_s17 = sadd.s32 1, %s1818_s17   ;;  %s2073_s15 = smov %s1814_s16 }
 0x162   : > { %p11_p5 = scmp.ge.s32.totalorder %s14_s17, 4   ;;  %s2074_s16 = smov %s2076_s18 }
 0x164   :  { %13 = sbr.rel (!%p11_p5) target bundleno = 2 (0x2), region = 80 }

// kernel: network_forward.25
= control target key start
LH: loop header
LB: loop body
LE: loop exit
PB: predicated region body
PF: predicated region fallthrough
CT: control target
= control target key end

     0   :  { %vm60_vm0 = vcmask 31744   ;;  %s1876_s0 = inlined_call_operand.vmem [shape: bf16[2,64,4], index: 0, kind: input, shape index: {}]   ;;  %s1877_s1 = inlined_call_operand.vmem [shape: bf16[64,512], index: 1, kind: input, shape index: {}]   ;;  %s1878_s2 = inlined_call_operand.vmem [shape: f32[1,512], index: 2, kind: input, shape index: {}]   ;;  %s1879_s3 = inlined_call_operand.vmem [shape: bf16[512,256], index: 3, kind: input, shape index: {}]   ;;  %s1880_s4 = inlined_call_operand.vmem [shape: f32[1,256], index: 4, kind: input, shape index: {}]   ;;  %s1881_s5 = inlined_call_operand.vmem [shape: bf16[256,4], index: 5, kind: input, shape index: {}]   ;;  %s1882_s6 = inlined_call_operand.vmem [shape: f32[1,4], index: 6, kind: input, shape index: {}]   ;;  %s1883_s7 = inlined_call_operand.hbm [shape: f32[2,4], index: 7, kind: output, shape index: {}]  }
   0x1   :  { %v1257_v0 = vld [vmem:[%s1876_s0 + $0x20] sm:$0xff]   ;;  %v1254_v6 = vld [vmem:[%s1876_s0 + $0x8] sm:$0xff]   ;;  %v1255_v14 = vld [vmem:[%s1876_s0 + $0x10] sm:$0xff]  }
   0x2   :  { %v1223_v1 = vld [vmem:[%s1876_s0] sm:$0xff]   ;;  %v1240_v2 = vunpack.c.l.bf16 %v1257_v0  ;;  %v1241_v4 = vunpack.c.h.bf16 %v1257_v0  ;;  %v1258_v9 = vld [vmem:[%s1876_s0 + $0x28] sm:$0xff]   ;;  %v1229_v12 = vunpack.c.h.bf16 %v1254_v6  ;;  %v1228_v13 = vunpack.c.l.bf16 %v1254_v6  ;;  %v1259_v19 = vld [vmem:[%s1876_s0 + $0x30] sm:$0xff]  }
   0x3   :  { %v1224_v3 = vunpack.c.l.bf16 %v1223_v1  ;;  %v1225_v5 = vunpack.c.h.bf16 %v1223_v1  ;;  %v1245_v17 = vunpack.c.h.bf16 %v1258_v9  ;;  %v1244_v18 = vunpack.c.l.bf16 %v1258_v9  ;;  %v1256_v24 = vld [vmem:[%s1876_s0 + $0x18] sm:$0xff]   ;;  %v1289_v40 = vld [vmem:[%s1877_s1 + $0x4] ss:$16 sps:$4 sm:$0xff]   ;;  %v1291_v41 = vld [vmem:[%s1877_s1] ss:$16 sps:$4 sm:$0xff]  }
   0x4   :  { %v85_v7 = vsel %vm60_vm0, %v1240_v2, -inf  ;;  %v88_v10 = vsel %vm60_vm0, %v1241_v4, -inf  ;;  %v70_v15 = vsel %vm60_vm0, %v1229_v12, -inf  ;;  %v67_v16 = vsel %vm60_vm0, %v1228_v13, -inf  ;;  %v1260_v29 = vld [vmem:[%s1876_s0 + $0x38] sm:$0xff]   ;;  %360 = vmatprep.subr.bf16.mxu0 %v1289_v40 }
   0x5   :  { %v61_v8 = vsel %vm60_vm0, %v1224_v3, -inf  ;;  %86 = vmax.xlane.f32.xlu1 %v85_v7  ;;  %v64_v11 = vsel %vm60_vm0, %v1225_v5, -inf  ;;  %v94_v20 = vsel %vm60_vm0, %v1245_v17, -inf  ;;  %v91_v21 = vsel %vm60_vm0, %v1244_v18, -inf  ;;  %361 = vmatpush1.bf16.msra.mxu0 %v1291_v41 }
   0x6   :  { %62 = vmax.xlane.f32.xlu0 %v61_v8  ;;  %v1233_v22 = vunpack.c.h.bf16 %v1255_v14  ;;  %v1232_v23 = vunpack.c.l.bf16 %v1255_v14  ;;  %v1249_v27 = vunpack.c.h.bf16 %v1259_v19  ;;  %v1248_v28 = vunpack.c.l.bf16 %v1259_v19 }
   0x7   :  { %v1237_v32 = vunpack.c.h.bf16 %v1256_v24  ;;  %v1236_v33 = vunpack.c.l.bf16 %v1256_v24  ;;  %v1253_v36 = vunpack.c.h.bf16 %v1260_v29  ;;  %v1252_v37 = vunpack.c.l.bf16 %v1260_v29 }
   0x8   :  { %v76_v25 = vsel %vm60_vm0, %v1233_v22, -inf  ;;  %v73_v26 = vsel %vm60_vm0, %v1232_v23, -inf  ;;  %v100_v30 = vsel %vm60_vm0, %v1249_v27, -inf  ;;  %v97_v31 = vsel %vm60_vm0, %v1248_v28, -inf }
   0x9   :  { %89 = vmax.xlane.f32.xlu1 %v88_v10  ;;  %v82_v34 = vsel %vm60_vm0, %v1237_v32, -inf  ;;  %v79_v35 = vsel %vm60_vm0, %v1236_v33, -inf  ;;  %v106_v38 = vsel %vm60_vm0, %v1253_v36, -inf  ;;  %v103_v39 = vsel %vm60_vm0, %v1252_v37, -inf }
   0xa   :  { %65 = vmax.xlane.f32.xlu0 %v64_v11 }
   0xd   :  { %71 = vmax.xlane.f32.xlu1 %v70_v15 }
   0xe   :  { %68 = vmax.xlane.f32.xlu0 %v67_v16 }
  0x11   :  { %95 = vmax.xlane.f32.xlu1 %v94_v20 }
  0x12   :  { %92 = vmax.xlane.f32.xlu0 %v91_v21 }
  0x15   :  { %77 = vmax.xlane.f32.xlu1 %v76_v25 }
  0x16   :  { %74 = vmax.xlane.f32.xlu0 %v73_v26 }
  0x19   :  { %101 = vmax.xlane.f32.xlu1 %v100_v30 }
  0x1a   :  { %98 = vmax.xlane.f32.xlu0 %v97_v31 }
  0x1d   :  { %83 = vmax.xlane.f32.xlu1 %v82_v34 }
  0x1e   :  { %80 = vmax.xlane.f32.xlu0 %v79_v35 }
  0x21   :  { %107 = vmax.xlane.f32.xlu1 %v106_v38 }
  0x22   :  { %104 = vmax.xlane.f32.xlu0 %v103_v39 }
  0x23   :  { %12 = vsyncpa [#allocation3], 0  ;;  %v1292_v42 = vld [vmem:[%s1877_s1 + $0x24] ss:$16 sps:$4 sm:$0xff]   ;;  %v1294_v43 = vld [vmem:[%s1877_s1 + $0x20] ss:$16 sps:$4 sm:$0xff]   ;;  %v135_v16 = vlaneseq }
  0x24   :  { %362 = vmatprep.subr.bf16.mxu0 %v1292_v42  ;;  %v1295_v44 = vld [vmem:[%s1877_s1 + $0x44] ss:$16 sps:$4 sm:$0xff]   ;;  %v1297_v45 = vld [vmem:[%s1877_s1 + $0x40] ss:$16 sps:$4 sm:$0xff]   ;;  %v1303_v48 = vld [vmem:[%s1877_s1 + $0xc] ss:$16 sps:$4 sm:$0xff]  }
  0x25   :  { %363 = vmatpush1.bf16.msra.mxu0 %v1294_v43  ;;  %v1298_v46 = vld [vmem:[%s1877_s1 + $0x64] ss:$16 sps:$4 sm:$0xff]   ;;  %v1300_v47 = vld [vmem:[%s1877_s1 + $0x60] ss:$16 sps:$4 sm:$0xff]   ;;  %v1449_v49 = vmov 0   ;;  %v180_v19 = vand.u32 127, %v135_v16 }
  0x26   :  { %364 = vmatprep.subr.bf16.mxu0 %v1295_v44  ;;  %392 = vmatprep.mubr.bf16.mxu0 %v1449_v49  ;;  %v1313_v50 = vld [vmem:[%s1879_s3 + $0x4] ss:$8 sps:$4 sm:$0xff]   ;;  %v1315_v51 = vld [vmem:[%s1879_s3] ss:$8 sps:$4 sm:$0xff]   ;;  %v1316_v52 = vld [vmem:[%s1879_s3 + $0x14] ss:$8 sps:$4 sm:$0xff]  }
  0x27   :  { %846 = vmatprep.subr.bf16.mxu1 %v1313_v50  ;;  %v1318_v53 = vld [vmem:[%s1879_s3 + $0x10] ss:$8 sps:$4 sm:$0xff]   ;;  %v1319_v54 = vld [vmem:[%s1879_s3 + $0x24] ss:$8 sps:$4 sm:$0xff]   ;;  %v1321_v55 = vld [vmem:[%s1879_s3 + $0x20] ss:$8 sps:$4 sm:$0xff]  }
  0x28   :  { %847 = vmatpush1.bf16.msra.mxu1 %v1315_v51  ;;  %v1322_v56 = vld [vmem:[%s1879_s3 + $0x34] ss:$8 sps:$4 sm:$0xff]   ;;  %v1324_v57 = vld [vmem:[%s1879_s3 + $0x30] ss:$8 sps:$4 sm:$0xff]   ;;  %v1328_v58 = vld [vmem:[%s1879_s3 + $0x44] ss:$8 sps:$4 sm:$0xff]  }
  0x29   :  { %365 = vmatpush1.bf16.msra.mxu0 %v1297_v45  ;;  %848 = vmatprep.subr.bf16.mxu1 %v1316_v52  ;;  %v1330_v59 = vld [vmem:[%s1879_s3 + $0x40] ss:$8 sps:$4 sm:$0xff]   ;;  %v1334_v60 = vld [vmem:[%s1879_s3 + $0x54] ss:$8 sps:$4 sm:$0xff]   ;;  %v1336_v61 = vld [vmem:[%s1879_s3 + $0x50] ss:$8 sps:$4 sm:$0xff]  }
  0x2a   :  { %366 = vmatprep.subr.bf16.mxu0 %v1298_v46  ;;  %v1340_v62 = vld [vmem:[%s1879_s3 + $0x64] ss:$8 sps:$4 sm:$0xff]   ;;  %v1342_v63 = vld [vmem:[%s1879_s3 + $0x60] ss:$8 sps:$4 sm:$0xff]   ;;  %v1346_v0 = vld [vmem:[%s1879_s3 + $0x74] ss:$8 sps:$4 sm:$0xff]  }
  0x2b   :  { %v1348_v1 = vld [vmem:[%s1879_s3 + $0x70] ss:$8 sps:$4 sm:$0xff]   ;;  %v1352_v2 = vld [vmem:[%s1879_s3 + $0x84] ss:$8 sps:$4 sm:$0xff]   ;;  %v1354_v3 = vld [vmem:[%s1879_s3 + $0x80] ss:$8 sps:$4 sm:$0xff]  }
  0x2c   :  { %849 = vmatpush1.bf16.msra.mxu1 %v1318_v53  ;;  %v1358_v4 = vld [vmem:[%s1879_s3 + $0x94] ss:$8 sps:$4 sm:$0xff]   ;;  %v1360_v5 = vld [vmem:[%s1879_s3 + $0x90] ss:$8 sps:$4 sm:$0xff]   ;;  %v1364_v6 = vld [vmem:[%s1879_s3 + $0xa4] ss:$8 sps:$4 sm:$0xff]  }
  0x2d   :  { %367 = vmatpush1.bf16.msra.mxu0 %v1300_v47  ;;  %850 = vmatprep.subr.bf16.mxu1 %v1319_v54  ;;  %v1366_v7 = vld [vmem:[%s1879_s3 + $0xa0] ss:$8 sps:$4 sm:$0xff]   ;;  %v1370_v8 = vld [vmem:[%s1879_s3 + $0xb4] ss:$8 sps:$4 sm:$0xff]   ;;  %v1372_v9 = vld [vmem:[%s1879_s3 + $0xb0] ss:$8 sps:$4 sm:$0xff]  }
  0x2e   :  { %401 = vmatprep.subr.bf16.mxu0 %v1303_v48  ;;  %v1376_v10 = vld [vmem:[%s1879_s3 + $0xc4] ss:$8 sps:$4 sm:$0xff]   ;;  %v1378_v11 = vld [vmem:[%s1879_s3 + $0xc0] ss:$8 sps:$4 sm:$0xff]   ;;  %v1382_v12 = vld [vmem:[%s1879_s3 + $0xd4] ss:$8 sps:$4 sm:$0xff]  }
  0x2f   :  { %v1384_v13 = vld [vmem:[%s1879_s3 + $0xd0] ss:$8 sps:$4 sm:$0xff]   ;;  %v1643_v22 = vshrl.u32 %v135_v16, 7  ;;  %v185_v23 = vadd.s32 4294967288, %v180_v19  ;;  %v192_v27 = vadd.s32 4294967280, %v180_v19  ;;  %v199_v31 = vadd.s32 4294967272, %v180_v19 }
  0x30   :  { %851 = vmatpush1.bf16.msra.mxu1 %v1321_v55  ;;  %v206_v37 = vadd.s32 4294967264, %v180_v19  ;;  %vm190_vm1 = vcmask 130112   ;;  %v213_v46 = vadd.s32 4294967256, %v180_v19  ;;  %vm197_vm2 = vcmask 195712   ;;  %s1450_s13 = smov [#allocation2]  }
  0x31   :  { %852 = vmatprep.subr.bf16.mxu1 %v1322_v56  ;;  %v183_v30 = vsub.s32 %v180_v19, %v1643_v22  ;;  %v188_v33 = vsub.s32 %v185_v23, %v1643_v22  ;;  %v195_v39 = vsub.s32 %v192_v27, %v1643_v22  ;;  %v202_v44 = vsub.s32 %v199_v31, %v1643_v22  ;;  %s1115_s14 = sshll.u32 %s1450_s13, 4  ;;  %s1116_s14 = int_to_ptr.vmem [resolvable:$true] %s1115_s14 }
  0x32   :  { %v209_v51 = vsub.s32 %v206_v37, %v1643_v22  ;;  %vm204_vm3 = vcmask 261312   ;;  %vm211_vm4 = vcmask 326912   ;;  %vm218_vm5 = vcmask 392512   ;;  %s1425_s15 = scalar_lea.vmem %s1116_s14, 32  ;;  %p1430_p1 = scmp.lt.s32.totalorder %s1116_s14, %s1116_s14 }
  0x33   :  { %vm225_vm6 = vcmask 458112   ;;  %vm232_vm7 = vcmask 523712   ;;  %vm273_vm8 = vcmask 1041409   ;;  %vm356_vm9 = vcmask 523264   ;;  %p1426_p0 = scmp.ne.s32.totalorder %s1116_s14, %s1425_s15  ;;  %p1431_p2 = scmp.lt.s32.totalorder %s1425_s15, %s1425_s15 }
  0x34   :  { %853 = vmatpush1.bf16.msra.mxu1 %v1324_v57  ;;  %v220_v57 = vadd.s32 4294967248, %v180_v19  ;;  %vm1107_vm10 = vcmask 25600  }
  0x35   :  { %854 = vmatprep.subr.bf16.mxu1 %v1328_v58  ;;  %p1432_p3 = por %p1431_p2, %p1430_p1 }
  0x37   :  { %p1433_p4 = pnand %p1432_p3, %p1426_p0 }
  0x38   :  { %855 = vmatpush1.bf16.msra.mxu1 %v1330_v59 }
  0x39   :  { %856 = vmatprep.subr.bf16.mxu1 %v1334_v60 }
  0x3c   :  { %857 = vmatpush1.bf16.msra.mxu1 %v1336_v61 }
  0x3d   :  { %858 = vmatprep.subr.bf16.mxu1 %v1340_v62  ;;  %v216_v62 = vsub.s32 %v213_v46, %v1643_v22  ;;  %v1307_v46 = vld [vmem:[%s1877_s1 + $0x48] ss:$16 sps:$4 sm:$0xff]  }
  0x40   :  { %859 = vmatpush1.bf16.msra.mxu1 %v1342_v63 }
  0x41   :  { %860 = vmatprep.subr.bf16.mxu1 %v1346_v0 }
  0x44   :  { %861 = vmatpush1.bf16.msra.mxu1 %v1348_v1 }
  0x45   :  { %862 = vmatprep.subr.bf16.mxu1 %v1352_v2 }
  0x48   :  { %863 = vmatpush1.bf16.msra.mxu1 %v1354_v3 }
  0x49   :  { %864 = vmatprep.subr.bf16.mxu1 %v1358_v4  ;;  %v227_v4 = vadd.s32 4294967240, %v180_v19 }
  0x4c   :  { %865 = vmatpush1.bf16.msra.mxu1 %v1360_v5 }
  0x4d   :  { %866 = vmatprep.subr.bf16.mxu1 %v1364_v6 }
  0x50   :  { %867 = vmatpush1.bf16.msra.mxu1 %v1366_v7 }
  0x51   :  { %868 = vmatprep.subr.bf16.mxu1 %v1370_v8  ;;  %v223_v8 = vsub.s32 %v220_v57, %v1643_v22  ;;  %v1351_v57 = vld [vmem:[%s1879_s3 + $0x144] ss:$8 sps:$4 sm:$0xff]  }
  0x54   :  { %869 = vmatpush1.bf16.msra.mxu1 %v1372_v9 }
  0x55   :  { %870 = vmatprep.subr.bf16.mxu1 %v1376_v10 }
  0x58   :  { %871 = vmatpush1.bf16.msra.mxu1 %v1378_v11 }
  0x59   :  { %872 = vmatprep.subr.bf16.mxu1 %v1382_v12 }
  0x5c   :  { %873 = vmatpush1.bf16.msra.mxu1 %v1384_v13 }
  0x92   :  { %v87_v14 = vpop.xlane.xlu1 %86 }
  0x93   :  { %v63_v15 = vpop.xlane.xlu0 %62 }
  0x96   :  { %v90_v17 = vpop.xlane.xlu1 %89 }
  0x97   :  { %v66_v18 = vpop.xlane.xlu0 %65  ;;  %v113_v29 = vpack.c.bf16 %v90_v17, %v87_v14 }
  0x98   :  { %v109_v24 = vpack.c.bf16 %v66_v18, %v63_v15  ;;  %v230_v18 = vsub.s32 %v227_v4, %v1643_v22  ;;  %v1379_v4 = vld [vmem:[%s1879_s3 + $0x190] ss:$8 sps:$4 sm:$0xff]  }
  0x99   :  { %v171_v42 = vunpack.c.l.b16 %v113_v29  ;;  %v172_v43 = vunpack.c.h.b16 %v113_v29 }
  0x9a   :  { %v72_v20 = vpop.xlane.xlu1 %71  ;;  %v163_v34 = vunpack.c.l.b16 %v109_v24  ;;  %v164_v35 = vunpack.c.h.b16 %v109_v24 }
  0x9b   :  { %v69_v21 = vpop.xlane.xlu0 %68  ;;  %v237_v58 = vrot.slane %v171_v42, %v183_v30  ;;  %v241_v59 = vrot.slane %v172_v43, %v188_v33  ;;  %v1306_v43 = vld [vmem:[%s1877_s1 + $0x2c] ss:$16 sps:$4 sm:$0xff]  }
  0x9c   :  { %v110_v28 = vpack.c.bf16 %v72_v20, %v69_v21  ;;  %v184_v47 = vrot.slane %v163_v34, %v183_v30  ;;  %v189_v48 = vrot.slane %v164_v35, %v188_v33 }
  0x9d   :  { %v242_v10 = vsel %vm190_vm1, %v241_v59, %v237_v58  ;;  %v1349_v58 = vld [vmem:[%s1879_s3 + $0x140] ss:$8 sps:$4 sm:$0xff]   ;;  %v1357_v59 = vld [vmem:[%s1879_s3 + $0x154] ss:$8 sps:$4 sm:$0xff]  }
  0x9e   :  { %v96_v25 = vpop.xlane.xlu1 %95  ;;  %v165_v40 = vunpack.c.l.b16 %v110_v28  ;;  %v166_v50 = vunpack.c.h.b16 %v110_v28  ;;  %v191_v0 = vsel %vm190_vm1, %v189_v48, %v184_v47  ;;  %v1312_v47 = vld [vmem:[%s1877_s1 + $0x6c] ss:$16 sps:$4 sm:$0xff]  }
  0x9f   :  { %v93_v26 = vpop.xlane.xlu0 %92  ;;  %v1327_v48 = vld [vmem:[%s1879_s3 + $0x104] ss:$8 sps:$4 sm:$0xff]  }
  0xa0   :  { %v114_v32 = vpack.c.bf16 %v96_v25, %v93_v26  ;;  %v196_v54 = vrot.slane %v165_v40, %v195_v39  ;;  %v203_v1 = vrot.slane %v166_v50, %v202_v44  ;;  %v1301_v40 = vld [vmem:[%s1877_s1 + $0x8] ss:$16 sps:$4 sm:$0xff]  }
  0xa1   :  { %v1325_v50 = vld [vmem:[%s1879_s3 + $0x100] ss:$8 sps:$4 sm:$0xff]  }
  0xa2   :  { %v78_v36 = vpop.xlane.xlu1 %77  ;;  %v173_v45 = vunpack.c.l.b16 %v114_v32  ;;  %v174_v60 = vunpack.c.h.b16 %v114_v32  ;;  %v198_v6 = vsel %vm197_vm2, %v196_v54, %v191_v0  ;;  %v1337_v54 = vld [vmem:[%s1879_s3 + $0x120] ss:$8 sps:$4 sm:$0xff]   ;;  %v1367_v0 = vld [vmem:[%s1879_s3 + $0x170] ss:$8 sps:$4 sm:$0xff]  }
  0xa3   :  { %v75_v38 = vpop.xlane.xlu0 %74  ;;  %v205_v16 = vsel %vm204_vm3, %v203_v1, %v198_v6  ;;  %v1375_v1 = vld [vmem:[%s1879_s3 + $0x184] ss:$8 sps:$4 sm:$0xff]   ;;  %v1385_v6 = vld [vmem:[%s1879_s3 + $0x1a0] ss:$8 sps:$4 sm:$0xff]  }
  0xa4   :  { %v111_v41 = vpack.c.bf16 %v78_v36, %v75_v38  ;;  %v246_v61 = vrot.slane %v173_v45, %v195_v39  ;;  %v251_v11 = vrot.slane %v174_v60, %v202_v44  ;;  %v1304_v44 = vld [vmem:[%s1877_s1 + $0x28] ss:$16 sps:$4 sm:$0xff]   ;;  %v1309_v45 = vld [vmem:[%s1877_s1 + $0x4c] ss:$16 sps:$4 sm:$0xff]  }
  0xa5   :  { %v1355_v60 = vld [vmem:[%s1879_s3 + $0x150] ss:$8 sps:$4 sm:$0xff]  }
  0xa6   :  { %v102_v52 = vpop.xlane.xlu1 %101  ;;  %v167_v55 = vunpack.c.l.b16 %v111_v41  ;;  %v168_v2 = vunpack.c.h.b16 %v111_v41  ;;  %v247_v13 = vsel %vm197_vm2, %v246_v61, %v242_v10  ;;  %v1363_v61 = vld [vmem:[%s1879_s3 + $0x164] ss:$8 sps:$4 sm:$0xff]   ;;  %v1391_v10 = vld [vmem:[%s1879_s3 + $0x1b0] ss:$8 sps:$4 sm:$0xff]  }
  0xa7   :  { %v99_v53 = vpop.xlane.xlu0 %98  ;;  %v252_v26 = vsel %vm204_vm3, %v251_v11, %v247_v13  ;;  %v1394_v11 = vld [vmem:[%s1879_s3 + $0xf4] ss:$8 sps:$4 sm:$0xff]   ;;  %v1399_v13 = vld [vmem:[%s1879_s3 + $0x1c4] ss:$8 sps:$4 sm:$0xff]  }
  0xa8   :  { %v115_v56 = vpack.c.bf16 %v102_v52, %v99_v53  ;;  %v210_v7 = vrot.slane %v167_v55, %v209_v51  ;;  %v217_v17 = vrot.slane %v168_v2, %v216_v62  ;;  %v1331_v52 = vld [vmem:[%s1879_s3 + $0x110] ss:$8 sps:$4 sm:$0xff]   ;;  %v1339_v53 = vld [vmem:[%s1879_s3 + $0x124] ss:$8 sps:$4 sm:$0xff]   ;;  %v1345_v55 = vld [vmem:[%s1879_s3 + $0x134] ss:$8 sps:$4 sm:$0xff]  }
  0xa9   :  { %v1373_v2 = vld [vmem:[%s1879_s3 + $0x180] ss:$8 sps:$4 sm:$0xff]  }
  0xaa   :  { %v175_v63 = vunpack.c.l.b16 %v115_v56  ;;  %v84_v3 = vpop.xlane.xlu1 %83  ;;  %v176_v12 = vunpack.c.h.b16 %v115_v56  ;;  %v212_v23 = vsel %vm211_vm4, %v210_v7, %v205_v16  ;;  %v1343_v56 = vld [vmem:[%s1879_s3 + $0x130] ss:$8 sps:$4 sm:$0xff]   ;;  %v1388_v7 = vld [vmem:[%s1879_s3 + $0xe4] ss:$8 sps:$4 sm:$0xff]  }
  0xab   :  { %v81_v5 = vpop.xlane.xlu0 %80  ;;  %v219_v31 = vsel %vm218_vm5, %v217_v17, %v212_v23  ;;  %874 = vmatprep.subr.bf16.mxu1 %v1388_v7  ;;  %v1400_v16 = vld [vmem:[%s1879_s3 + $0x1d0] ss:$8 sps:$4 sm:$0xff]   ;;  %v1405_v17 = vld [vmem:[%s1879_s3 + $0x1e4] ss:$8 sps:$4 sm:$0xff]   ;;  %v137_v23 = vsub.s32 0, %v1643_v22 }
  0xac   :  { %v112_v9 = vpack.c.bf16 %v84_v3, %v81_v5  ;;  %v256_v14 = vrot.slane %v175_v63, %v209_v51  ;;  %v261_v27 = vrot.slane %v176_v12, %v216_v62  ;;  %v1333_v51 = vld [vmem:[%s1879_s3 + $0x114] ss:$8 sps:$4 sm:$0xff]   ;;  %v1361_v62 = vld [vmem:[%s1879_s3 + $0x160] ss:$8 sps:$4 sm:$0xff]   ;;  %v1387_v5 = vld [vmem:[%s1879_s3 + $0x1a4] ss:$8 sps:$4 sm:$0xff]  }
  0xad   :  { %v1369_v63 = vld [vmem:[%s1879_s3 + $0x174] ss:$8 sps:$4 sm:$0xff]   ;;  %v1396_v12 = vld [vmem:[%s1879_s3 + $0xf0] ss:$8 sps:$4 sm:$0xff]   ;;  %v514_v7 = vld [vmem:[%s1880_s4] sm:$0x3] }
  0xae   :  { %v169_v15 = vunpack.c.l.b16 %v112_v9  ;;  %v170_v19 = vunpack.c.h.b16 %v112_v9  ;;  %v108_v20 = vpop.xlane.xlu1 %107  ;;  %v257_v28 = vsel %vm211_vm4, %v256_v14, %v252_v26  ;;  %v1381_v3 = vld [vmem:[%s1879_s3 + $0x194] ss:$8 sps:$4 sm:$0xff]   ;;  %v1397_v14 = vld [vmem:[%s1879_s3 + $0x1c0] ss:$8 sps:$4 sm:$0xff]  }
  0xaf   :  { %v105_v21 = vpop.xlane.xlu0 %104  ;;  %v262_v36 = vsel %vm218_vm5, %v261_v27, %v257_v28  ;;  %v1393_v9 = vld [vmem:[%s1879_s3 + $0x1b4] ss:$8 sps:$4 sm:$0xff]  }
  0xb0   :  { %v224_v24 = vrot.slane %v169_v15, %v223_v8  ;;  %v116_v25 = vpack.c.bf16 %v108_v20, %v105_v21  ;;  %v231_v32 = vrot.slane %v170_v19, %v230_v18  ;;  %v1402_v15 = vld [vmem:[%s1879_s3 + $0x1d4] ss:$8 sps:$4 sm:$0xff]   ;;  %v1406_v20 = vld [vmem:[%s1879_s3 + $0x1f0] ss:$8 sps:$4 sm:$0xff]   ;;  %v1409_v21 = vld [vmem:[%s1881_s5 + $0x40] sm:$0xff]  }
  0xb1   :  { %v1408_v19 = vld [vmem:[%s1879_s3 + $0x1f4] ss:$8 sps:$4 sm:$0xff]  }
  0xb2   :  { %v177_v29 = vunpack.c.l.b16 %v116_v25  ;;  %v178_v30 = vunpack.c.h.b16 %v116_v25  ;;  %v226_v33 = vsel %vm225_vm6, %v224_v24, %v219_v31  ;;  %v133_v24 = vld [vmem:[%s1878_s2] sm:$0xf]  ;;  %v141_v25 = vsub.s32 1, %v1643_v22 }
  0xb3   :  { %v233_v38 = vsel %vm232_vm7, %v231_v32, %v226_v33  ;;  %v138_v26 = vrot.slane %v133_v24, %v137_v23 }
  0xb4   :  { %v266_v34 = vrot.slane %v177_v29, %v223_v8  ;;  %v271_v35 = vrot.slane %v178_v30, %v230_v18  ;;  %v1390_v8 = vld [vmem:[%s1879_s3 + $0xe0] ss:$8 sps:$4 sm:$0xff]   ;;  %v142_v27 = vrot.slane %v133_v24, %v141_v25 }
  0xb5   :  { %875 = vmatpush1.bf16.msra.mxu1 %v1390_v8  ;;  %v1403_v18 = vld [vmem:[%s1879_s3 + $0x1e0] ss:$8 sps:$4 sm:$0xff]   ;;  %v519_v8 = vrot.slane %v514_v7, %v137_v23 }
  0xb6   :  { %v267_v37 = vsel %vm225_vm6, %v266_v34, %v262_v36  ;;  %876 = vmatprep.subr.bf16.mxu1 %v1394_v11 }
  0xb7   :  { %v272_v39 = vsel %vm232_vm7, %v271_v35, %v267_v37  ;;  %v1410_v37 = vld [vmem:[%s1881_s5] sm:$0xff]  }
  0xb8   :  { %v274_v41 = vsel %vm273_vm8, %v272_v39, %v233_v38  ;;  %v1411_v39 = vld [vmem:[%s1881_s5 + $0x48] sm:$0xff]  }
  0xb9   :  { %v275_v42 = vpack.c.b16 %v274_v41, %v274_v41  ;;  %877 = vmatpush1.bf16.msra.mxu1 %v1396_v12  ;;  %v149_v41 = vsub.s32 3, %v1643_v22 }
  0xba   :  { %1261 = vmatprep.subr.bf16.mxu1 %v1409_v21 }
  0xbb   :  { %1139 = vmatmul.mubr.msk.bf16.vlgmr.msra.gmra.mrb[0].mxu0 %vm356_vm9, %v275_v42 }
  0xbc   :  { %402 = vmatpush1.bf16.msra.mxu0 %v1301_v40  ;;  %433 = vmatprep.mubr.bf16.mxu0 %v1449_v49  ;;  %v1310_v49 = vld [vmem:[%s1877_s1 + $0x68] ss:$16 sps:$4 sm:$0xff]   ;;  %v145_v40 = vsub.s32 2, %v1643_v22  ;;  %v1205_v22 = vld [vmem:[%s1882_s6] ss:$0 sm:$0xff] }
  0xbd   :  { %403 = vmatprep.subr.bf16.mxu0 %v1306_v43 }
  0xbe   :  { %v146_v43 = vrot.slane %v133_v24, %v145_v40 }
  0xc0   :  { %404 = vmatpush1.bf16.msra.mxu0 %v1304_v44  ;;  %v150_v44 = vrot.slane %v133_v24, %v149_v41 }
  0xc1   :  { %405 = vmatprep.subr.bf16.mxu0 %v1309_v45 }
  0xc4   :  { %406 = vmatpush1.bf16.msra.mxu0 %v1307_v46 }
  0xc5   :  { %407 = vmatprep.subr.bf16.mxu0 %v1312_v47 }
  0xc8   :  { %408 = vmatpush1.bf16.msra.mxu0 %v1310_v49 }
  0xc9   :  { %887 = vmatprep.subr.bf16.mxu0 %v1327_v48 }
  0xcb   :  { %1140 = vmatmul.mubr.msk.bf16.vlgmr.msra.gmra.mrb[4].mxu0 %vm356_vm9, %v275_v42  ;;  %v1412_v42 = vld [vmem:[%s1881_s5 + $0x8] sm:$0xff]  }
  0xcc   :  { %888 = vmatpush1.bf16.msra.mxu0 %v1325_v50 }
  0xcd   :  { %889 = vmatprep.subr.bf16.mxu0 %v1333_v51 }
  0xd0   :  { %890 = vmatpush1.bf16.msra.mxu0 %v1331_v52 }
  0xd1   :  { %891 = vmatprep.subr.bf16.mxu0 %v1339_v53 }
  0xd4   :  { %892 = vmatpush1.bf16.msra.mxu0 %v1337_v54 }
  0xd5   :  { %893 = vmatprep.subr.bf16.mxu0 %v1345_v55  ;;  %v1413_v55 = vld [vmem:[%s1881_s5 + $0x50] sm:$0xff]  }
  0xd8   :  { %894 = vmatpush1.bf16.msra.mxu0 %v1343_v56  ;;  %v1414_v56 = vld [vmem:[%s1881_s5 + $0x10] sm:$0xff]  }
  0xd9   :  { %895 = vmatprep.subr.bf16.mxu0 %v1351_v57  ;;  %v1415_v57 = vld [vmem:[%s1881_s5 + $0x58] sm:$0xff]  }
  0xdc   :  { %896 = vmatpush1.bf16.msra.mxu0 %v1349_v58  ;;  %v1416_v58 = vld [vmem:[%s1881_s5 + $0x18] sm:$0xff]  }
  0xdd   :  { %897 = vmatprep.subr.bf16.mxu0 %v1357_v59  ;;  %v1417_v59 = vld [vmem:[%s1881_s5 + $0x60] sm:$0xff]  }
  0xe0   :  { %898 = vmatpush1.bf16.msra.mxu0 %v1355_v60  ;;  %v1418_v60 = vld [vmem:[%s1881_s5 + $0x20] sm:$0xff]  }
  0xe1   :  { %899 = vmatprep.subr.bf16.mxu0 %v1363_v61  ;;  %v1419_v61 = vld [vmem:[%s1881_s5 + $0x68] sm:$0xff]  }
  0xe4   :  { %900 = vmatpush1.bf16.msra.mxu0 %v1361_v62  ;;  %v1420_v62 = vld [vmem:[%s1881_s5 + $0x28] sm:$0xff]  }
  0xe5   :  { %901 = vmatprep.subr.bf16.mxu0 %v1369_v63  ;;  %v1421_v63 = vld [vmem:[%s1881_s5 + $0x70] sm:$0xff]  }
  0xe8   :  { %902 = vmatpush1.bf16.msra.mxu0 %v1367_v0  ;;  %v1422_v0 = vld [vmem:[%s1881_s5 + $0x30] sm:$0xff]  }
  0xe9   :  { %903 = vmatprep.subr.bf16.mxu0 %v1375_v1  ;;  %v1423_v1 = vld [vmem:[%s1881_s5 + $0x78] sm:$0xff]  }
  0xec   :  { %904 = vmatpush1.bf16.msra.mxu0 %v1373_v2  ;;  %v1424_v2 = vld [vmem:[%s1881_s5 + $0x38] sm:$0xff]  }
  0xed   :  { %905 = vmatprep.subr.bf16.mxu0 %v1381_v3 }
  0xf0   :  { %906 = vmatpush1.bf16.msra.mxu0 %v1379_v4 }
  0xf1   :  { %907 = vmatprep.subr.bf16.mxu0 %v1387_v5 }
  0xf4   :  { %908 = vmatpush1.bf16.msra.mxu0 %v1385_v6 }
  0xf5   :  { %909 = vmatprep.subr.bf16.mxu0 %v1393_v9  ;;  %v523_v9 = vrot.slane %v514_v7, %v141_v25 }
  0xf8   :  { %910 = vmatpush1.bf16.msra.mxu0 %v1391_v10 }
  0xf9   :  { %911 = vmatprep.subr.bf16.mxu0 %v1399_v13 }
  0xfc   :  { %912 = vmatpush1.bf16.msra.mxu0 %v1397_v14 }
  0xfd   :  { %913 = vmatprep.subr.bf16.mxu0 %v1402_v15 }
 0x100   :  { %914 = vmatpush1.bf16.msra.mxu0 %v1400_v16 }
 0x101   :  { %915 = vmatprep.subr.bf16.mxu0 %v1405_v17 }
 0x104   :  { %916 = vmatpush1.bf16.msra.mxu0 %v1403_v18 }
 0x105   :  { %917 = vmatprep.subr.bf16.mxu0 %v1408_v19 }
 0x108   :  { %918 = vmatpush1.bf16.msra.mxu0 %v1406_v20 }
 0x18e   :  { %v394_v28 = vpop.f32.mrb[0].mxu0 }
 0x18f   :  { %v395_v29 = vadd.f32 %v394_v28, %v138_v26  ;;  %v396_v30 = vpop.f32.mrb[1].mxu0 }
 0x190   :  { %v397_v31 = vadd.f32 %v396_v30, %v142_v27  ;;  %v398_v32 = vpop.f32.mrb[2].mxu0 }
 0x191   :  { %v442_v33 = vmax.f32 %v395_v29, 0.0  ;;  %v399_v34 = vpop.f32.mrb[3].mxu0 }
 0x192   :  { %v443_v35 = vmax.f32 %v397_v31, 0.0 }
 0x193   :  { %v446_v38 = vpack.c.bf16 %v442_v33, %v442_v33 }
 0x194   :  { %v447_v36 = vpack.c.bf16 %v443_v35, %v443_v35 }
 0x196   :  { %878 = vmatprep.mubr.bf16.mxu1 %v447_v36 }
 0x197   :  { %879 = vmatmul.mubr.bf16.vlgmr.msra.gmra.mrb[0].mxu1 %v446_v38 }
 0x198   :  { %1262 = vmatpush3.bf16.msra.mxu1 %v1410_v37 }
 0x199   :  { %1263 = vmatprep.subr.bf16.mxu1 %v1411_v39 }
 0x19c   :  { %1264 = vmatpush3.bf16.msra.mxu1 %v1412_v42 }
 0x19d   :  { %1265 = vmatprep.subr.bf16.mxu1 %v1413_v55 }
 0x19e   :  { %v435_v45 = vpop.f32.mrb[4].mxu0 }
 0x19f   :  { %v436_v46 = vadd.f32 %v435_v45, %v146_v43  ;;  %v437_v47 = vpop.f32.mrb[5].mxu0 }
 0x1a0   :  { %v438_v49 = vadd.f32 %v437_v47, %v150_v44  ;;  %v439_v48 = vpop.f32.mrb[6].mxu0  ;;  %1266 = vmatpush3.bf16.msra.mxu1 %v1414_v56 }
 0x1a1   :  { %v444_v50 = vmax.f32 %v436_v46, 0.0  ;;  %v440_v51 = vpop.f32.mrb[7].mxu0  ;;  %1267 = vmatprep.subr.bf16.mxu1 %v1415_v57 }
 0x1a2   :  { %v445_v52 = vmax.f32 %v438_v49, 0.0 }
 0x1a3   :  { %v448_v54 = vpack.c.bf16 %v444_v50, %v444_v50 }
 0x1a4   :  { %v449_v53 = vpack.c.bf16 %v445_v52, %v445_v52  ;;  %1268 = vmatpush3.bf16.msra.mxu1 %v1416_v58 }
 0x1a5   :  { %1269 = vmatprep.subr.bf16.mxu1 %v1417_v59 }
 0x1a6   :  { %919 = vmatprep.mubr.bf16.mxu0 %v449_v53 }
 0x1a7   :  { %920 = vmatmul.mubr.bf16.vlgmr.msra.gmra.mrb[8].mxu0 %v448_v54 }
 0x1a8   :  { %1270 = vmatpush3.bf16.msra.mxu1 %v1418_v60 }
 0x1a9   :  { %1271 = vmatprep.subr.bf16.mxu1 %v1419_v61 }
 0x1ac   :  { %1272 = vmatpush3.bf16.msra.mxu1 %v1420_v62 }
 0x1ad   :  { %1273 = vmatprep.subr.bf16.mxu1 %v1421_v63 }
 0x1b0   :  { %1274 = vmatpush3.bf16.msra.mxu1 %v1422_v0 }
 0x1b1   :  { %1275 = vmatprep.subr.bf16.mxu1 %v1423_v1 }
 0x1b4   :  { %1276 = vmatpush3.bf16.msra.mxu1 %v1424_v2 }
 0x26a   :  { %v880_v3 = vpop.f32.mrb[0].mxu1 }
 0x26b   :  { %v882_v4 = vpop.f32.mrb[1].mxu1  ;;  %v881_v10 = vadd.f32 %v880_v3, %v519_v8 }
 0x26c   :  { %v884_v5 = vpop.f32.mrb[2].mxu1  ;;  %v883_v11 = vadd.f32 %v882_v4, %v523_v9 }
 0x26d   :  { %v885_v6 = vpop.f32.mrb[3].mxu1 }
 0x27a   :  { %v921_v12 = vpop.f32.mrb[8].mxu0 }
 0x27b   :  { %v922_v13 = vadd.f32 %v921_v12, %v881_v10  ;;  %v923_v14 = vpop.f32.mrb[9].mxu0 }
 0x27c   :  { %v924_v15 = vadd.f32 %v923_v14, %v883_v11  ;;  %v925_v16 = vpop.f32.mrb[10].mxu0 }
 0x27d   :  { %v928_v17 = vmax.f32 %v922_v13, 0.0  ;;  %v926_v18 = vpop.f32.mrb[11].mxu0 }
 0x27e   :  { %v929_v19 = vmax.f32 %v924_v15, 0.0 }
 0x27f   :  { %v930_v21 = vpack.c.bf16 %v928_v17, %v928_v17 }
 0x280   :  { %v931_v20 = vpack.c.bf16 %v929_v19, %v929_v19 }
 0x282   :  { %1099 = vmatprep.mubr.bf16.mxu1 %v931_v20 }
 0x283   :  { %1100 = vmatmul.mubr.bf16.vlgmr.msra.gmra.mrb[4].mxu1 %v930_v21 }
 0x356   :  { %v1277_v24 = vpop.f32.mrb[4].mxu1 }
 0x357   :  { %v1278_v23 = vpop.f32.mrb[5].mxu1 }
 0x358   :  { %v1279_v25 = vadd.f32 %v1278_v23, %v1277_v24  ;;  %v1280_v26 = vpop.f32.mrb[6].mxu1 }
 0x359   :  { %v1281_v27 = vpop.f32.mrb[7].mxu1 }
 0x35a   :  { %v1102_v28 = vadd.f32 %v1279_v25, %v1205_v22 }
 0x35c   :  { %1108 = vst.msk [vmem:[#allocation2] sm:$0x3] %vm1107_vm10, %v1102_v28 }
 0x35d   :  { %1436 = shalt.err (!%p1433_p4)
}
 0x35e   :  { %s1437_s6 = scalar_lea.hbm %s1883_s7, 32 }
 0x35f   :  { %p1438_p5 = scmp.ne.s32.totalorder %s1883_s7, %s1437_s6  ;;  %p1441_p6 = scmp.lt.u32.totalorder %s1437_s6, %s1883_s7 }
 0x361   :  { %p1443_p7 = pnand %p1441_p6, %p1438_p5 }
 0x363   :  { %1446 = shalt.err (!%p1443_p7)
}
 0x364   :  { %1118 = dma.vmem_to_hbm [thread:$0]  %s1116_s14, 32, %s1883_s7, [#allocation3]  }
 0x365   :  { %1447 = dma.done.wait [#allocation3], 32  }
 0x366   :  { %1448 = vsyncadd [#allocation3], 4294967264 }
 0x367   :  { %1122 = vsyncpa [#allocation3], 1 }

</bundles_post_ra>
